<compile_context>
chip_gen: v7x
topology: tpu7x:2x2x1
jax: 0.10.0
libtpu: 0.0.40
codegen_flags: <defaults>
</compile_context>

<pallas_src>
import functools

import jax
import jax.numpy as jnp
from jax.experimental import pallas as pl
from jax.experimental.pallas import tpu as pltpu

EPS = 1e-5     # nn.BatchNorm2d default
LANES = 128    # channel / K padding target (TPU lane width)


# ----------------------------- Pallas kernel -------------------------------

def _bn_relu(acc, gamma, beta):
    """Training-mode BatchNorm over all rows, folded into one FMA, then ReLU.

    acc   : (rows, cp) f32 conv output
    gamma : (1, cp)    f32 (padded lanes are 0 -> padded output lanes stay 0)
    beta  : (1, cp)    f32
    """
    mean = jnp.mean(acc, axis=0, keepdims=True)
    var = jnp.mean(jnp.square(acc - mean), axis=0, keepdims=True)  # centered
    scale = gamma * jax.lax.rsqrt(var + EPS)
    shift = beta - mean * scale
    return jnp.maximum(acc * scale + shift, 0.0)


def _conv_block_kernel(a1_ref, w1_ref, g1_ref, be1_ref,
                       w2_ref, g2_ref, be2_ref,
                       o_ref, halo_ref, col2_ref, *, n, h, w, cp):
    """Both fused layers of conv_block in one invocation.

    a1_ref  : (n*h*w, cp)        bf16  layer-1 K-packed im2col (K = 9*Cin -> cp)
    w1_ref  : (cp, cp)           bf16  layer-1 weights, rows = tap*Cin + c
    g1/be1  : (1, cp)            f32   layer-1 BN gamma / beta (padded = 0)
    w2_ref  : (9*cp, cp)         bf16  layer-2 weights, rows = tap*cp + c
    g2/be2  : (1, cp)            f32   layer-2 BN gamma / beta (padded = 0)
    o_ref   : (n*h*w, cp)        bf16  layer-2 output, lane-dense
    halo_ref: (n, h+2, w+2, cp)  bf16  VMEM scratch: halo-padded layer-1 act
    col2_ref: (n*h*w, 9*cp)      bf16  VMEM scratch: layer-2 im2col slab
    """
    rows = n * h * w

    # ---------------- Layer 1: one K-packed MXU matmul ----------------------
    acc1 = jnp.dot(a1_ref[...], w1_ref[...], preferred_element_type=jnp.float32)
    y1 = _bn_relu(acc1, g1_ref[...], be1_ref[...]).astype(jnp.bfloat16)

    # ------- Inter-layer halo pad entirely in VMEM (no HBM round trip) ------
    halo_ref[...] = jnp.zeros_like(halo_ref)
    halo_ref[:, pl.ds(1, h), pl.ds(1, w), :] = y1.reshape(n, h, w, cp)

    # ---- Layer-2 im2col slab: nine lane-aligned 128-lane block writes ------
    for tap in range(9):                                # unrolled at trace time
        dy, dx = divmod(tap, 3)
        col2_ref[:, pl.ds(tap * cp, cp)] = (
            halo_ref[:, pl.ds(dy, h), pl.ds(dx, w), :].reshape(rows, cp))

    # ---------------- Layer 2: one MXU matmul over the slab -----------------
    acc2 = jnp.dot(col2_ref[...], w2_ref[...], preferred_element_type=jnp.float32)
    o_ref[...] = _bn_relu(acc2, g2_ref[...], be2_ref[...]).astype(o_ref.dtype)


# ----------------------------- wrapper ---------------------------------------

def _pad_lanes(v, cp):
    return jnp.pad(v, (0, cp - v.shape[0]))


def conv_block_forward(x_nchw, params, drop_out=False):
    N, Cin, H, W = x_nchw.shape
    Cout = params["w1"].shape[0]
    cp = LANES
    rows = N * H * W
    assert 9 * Cin <= cp and Cout <= cp, "K-packed path needs 9*Cin, Cout <= 128"

    # ---- Layer-1 K-packed im2col, built wrapper-side on the tiny raw input.
    x = jnp.transpose(x_nchw, (0, 2, 3, 1))                       # NCHW -> NHWC
    xp = jnp.pad(x, ((0, 0), (1, 1), (1, 1), (0, 0)))             # spatial halo
    cols = [xp[:, dy:dy + H, dx:dx + W, :] for dy in range(3) for dx in range(3)]
    a1 = jnp.concatenate(cols, axis=-1).reshape(rows, 9 * Cin)    # tap-major, c fastest
    a1 = jnp.pad(a1, ((0, 0), (0, cp - 9 * Cin))).astype(jnp.bfloat16)

    # Layer-1 weights: (Cout,Cin,3,3) -> rows = tap*Cin + c, padded to (cp, cp).
    w1 = jnp.transpose(params["w1"], (2, 3, 1, 0)).reshape(9 * Cin, Cout)
    w1 = jnp.pad(w1, ((0, cp - 9 * Cin), (0, cp - Cout))).astype(jnp.bfloat16)

    # Layer-2 weights: (Cout,Cout,3,3) -> rows = tap*cp + c, shape (9*cp, cp).
    w2 = jnp.transpose(params["w2"], (2, 3, 1, 0))                # (3,3,Cin2,Cout)
    w2 = jnp.pad(w2, ((0, 0), (0, 0), (0, cp - w2.shape[2]), (0, cp - Cout)))
    w2 = w2.reshape(9 * cp, cp).astype(jnp.bfloat16)

    g1 = _pad_lanes(params["g1"], cp).reshape(1, cp).astype(jnp.float32)
    be1 = _pad_lanes(params["be1"], cp).reshape(1, cp).astype(jnp.float32)
    g2 = _pad_lanes(params["g2"], cp).reshape(1, cp).astype(jnp.float32)
    be2 = _pad_lanes(params["be2"], cp).reshape(1, cp).astype(jnp.float32)

    # NOTE: conv biases (params["b1"]/["b2"]) are intentionally unused: under
    # training-mode BatchNorm a per-channel bias shifts y and mean(y) equally,
    # so it cancels exactly in (y - mean).  (Only valid for batch-stat BN.)

    kernel = functools.partial(_conv_block_kernel, n=N, h=H, w=W, cp=cp)
    vmem = pl.BlockSpec(memory_space=pltpu.MemorySpace.VMEM)
    out = pl.pallas_call(
        kernel,
        out_shape=jax.ShapeDtypeStruct((rows, cp), jnp.bfloat16),
        in_specs=[vmem] * 7,
        out_specs=vmem,
        scratch_shapes=[
            pltpu.VMEM((N, H + 2, W + 2, cp), jnp.bfloat16),   # halo'd layer-1 act
            pltpu.VMEM((rows, 9 * cp), jnp.bfloat16),          # layer-2 im2col slab
        ],
    )(a1, w1, g1, be1, w2, g2, be2)

    # Channel slice + NHWC->NCHW transpose + f32 cast fuse into one XLA pass.
    out = out.reshape(N, H, W, cp)[..., :Cout]
    out = jnp.transpose(out, (0, 3, 1, 2)).astype(jnp.float32)

    if drop_out:
        # TODO(synk): Dropout2d(0.5) path not implemented; module default False.
        pass
    return out


# ----------------------------- pure-JAX reference ---------------------------

def reference_forward(x, p):
    def step(x, w, b, g, be):
        y = jax.lax.conv_general_dilated(
            x, w, (1, 1), "SAME",
            dimension_numbers=("NCHW", "OIHW", "NCHW")) + b.reshape(1, -1, 1, 1)
        mean = y.mean(axis=(0, 2, 3), keepdims=True)
        var = y.var(axis=(0, 2, 3), keepdims=True)
        y = (y - mean) / jnp.sqrt(var + EPS) * g.reshape(1, -1, 1, 1) \
            + be.reshape(1, -1, 1, 1)
        return jnp.maximum(y, 0.0)

    x = step(x, p["w1"], p["b1"], p["g1"], p["be1"])
    x = step(x, p["w2"], p["b2"], p["g2"], p["be2"])
    return x


# ----------------------------- main ------------------------------------------

if __name__ == "__main__":
    N, Cin, Cout, H, W = 2, 4, 8, 16, 16
    key = jax.random.PRNGKey(0)
    ks = jax.random.split(key, 5)

    x = jax.random.normal(ks[0], (N, Cin, H, W), jnp.float32)
    params = {
        "w1": jax.random.normal(ks[1], (Cout, Cin, 3, 3), jnp.float32) * 0.1,
        "b1": jax.random.normal(ks[2], (Cout,), jnp.float32) * 0.1,
        "g1": jnp.ones((Cout,), jnp.float32),    # BN weight init (PyTorch default)
        "be1": jnp.zeros((Cout,), jnp.float32),  # BN bias init
        "w2": jax.random.normal(ks[3], (Cout, Cout, 3, 3), jnp.float32) * 0.1,
        "b2": jax.random.normal(ks[4], (Cout,), jnp.float32) * 0.1,
        "g2": jnp.ones((Cout,), jnp.float32),
        "be2": jnp.zeros((Cout,), jnp.float32),
    }

    out = jax.jit(conv_block_forward)(x, params)
    jax.block_until_ready(out)

    ref = reference_forward(x, params)
    assert out.shape == (N, Cout, H, W)
    # Tolerance accounts for bf16 MXU operands, bf16 inter-layer activation and
    # bf16 final store (f32 accumulation / f32 BN math); f32 reference.
    err = jnp.max(jnp.abs(out - ref))
    assert jnp.allclose(out, ref, atol=6e-2, rtol=6e-2), f"max abs err {err}"

    print("KERNEL_OK")
</pallas_src>

<mosaic_0001>
module attributes {stable_mosaic.version = 11 : i64} {
  func.func @_conv_block_kernel(%arg0: memref<512x128xbf16, #tpu.memory_space<vmem>>, %arg1: memref<128x128xbf16, #tpu.memory_space<vmem>>, %arg2: memref<1x128xf32, #tpu.memory_space<vmem>>, %arg3: memref<1x128xf32, #tpu.memory_space<vmem>>, %arg4: memref<1152x128xbf16, #tpu.memory_space<vmem>>, %arg5: memref<1x128xf32, #tpu.memory_space<vmem>>, %arg6: memref<1x128xf32, #tpu.memory_space<vmem>>, %arg7: memref<512x128xbf16, #tpu.memory_space<vmem>>, %arg8: memref<2x18x18x128xbf16, #tpu.memory_space<vmem>>, %arg9: memref<512x1152xbf16, #tpu.memory_space<vmem>>) attributes {dimension_semantics = [], scalar_prefetch = 0 : i64, scratch_operands = 2 : i64, tpu.core_type = #tpu.core_type<tc>} {
    %c0 = arith.constant 0 : index
    %c0_0 = arith.constant 0 : index
    %0 = vector.load %arg0[%c0, %c0_0] : memref<512x128xbf16, #tpu.memory_space<vmem>>, vector<512x128xbf16>
    %c0_1 = arith.constant 0 : index
    %c0_2 = arith.constant 0 : index
    %1 = vector.load %arg1[%c0_1, %c0_2] : memref<128x128xbf16, #tpu.memory_space<vmem>>, vector<128x128xbf16>
    %cst = arith.constant dense<0.000000e+00> : vector<512x128xf32>
    %2 = tpu.matmul %0, %1, %cst {dimension_numbers = #tpu.dot_dimension_numbers<[1], [0], [0], [1], [0, 0, 1, 1], [], []>} : vector<512x128xbf16>, vector<128x128xbf16>, vector<512x128xf32> -> vector<512x128xf32>
    %c0_3 = arith.constant 0 : index
    %c0_4 = arith.constant 0 : index
    %3 = vector.load %arg2[%c0_3, %c0_4] : memref<1x128xf32, #tpu.memory_space<vmem>>, vector<1x128xf32>
    %c0_5 = arith.constant 0 : index
    %c0_6 = arith.constant 0 : index
    %4 = vector.load %arg3[%c0_5, %c0_6] : memref<1x128xf32, #tpu.memory_space<vmem>>, vector<1x128xf32>
    %cst_7 = arith.constant dense<0.000000e+00> : vector<128xf32>
    %5 = vector.multi_reduction <add>, %2, %cst_7 [0] : vector<512x128xf32> to vector<128xf32>
    %6 = vector.shape_cast %5 : vector<128xf32> to vector<1x128xf32>
    %cst_8 = arith.constant 5.120000e+02 : f32
    %7 = vector.broadcast %cst_8 : f32 to vector<1x128xf32>
    %8 = arith.divf %6, %7 : vector<1x128xf32>
    %9 = vector.broadcast %8 : vector<1x128xf32> to vector<512x128xf32>
    %10 = arith.subf %2, %9 : vector<512x128xf32>
    %11 = arith.mulf %10, %10 : vector<512x128xf32>
    %cst_9 = arith.constant dense<0.000000e+00> : vector<128xf32>
    %12 = vector.multi_reduction <add>, %11, %cst_9 [0] : vector<512x128xf32> to vector<128xf32>
    %13 = vector.shape_cast %12 : vector<128xf32> to vector<1x128xf32>
    %cst_10 = arith.constant 5.120000e+02 : f32
    %14 = vector.broadcast %cst_10 : f32 to vector<1x128xf32>
    %15 = arith.divf %13, %14 : vector<1x128xf32>
    %cst_11 = arith.constant 9.99999974E-6 : f32
    %16 = vector.broadcast %cst_11 : f32 to vector<1x128xf32>
    %17 = arith.addf %15, %16 : vector<1x128xf32>
    %18 = math.rsqrt %17 : vector<1x128xf32>
    %19 = arith.mulf %3, %18 : vector<1x128xf32>
    %20 = arith.mulf %8, %19 : vector<1x128xf32>
    %21 = arith.subf %4, %20 : vector<1x128xf32>
    %22 = vector.broadcast %19 : vector<1x128xf32> to vector<512x128xf32>
    %23 = arith.mulf %2, %22 : vector<512x128xf32>
    %24 = vector.broadcast %21 : vector<1x128xf32> to vector<512x128xf32>
    %25 = arith.addf %23, %24 : vector<512x128xf32>
    %cst_12 = arith.constant 0.000000e+00 : f32
    %26 = vector.broadcast %cst_12 : f32 to vector<512x128xf32>
    %27 = arith.maximumf %25, %26 : vector<512x128xf32>
    %28 = arith.truncf %27 : vector<512x128xf32> to vector<512x128xbf16>
    %cst_13 = arith.constant 0.000000e+00 : bf16
    %29 = vector.broadcast %cst_13 : bf16 to vector<2x18x18x128xbf16>
    %c0_14 = arith.constant 0 : index
    %c0_15 = arith.constant 0 : index
    %c0_16 = arith.constant 0 : index
    %c0_17 = arith.constant 0 : index
    %30 = vector.load %arg8[%c0_14, %c0_15, %c0_16, %c0_17] : memref<2x18x18x128xbf16, #tpu.memory_space<vmem>>, vector<2x18x18x128xbf16>
    tpu.vector_store %arg8[%c0_14, %c0_15, %c0_16, %c0_17], %29 {strides = array<i32>} : memref<2x18x18x128xbf16, #tpu.memory_space<vmem>>, vector<2x18x18x128xbf16>,
    %31 = vector.shape_cast %28 : vector<512x128xbf16> to vector<2x16x16x128xbf16>
    %c0_18 = arith.constant 0 : index
    %c1 = arith.constant 1 : index
    %c1_19 = arith.constant 1 : index
    %c0_20 = arith.constant 0 : index
    %32 = vector.load %arg8[%c0_18, %c1, %c1_19, %c0_20] : memref<2x18x18x128xbf16, #tpu.memory_space<vmem>>, vector<2x16x16x128xbf16>
    tpu.vector_store %arg8[%c0_18, %c1, %c1_19, %c0_20], %31 {strides = array<i32>} : memref<2x18x18x128xbf16, #tpu.memory_space<vmem>>, vector<2x16x16x128xbf16>,
    %c0_21 = arith.constant 0 : index
    %c0_22 = arith.constant 0 : index
    %c0_23 = arith.constant 0 : index
    %c0_24 = arith.constant 0 : index
    %33 = vector.load %arg8[%c0_21, %c0_22, %c0_23, %c0_24] : memref<2x18x18x128xbf16, #tpu.memory_space<vmem>>, vector<2x16x16x128xbf16>
    %34 = vector.shape_cast %33 : vector<2x16x16x128xbf16> to vector<512x128xbf16>
    %c0_25 = arith.constant 0 : index
    %c0_26 = arith.constant 0 : index
    %35 = vector.load %arg9[%c0_25, %c0_26] : memref<512x1152xbf16, #tpu.memory_space<vmem>>, vector<512x128xbf16>
    tpu.vector_store %arg9[%c0_25, %c0_26], %34 {strides = array<i32>} : memref<512x1152xbf16, #tpu.memory_space<vmem>>, vector<512x128xbf16>,
    %c0_27 = arith.constant 0 : index
    %c0_28 = arith.constant 0 : index
    %c1_29 = arith.constant 1 : index
    %c0_30 = arith.constant 0 : index
    %36 = vector.load %arg8[%c0_27, %c0_28, %c1_29, %c0_30] : memref<2x18x18x128xbf16, #tpu.memory_space<vmem>>, vector<2x16x16x128xbf16>
    %37 = vector.shape_cast %36 : vector<2x16x16x128xbf16> to vector<512x128xbf16>
    %c0_31 = arith.constant 0 : index
    %c128 = arith.constant 128 : index
    %38 = vector.load %arg9[%c0_31, %c128] : memref<512x1152xbf16, #tpu.memory_space<vmem>>, vector<512x128xbf16>
    tpu.vector_store %arg9[%c0_31, %c128], %37 {strides = array<i32>} : memref<512x1152xbf16, #tpu.memory_space<vmem>>, vector<512x128xbf16>,
    %c0_32 = arith.constant 0 : index
    %c0_33 = arith.constant 0 : index
    %c2 = arith.constant 2 : index
    %c0_34 = arith.constant 0 : index
    %39 = vector.load %arg8[%c0_32, %c0_33, %c2, %c0_34] : memref<2x18x18x128xbf16, #tpu.memory_space<vmem>>, vector<2x16x16x128xbf16>
    %40 = vector.shape_cast %39 : vector<2x16x16x128xbf16> to vector<512x128xbf16>
    %c0_35 = arith.constant 0 : index
    %c256 = arith.constant 256 : index
    %41 = vector.load %arg9[%c0_35, %c256] : memref<512x1152xbf16, #tpu.memory_space<vmem>>, vector<512x128xbf16>
    tpu.vector_store %arg9[%c0_35, %c256], %40 {strides = array<i32>} : memref<512x1152xbf16, #tpu.memory_space<vmem>>, vector<512x128xbf16>,
    %c0_36 = arith.constant 0 : index
    %c1_37 = arith.constant 1 : index
    %c0_38 = arith.constant 0 : index
    %c0_39 = arith.constant 0 : index
    %42 = vector.load %arg8[%c0_36, %c1_37, %c0_38, %c0_39] : memref<2x18x18x128xbf16, #tpu.memory_space<vmem>>, vector<2x16x16x128xbf16>
    %43 = vector.shape_cast %42 : vector<2x16x16x128xbf16> to vector<512x128xbf16>
    %c0_40 = arith.constant 0 : index
    %c384 = arith.constant 384 : index
    %44 = vector.load %arg9[%c0_40, %c384] : memref<512x1152xbf16, #tpu.memory_space<vmem>>, vector<512x128xbf16>
    tpu.vector_store %arg9[%c0_40, %c384], %43 {strides = array<i32>} : memref<512x1152xbf16, #tpu.memory_space<vmem>>, vector<512x128xbf16>,
    %c0_41 = arith.constant 0 : index
    %c1_42 = arith.constant 1 : index
    %c1_43 = arith.constant 1 : index
    %c0_44 = arith.constant 0 : index
    %45 = vector.load %arg8[%c0_41, %c1_42, %c1_43, %c0_44] : memref<2x18x18x128xbf16, #tpu.memory_space<vmem>>, vector<2x16x16x128xbf16>
    %46 = vector.shape_cast %45 : vector<2x16x16x128xbf16> to vector<512x128xbf16>
    %c0_45 = arith.constant 0 : index
    %c512 = arith.constant 512 : index
    %47 = vector.load %arg9[%c0_45, %c512] : memref<512x1152xbf16, #tpu.memory_space<vmem>>, vector<512x128xbf16>
    tpu.vector_store %arg9[%c0_45, %c512], %46 {strides = array<i32>} : memref<512x1152xbf16, #tpu.memory_space<vmem>>, vector<512x128xbf16>,
    %c0_46 = arith.constant 0 : index
    %c1_47 = arith.constant 1 : index
    %c2_48 = arith.constant 2 : index
    %c0_49 = arith.constant 0 : index
    %48 = vector.load %arg8[%c0_46, %c1_47, %c2_48, %c0_49] : memref<2x18x18x128xbf16, #tpu.memory_space<vmem>>, vector<2x16x16x128xbf16>
    %49 = vector.shape_cast %48 : vector<2x16x16x128xbf16> to vector<512x128xbf16>
    %c0_50 = arith.constant 0 : index
    %c640 = arith.constant 640 : index
    %50 = vector.load %arg9[%c0_50, %c640] : memref<512x1152xbf16, #tpu.memory_space<vmem>>, vector<512x128xbf16>
    tpu.vector_store %arg9[%c0_50, %c640], %49 {strides = array<i32>} : memref<512x1152xbf16, #tpu.memory_space<vmem>>, vector<512x128xbf16>,
    %c0_51 = arith.constant 0 : index
    %c2_52 = arith.constant 2 : index
    %c0_53 = arith.constant 0 : index
    %c0_54 = arith.constant 0 : index
    %51 = vector.load %arg8[%c0_51, %c2_52, %c0_53, %c0_54] : memref<2x18x18x128xbf16, #tpu.memory_space<vmem>>, vector<2x16x16x128xbf16>
    %52 = vector.shape_cast %51 : vector<2x16x16x128xbf16> to vector<512x128xbf16>
    %c0_55 = arith.constant 0 : index
    %c768 = arith.constant 768 : index
    %53 = vector.load %arg9[%c0_55, %c768] : memref<512x1152xbf16, #tpu.memory_space<vmem>>, vector<512x128xbf16>
    tpu.vector_store %arg9[%c0_55, %c768], %52 {strides = array<i32>} : memref<512x1152xbf16, #tpu.memory_space<vmem>>, vector<512x128xbf16>,
    %c0_56 = arith.constant 0 : index
    %c2_57 = arith.constant 2 : index
    %c1_58 = arith.constant 1 : index
    %c0_59 = arith.constant 0 : index
    %54 = vector.load %arg8[%c0_56, %c2_57, %c1_58, %c0_59] : memref<2x18x18x128xbf16, #tpu.memory_space<vmem>>, vector<2x16x16x128xbf16>
    %55 = vector.shape_cast %54 : vector<2x16x16x128xbf16> to vector<512x128xbf16>
    %c0_60 = arith.constant 0 : index
    %c896 = arith.constant 896 : index
    %56 = vector.load %arg9[%c0_60, %c896] : memref<512x1152xbf16, #tpu.memory_space<vmem>>, vector<512x128xbf16>
    tpu.vector_store %arg9[%c0_60, %c896], %55 {strides = array<i32>} : memref<512x1152xbf16, #tpu.memory_space<vmem>>, vector<512x128xbf16>,
    %c0_61 = arith.constant 0 : index
    %c2_62 = arith.constant 2 : index
    %c2_63 = arith.constant 2 : index
    %c0_64 = arith.constant 0 : index
    %57 = vector.load %arg8[%c0_61, %c2_62, %c2_63, %c0_64] : memref<2x18x18x128xbf16, #tpu.memory_space<vmem>>, vector<2x16x16x128xbf16>
    %58 = vector.shape_cast %57 : vector<2x16x16x128xbf16> to vector<512x128xbf16>
    %c0_65 = arith.constant 0 : index
    %c1024 = arith.constant 1024 : index
    %59 = vector.load %arg9[%c0_65, %c1024] : memref<512x1152xbf16, #tpu.memory_space<vmem>>, vector<512x128xbf16>
    tpu.vector_store %arg9[%c0_65, %c1024], %58 {strides = array<i32>} : memref<512x1152xbf16, #tpu.memory_space<vmem>>, vector<512x128xbf16>,
    %c0_66 = arith.constant 0 : index
    %c0_67 = arith.constant 0 : index
    %60 = vector.load %arg9[%c0_66, %c0_67] : memref<512x1152xbf16, #tpu.memory_space<vmem>>, vector<512x1152xbf16>
    %c0_68 = arith.constant 0 : index
    %c0_69 = arith.constant 0 : index
    %61 = vector.load %arg4[%c0_68, %c0_69] : memref<1152x128xbf16, #tpu.memory_space<vmem>>, vector<1152x128xbf16>
    %cst_70 = arith.constant dense<0.000000e+00> : vector<512x128xf32>
    %62 = tpu.matmul %60, %61, %cst_70 {dimension_numbers = #tpu.dot_dimension_numbers<[1], [0], [0], [1], [0, 0, 1, 1], [], []>} : vector<512x1152xbf16>, vector<1152x128xbf16>, vector<512x128xf32> -> vector<512x128xf32>
    %c0_71 = arith.constant 0 : index
    %c0_72 = arith.constant 0 : index
    %63 = vector.load %arg5[%c0_71, %c0_72] : memref<1x128xf32, #tpu.memory_space<vmem>>, vector<1x128xf32>
    %c0_73 = arith.constant 0 : index
    %c0_74 = arith.constant 0 : index
    %64 = vector.load %arg6[%c0_73, %c0_74] : memref<1x128xf32, #tpu.memory_space<vmem>>, vector<1x128xf32>
    %cst_75 = arith.constant dense<0.000000e+00> : vector<128xf32>
    %65 = vector.multi_reduction <add>, %62, %cst_75 [0] : vector<512x128xf32> to vector<128xf32>
    %66 = vector.shape_cast %65 : vector<128xf32> to vector<1x128xf32>
    %cst_76 = arith.constant 5.120000e+02 : f32
    %67 = vector.broadcast %cst_76 : f32 to vector<1x128xf32>
    %68 = arith.divf %66, %67 : vector<1x128xf32>
    %69 = vector.broadcast %68 : vector<1x128xf32> to vector<512x128xf32>
    %70 = arith.subf %62, %69 : vector<512x128xf32>
    %71 = arith.mulf %70, %70 : vector<512x128xf32>
    %cst_77 = arith.constant dense<0.000000e+00> : vector<128xf32>
    %72 = vector.multi_reduction <add>, %71, %cst_77 [0] : vector<512x128xf32> to vector<128xf32>
    %73 = vector.shape_cast %72 : vector<128xf32> to vector<1x128xf32>
    %cst_78 = arith.constant 5.120000e+02 : f32
    %74 = vector.broadcast %cst_78 : f32 to vector<1x128xf32>
    %75 = arith.divf %73, %74 : vector<1x128xf32>
    %cst_79 = arith.constant 9.99999974E-6 : f32
    %76 = vector.broadcast %cst_79 : f32 to vector<1x128xf32>
    %77 = arith.addf %75, %76 : vector<1x128xf32>
    %78 = math.rsqrt %77 : vector<1x128xf32>
    %79 = arith.mulf %63, %78 : vector<1x128xf32>
    %80 = arith.mulf %68, %79 : vector<1x128xf32>
    %81 = arith.subf %64, %80 : vector<1x128xf32>
    %82 = vector.broadcast %79 : vector<1x128xf32> to vector<512x128xf32>
    %83 = arith.mulf %62, %82 : vector<512x128xf32>
    %84 = vector.broadcast %81 : vector<1x128xf32> to vector<512x128xf32>
    %85 = arith.addf %83, %84 : vector<512x128xf32>
    %cst_80 = arith.constant 0.000000e+00 : f32
    %86 = vector.broadcast %cst_80 : f32 to vector<512x128xf32>
    %87 = arith.maximumf %85, %86 : vector<512x128xf32>
    %88 = arith.truncf %87 : vector<512x128xf32> to vector<512x128xbf16>
    %c0_81 = arith.constant 0 : index
    %c0_82 = arith.constant 0 : index
    %89 = vector.load %arg7[%c0_81, %c0_82] : memref<512x128xbf16, #tpu.memory_space<vmem>>, vector<512x128xbf16>
    tpu.vector_store %arg7[%c0_81, %c0_82], %88 {strides = array<i32>} : memref<512x128xbf16, #tpu.memory_space<vmem>>, vector<512x128xbf16>,
    return
  }
}

</mosaic_0001>

<bundles_post_ra>
// kernel: conv_block_forward.1
= control target key start
LH: loop header
LB: loop body
LE: loop exit
PB: predicated region body
PF: predicated region fallthrough
CT: control target
= control target key end

     0   :  { %v17903_v32 = vmov 0   ;;  %vm1416_vm0 = vsmask.f32 256  ;;  %vm1417_vm1 = vsmask.f32 4368  ;;  %vm2067_vm2 = vcmask 1040384   ;;  %s17895_s1 = inlined_call_operand.vmem [shape: bf16[128,128], index: 1, kind: input, shape index: {}]   ;;  %s17896_s0 = inlined_call_operand.vmem [shape: bf16[512,128], index: 0, kind: input, shape index: {}]   ;;  %s17897_s4 = inlined_call_operand.vmem [shape: bf16[1152,128], index: 4, kind: input, shape index: {}]   ;;  %s17898_s2 = inlined_call_operand.vmem [shape: f32[1,128], index: 2, kind: input, shape index: {}]   ;;  %s17899_s3 = inlined_call_operand.vmem [shape: f32[1,128], index: 3, kind: input, shape index: {}]   ;;  %s17900_s5 = inlined_call_operand.vmem [shape: f32[1,128], index: 5, kind: input, shape index: {}]   ;;  %s17901_s6 = inlined_call_operand.vmem [shape: f32[1,128], index: 6, kind: input, shape index: {}]   ;;  %s17902_s7 = inlined_call_operand.vmem [shape: bf16[512,128], index: 7, kind: output, shape index: {}]  }
   0x1   :  { %v12608_v0 = vld [vmem:[%s17895_s1] sm:$0xff]   ;;  %v12609_v1 = vld [vmem:[%s17895_s1 + $0x8] sm:$0xff]   ;;  %v12610_v2 = vld [vmem:[%s17895_s1 + $0x10] sm:$0xff]   ;;  %1154 = vst [vmem:[#allocation2 + $0x18] sm:$0xf] %v17903_v32  ;;  %12255 = vmatprep.subr.bf16.mxu1 %v17903_v32  ;;  %vm2060_vm5 = vcmask 1043456  }
   0x2   :  { %12095 = vmatprep.subr.bf16.mxu0 %v12608_v0  ;;  %v12611_v3 = vld [vmem:[%s17895_s1 + $0x18] sm:$0xff]   ;;  %v12616_v4 = vld [vmem:[%s17896_s0] sm:$0xff]   ;;  %v12613_v6 = vld [vmem:[%s17895_s1 + $0x28] sm:$0xff]   ;;  %1148 = vst [vmem:[#allocation2] sm:$0xf] %v17903_v32  ;;  %vm3796_vm10 = vcmask 1042432  }
   0x3   :  { %12096 = vmatpush3.bf16.msra.mxu0 %v12608_v0  ;;  %12111 = vmatprep.mubr.bf16.mxu0 %v12616_v4  ;;  %v12612_v5 = vld [vmem:[%s17895_s1 + $0x20] sm:$0xff]   ;;  %v12614_v7 = vld [vmem:[%s17895_s1 + $0x30] sm:$0xff]   ;;  %v12615_v8 = vld [vmem:[%s17895_s1 + $0x38] sm:$0xff]   ;;  %1149 = vst [vmem:[#allocation2 + $0x4] sm:$0xf] %v17903_v32  ;;  %vm3797_vm11 = vcmask 1046532  }
   0x4   :  { %12097 = vmatprep.subr.bf16.mxu0 %v12609_v1  ;;  %v12617_v9 = vld [vmem:[%s17896_s0 + $0x8] sm:$0xff]   ;;  %v12618_v10 = vld [vmem:[%s17896_s0 + $0x10] sm:$0xff]   ;;  %v12619_v11 = vld [vmem:[%s17896_s0 + $0x18] sm:$0xff]   ;;  %1150 = vst [vmem:[#allocation2 + $0x8] sm:$0x1] %v17903_v32 }
   0x5   :  { %v12620_v12 = vld [vmem:[%s17896_s0 + $0x20] sm:$0xff]   ;;  %v12621_v13 = vld [vmem:[%s17896_s0 + $0x28] sm:$0xff]   ;;  %v12622_v14 = vld [vmem:[%s17896_s0 + $0x30] sm:$0xff]   ;;  %1151 = vst [vmem:[#allocation2 + $0xc] sm:$0xf] %v17903_v32 }
   0x6   :  { %v12623_v15 = vld [vmem:[%s17896_s0 + $0x38] sm:$0xff]   ;;  %v12624_v16 = vld [vmem:[%s17896_s0 + $0x40] sm:$0xff]   ;;  %v12625_v17 = vld [vmem:[%s17896_s0 + $0x48] sm:$0xff]   ;;  %1152 = vst [vmem:[#allocation2 + $0x10] sm:$0xf] %v17903_v32 }
   0x7   :  { %12098 = vmatpush3.bf16.msra.mxu0 %v12609_v1  ;;  %v12626_v18 = vld [vmem:[%s17896_s0 + $0x50] sm:$0xff]   ;;  %v12627_v19 = vld [vmem:[%s17896_s0 + $0x58] sm:$0xff]   ;;  %v12628_v20 = vld [vmem:[%s17896_s0 + $0x60] sm:$0xff]   ;;  %1153 = vst [vmem:[#allocation2 + $0x14] sm:$0x1] %v17903_v32 }
   0x8   :  { %12099 = vmatprep.subr.bf16.mxu0 %v12610_v2  ;;  %v12629_v21 = vld [vmem:[%s17896_s0 + $0x68] sm:$0xff]   ;;  %v12630_v22 = vld [vmem:[%s17896_s0 + $0x70] sm:$0xff]   ;;  %v12631_v23 = vld [vmem:[%s17896_s0 + $0x78] sm:$0xff]   ;;  %1155 = vst [vmem:[#allocation2 + $0x1c] sm:$0xf] %v17903_v32 }
   0x9   :  { %v12632_v24 = vld [vmem:[%s17896_s0 + $0x80] sm:$0xff]   ;;  %v12633_v25 = vld [vmem:[%s17896_s0 + $0x88] sm:$0xff]   ;;  %v12634_v26 = vld [vmem:[%s17896_s0 + $0x90] sm:$0xff]   ;;  %1156 = vst [vmem:[#allocation2 + $0x20] sm:$0x1] %v17903_v32 }
   0xa   :  { %v12635_v27 = vld [vmem:[%s17896_s0 + $0x98] sm:$0xff]   ;;  %v12636_v28 = vld [vmem:[%s17896_s0 + $0xa0] sm:$0xff]   ;;  %v12637_v29 = vld [vmem:[%s17896_s0 + $0xa8] sm:$0xff]   ;;  %1157 = vst [vmem:[#allocation2 + $0x24] sm:$0xf] %v17903_v32 }
   0xb   :  { %12100 = vmatpush3.bf16.msra.mxu0 %v12610_v2  ;;  %v12638_v30 = vld [vmem:[%s17896_s0 + $0xb0] sm:$0xff]   ;;  %v12973_v31 = vld [vmem:[%s17896_s0 + $0xb8] sm:$0xff]   ;;  %1158 = vst [vmem:[#allocation2 + $0x28] sm:$0xf] %v17903_v32  ;;  %1159 = vst [vmem:[#allocation2 + $0x2c] sm:$0x1] %v17903_v32 }
   0xc   :  { %12101 = vmatprep.subr.bf16.mxu0 %v12611_v3  ;;  %1160 = vst [vmem:[#allocation2 + $0x30] sm:$0xf] %v17903_v32  ;;  %1161 = vst [vmem:[#allocation2 + $0x34] sm:$0xf] %v17903_v32  ;;  %v12640_v33 = vld [vmem:[%s17896_s0 + $0xc0] sm:$0xff]   ;;  %v12641_v34 = vld [vmem:[%s17896_s0 + $0xc8] sm:$0xff]  }
   0xd   :  { %1162 = vst [vmem:[#allocation2 + $0x38] sm:$0x1] %v17903_v32  ;;  %1163 = vst [vmem:[#allocation2 + $0x3c] sm:$0xf] %v17903_v32  ;;  %v12642_v35 = vld [vmem:[%s17896_s0 + $0xd0] sm:$0xff]   ;;  %v12643_v36 = vld [vmem:[%s17896_s0 + $0xd8] sm:$0xff]  }
   0xe   :  { %1164 = vst [vmem:[#allocation2 + $0x40] sm:$0xf] %v17903_v32  ;;  %1165 = vst [vmem:[#allocation2 + $0x44] sm:$0x1] %v17903_v32  ;;  %v12644_v37 = vld [vmem:[%s17896_s0 + $0xe0] sm:$0xff]   ;;  %v12645_v38 = vld [vmem:[%s17896_s0 + $0xe8] sm:$0xff]  }
   0xf   :  { %12102 = vmatpush3.bf16.msra.mxu0 %v12611_v3  ;;  %1166 = vst [vmem:[#allocation2 + $0x48] sm:$0xf] %v17903_v32  ;;  %1167 = vst [vmem:[#allocation2 + $0x4c] sm:$0xf] %v17903_v32  ;;  %v12646_v39 = vld [vmem:[%s17896_s0 + $0xf0] sm:$0xff]   ;;  %v12647_v40 = vld [vmem:[%s17896_s0 + $0xf8] sm:$0xff]  }
  0x10   :  { %12103 = vmatprep.subr.bf16.mxu0 %v12612_v5  ;;  %1168 = vst [vmem:[#allocation2 + $0x50] sm:$0x1] %v17903_v32  ;;  %1169 = vst [vmem:[#allocation2 + $0x54] sm:$0xf] %v17903_v32  ;;  %vm2061_vm6 = vsmask.f32 7938 }
  0x11   :  { %1170 = vst [vmem:[#allocation2 + $0x58] sm:$0xf] %v17903_v32  ;;  %1171 = vst [vmem:[#allocation2 + $0x5c] sm:$0x1] %v17903_v32  ;;  %vm2673_vm8 = vsmask.f32 3328 }
  0x12   :  { %1172 = vst [vmem:[#allocation2 + $0x60] sm:$0xf] %v17903_v32  ;;  %1173 = vst [vmem:[#allocation2 + $0x64] sm:$0xf] %v17903_v32  ;;  %vm2674_vm9 = vsmask.f32 7440 }
  0x13   :  { %12104 = vmatpush3.bf16.msra.mxu0 %v12612_v5  ;;  %1174 = vst [vmem:[#allocation2 + $0x68] sm:$0x1] %v17903_v32  ;;  %1175 = vst [vmem:[#allocation2 + $0x6c] sm:$0xf] %v17903_v32 }
  0x14   :  { %12105 = vmatprep.subr.bf16.mxu0 %v12613_v6  ;;  %1176 = vst [vmem:[#allocation2 + $0x70] sm:$0xf] %v17903_v32  ;;  %1177 = vst [vmem:[#allocation2 + $0x74] sm:$0x1] %v17903_v32 }
  0x15   :  { %1178 = vst [vmem:[#allocation2 + $0x78] sm:$0xf] %v17903_v32  ;;  %1179 = vst [vmem:[#allocation2 + $0x7c] sm:$0xf] %v17903_v32 }
  0x16   :  { %1180 = vst [vmem:[#allocation2 + $0x80] sm:$0x1] %v17903_v32  ;;  %1181 = vst [vmem:[#allocation2 + $0x84] sm:$0xf] %v17903_v32 }
  0x17   :  { %12106 = vmatpush3.bf16.msra.mxu0 %v12613_v6  ;;  %1182 = vst [vmem:[#allocation2 + $0x88] sm:$0xf] %v17903_v32  ;;  %1183 = vst [vmem:[#allocation2 + $0x8c] sm:$0x1] %v17903_v32 }
  0x18   :  { %12107 = vmatprep.subr.bf16.mxu0 %v12614_v7  ;;  %1184 = vst [vmem:[#allocation2 + $0x90] sm:$0xf] %v17903_v32  ;;  %1185 = vst [vmem:[#allocation2 + $0x94] sm:$0xf] %v17903_v32 }
  0x19   :  { %1186 = vst [vmem:[#allocation2 + $0x98] sm:$0x1] %v17903_v32  ;;  %1187 = vst [vmem:[#allocation2 + $0x9c] sm:$0xf] %v17903_v32 }
  0x1a   :  { %1188 = vst [vmem:[#allocation2 + $0xa0] sm:$0xf] %v17903_v32  ;;  %1189 = vst [vmem:[#allocation2 + $0xa4] sm:$0x1] %v17903_v32 }
  0x1b   :  { %12108 = vmatpush3.bf16.msra.mxu0 %v12614_v7  ;;  %1190 = vst [vmem:[#allocation2 + $0xa8] sm:$0xf] %v17903_v32  ;;  %1191 = vst [vmem:[#allocation2 + $0xac] sm:$0xf] %v17903_v32 }
  0x1c   :  { %12109 = vmatprep.subr.bf16.mxu0 %v12615_v8  ;;  %1192 = vst [vmem:[#allocation2 + $0xb0] sm:$0x1] %v17903_v32  ;;  %1193 = vst [vmem:[#allocation2 + $0xb4] sm:$0xf] %v17903_v32 }
  0x1d   :  { %1194 = vst [vmem:[#allocation2 + $0xb8] sm:$0xf] %v17903_v32  ;;  %1195 = vst [vmem:[#allocation2 + $0xbc] sm:$0x1] %v17903_v32 }
  0x1e   :  { %1196 = vst [vmem:[#allocation2 + $0xc0] sm:$0xf] %v17903_v32  ;;  %1197 = vst [vmem:[#allocation2 + $0xc4] sm:$0xf] %v17903_v32 }
  0x1f   :  { %12110 = vmatpush3.bf16.msra.mxu0 %v12615_v8  ;;  %1198 = vst [vmem:[#allocation2 + $0xc8] sm:$0x1] %v17903_v32  ;;  %1199 = vst [vmem:[#allocation2 + $0xcc] sm:$0xf] %v17903_v32 }
  0x20   :  { %1200 = vst [vmem:[#allocation2 + $0xd0] sm:$0xf] %v17903_v32  ;;  %1201 = vst [vmem:[#allocation2 + $0xd4] sm:$0x1] %v17903_v32  ;;  %8824 = vmatprep.subr.bf16.mxu0 %v17903_v32 }
  0x21   :  { %1202 = vst [vmem:[#allocation2 + $0xd8] sm:$0xf] %v17903_v32  ;;  %1203 = vst [vmem:[#allocation2 + $0xdc] sm:$0xf] %v17903_v32 }
  0x22   :  { %12112 = vmatmul.mubr.bf16.vlgmr.msra.gmra.mrb[0].mxu0 %v12617_v9  ;;  %1204 = vst [vmem:[#allocation2 + $0xe0] sm:$0x1] %v17903_v32  ;;  %1205 = vst [vmem:[#allocation2 + $0xe4] sm:$0xf] %v17903_v32 }
  0x23   :  { %12115 = vmatprep.mubr.bf16.mxu0 %v12618_v10  ;;  %1206 = vst [vmem:[#allocation2 + $0xe8] sm:$0xf] %v17903_v32  ;;  %1207 = vst [vmem:[#allocation2 + $0xec] sm:$0x1] %v17903_v32 }
  0x24   :  { %1208 = vst [vmem:[#allocation2 + $0xf0] sm:$0xf] %v17903_v32  ;;  %1209 = vst [vmem:[#allocation2 + $0xf4] sm:$0xf] %v17903_v32 }
  0x25   :  { %1210 = vst [vmem:[#allocation2 + $0xf8] sm:$0x1] %v17903_v32  ;;  %1211 = vst [vmem:[#allocation2 + $0xfc] sm:$0xf] %v17903_v32 }
  0x26   :  { %1212 = vst [vmem:[#allocation2 + $0x100] sm:$0xf] %v17903_v32  ;;  %1213 = vst [vmem:[#allocation2 + $0x104] sm:$0x1] %v17903_v32 }
  0x27   :  { %1214 = vst [vmem:[#allocation2 + $0x108] sm:$0xf] %v17903_v32  ;;  %1215 = vst [vmem:[#allocation2 + $0x10c] sm:$0xf] %v17903_v32 }
  0x28   :  { %1216 = vst [vmem:[#allocation2 + $0x110] sm:$0x1] %v17903_v32  ;;  %1217 = vst [vmem:[#allocation2 + $0x114] sm:$0xf] %v17903_v32 }
  0x29   :  { %1218 = vst [vmem:[#allocation2 + $0x118] sm:$0xf] %v17903_v32  ;;  %1219 = vst [vmem:[#allocation2 + $0x11c] sm:$0x1] %v17903_v32 }
  0x2a   :  { %12116 = vmatmul.mubr.bf16.gmra.mrb[4].mxu0 %v12619_v11  ;;  %1220 = vst [vmem:[#allocation2 + $0x120] sm:$0xf] %v17903_v32  ;;  %1221 = vst [vmem:[#allocation2 + $0x124] sm:$0xf] %v17903_v32 }
  0x2b   :  { %12119 = vmatprep.mubr.bf16.mxu0 %v12620_v12  ;;  %1222 = vst [vmem:[#allocation2 + $0x128] sm:$0x1] %v17903_v32  ;;  %1223 = vst [vmem:[#allocation2 + $0x12c] sm:$0xf] %v17903_v32 }
  0x2c   :  { %1224 = vst [vmem:[#allocation2 + $0x130] sm:$0xf] %v17903_v32  ;;  %1225 = vst [vmem:[#allocation2 + $0x134] sm:$0x1] %v17903_v32 }
  0x2d   :  { %1226 = vst [vmem:[#allocation2 + $0x138] sm:$0xf] %v17903_v32  ;;  %1227 = vst [vmem:[#allocation2 + $0x13c] sm:$0xf] %v17903_v32 }
  0x2e   :  { %1228 = vst [vmem:[#allocation2 + $0x140] sm:$0x1] %v17903_v32  ;;  %1229 = vst [vmem:[#allocation2 + $0x144] sm:$0xf] %v17903_v32 }
  0x2f   :  { %1230 = vst [vmem:[#allocation2 + $0x148] sm:$0xf] %v17903_v32  ;;  %1231 = vst [vmem:[#allocation2 + $0x14c] sm:$0x1] %v17903_v32 }
  0x30   :  { %1232 = vst [vmem:[#allocation2 + $0x150] sm:$0xf] %v17903_v32  ;;  %1233 = vst [vmem:[#allocation2 + $0x154] sm:$0xf] %v17903_v32 }
  0x31   :  { %1234 = vst [vmem:[#allocation2 + $0x158] sm:$0x1] %v17903_v32  ;;  %1235 = vst [vmem:[#allocation2 + $0x15c] sm:$0xf] %v17903_v32 }
  0x32   :  { %12120 = vmatmul.mubr.bf16.gmra.mrb[8].mxu0 %v12621_v13  ;;  %1236 = vst [vmem:[#allocation2 + $0x160] sm:$0xf] %v17903_v32  ;;  %1237 = vst [vmem:[#allocation2 + $0x164] sm:$0x1] %v17903_v32 }
  0x33   :  { %12123 = vmatprep.mubr.bf16.mxu0 %v12622_v14  ;;  %1238 = vst [vmem:[#allocation2 + $0x168] sm:$0xf] %v17903_v32  ;;  %1239 = vst [vmem:[#allocation2 + $0x16c] sm:$0xf] %v17903_v32 }
  0x34   :  { %1240 = vst [vmem:[#allocation2 + $0x170] sm:$0x1] %v17903_v32  ;;  %1241 = vst [vmem:[#allocation2 + $0x174] sm:$0xf] %v17903_v32 }
  0x35   :  { %1242 = vst [vmem:[#allocation2 + $0x178] sm:$0xf] %v17903_v32  ;;  %1243 = vst [vmem:[#allocation2 + $0x17c] sm:$0x1] %v17903_v32 }
  0x36   :  { %1244 = vst [vmem:[#allocation2 + $0x180] sm:$0xf] %v17903_v32  ;;  %1245 = vst [vmem:[#allocation2 + $0x184] sm:$0xf] %v17903_v32 }
  0x37   :  { %1246 = vst [vmem:[#allocation2 + $0x188] sm:$0x1] %v17903_v32  ;;  %1247 = vst [vmem:[#allocation2 + $0x18c] sm:$0xf] %v17903_v32 }
  0x38   :  { %1248 = vst [vmem:[#allocation2 + $0x190] sm:$0xf] %v17903_v32  ;;  %1249 = vst [vmem:[#allocation2 + $0x194] sm:$0x1] %v17903_v32 }
  0x39   :  { %1250 = vst [vmem:[#allocation2 + $0x198] sm:$0xf] %v17903_v32  ;;  %1251 = vst [vmem:[#allocation2 + $0x19c] sm:$0xf] %v17903_v32 }
  0x3a   :  { %12124 = vmatmul.mubr.bf16.gmra.mrb[12].mxu0 %v12623_v15  ;;  %1252 = vst [vmem:[#allocation2 + $0x1a0] sm:$0x1] %v17903_v32  ;;  %1253 = vst [vmem:[#allocation2 + $0x1a4] sm:$0xf] %v17903_v32 }
  0x3b   :  { %12127 = vmatprep.mubr.bf16.mxu0 %v12624_v16  ;;  %1254 = vst [vmem:[#allocation2 + $0x1a8] sm:$0xf] %v17903_v32  ;;  %1255 = vst [vmem:[#allocation2 + $0x1ac] sm:$0x1] %v17903_v32 }
  0x3c   :  { %vm13619_vm3 = vmor %vm1416_vm0, %vm1417_vm1 }
  0x3d   :  { %vm13651_vm4 = vmand %vm2067_vm2, %vm1416_vm0 }
  0x3e   :  { %vm14816_vm7 = vmand %vm2060_vm5, %vm2061_vm6 }
  0x3f   :  { %vm15165_vm12 = vmor %vm3796_vm10, %vm3797_vm11 }
  0x40   :  { %vm15171_vm13 = vmor %vm2673_vm8, %vm2674_vm9 }
  0x42   :  { %12128 = vmatmul.mubr.bf16.gmra.mrb[16].mxu0 %v12625_v17 }
  0x43   :  { %12131 = vmatprep.mubr.bf16.mxu0 %v12626_v18 }
  0x4a   :  { %12132 = vmatmul.mubr.bf16.gmra.mrb[20].mxu0 %v12627_v19 }
  0x4b   :  { %12135 = vmatprep.mubr.bf16.mxu0 %v12628_v20 }
  0x52   :  { %12136 = vmatmul.mubr.bf16.gmra.mrb[24].mxu0 %v12629_v21 }
  0x53   :  { %12139 = vmatprep.mubr.bf16.mxu0 %v12630_v22 }
  0x5a   :  { %12140 = vmatmul.mubr.bf16.gmra.mrb[28].mxu0 %v12631_v23 }
  0x5b   :  { %12143 = vmatprep.mubr.bf16.mxu0 %v12632_v24 }
  0x62   :  { %12144 = vmatmul.mubr.bf16.gmra.mrb[32].mxu0 %v12633_v25 }
  0x63   :  { %12147 = vmatprep.mubr.bf16.mxu0 %v12634_v26 }
  0x6a   :  { %12148 = vmatmul.mubr.bf16.gmra.mrb[36].mxu0 %v12635_v27 }
  0x6b   :  { %12151 = vmatprep.mubr.bf16.mxu0 %v12636_v28 }
  0x72   :  { %12152 = vmatmul.mubr.bf16.gmra.mrb[40].mxu0 %v12637_v29 }
  0x73   :  { %12155 = vmatprep.mubr.bf16.mxu0 %v12638_v30 }
  0x7a   :  { %12156 = vmatmul.mubr.bf16.gmra.mrb[44].mxu0 %v12973_v31 }
  0x7b   :  { %12159 = vmatprep.mubr.bf16.mxu0 %v12640_v33 }
  0x82   :  { %12160 = vmatmul.mubr.bf16.gmra.mrb[48].mxu0 %v12641_v34 }
  0x83   :  { %12163 = vmatprep.mubr.bf16.mxu0 %v12642_v35 }
  0x8a   :  { %12164 = vmatmul.mubr.bf16.gmra.mrb[52].mxu0 %v12643_v36 }
  0x8b   :  { %12167 = vmatprep.mubr.bf16.mxu0 %v12644_v37 }
  0x92   :  { %12168 = vmatmul.mubr.bf16.gmra.mrb[56].mxu0 %v12645_v38 }
  0x93   :  { %12171 = vmatprep.mubr.bf16.mxu0 %v12646_v39 }
  0x9a   :  { %12172 = vmatmul.mubr.bf16.gmra.mrb[60].mxu0 %v12647_v40 }
  0xf5   :  { %v13110_v41 = vpop.f32.mrb[0].mxu0 }
  0xf6   :  { %18058 = vst [vmem:[#allocation4_spill] sm:$0xff] %v13110_v41  ;;  %v13112_v42 = vpop.f32.mrb[1].mxu0 }
  0xf7   :  { %v13114_v43 = vpop.f32.mrb[2].mxu0 }
  0xf8   :  { %18059 = vst [vmem:[#allocation5_spill] sm:$0xff] %v13114_v43  ;;  %v13116_v44 = vpop.f32.mrb[3].mxu0 }
  0xf9   :  { %18060 = vst [vmem:[#allocation6_spill] sm:$0xff] %v13116_v44  ;;  %v638_v45 = vadd.f32 %v13116_v44, %v13112_v42 }
  0xfb   :  { %v639_v46 = vadd.f32 %v13110_v41, %v638_v45 }
  0xfd   :  { %v13121_v47 = vpop.f32.mrb[4].mxu0  ;;  %v640_v48 = vadd.f32 %v13114_v43, %v639_v46 }
  0xfe   :  { %v13124_v49 = vpop.f32.mrb[5].mxu0 }
  0xff   :  { %18061 = vst [vmem:[#allocation7_spill] sm:$0xff] %v13124_v49  ;;  %v641_v50 = vadd.f32 %v640_v48, %v13124_v49  ;;  %v13127_v51 = vpop.f32.mrb[6].mxu0 }
 0x100   :  { %v13129_v52 = vpop.f32.mrb[7].mxu0 }
 0x101   :  { %v642_v53 = vadd.f32 %v641_v50, %v13129_v52 }
 0x103   :  { %v643_v54 = vadd.f32 %v13121_v47, %v642_v53 }
 0x105   :  { %v13133_v55 = vpop.f32.mrb[8].mxu0  ;;  %v644_v56 = vadd.f32 %v13127_v51, %v643_v54 }
 0x106   :  { %v13136_v57 = vpop.f32.mrb[9].mxu0 }
 0x107   :  { %v645_v58 = vadd.f32 %v644_v56, %v13136_v57  ;;  %v13139_v59 = vpop.f32.mrb[10].mxu0 }
 0x108   :  { %v13141_v60 = vpop.f32.mrb[11].mxu0 }
 0x109   :  { %v646_v61 = vadd.f32 %v645_v58, %v13141_v60 }
 0x10b   :  { %v647_v62 = vadd.f32 %v13133_v55, %v646_v61 }
 0x10d   :  { %v13145_v63 = vpop.f32.mrb[12].mxu0  ;;  %v648_v0 = vadd.f32 %v13139_v59, %v647_v62 }
 0x10e   :  { %v13148_v1 = vpop.f32.mrb[13].mxu0 }
 0x10f   :  { %v649_v2 = vadd.f32 %v648_v0, %v13148_v1  ;;  %v13151_v3 = vpop.f32.mrb[14].mxu0 }
 0x110   :  { %v13153_v4 = vpop.f32.mrb[15].mxu0 }
 0x111   :  { %v650_v5 = vadd.f32 %v649_v2, %v13153_v4 }
 0x113   :  { %v651_v6 = vadd.f32 %v13145_v63, %v650_v5 }
 0x115   :  { %v13157_v7 = vpop.f32.mrb[16].mxu0  ;;  %v652_v8 = vadd.f32 %v13151_v3, %v651_v6 }
 0x116   :  { %v13160_v9 = vpop.f32.mrb[17].mxu0 }
 0x117   :  { %v653_v10 = vadd.f32 %v652_v8, %v13160_v9  ;;  %v13163_v11 = vpop.f32.mrb[18].mxu0 }
 0x118   :  { %v13165_v12 = vpop.f32.mrb[19].mxu0 }
 0x119   :  { %v654_v13 = vadd.f32 %v653_v10, %v13165_v12 }
 0x11b   :  { %v655_v14 = vadd.f32 %v13157_v7, %v654_v13 }
 0x11d   :  { %v13169_v15 = vpop.f32.mrb[20].mxu0  ;;  %v656_v16 = vadd.f32 %v13163_v11, %v655_v14 }
 0x11e   :  { %v13172_v17 = vpop.f32.mrb[21].mxu0 }
 0x11f   :  { %v657_v18 = vadd.f32 %v656_v16, %v13172_v17  ;;  %v13175_v19 = vpop.f32.mrb[22].mxu0 }
 0x120   :  { %v13177_v20 = vpop.f32.mrb[23].mxu0 }
 0x121   :  { %v658_v21 = vadd.f32 %v657_v18, %v13177_v20 }
 0x123   :  { %v659_v22 = vadd.f32 %v13169_v15, %v658_v21 }
 0x125   :  { %v13181_v23 = vpop.f32.mrb[24].mxu0  ;;  %v660_v24 = vadd.f32 %v13175_v19, %v659_v22 }
 0x126   :  { %v13184_v25 = vpop.f32.mrb[25].mxu0 }
 0x127   :  { %v661_v26 = vadd.f32 %v660_v24, %v13184_v25  ;;  %v13187_v27 = vpop.f32.mrb[26].mxu0 }
 0x128   :  { %v13189_v28 = vpop.f32.mrb[27].mxu0 }
 0x129   :  { %v662_v29 = vadd.f32 %v661_v26, %v13189_v28 }
 0x12b   :  { %v663_v30 = vadd.f32 %v13181_v23, %v662_v29 }
 0x12d   :  { %v13193_v31 = vpop.f32.mrb[28].mxu0  ;;  %v664_v33 = vadd.f32 %v13187_v27, %v663_v30 }
 0x12e   :  { %v13196_v34 = vpop.f32.mrb[29].mxu0 }
 0x12f   :  { %v665_v35 = vadd.f32 %v664_v33, %v13196_v34  ;;  %v13199_v36 = vpop.f32.mrb[30].mxu0 }
 0x130   :  { %v13201_v37 = vpop.f32.mrb[31].mxu0 }
 0x131   :  { %v666_v38 = vadd.f32 %v665_v35, %v13201_v37 }
 0x133   :  { %v667_v39 = vadd.f32 %v13193_v31, %v666_v38 }
 0x135   :  { %v13205_v40 = vpop.f32.mrb[32].mxu0  ;;  %v668_v45 = vadd.f32 %v13199_v36, %v667_v39 }
 0x136   :  { %v13208_v46 = vpop.f32.mrb[33].mxu0 }
 0x137   :  { %v669_v48 = vadd.f32 %v668_v45, %v13208_v46  ;;  %v13211_v50 = vpop.f32.mrb[34].mxu0 }
 0x138   :  { %v13213_v53 = vpop.f32.mrb[35].mxu0 }
 0x139   :  { %v670_v54 = vadd.f32 %v669_v48, %v13213_v53 }
 0x13b   :  { %v671_v56 = vadd.f32 %v13205_v40, %v670_v54 }
 0x13d   :  { %v13217_v58 = vpop.f32.mrb[36].mxu0  ;;  %v672_v61 = vadd.f32 %v13211_v50, %v671_v56 }
 0x13e   :  { %v13220_v62 = vpop.f32.mrb[37].mxu0 }
 0x13f   :  { %v673_v0 = vadd.f32 %v672_v61, %v13220_v62  ;;  %v13223_v2 = vpop.f32.mrb[38].mxu0 }
 0x140   :  { %v13225_v5 = vpop.f32.mrb[39].mxu0 }
 0x141   :  { %v674_v6 = vadd.f32 %v673_v0, %v13225_v5 }
 0x143   :  { %v675_v8 = vadd.f32 %v13217_v58, %v674_v6 }
 0x145   :  { %v13229_v10 = vpop.f32.mrb[40].mxu0  ;;  %v676_v13 = vadd.f32 %v13223_v2, %v675_v8 }
 0x146   :  { %18062 = vst [vmem:[#allocation8_spill] sm:$0xff] %v13229_v10  ;;  %v13232_v14 = vpop.f32.mrb[41].mxu0 }
 0x147   :  { %v677_v16 = vadd.f32 %v676_v13, %v13232_v14  ;;  %v13235_v18 = vpop.f32.mrb[42].mxu0 }
 0x148   :  { %18063 = vst [vmem:[#allocation9_spill] sm:$0xff] %v13235_v18  ;;  %v13237_v21 = vpop.f32.mrb[43].mxu0 }
 0x149   :  { %18064 = vst [vmem:[#allocation10_spill] sm:$0xff] %v13237_v21  ;;  %v678_v22 = vadd.f32 %v677_v16, %v13237_v21 }
 0x14b   :  { %v679_v24 = vadd.f32 %v13229_v10, %v678_v22 }
 0x14d   :  { %v13241_v26 = vpop.f32.mrb[44].mxu0  ;;  %v680_v29 = vadd.f32 %v13235_v18, %v679_v24 }
 0x14e   :  { %18065 = vst [vmem:[#allocation11_spill] sm:$0xff] %v13241_v26  ;;  %v13244_v30 = vpop.f32.mrb[45].mxu0 }
 0x14f   :  { %18066 = vst [vmem:[#allocation12_spill] sm:$0xff] %v13244_v30  ;;  %v681_v33 = vadd.f32 %v680_v29, %v13244_v30  ;;  %v13247_v35 = vpop.f32.mrb[46].mxu0 }
 0x150   :  { %18067 = vst [vmem:[#allocation13_spill] sm:$0xff] %v13247_v35  ;;  %v13249_v38 = vpop.f32.mrb[47].mxu0 }
 0x151   :  { %18068 = vst [vmem:[#allocation14_spill] sm:$0xff] %v13249_v38  ;;  %v682_v39 = vadd.f32 %v681_v33, %v13249_v38 }
 0x153   :  { %v683_v45 = vadd.f32 %v13241_v26, %v682_v39 }
 0x155   :  { %v13253_v48 = vpop.f32.mrb[48].mxu0  ;;  %v684_v54 = vadd.f32 %v13247_v35, %v683_v45 }
 0x156   :  { %18069 = vst [vmem:[#allocation15_spill] sm:$0xff] %v13253_v48  ;;  %v13256_v56 = vpop.f32.mrb[49].mxu0 }
 0x157   :  { %18070 = vst [vmem:[#allocation16_spill] sm:$0xff] %v13256_v56  ;;  %v685_v61 = vadd.f32 %v684_v54, %v13256_v56  ;;  %v13259_v0 = vpop.f32.mrb[50].mxu0 }
 0x158   :  { %18071 = vst [vmem:[#allocation17_spill] sm:$0xff] %v13259_v0  ;;  %v13261_v6 = vpop.f32.mrb[51].mxu0 }
 0x159   :  { %18072 = vst [vmem:[#allocation18_spill] sm:$0xff] %v13261_v6  ;;  %v686_v8 = vadd.f32 %v685_v61, %v13261_v6 }
 0x15b   :  { %v687_v13 = vadd.f32 %v13253_v48, %v686_v8 }
 0x15d   :  { %v13265_v16 = vpop.f32.mrb[52].mxu0  ;;  %v688_v22 = vadd.f32 %v13259_v0, %v687_v13 }
 0x15e   :  { %18073 = vst [vmem:[#allocation19_spill] sm:$0xff] %v13265_v16  ;;  %v13268_v24 = vpop.f32.mrb[53].mxu0 }
 0x15f   :  { %18074 = vst [vmem:[#allocation20_spill] sm:$0xff] %v13268_v24  ;;  %v689_v29 = vadd.f32 %v688_v22, %v13268_v24  ;;  %v13271_v33 = vpop.f32.mrb[54].mxu0 }
 0x160   :  { %18075 = vst [vmem:[#allocation21_spill] sm:$0xff] %v13271_v33  ;;  %v13273_v39 = vpop.f32.mrb[55].mxu0 }
 0x161   :  { %18076 = vst [vmem:[#allocation22_spill] sm:$0xff] %v13273_v39  ;;  %v690_v45 = vadd.f32 %v689_v29, %v13273_v39 }
 0x163   :  { %v691_v54 = vadd.f32 %v13265_v16, %v690_v45 }
 0x165   :  { %v13277_v32 = vpop.f32.mrb[56].mxu0  ;;  %v692_v61 = vadd.f32 %v13271_v33, %v691_v54 }
 0x166   :  { %18077 = vst [vmem:[#allocation23_spill] sm:$0xff] %v13277_v32  ;;  %v13280_v8 = vpop.f32.mrb[57].mxu0 }
 0x167   :  { %18078 = vst [vmem:[#allocation24_spill] sm:$0xff] %v13280_v8  ;;  %v693_v13 = vadd.f32 %v692_v61, %v13280_v8  ;;  %v13283_v0 = vpop.f32.mrb[58].mxu0 }
 0x168   :  { %18079 = vst [vmem:[#allocation25_spill] sm:$0xff] %v13283_v0  ;;  %v13285_v48 = vpop.f32.mrb[59].mxu0 }
 0x169   :  { %18080 = vst [vmem:[#allocation26_spill] sm:$0xff] %v13285_v48  ;;  %v694_v22 = vadd.f32 %v693_v13, %v13285_v48 }
 0x16b   :  { %v695_v24 = vadd.f32 %v13277_v32, %v694_v22 }
 0x16d   :  { %v13289_v6 = vpop.f32.mrb[60].mxu0  ;;  %v696_v29 = vadd.f32 %v13283_v0, %v695_v24 }
 0x16e   :  { %18081 = vst [vmem:[#allocation27_spill] sm:$0xff] %v13289_v6  ;;  %v13292_v45 = vpop.f32.mrb[61].mxu0 }
 0x16f   :  { %18082 = vst [vmem:[#allocation28_spill] sm:$0xff] %v13292_v45  ;;  %v697_v54 = vadd.f32 %v696_v29, %v13292_v45  ;;  %v13295_v33 = vpop.f32.mrb[62].mxu0 }
 0x170   :  { %v13297_v16 = vpop.f32.mrb[63].mxu0 }
 0x171   :  { %v698_v61 = vadd.f32 %v697_v54, %v13297_v16 }
 0x173   :  { %v699_v8 = vadd.f32 %v13289_v6, %v698_v61 }
 0x175   :  { %v700_v13 = vadd.f32 %v13295_v33, %v699_v8 }
 0x177   :  { %v701_v48 = vrot.slane %v700_v13, 4 }
 0x179   :  { %v702_v22 = vadd.f32 %v701_v48, %v700_v13 }
 0x17b   :  { %v703_v32 = vrot.slane %v702_v22, 2 }
 0x17d   :  { %v704_v39 = vadd.f32 %v703_v32, %v702_v22 }
 0x17f   :  { %v705_v56 = vrot.slane %v704_v39, 1 }
 0x181   :  { %v706_v24 = vadd.f32 %v705_v56, %v704_v39 }
 0x183   :  { %v13302_v0 = vmul.f32 0.001953125, %v706_v24 }
 0x185   :  { %v709_v29 = vsub.f32 %v13112_v42, %v13302_v0  ;;  %v710_v45 = vsub.f32 %v13116_v44, %v13302_v0  ;;  %v711_v54 = vsub.f32 %v13110_v41, %v13302_v0  ;;  %v712_v48 = vsub.f32 %v13114_v43, %v13302_v0 }
 0x186   :  { %v713_v32 = vsub.f32 %v13124_v49, %v13302_v0  ;;  %v714_v8 = vsub.f32 %v13129_v52, %v13302_v0  ;;  %v715_v24 = vsub.f32 %v13121_v47, %v13302_v0  ;;  %v717_v49 = vsub.f32 %v13136_v57, %v13302_v0 }
 0x187   :  { %v773_v61 = vmul.f32 %v709_v29, %v709_v29  ;;  %v774_v6 = vmul.f32 %v710_v45, %v710_v45  ;;  %v775_v56 = vmul.f32 %v711_v54, %v711_v54  ;;  %v776_v13 = vmul.f32 %v712_v48, %v712_v48 }
 0x188   :  { %v777_v44 = vmul.f32 %v713_v32, %v713_v32  ;;  %v716_v45 = vsub.f32 %v13127_v51, %v13302_v0  ;;  %v778_v29 = vmul.f32 %v714_v8, %v714_v8  ;;  %v779_v54 = vmul.f32 %v715_v24, %v715_v24 }
 0x189   :  { %v837_v39 = vadd.f32 %v774_v6, %v773_v61  ;;  %v718_v61 = vsub.f32 %v13141_v60, %v13302_v0  ;;  %v781_v32 = vmul.f32 %v717_v49, %v717_v49 }
 0x18a   :  { %v780_v48 = vmul.f32 %v716_v45, %v716_v45 }
 0x18b   :  { %v838_v22 = vadd.f32 %v837_v39, %v775_v56  ;;  %v719_v39 = vsub.f32 %v13133_v55, %v13302_v0  ;;  %v782_v8 = vmul.f32 %v718_v61, %v718_v61 }
 0x18d   :  { %v839_v41 = vadd.f32 %v838_v22, %v776_v13  ;;  %v720_v22 = vsub.f32 %v13139_v59, %v13302_v0  ;;  %v783_v24 = vmul.f32 %v719_v39, %v719_v39 }
 0x18f   :  { %v840_v43 = vadd.f32 %v839_v41, %v777_v44  ;;  %v721_v44 = vsub.f32 %v13148_v1, %v13302_v0  ;;  %v784_v45 = vmul.f32 %v720_v22, %v720_v22 }
 0x191   :  { %v841_v6 = vadd.f32 %v840_v43, %v778_v29  ;;  %v722_v29 = vsub.f32 %v13153_v4, %v13302_v0  ;;  %v785_v49 = vmul.f32 %v721_v44, %v721_v44 }
 0x193   :  { %v842_v56 = vadd.f32 %v841_v6, %v779_v54  ;;  %v723_v6 = vsub.f32 %v13145_v63, %v13302_v0  ;;  %v786_v61 = vmul.f32 %v722_v29, %v722_v29 }
 0x195   :  { %v843_v13 = vadd.f32 %v842_v56, %v780_v48  ;;  %v724_v56 = vsub.f32 %v13151_v3, %v13302_v0  ;;  %v787_v39 = vmul.f32 %v723_v6, %v723_v6 }
 0x197   :  { %v844_v41 = vadd.f32 %v843_v13, %v781_v32  ;;  %v725_v13 = vsub.f32 %v13160_v9, %v13302_v0  ;;  %v788_v22 = vmul.f32 %v724_v56, %v724_v56 }
 0x199   :  { %v845_v43 = vadd.f32 %v844_v41, %v782_v8  ;;  %v726_v41 = vsub.f32 %v13165_v12, %v13302_v0  ;;  %v789_v44 = vmul.f32 %v725_v13, %v725_v13 }
 0x19b   :  { %v846_v54 = vadd.f32 %v845_v43, %v783_v24  ;;  %v727_v43 = vsub.f32 %v13157_v7, %v13302_v0  ;;  %v790_v29 = vmul.f32 %v726_v41, %v726_v41 }
 0x19d   :  { %v847_v48 = vadd.f32 %v846_v54, %v784_v45  ;;  %v728_v54 = vsub.f32 %v13163_v11, %v13302_v0  ;;  %v791_v6 = vmul.f32 %v727_v43, %v727_v43 }
 0x19f   :  { %v848_v32 = vadd.f32 %v847_v48, %v785_v49  ;;  %v729_v48 = vsub.f32 %v13172_v17, %v13302_v0  ;;  %v792_v56 = vmul.f32 %v728_v54, %v728_v54 }
 0x1a1   :  { %v849_v8 = vadd.f32 %v848_v32, %v786_v61  ;;  %v730_v32 = vsub.f32 %v13177_v20, %v13302_v0  ;;  %v793_v13 = vmul.f32 %v729_v48, %v729_v48 }
 0x1a3   :  { %v850_v24 = vadd.f32 %v849_v8, %v787_v39  ;;  %v731_v8 = vsub.f32 %v13169_v15, %v13302_v0  ;;  %v794_v41 = vmul.f32 %v730_v32, %v730_v32 }
 0x1a5   :  { %v851_v45 = vadd.f32 %v850_v24, %v788_v22  ;;  %v732_v24 = vsub.f32 %v13175_v19, %v13302_v0  ;;  %v795_v43 = vmul.f32 %v731_v8, %v731_v8 }
 0x1a7   :  { %v852_v49 = vadd.f32 %v851_v45, %v789_v44  ;;  %v733_v45 = vsub.f32 %v13184_v25, %v13302_v0  ;;  %v796_v54 = vmul.f32 %v732_v24, %v732_v24 }
 0x1a9   :  { %v853_v61 = vadd.f32 %v852_v49, %v790_v29  ;;  %v734_v49 = vsub.f32 %v13189_v28, %v13302_v0  ;;  %v797_v48 = vmul.f32 %v733_v45, %v733_v45 }
 0x1ab   :  { %v854_v39 = vadd.f32 %v853_v61, %v791_v6  ;;  %v735_v61 = vsub.f32 %v13181_v23, %v13302_v0  ;;  %v798_v32 = vmul.f32 %v734_v49, %v734_v49 }
 0x1ad   :  { %v855_v22 = vadd.f32 %v854_v39, %v792_v56  ;;  %v736_v39 = vsub.f32 %v13187_v27, %v13302_v0  ;;  %v799_v8 = vmul.f32 %v735_v61, %v735_v61 }
 0x1af   :  { %v856_v44 = vadd.f32 %v855_v22, %v793_v13  ;;  %v737_v22 = vsub.f32 %v13196_v34, %v13302_v0  ;;  %v800_v24 = vmul.f32 %v736_v39, %v736_v39 }
 0x1b1   :  { %v857_v29 = vadd.f32 %v856_v44, %v794_v41  ;;  %v738_v44 = vsub.f32 %v13201_v37, %v13302_v0  ;;  %v801_v45 = vmul.f32 %v737_v22, %v737_v22 }
 0x1b3   :  { %v858_v6 = vadd.f32 %v857_v29, %v795_v43  ;;  %v739_v29 = vsub.f32 %v13193_v31, %v13302_v0  ;;  %v802_v49 = vmul.f32 %v738_v44, %v738_v44 }
 0x1b5   :  { %v859_v56 = vadd.f32 %v858_v6, %v796_v54  ;;  %v740_v6 = vsub.f32 %v13199_v36, %v13302_v0  ;;  %v803_v61 = vmul.f32 %v739_v29, %v739_v29 }
 0x1b7   :  { %v860_v13 = vadd.f32 %v859_v56, %v797_v48  ;;  %v741_v56 = vsub.f32 %v13208_v46, %v13302_v0  ;;  %v804_v39 = vmul.f32 %v740_v6, %v740_v6 }
 0x1b9   :  { %v861_v41 = vadd.f32 %v860_v13, %v798_v32  ;;  %v742_v13 = vsub.f32 %v13213_v53, %v13302_v0  ;;  %v805_v22 = vmul.f32 %v741_v56, %v741_v56 }
 0x1bb   :  { %v862_v43 = vadd.f32 %v861_v41, %v799_v8  ;;  %v743_v41 = vsub.f32 %v13205_v40, %v13302_v0  ;;  %v806_v44 = vmul.f32 %v742_v13, %v742_v13 }
 0x1bd   :  { %v863_v54 = vadd.f32 %v862_v43, %v800_v24  ;;  %v744_v43 = vsub.f32 %v13211_v50, %v13302_v0  ;;  %v807_v29 = vmul.f32 %v743_v41, %v743_v41 }
 0x1bf   :  { %v864_v48 = vadd.f32 %v863_v54, %v801_v45  ;;  %v745_v54 = vsub.f32 %v13220_v62, %v13302_v0  ;;  %v808_v6 = vmul.f32 %v744_v43, %v744_v43 }
 0x1c1   :  { %v865_v32 = vadd.f32 %v864_v48, %v802_v49  ;;  %v746_v48 = vsub.f32 %v13225_v5, %v13302_v0  ;;  %v809_v56 = vmul.f32 %v745_v54, %v745_v54 }
 0x1c3   :  { %v866_v8 = vadd.f32 %v865_v32, %v803_v61  ;;  %v747_v32 = vsub.f32 %v13217_v58, %v13302_v0  ;;  %v810_v13 = vmul.f32 %v746_v48, %v746_v48 }
 0x1c5   :  { %v867_v24 = vadd.f32 %v866_v8, %v804_v39  ;;  %v748_v8 = vsub.f32 %v13223_v2, %v13302_v0  ;;  %v811_v41 = vmul.f32 %v747_v32, %v747_v32 }
 0x1c7   :  { %v868_v45 = vadd.f32 %v867_v24, %v805_v22  ;;  %v749_v24 = vsub.f32 %v13232_v14, %v13302_v0  ;;  %v812_v43 = vmul.f32 %v748_v8, %v748_v8 }
 0x1c9   :  { %v869_v49 = vadd.f32 %v868_v45, %v806_v44  ;;  %v750_v45 = vsub.f32 %v13237_v21, %v13302_v0  ;;  %v813_v54 = vmul.f32 %v749_v24, %v749_v24 }
 0x1cb   :  { %v870_v61 = vadd.f32 %v869_v49, %v807_v29  ;;  %v751_v49 = vsub.f32 %v13229_v10, %v13302_v0  ;;  %v814_v48 = vmul.f32 %v750_v45, %v750_v45 }
 0x1cd   :  { %v871_v39 = vadd.f32 %v870_v61, %v808_v6  ;;  %v752_v61 = vsub.f32 %v13235_v18, %v13302_v0  ;;  %v815_v32 = vmul.f32 %v751_v49, %v751_v49 }
 0x1cf   :  { %v872_v22 = vadd.f32 %v871_v39, %v809_v56  ;;  %v753_v39 = vsub.f32 %v13244_v30, %v13302_v0  ;;  %v816_v8 = vmul.f32 %v752_v61, %v752_v61 }
 0x1d1   :  { %v873_v44 = vadd.f32 %v872_v22, %v810_v13  ;;  %v754_v22 = vsub.f32 %v13249_v38, %v13302_v0  ;;  %v817_v24 = vmul.f32 %v753_v39, %v753_v39 }
 0x1d3   :  { %v874_v29 = vadd.f32 %v873_v44, %v811_v41  ;;  %v755_v44 = vsub.f32 %v13241_v26, %v13302_v0  ;;  %v818_v45 = vmul.f32 %v754_v22, %v754_v22 }
 0x1d5   :  { %v875_v6 = vadd.f32 %v874_v29, %v812_v43  ;;  %v756_v29 = vsub.f32 %v13247_v35, %v13302_v0  ;;  %v819_v49 = vmul.f32 %v755_v44, %v755_v44 }
 0x1d7   :  { %v876_v56 = vadd.f32 %v875_v6, %v813_v54  ;;  %v18083_v6 = vld [vmem:[#allocation16_spill] sm:$0xff]  ;;  %v820_v61 = vmul.f32 %v756_v29, %v756_v29 }
 0x1d8   :  { %v757_v30 = vsub.f32 %v18083_v6, %v13302_v0 }
 0x1d9   :  { %v877_v13 = vadd.f32 %v876_v56, %v814_v48  ;;  %v18084_v56 = vld [vmem:[#allocation18_spill] sm:$0xff] }
 0x1da   :  { %v758_v38 = vsub.f32 %v18084_v56, %v13302_v0  ;;  %v821_v39 = vmul.f32 %v757_v30, %v757_v30 }
 0x1db   :  { %v878_v41 = vadd.f32 %v877_v13, %v815_v32  ;;  %v18085_v13 = vld [vmem:[#allocation15_spill] sm:$0xff] }
 0x1dc   :  { %v759_v26 = vsub.f32 %v18085_v13, %v13302_v0  ;;  %v822_v22 = vmul.f32 %v758_v38, %v758_v38 }
 0x1dd   :  { %v879_v43 = vadd.f32 %v878_v41, %v816_v8  ;;  %v18086_v41 = vld [vmem:[#allocation17_spill] sm:$0xff] }
 0x1de   :  { %v760_v35 = vsub.f32 %v18086_v41, %v13302_v0  ;;  %v823_v44 = vmul.f32 %v759_v26, %v759_v26 }
 0x1df   :  { %v880_v54 = vadd.f32 %v879_v43, %v817_v24  ;;  %v18087_v43 = vld [vmem:[#allocation20_spill] sm:$0xff] }
 0x1e0   :  { %v761_v6 = vsub.f32 %v18087_v43, %v13302_v0  ;;  %v824_v29 = vmul.f32 %v760_v35, %v760_v35 }
 0x1e1   :  { %v881_v48 = vadd.f32 %v880_v54, %v818_v45  ;;  %v18088_v54 = vld [vmem:[#allocation22_spill] sm:$0xff] }
 0x1e2   :  { %v762_v56 = vsub.f32 %v18088_v54, %v13302_v0  ;;  %v825_v30 = vmul.f32 %v761_v6, %v761_v6 }
 0x1e3   :  { %v882_v32 = vadd.f32 %v881_v48, %v819_v49  ;;  %v18089_v48 = vld [vmem:[#allocation19_spill] sm:$0xff] }
 0x1e4   :  { %v763_v13 = vsub.f32 %v18089_v48, %v13302_v0  ;;  %v826_v38 = vmul.f32 %v762_v56, %v762_v56 }
 0x1e5   :  { %v883_v8 = vadd.f32 %v882_v32, %v820_v61  ;;  %v18090_v32 = vld [vmem:[#allocation21_spill] sm:$0xff] }
 0x1e6   :  { %v764_v41 = vsub.f32 %v18090_v32, %v13302_v0  ;;  %v827_v26 = vmul.f32 %v763_v13, %v763_v13 }
 0x1e7   :  { %v884_v24 = vadd.f32 %v883_v8, %v821_v39  ;;  %v18091_v8 = vld [vmem:[#allocation24_spill] sm:$0xff] }
 0x1e8   :  { %v765_v43 = vsub.f32 %v18091_v8, %v13302_v0  ;;  %v828_v35 = vmul.f32 %v764_v41, %v764_v41 }
 0x1e9   :  { %v885_v45 = vadd.f32 %v884_v24, %v822_v22  ;;  %v18092_v24 = vld [vmem:[#allocation26_spill] sm:$0xff] }
 0x1ea   :  { %v766_v54 = vsub.f32 %v18092_v24, %v13302_v0  ;;  %v829_v6 = vmul.f32 %v765_v43, %v765_v43 }
 0x1eb   :  { %v886_v49 = vadd.f32 %v885_v45, %v823_v44  ;;  %v18093_v45 = vld [vmem:[#allocation23_spill] sm:$0xff] }
 0x1ec   :  { %v767_v48 = vsub.f32 %v18093_v45, %v13302_v0  ;;  %v830_v56 = vmul.f32 %v766_v54, %v766_v54 }
 0x1ed   :  { %v887_v61 = vadd.f32 %v886_v49, %v824_v29  ;;  %v18094_v49 = vld [vmem:[#allocation25_spill] sm:$0xff] }
 0x1ee   :  { %v768_v32 = vsub.f32 %v18094_v49, %v13302_v0  ;;  %v831_v13 = vmul.f32 %v767_v48, %v767_v48 }
 0x1ef   :  { %v888_v39 = vadd.f32 %v887_v61, %v825_v30  ;;  %v18095_v61 = vld [vmem:[#allocation28_spill] sm:$0xff] }
 0x1f0   :  { %v769_v8 = vsub.f32 %v18095_v61, %v13302_v0  ;;  %v832_v41 = vmul.f32 %v768_v32, %v768_v32 }
 0x1f1   :  { %v889_v22 = vadd.f32 %v888_v39, %v826_v38  ;;  %v770_v39 = vsub.f32 %v13297_v16, %v13302_v0 }
 0x1f2   :  { %v833_v43 = vmul.f32 %v769_v8, %v769_v8  ;;  %v913_v8 = vlaneseq }
 0x1f3   :  { %v890_v44 = vadd.f32 %v889_v22, %v827_v26  ;;  %v18096_v22 = vld [vmem:[#allocation27_spill] sm:$0xff]  ;;  %v834_v54 = vmul.f32 %v770_v39, %v770_v39  ;;  %v12648_v39 = vld [vmem:[%s17897_s4] sm:$0xff]  }
 0x1f4   :  { %v771_v45 = vsub.f32 %v18096_v22, %v13302_v0  ;;  %8825 = vmatpush1.bf16.msra.mxu0 %v12648_v39 }
 0x1f5   :  { %v891_v29 = vadd.f32 %v890_v44, %v828_v35  ;;  %v772_v44 = vsub.f32 %v13295_v33, %v13302_v0 }
 0x1f7   :  { %v892_v30 = vadd.f32 %v891_v29, %v829_v6  ;;  %v835_v29 = vmul.f32 %v771_v45, %v771_v45  ;;  %v836_v24 = vmul.f32 %v772_v44, %v772_v44 }
 0x1f9   :  { %v893_v38 = vadd.f32 %v892_v30, %v830_v56 }
 0x1fb   :  { %v894_v26 = vadd.f32 %v893_v38, %v831_v13 }
 0x1fd   :  { %v895_v35 = vadd.f32 %v894_v26, %v832_v41  ;;  %v914_v41 = vshrl.u32 %v913_v8, 7  ;;  %v637_v26 = vld [vmem:[%s17899_s3] sm:$0x1] }
 0x1ff   :  { %v896_v6 = vadd.f32 %v895_v35, %v833_v43  ;;  %v13442_v45 = vsub.s32 0, %v914_v41  ;;  %v12652_v35 = vld [vmem:[%s17897_s4 + $0x10] sm:$0xff]   ;;  %v18102_v41 = vld [vmem:[#allocation7_spill] sm:$0xff] }
 0x201   :  { %v897_v49 = vadd.f32 %v896_v6, %v834_v54  ;;  %18098 = vst [vmem:[#allocation28_spill] sm:$0xff] %v13442_v45  ;;  %v12653_v6 = vld [vmem:[%s17897_s4 + $0x90] sm:$0xff]  }
 0x203   :  { %v898_v48 = vadd.f32 %v897_v49, %v835_v29 }
 0x205   :  { %v899_v56 = vadd.f32 %v898_v48, %v836_v24  ;;  %v636_v24 = vld [vmem:[%s17898_s2] sm:$0x1] }
 0x207   :  { %v900_v30 = vrot.slane %v899_v56, 4 }
 0x209   :  { %v901_v18 = vadd.f32 %v900_v30, %v899_v56  ;;  %v12654_v30 = vld [vmem:[%s17897_s4 + $0x18] sm:$0xff]  }
 0x20b   :  { %v902_v10 = vrot.slane %v901_v18, 2 }
 0x20d   :  { %v903_v32 = vadd.f32 %v902_v10, %v901_v18  ;;  %v12649_v10 = vld [vmem:[%s17897_s4 + $0x80] sm:$0xff]   ;;  %v18097_v18 = vmov 0  }
 0x20e   :  { %8826 = vmatprep.subr.bf16.mxu0 %v18097_v18  ;;  %12271 = vmatpush1.bf16.msra.mxu1 %v12649_v10 }
 0x20f   :  { %v904_v13 = vrot.slane %v903_v32, 1  ;;  %12256 = vmatprep.subr.bf16.mxu1 %v18097_v18 }
 0x211   :  { %v905_v38 = vadd.f32 %v904_v13, %v903_v32  ;;  %v18099_v32 = vld [vmem:[#allocation6_spill] sm:$0xff] }
 0x213   :  { %v906_v21 = vmul.f32 0.001953125, %v905_v38  ;;  %v18100_v38 = vld [vmem:[#allocation4_spill] sm:$0xff] }
 0x215   :  { %v907_v22 = vadd.f32 1e-05, %v906_v21  ;;  %v12650_v21 = vld [vmem:[%s17897_s4 + $0x8] sm:$0xff]  }
 0x216   :  { %8827 = vmatpush1.bf16.msra.mxu0 %v12650_v21 }
 0x217   :  { %12816 = vrsqrt.f32 %v907_v22  ;;  %v12651_v22 = vld [vmem:[%s17897_s4 + $0x88] sm:$0xff]   ;;  %8828 = vmatprep.subr.bf16.mxu0 %v18097_v18 }
 0x218   :  { %12272 = vmatpush1.bf16.msra.mxu1 %v12651_v22 }
 0x219   :  { %12257 = vmatprep.subr.bf16.mxu1 %v18097_v18 }
 0x21a   :  { %8829 = vmatpush1.bf16.msra.mxu0 %v12652_v35 }
 0x21b   :  { %8830 = vmatprep.subr.bf16.mxu0 %v18097_v18 }
 0x21c   :  { %12273 = vmatpush1.bf16.msra.mxu1 %v12653_v6 }
 0x21d   :  { %12258 = vmatprep.subr.bf16.mxu1 %v18097_v18 }
 0x21e   :  { %8831 = vmatpush1.bf16.msra.mxu0 %v12654_v30 }
 0x21f   :  { %8832 = vmatprep.subr.bf16.mxu0 %v18097_v18 }
 0x221   :  { %v12817_v49 = vpop.eup %12816 }
 0x222   :  { %v909_v43 = vmul.f32 %v12817_v49, %v636_v24 }
 0x224   :  { %v910_v44 = vmul.f32 %v909_v43, %v13302_v0  ;;  %v13460_v54 = vrot.slane %v909_v43, %v13442_v45 }
 0x226   :  { %v911_v29 = vsub.f32 %v637_v26, %v910_v44  ;;  %v978_v48 = vmul.f32 %v13460_v54, %v18095_v61  ;;  %v979_v0 = vmul.f32 %v13460_v54, %v13297_v16  ;;  %v13473_v56 = vmul.f32 %v13460_v54, %v13112_v42  ;;  %v18101_v61 = vld [vmem:[#allocation5_spill] sm:$0xff] }
 0x227   :  { %v13480_v13 = vmul.f32 %v13460_v54, %v18099_v32  ;;  %v13484_v8 = vmul.f32 %v18100_v38, %v13460_v54  ;;  %v13488_v16 = vmul.f32 %v18101_v61, %v13460_v54  ;;  %v13492_v42 = vmul.f32 %v13460_v54, %v18102_v41 }
 0x228   :  { %v13495_v39 = vrot.slane %v911_v29, %v13442_v45  ;;  %v13499_v24 = vmul.f32 %v13460_v54, %v13129_v52  ;;  %v13503_v10 = vmul.f32 %v13121_v47, %v13460_v54  ;;  %v13507_v21 = vmul.f32 %v13127_v51, %v13460_v54  ;;  %v12655_v51 = vld [vmem:[%s17897_s4 + $0x98] sm:$0xff]  }
 0x229   :  { %v13511_v49 = vmul.f32 %v13460_v54, %v13136_v57  ;;  %v13515_v26 = vmul.f32 %v13460_v54, %v13141_v60  ;;  %v13519_v52 = vmul.f32 %v13133_v55, %v13460_v54  ;;  %v13523_v47 = vmul.f32 %v13139_v59, %v13460_v54  ;;  %v12656_v59 = vld [vmem:[%s17897_s4 + $0x20] sm:$0xff]   ;;  %12274 = vmatpush1.bf16.msra.mxu1 %v12655_v51 }
 0x22a   :  { %v1048_v57 = vadd.f32 %v13495_v39, %v978_v48  ;;  %v1049_v22 = vadd.f32 %v13495_v39, %v979_v0  ;;  %v13533_v60 = vmul.f32 %v13460_v54, %v13148_v1  ;;  %v13537_v55 = vmul.f32 %v13460_v54, %v13153_v4  ;;  %8833 = vmatpush1.bf16.msra.mxu0 %v12656_v59  ;;  %v12660_v59 = vld [vmem:[%s17897_s4 + $0x30] sm:$0xff]  }
 0x22b   :  { %v13545_v43 = vmul.f32 %v13145_v63, %v13460_v54  ;;  %v13549_v35 = vmul.f32 %v13151_v3, %v13460_v54  ;;  %v13553_v1 = vmul.f32 %v13460_v54, %v13160_v9  ;;  %v13557_v4 = vmul.f32 %v13460_v54, %v13165_v12  ;;  %12259 = vmatprep.subr.bf16.mxu1 %v18097_v18 }
 0x22c   :  { %v1112_v44 = vmax.f32 %v1048_v57, 0.0  ;;  %v1113_v6 = vmax.f32 %v1049_v22, 0.0  ;;  %v13561_v29 = vmul.f32 %v13157_v7, %v13460_v54  ;;  %v13565_v63 = vmul.f32 %v13163_v11, %v13460_v54  ;;  %v12657_v11 = vld [vmem:[%s17897_s4 + $0xa0] sm:$0xff]   ;;  %8834 = vmatprep.subr.bf16.mxu0 %v18097_v18  ;;  %v12659_v57 = vld [vmem:[%s17897_s4 + $0xa8] sm:$0xff]  }
 0x22d   :  { %v13570_v3 = vmul.f32 %v13460_v54, %v13172_v17  ;;  %v13574_v9 = vmul.f32 %v13460_v54, %v13177_v20  ;;  %v13578_v12 = vmul.f32 %v13169_v15, %v13460_v54  ;;  %v13582_v7 = vmul.f32 %v13175_v19, %v13460_v54  ;;  %v12658_v19 = vld [vmem:[%s17897_s4 + $0x28] sm:$0xff]   ;;  %12275 = vmatpush1.bf16.msra.mxu1 %v12657_v11 }
 0x22e   :  { %v13588_v17 = vpack.c.bf16 %v1112_v44, %v1112_v44  ;;  %v11757_v48 = vpack.c.bf16 %v1113_v6, %v1113_v6  ;;  %v13592_v20 = vmul.f32 %v13460_v54, %v13184_v25  ;;  %v13596_v15 = vmul.f32 %v13460_v54, %v13189_v28  ;;  %8835 = vmatpush1.bf16.msra.mxu0 %v12658_v19 }
 0x22f   :  { %v13603_v0 = vmul.f32 %v13181_v23, %v13460_v54  ;;  %v13607_v30 = vmul.f32 %v13187_v27, %v13460_v54  ;;  %v13611_v25 = vmul.f32 %v13460_v54, %v13196_v34  ;;  %v13615_v28 = vmul.f32 %v13460_v54, %v13201_v37  ;;  %12260 = vmatprep.subr.bf16.mxu1 %v18097_v18  ;;  %v2279_v34 = vld [vmem:[#allocation2 + $0x194] sm:$0x1] }
 0x230   :  { %18103 = vst [vmem:[#allocation6_spill] sm:$0xff] %v13588_v17  ;;  %v18104_v32 = vmov 0  ;;  %v1930_v23 = vshrl.u32 %v13588_v17, 16  ;;  %v1938_v38 = vshrl.u32 %v11757_v48, 16  ;;  %v1941_v27 = vshll.u32 %v11757_v48, 16  ;;  %8836 = vmatprep.subr.bf16.mxu0 %v18097_v18  ;;  %v12670_v17 = vld [vmem:[%s17897_s4 + $0x58] sm:$0xff]  }
 0x231   :  { %v18105_v32 = vsel %vm13619_vm3, 4294967295, %v18104_v32  ;;  %v13626_v61 = vmul.f32 %v13193_v31, %v13460_v54  ;;  %v13631_v37 = vmul.f32 %v13199_v36, %v13460_v54  ;;  %v13635_v41 = vmul.f32 %v13460_v54, %v13208_v46  ;;  %12276 = vmatpush1.bf16.msra.mxu1 %v12659_v57  ;;  %v18114_v57 = vld [vmem:[#allocation12_spill] sm:$0xff] }
 0x232   :  { %18106 = vst [vmem:[#allocation4_spill] sm:$0xff] %v18105_v32  ;;  %v13639_v51 = vmul.f32 %v13460_v54, %v13213_v53  ;;  %v13643_v31 = vmul.f32 %v13205_v40, %v13460_v54  ;;  %v18107_v36 = vmov 0  ;;  %v13655_v46 = vrot.slane %v1930_v23, 7  ;;  %v18111_v23 = vld [vmem:[#allocation10_spill] sm:$0xff]  ;;  %8837 = vmatpush1.bf16.msra.mxu0 %v12660_v59  ;;  %12261 = vmatprep.subr.bf16.mxu1 %v18097_v18  ;;  %v12661_v59 = vld [vmem:[%s17897_s4 + $0xb0] sm:$0xff]  }
 0x233   :  { %v18108_v36 = vsel %vm13651_vm4, 4294967295, %v18107_v36  ;;  %v1940_v53 = vrot.slane %v1938_v38, 7  ;;  %v13659_v22 = vmul.f32 %v13211_v50, %v13460_v54  ;;  %v13663_v40 = vmul.f32 %v13460_v54, %v13220_v62  ;;  %v18113_v38 = vld [vmem:[#allocation9_spill] sm:$0xff]  ;;  %8838 = vmatprep.subr.bf16.mxu0 %v18097_v18  ;;  %v18127_v32 = vld [vmem:[#allocation20_spill] sm:$0xff] }
 0x234   :  { %18109 = vst [vmem:[#allocation5_spill] sm:$0xff] %v18108_v36  ;;  %18110 = vst [vmem:[#allocation7_spill] sm:$0xff] %v13655_v46  ;;  %v13670_v44 = vmul.f32 %v13460_v54, %v13225_v5  ;;  %v13674_v6 = vmul.f32 %v13217_v58, %v13460_v54  ;;  %v13678_v50 = vmul.f32 %v13223_v2, %v13460_v54  ;;  %v1936_v11 = vrot.slane %v13655_v46, 4  ;;  %v18112_v58 = vld [vmem:[#allocation8_spill] sm:$0xff]  ;;  %v18119_v46 = vld [vmem:[#allocation13_spill] sm:$0xff] }
 0x235   :  { %v13682_v62 = vmul.f32 %v13460_v54, %v13232_v14  ;;  %v1943_v48 = vor.u32 %v1941_v27, %v1940_v53  ;;  %v1945_v19 = vrot.slane %v1940_v53, 4  ;;  %v13687_v5 = vmul.f32 %v13460_v54, %v18111_v23  ;;  %v18116_v27 = vld [vmem:[#allocation14_spill] sm:$0xff]  ;;  %12277 = vmatpush1.bf16.msra.mxu1 %v12661_v59 }
 0x236   :  { %v13692_v2 = vmul.f32 %v18112_v58, %v13460_v54  ;;  %v13696_v14 = vmul.f32 %v18113_v38, %v13460_v54  ;;  %v13700_v45 = vmul.f32 %v13460_v54, %v18114_v57  ;;  %v13704_v53 = vmul.f32 %v13460_v54, %v18116_v27  ;;  %v18118_v38 = vld [vmem:[#allocation11_spill] sm:$0xff]  ;;  %12262 = vmatprep.subr.bf16.mxu1 %v18097_v18 }
 0x237   :  { %v1944_v23 = vsel %vm13619_vm3, %v1936_v11, %v1943_v48  ;;  %v2280_v58 = vsel %vm13651_vm4, %v1945_v19, %v2279_v34  ;;  %v13716_v57 = vmul.f32 %v18118_v38, %v13460_v54  ;;  %v13720_v27 = vmul.f32 %v18119_v46, %v13460_v54  ;;  %v18121_v48 = vld [vmem:[#allocation18_spill] sm:$0xff]  ;;  %v18123_v19 = vld [vmem:[#allocation15_spill] sm:$0xff]  ;;  %v18125_v46 = vld [vmem:[#allocation17_spill] sm:$0xff] }
 0x238   :  { %18115 = vst [vmem:[#allocation10_spill] sm:$0xff] %v13700_v45  ;;  %18117 = vst [vmem:[#allocation8_spill] sm:$0xff] %v13704_v53  ;;  %v12662_v53 = vld [vmem:[%s17897_s4 + $0x38] sm:$0xff]   ;;  %v18120_v45 = vld [vmem:[#allocation16_spill] sm:$0xff]  ;;  %v13731_v34 = vmul.f32 %v13460_v54, %v18121_v48  ;;  %v13735_v38 = vmul.f32 %v18123_v19, %v13460_v54  ;;  %v13739_v36 = vmul.f32 %v18125_v46, %v13460_v54 }
 0x239   :  { %2278 = vst [vmem:[#allocation2 + $0x190] sm:$0xf] %v1944_v23  ;;  %2281 = vst [vmem:[#allocation2 + $0x194] sm:$0x1] %v2280_v58  ;;  %v13727_v11 = vmul.f32 %v13460_v54, %v18120_v45  ;;  %v13743_v23 = vmul.f32 %v13460_v54, %v18127_v32  ;;  %v18128_v58 = vld [vmem:[#allocation22_spill] sm:$0xff]  ;;  %v18130_v48 = vld [vmem:[#allocation19_spill] sm:$0xff]  ;;  %8839 = vmatpush1.bf16.msra.mxu0 %v12662_v53 }
 0x23a   :  { %18122 = vst [vmem:[#allocation9_spill] sm:$0xff] %v13731_v34  ;;  %18124 = vst [vmem:[#allocation12_spill] sm:$0xff] %v13735_v38  ;;  %v13747_v45 = vmul.f32 %v13460_v54, %v18128_v58  ;;  %v13751_v34 = vmul.f32 %v18130_v48, %v13460_v54  ;;  %v18132_v19 = vld [vmem:[#allocation21_spill] sm:$0xff]  ;;  %v18133_v46 = vld [vmem:[#allocation24_spill] sm:$0xff]  ;;  %8840 = vmatprep.subr.bf16.mxu0 %v18097_v18 }
 0x23b   :  { %18126 = vst [vmem:[#allocation14_spill] sm:$0xff] %v13739_v36  ;;  %v13755_v38 = vmul.f32 %v18132_v19, %v13460_v54  ;;  %v13759_v59 = vmul.f32 %v13460_v54, %v18133_v46  ;;  %v18134_v36 = vld [vmem:[#allocation26_spill] sm:$0xff]  ;;  %v18135_v58 = vld [vmem:[#allocation23_spill] sm:$0xff]  ;;  %v18136_v48 = vld [vmem:[#allocation25_spill] sm:$0xff] }
 0x23c   :  { %18129 = vst [vmem:[#allocation11_spill] sm:$0xff] %v13747_v45  ;;  %18131 = vst [vmem:[#allocation13_spill] sm:$0xff] %v13751_v34  ;;  %v13763_v32 = vmul.f32 %v13460_v54, %v18134_v36  ;;  %v13767_v45 = vmul.f32 %v18135_v58, %v13460_v54  ;;  %v13771_v34 = vmul.f32 %v18136_v48, %v13460_v54  ;;  %v12663_v53 = vld [vmem:[%s17897_s4 + $0xb8] sm:$0xff]   ;;  %v18138_v19 = vld [vmem:[#allocation27_spill] sm:$0xff] }
 0x23d   :  { %v13779_v46 = vmul.f32 %v18138_v19, %v13460_v54  ;;  %v13783_v36 = vmul.f32 %v13295_v33, %v13460_v54  ;;  %v13788_v48 = vadd.f32 %v13495_v39, %v13473_v56  ;;  %v13796_v19 = vadd.f32 %v13495_v39, %v13480_v13  ;;  %12278 = vmatpush1.bf16.msra.mxu1 %v12663_v53 }
 0x23e   :  { %18137 = vst [vmem:[#allocation16_spill] sm:$0xff] %v13771_v34  ;;  %v12664_v34 = vld [vmem:[%s17897_s4 + $0x40] sm:$0xff]   ;;  %v13800_v33 = vadd.f32 %v13495_v39, %v13484_v8  ;;  %v13804_v54 = vadd.f32 %v13495_v39, %v13488_v16  ;;  %v13808_v56 = vadd.f32 %v13495_v39, %v13492_v42  ;;  %v13812_v58 = vadd.f32 %v13495_v39, %v13499_v24 }
 0x23f   :  { %v13816_v13 = vadd.f32 %v13495_v39, %v13503_v10  ;;  %v13820_v8 = vadd.f32 %v13495_v39, %v13507_v21  ;;  %v13824_v16 = vadd.f32 %v13495_v39, %v13511_v49  ;;  %8841 = vmatpush1.bf16.msra.mxu0 %v12664_v34  ;;  %v13828_v42 = vadd.f32 %v13495_v39, %v13515_v26  ;;  %v12665_v49 = vld [vmem:[%s17897_s4 + $0xc0] sm:$0xff]   ;;  %v12666_v34 = vld [vmem:[%s17897_s4 + $0x48] sm:$0xff]  }
 0x240   :  { %v13832_v24 = vadd.f32 %v13495_v39, %v13519_v52  ;;  %v13836_v10 = vadd.f32 %v13495_v39, %v13523_v47  ;;  %v13840_v21 = vadd.f32 %v13495_v39, %v13533_v60  ;;  %12263 = vmatprep.subr.bf16.mxu1 %v18097_v18  ;;  %v13848_v26 = vadd.f32 %v13495_v39, %v13537_v55 }
 0x241   :  { %v13852_v52 = vadd.f32 %v13495_v39, %v13545_v43  ;;  %v13856_v47 = vadd.f32 %v13495_v39, %v13549_v35  ;;  %v13860_v60 = vadd.f32 %v13495_v39, %v13553_v1  ;;  %8842 = vmatprep.subr.bf16.mxu0 %v18097_v18  ;;  %v13868_v55 = vadd.f32 %v13495_v39, %v13557_v4 }
 0x242   :  { %v13872_v43 = vadd.f32 %v13495_v39, %v13561_v29  ;;  %v13876_v35 = vadd.f32 %v13495_v39, %v13565_v63  ;;  %v13880_v1 = vadd.f32 %v13495_v39, %v13570_v3  ;;  %12279 = vmatpush1.bf16.msra.mxu1 %v12665_v49  ;;  %v13884_v53 = vadd.f32 %v13495_v39, %v13574_v9  ;;  %v12668_v49 = vld [vmem:[%s17897_s4 + $0x50] sm:$0xff]  }
 0x243   :  { %v13888_v4 = vadd.f32 %v13495_v39, %v13578_v12  ;;  %v13892_v29 = vadd.f32 %v13495_v39, %v13582_v7  ;;  %v13896_v63 = vadd.f32 %v13495_v39, %v13592_v20  ;;  %8843 = vmatpush1.bf16.msra.mxu0 %v12666_v34  ;;  %v13900_v3 = vadd.f32 %v13495_v39, %v13596_v15  ;;  %v12667_v20 = vld [vmem:[%s17897_s4 + $0xc8] sm:$0xff]  }
 0x244   :  { %18139 = vst [vmem:[#allocation18_spill] sm:$0xff] %v13872_v43  ;;  %v13904_v9 = vadd.f32 %v13495_v39, %v13603_v0  ;;  %v13908_v12 = vadd.f32 %v13495_v39, %v13607_v30  ;;  %v13912_v7 = vadd.f32 %v13495_v39, %v13611_v25  ;;  %12264 = vmatprep.subr.bf16.mxu1 %v18097_v18 }
 0x245   :  { %v13920_v15 = vadd.f32 %v13495_v39, %v13615_v28  ;;  %v13924_v0 = vadd.f32 %v13495_v39, %v13626_v61  ;;  %v13928_v30 = vadd.f32 %v13495_v39, %v13631_v37  ;;  %v13932_v25 = vadd.f32 %v13495_v39, %v13635_v41  ;;  %8844 = vmatprep.subr.bf16.mxu0 %v18097_v18 }
 0x246   :  { %v13940_v28 = vadd.f32 %v13495_v39, %v13639_v51  ;;  %v13944_v61 = vadd.f32 %v13495_v39, %v13643_v31  ;;  %v13948_v37 = vadd.f32 %v13495_v39, %v13659_v22  ;;  %v13952_v41 = vadd.f32 %v13495_v39, %v13663_v40  ;;  %12280 = vmatpush1.bf16.msra.mxu1 %v12667_v20  ;;  %v18147_v20 = vld [vmem:[#allocation10_spill] sm:$0xff] }
 0x247   :  { %v13956_v34 = vadd.f32 %v13495_v39, %v13670_v44  ;;  %v13960_v51 = vadd.f32 %v13495_v39, %v13674_v6  ;;  %v13964_v31 = vadd.f32 %v13495_v39, %v13678_v50  ;;  %v13968_v22 = vadd.f32 %v13495_v39, %v13682_v62  ;;  %8845 = vmatpush1.bf16.msra.mxu0 %v12668_v49  ;;  %v12669_v62 = vld [vmem:[%s17897_s4 + $0xd0] sm:$0xff]  }
 0x248   :  { %18140 = vst [vmem:[#allocation15_spill] sm:$0xff] %v13948_v37  ;;  %18141 = vst [vmem:[#allocation17_spill] sm:$0xff] %v13952_v41  ;;  %v13972_v40 = vadd.f32 %v13495_v39, %v13687_v5  ;;  %v13976_v44 = vadd.f32 %v13495_v39, %v13692_v2  ;;  %v13980_v6 = vadd.f32 %v13495_v39, %v13696_v14  ;;  %12265 = vmatprep.subr.bf16.mxu1 %v18097_v18  ;;  %v18149_v5 = vld [vmem:[#allocation8_spill] sm:$0xff] }
 0x249   :  { %18142 = vst [vmem:[#allocation20_spill] sm:$0xff] %v13956_v34  ;;  %18143 = vst [vmem:[#allocation22_spill] sm:$0xff] %v13960_v51  ;;  %v13984_v50 = vadd.f32 %v13495_v39, %v18147_v20  ;;  %v13992_v49 = vadd.f32 %v13495_v39, %v18149_v5  ;;  %v13996_v2 = vadd.f32 %v13495_v39, %v13716_v57  ;;  %8846 = vmatprep.subr.bf16.mxu0 %v18097_v18  ;;  %v18154_v5 = vld [vmem:[#allocation9_spill] sm:$0xff]  ;;  %v18155_v57 = vld [vmem:[#allocation12_spill] sm:$0xff] }
 0x24a   :  { %18144 = vst [vmem:[#allocation19_spill] sm:$0xff] %v13964_v31  ;;  %18145 = vst [vmem:[#allocation21_spill] sm:$0xff] %v13968_v22  ;;  %v14000_v14 = vadd.f32 %v13495_v39, %v13720_v27  ;;  %v14004_v20 = vadd.f32 %v13495_v39, %v13727_v11  ;;  %v18156_v27 = vld [vmem:[#allocation14_spill] sm:$0xff]  ;;  %v14024_v11 = vadd.f32 %v13495_v39, %v13743_v23  ;;  %12281 = vmatpush1.bf16.msra.mxu1 %v12669_v62 }
 0x24b   :  { %18146 = vst [vmem:[#allocation24_spill] sm:$0xff] %v13980_v6  ;;  %18148 = vst [vmem:[#allocation26_spill] sm:$0xff] %v13984_v50  ;;  %v18158_v6 = vld [vmem:[#allocation13_spill] sm:$0xff]  ;;  %8847 = vmatpush1.bf16.msra.mxu0 %v12670_v17  ;;  %v14044_v23 = vadd.f32 %v13495_v39, %v13763_v32  ;;  %v14048_v62 = vadd.f32 %v13495_v39, %v13767_v45  ;;  %12266 = vmatprep.subr.bf16.mxu1 %v18097_v18  ;;  %v12677_v45 = vld [vmem:[%s17897_s4 + $0xf0] sm:$0xff]   ;;  %v18172_v34 = vmax.f32 %v13788_v48, 0.0 }
 0x24c   :  { %18150 = vst [vmem:[#allocation23_spill] sm:$0xff] %v13992_v49  ;;  %18151 = vst [vmem:[#allocation25_spill] sm:$0xff] %v13996_v2  ;;  %v14012_v49 = vadd.f32 %v13495_v39, %v18154_v5  ;;  %v14016_v2 = vadd.f32 %v13495_v39, %v18155_v57  ;;  %v14032_v5 = vadd.f32 %v13495_v39, %v18158_v6  ;;  %v12671_v17 = vld [vmem:[%s17897_s4 + $0xd8] sm:$0xff]   ;;  %8848 = vmatprep.subr.bf16.mxu0 %v18097_v18 }
 0x24d   :  { %18152 = vst [vmem:[#allocation27_spill] sm:$0xff] %v14000_v14  ;;  %18153 = vst [vmem:[#allocation10_spill] sm:$0xff] %v14004_v20  ;;  %v14020_v14 = vadd.f32 %v13495_v39, %v18156_v27  ;;  %v18157_v20 = vld [vmem:[#allocation11_spill] sm:$0xff]  ;;  %v14036_v57 = vadd.f32 %v13495_v39, %v13755_v38  ;;  %v14040_v27 = vadd.f32 %v13495_v39, %v13759_v59  ;;  %v18173_v31 = vmax.f32 %v13796_v19, 0.0  ;;  %v12680_v19 = vld [vmem:[%s17897_s4 + $0xf8] sm:$0xff]  }
 0x24e   :  { %v14028_v50 = vadd.f32 %v13495_v39, %v18157_v20  ;;  %18159 = vst [vmem:[#allocation8_spill] sm:$0xff] %v14048_v62  ;;  %v18160_v20 = vld [vmem:[#allocation16_spill] sm:$0xff]  ;;  %v14056_v38 = vadd.f32 %v13495_v39, %v13779_v46  ;;  %v14064_v59 = vadd.f32 %v13495_v39, %v13783_v36  ;;  %v12672_v46 = vld [vmem:[%s17897_s4 + $0x60] sm:$0xff]   ;;  %12282 = vmatpush1.bf16.msra.mxu1 %v12671_v17  ;;  %v12674_v62 = vld [vmem:[%s17897_s4 + $0x68] sm:$0xff]   ;;  %v18176_v48 = vmax.f32 %v13808_v56, 0.0 }
 0x24f   :  { %v14052_v6 = vadd.f32 %v13495_v39, %v18160_v20  ;;  %8849 = vmatpush1.bf16.msra.mxu0 %v12672_v46  ;;  %12267 = vmatprep.subr.bf16.mxu1 %v18097_v18  ;;  %v12673_v17 = vld [vmem:[%s17897_s4 + $0xe0] sm:$0xff]   ;;  %v12675_v46 = vld [vmem:[%s17897_s4 + $0xe8] sm:$0xff]   ;;  %v12676_v36 = vld [vmem:[%s17897_s4 + $0x70] sm:$0xff]  }
 0x250   :  { %18162 = vst [vmem:[#allocation12_spill] sm:$0xff] %v14056_v38  ;;  %8850 = vmatprep.subr.bf16.mxu0 %v18097_v18  ;;  %v14166_v38 = vpack.c.bf16 %v18173_v31, %v18173_v31  ;;  %v18177_v31 = vmax.f32 %v13812_v58, 0.0  ;;  %v18181_v58 = vmax.f32 %v13828_v42, 0.0  ;;  %v18185_v42 = vmax.f32 %v13848_v26, 0.0 }
 0x251   :  { %18161 = vst [vmem:[#allocation9_spill] sm:$0xff] %v14052_v6  ;;  %v18189_v26 = vmax.f32 %v13868_v55, 0.0  ;;  %v18194_v55 = vmax.f32 %v13884_v53, 0.0  ;;  %v18198_v53 = vmax.f32 %v13900_v3, 0.0  ;;  %v18202_v3 = vmax.f32 %v13920_v15, 0.0 }
 0x252   :  { %12283 = vmatpush1.bf16.msra.mxu1 %v12673_v17  ;;  %v18164_v32 = vld [vmem:[#allocation26_spill] sm:$0xff]  ;;  %v18207_v15 = vmax.f32 %v13940_v28, 0.0 }
 0x253   :  { %8851 = vmatpush1.bf16.msra.mxu0 %v12674_v62  ;;  %12268 = vmatprep.subr.bf16.mxu1 %v18097_v18  ;;  %v12678_v62 = vld [vmem:[%s17897_s4 + $0x78] sm:$0xff]   ;;  %v18165_v51 = vld [vmem:[#allocation23_spill] sm:$0xff] }
 0x254   :  { %8852 = vmatprep.subr.bf16.mxu0 %v18097_v18  ;;  %v18167_v43 = vld [vmem:[#allocation27_spill] sm:$0xff] }
 0x255   :  { %v18169_v22 = vld [vmem:[#allocation8_spill] sm:$0xff] }
 0x256   :  { %12284 = vmatpush1.bf16.msra.mxu1 %v12675_v46  ;;  %v18163_v46 = vld [vmem:[#allocation24_spill] sm:$0xff] }
 0x257   :  { %8853 = vmatpush1.bf16.msra.mxu0 %v12676_v36  ;;  %12269 = vmatprep.subr.bf16.mxu1 %v18097_v18  ;;  %v18170_v36 = vmov %v14052_v6  ;;  %v18171_v39 = vld [vmem:[#allocation12_spill] sm:$0xff]  ;;  %v18175_v6 = vmax.f32 %v13804_v54, 0.0 }
 0x258   :  { %8854 = vmatprep.subr.bf16.mxu0 %v18097_v18 }
 0x259   :  { %v14176_v20 = vpack.c.bf16 %v18175_v6, %v18175_v6  ;;  %v18179_v6 = vmax.f32 %v13820_v8, 0.0  ;;  %v18183_v8 = vmax.f32 %v13836_v10, 0.0  ;;  %v18187_v10 = vmax.f32 %v13856_v47, 0.0 }
 0x25a   :  { %12285 = vmatpush1.bf16.msra.mxu1 %v12677_v45  ;;  %v14160_v45 = vpack.c.bf16 %v18172_v34, %v18172_v34  ;;  %v14181_v34 = vpack.c.bf16 %v18176_v48, %v18176_v48  ;;  %v18180_v48 = vmax.f32 %v13824_v16, 0.0  ;;  %v18184_v16 = vmax.f32 %v13840_v21, 0.0 }
 0x25b   :  { %8855 = vmatpush1.bf16.msra.mxu0 %v12678_v62  ;;  %12270 = vmatprep.subr.bf16.mxu1 %v18097_v18  ;;  %v18174_v62 = vmax.f32 %v13800_v33, 0.0  ;;  %v14189_v33 = vpack.c.bf16 %v18177_v31, %v18177_v31  ;;  %v14199_v56 = vpack.c.bf16 %v18179_v6, %v18179_v6  ;;  %v14209_v31 = vpack.c.bf16 %v18181_v58, %v18181_v58 }
 0x25c   :  { %9113 = vmatprep.subr.bf16.mxu0 %v18097_v18  ;;  %v14204_v41 = vpack.c.bf16 %v18180_v48, %v18180_v48  ;;  %v14219_v6 = vpack.c.bf16 %v18183_v8, %v18183_v8  ;;  %v14224_v48 = vpack.c.bf16 %v18184_v16, %v18184_v16  ;;  %v14229_v58 = vpack.c.bf16 %v18185_v42, %v18185_v42 }
 0x25d   :  { %v14171_v17 = vpack.c.bf16 %v18174_v62, %v18174_v62  ;;  %v18178_v62 = vmax.f32 %v13816_v13, 0.0  ;;  %v18182_v13 = vmax.f32 %v13832_v24, 0.0  ;;  %v18186_v24 = vmax.f32 %v13852_v52, 0.0  ;;  %v18190_v52 = vld [vmem:[#allocation18_spill] sm:$0xff] }
 0x25e   :  { %12286 = vmatpush1.bf16.msra.mxu1 %v12680_v19  ;;  %v14239_v8 = vpack.c.bf16 %v18187_v10, %v18187_v10  ;;  %v18188_v21 = vmax.f32 %v13860_v60, 0.0  ;;  %v14250_v19 = vpack.c.bf16 %v18189_v26, %v18189_v26  ;;  %v18191_v42 = vmax.f32 %v18190_v52, 0.0 }
 0x25f   :  { %v14194_v54 = vpack.c.bf16 %v18178_v62, %v18178_v62  ;;  %v14214_v62 = vpack.c.bf16 %v18182_v13, %v18182_v13  ;;  %v14234_v13 = vpack.c.bf16 %v18186_v24, %v18186_v24  ;;  %9402 = vmatprep.subr.bf16.mxu1 %v18097_v18  ;;  %v18192_v47 = vmax.f32 %v13876_v35, 0.0  ;;  %v18213_v18 = vld [vmem:[#allocation17_spill] sm:$0xff] }
 0x260   :  { %v14244_v16 = vpack.c.bf16 %v18188_v21, %v18188_v21  ;;  %v14255_v24 = vpack.c.bf16 %v18191_v42, %v18191_v42  ;;  %v18193_v60 = vmax.f32 %v13880_v1, 0.0  ;;  %v14270_v26 = vpack.c.bf16 %v18194_v55, %v18194_v55 }
 0x261   :  { %v14260_v10 = vpack.c.bf16 %v18192_v47, %v18192_v47  ;;  %v18195_v52 = vmax.f32 %v13888_v4, 0.0  ;;  %v18196_v35 = vmax.f32 %v13892_v29, 0.0  ;;  %v18197_v1 = vmax.f32 %v13896_v63, 0.0 }
 0x262   :  { %v14265_v21 = vpack.c.bf16 %v18193_v60, %v18193_v60  ;;  %v14290_v55 = vpack.c.bf16 %v18198_v53, %v18198_v53  ;;  %v18199_v4 = vmax.f32 %v13904_v9, 0.0  ;;  %v18200_v29 = vmax.f32 %v13908_v12, 0.0 }
 0x263   :  { %v14275_v42 = vpack.c.bf16 %v18195_v52, %v18195_v52  ;;  %v14280_v47 = vpack.c.bf16 %v18196_v35, %v18196_v35  ;;  %v14285_v60 = vpack.c.bf16 %v18197_v1, %v18197_v1  ;;  %v18201_v63 = vmax.f32 %v13912_v7, 0.0 }
 0x264   :  { %v14295_v52 = vpack.c.bf16 %v18199_v4, %v18199_v4  ;;  %v14300_v35 = vpack.c.bf16 %v18200_v29, %v18200_v29  ;;  %v14310_v53 = vpack.c.bf16 %v18202_v3, %v18202_v3  ;;  %v18203_v9 = vmax.f32 %v13924_v0, 0.0 }
 0x265   :  { %v14305_v1 = vpack.c.bf16 %v18201_v63, %v18201_v63  ;;  %v18204_v12 = vmax.f32 %v13928_v30, 0.0  ;;  %v18205_v7 = vmax.f32 %v13932_v25, 0.0  ;;  %v14330_v3 = vpack.c.bf16 %v18207_v15, %v18207_v15 }
 0x266   :  { %v14315_v4 = vpack.c.bf16 %v18203_v9, %v18203_v9  ;;  %v18209_v0 = vmax.f32 %v13944_v61, 0.0  ;;  %v18211_v30 = vmax.f32 %v13948_v37, 0.0  ;;  %v18214_v25 = vmax.f32 %v18213_v18, 0.0 }
 0x267   :  { %v14320_v29 = vpack.c.bf16 %v18204_v12, %v18204_v12  ;;  %v14325_v63 = vpack.c.bf16 %v18205_v7, %v18205_v7  ;;  %18208 = vst [vmem:[#allocation11_spill] sm:$0xff] %v14330_v3  ;;  %v18217_v3 = vld [vmem:[#allocation22_spill] sm:$0xff] }
 0x268   :  { %v14335_v9 = vpack.c.bf16 %v18209_v0, %v18209_v0  ;;  %v14340_v12 = vpack.c.bf16 %v18211_v30, %v18211_v30  ;;  %v14345_v7 = vpack.c.bf16 %v18214_v25, %v18214_v25  ;;  %v18218_v61 = vmax.f32 %v18217_v3, 0.0 }
 0x269   :  { %18206 = vst [vmem:[#allocation14_spill] sm:$0xff] %v14325_v63  ;;  %v18215_v63 = vld [vmem:[#allocation20_spill] sm:$0xff]  ;;  %v18225_v3 = vmax.f32 %v13976_v44, 0.0 }
 0x26a   :  { %18210 = vst [vmem:[#allocation13_spill] sm:$0xff] %v14335_v9  ;;  %18212 = vst [vmem:[#allocation16_spill] sm:$0xff] %v14340_v12  ;;  %v18216_v28 = vmax.f32 %v18215_v63, 0.0  ;;  %v14355_v0 = vpack.c.bf16 %v18218_v61, %v18218_v61  ;;  %v18219_v9 = vld [vmem:[#allocation19_spill] sm:$0xff]  ;;  %v18221_v12 = vld [vmem:[#allocation21_spill] sm:$0xff]  ;;  %v18223_v63 = vmax.f32 %v13972_v40, 0.0 }
 0x26b   :  { %v18220_v37 = vmax.f32 %v18219_v9, 0.0  ;;  %v18222_v18 = vmax.f32 %v18221_v12, 0.0  ;;  %v14375_v61 = vpack.c.bf16 %v18225_v3, %v18225_v3  ;;  %v18226_v9 = vmax.f32 %v18163_v46, 0.0 }
 0x26c   :  { %v14350_v15 = vpack.c.bf16 %v18216_v28, %v18216_v28  ;;  %v14370_v28 = vpack.c.bf16 %v18223_v63, %v18223_v63  ;;  %v18228_v12 = vmax.f32 %v18164_v32, 0.0  ;;  %v18229_v40 = vmax.f32 %v18165_v51, 0.0 }
 0x26d   :  { %v14360_v30 = vpack.c.bf16 %v18220_v37, %v18220_v37  ;;  %v14365_v25 = vpack.c.bf16 %v18222_v18, %v18222_v18  ;;  %v14380_v37 = vpack.c.bf16 %v18226_v9, %v18226_v9  ;;  %v18232_v46 = vmax.f32 %v18167_v43, 0.0 }
 0x26e   :  { %18224 = vst [vmem:[#allocation24_spill] sm:$0xff] %v14370_v28  ;;  %v14385_v18 = vpack.c.bf16 %v18228_v12, %v18228_v12  ;;  %v14390_v63 = vpack.c.bf16 %v18229_v40, %v18229_v40  ;;  %v18230_v28 = vld [vmem:[#allocation25_spill] sm:$0xff]  ;;  %v18235_v51 = vmax.f32 %v14012_v49, 0.0  ;;  %v18237_v43 = vmax.f32 %v14020_v14, 0.0 }
 0x26f   :  { %18227 = vst [vmem:[#allocation26_spill] sm:$0xff] %v14380_v37  ;;  %v18231_v44 = vmax.f32 %v18230_v28, 0.0  ;;  %v14400_v9 = vpack.c.bf16 %v18232_v46, %v18232_v46  ;;  %v18233_v37 = vld [vmem:[#allocation10_spill] sm:$0xff]  ;;  %v18236_v28 = vmax.f32 %v14016_v2, 0.0  ;;  %v18240_v49 = vmax.f32 %v14028_v50, 0.0 }
 0x270   :  { %v18234_v32 = vmax.f32 %v18233_v37, 0.0  ;;  %v14410_v40 = vpack.c.bf16 %v18235_v51, %v18235_v51  ;;  %v14420_v46 = vpack.c.bf16 %v18237_v43, %v18237_v43  ;;  %v18238_v37 = vmax.f32 %v14024_v11, 0.0 }
 0x271   :  { %v14395_v3 = vpack.c.bf16 %v18231_v44, %v18231_v44  ;;  %v14415_v44 = vpack.c.bf16 %v18236_v28, %v18236_v28  ;;  %v14430_v51 = vpack.c.bf16 %v18240_v49, %v18240_v49  ;;  %v18242_v2 = vmax.f32 %v14032_v5, 0.0 }
 0x272   :  { %v14405_v12 = vpack.c.bf16 %v18234_v32, %v18234_v32  ;;  %v14425_v32 = vpack.c.bf16 %v18238_v37, %v18238_v37  ;;  %v18244_v14 = vmax.f32 %v14036_v57, 0.0  ;;  %v18246_v11 = vmax.f32 %v14040_v27, 0.0 }
 0x273   :  { %18241 = vst [vmem:[#allocation27_spill] sm:$0xff] %v14430_v51  ;;  %v14435_v28 = vpack.c.bf16 %v18242_v2, %v18242_v2  ;;  %v18248_v50 = vmax.f32 %v14044_v23, 0.0  ;;  %v18250_v5 = vmax.f32 %v18169_v22, 0.0  ;;  %v18252_v57 = vmax.f32 %v18170_v36, 0.0 }
 0x274   :  { %18239 = vst [vmem:[#allocation23_spill] sm:$0xff] %v14425_v32  ;;  %v14440_v43 = vpack.c.bf16 %v18244_v14, %v18244_v14  ;;  %v14445_v37 = vpack.c.bf16 %v18246_v11, %v18246_v11  ;;  %v18254_v27 = vmax.f32 %v18171_v39, 0.0  ;;  %v18256_v23 = vmax.f32 %v14064_v59, 0.0 }
 0x275   :  { %18243 = vst [vmem:[#allocation8_spill] sm:$0xff] %v14435_v28  ;;  %v14450_v49 = vpack.c.bf16 %v18248_v50, %v18248_v50  ;;  %v14455_v2 = vpack.c.bf16 %v18250_v5, %v18250_v5  ;;  %v14460_v14 = vpack.c.bf16 %v18252_v57, %v18252_v57  ;;  %v1420_v22 = vshrl.u32 %v14160_v45, 16 }
 0x276   :  { %18245 = vst [vmem:[#allocation9_spill] sm:$0xff] %v14440_v43  ;;  %18247 = vst [vmem:[#allocation12_spill] sm:$0xff] %v14445_v37  ;;  %v14465_v11 = vpack.c.bf16 %v18254_v27, %v18254_v27  ;;  %v14470_v50 = vpack.c.bf16 %v18256_v23, %v18256_v23  ;;  %v1423_v5 = vshll.u32 %v14160_v45, 16  ;;  %v1431_v36 = vshll.u32 %v14166_v38, 16 }
 0x277   :  { %18249 = vst [vmem:[#allocation18_spill] sm:$0xff] %v14450_v49  ;;  %18251 = vst [vmem:[#allocation15_spill] sm:$0xff] %v14455_v2  ;;  %v1428_v2 = vshrl.u32 %v14166_v38, 16  ;;  %v1437_v57 = vshrl.u32 %v14171_v17, 16  ;;  %v1440_v39 = vshll.u32 %v14171_v17, 16  ;;  %v1445_v27 = vshrl.u32 %v14176_v20, 16 }
 0x278   :  { %18253 = vst [vmem:[#allocation17_spill] sm:$0xff] %v14460_v14  ;;  %18255 = vst [vmem:[#allocation20_spill] sm:$0xff] %v14465_v11  ;;  %v1422_v11 = vrot.slane %v1420_v22, 7  ;;  %v1448_v59 = vshll.u32 %v14176_v20, 16  ;;  %v1454_v23 = vshrl.u32 %v14181_v34, 16  ;;  %v1457_v45 = vshll.u32 %v14181_v34, 16 }
 0x279   :  { %18257 = vst [vmem:[#allocation22_spill] sm:$0xff] %v14470_v50  ;;  %v14479_v14 = vrot.slane %v1428_v2, 7  ;;  %v1439_v50 = vrot.slane %v1437_v57, 7  ;;  %v14483_v49 = vrot.slane %v1445_v27, 7  ;;  %v1462_v38 = vshrl.u32 %v14189_v33, 16 }
 0x27a   :  { %v14487_v37 = vor.u32 %v1423_v5, %v1422_v11  ;;  %v1426_v43 = vrot.slane %v1422_v11, 4  ;;  %v1456_v34 = vrot.slane %v1454_v23, 7  ;;  %v1465_v5 = vshll.u32 %v14189_v33, 16 }
 0x27b   :  { %v1433_v17 = vor.u32 %v1431_v36, %v14479_v14  ;;  %v14491_v2 = vor.u32 %v1440_v39, %v1439_v50  ;;  %v1443_v28 = vrot.slane %v1439_v50, 4  ;;  %v1450_v20 = vor.u32 %v1448_v59, %v14483_v49 }
 0x27c   :  { %v14497_v32 = vrot.slane %v1462_v38, 7  ;;  %v1471_v36 = vshrl.u32 %v14194_v54, 16  ;;  %v1474_v39 = vshll.u32 %v14194_v54, 16  ;;  %v1479_v50 = vshrl.u32 %v14199_v56, 16 }
 0x27d   :  { %v1434_v51 = vsel %vm13619_vm3, %v1426_v43, %v1433_v17  ;;  %v1451_v11 = vsel %vm13619_vm3, %v1443_v28, %v1450_v20  ;;  %v14505_v59 = vor.u32 %v1457_v45, %v1456_v34  ;;  %v1460_v57 = vrot.slane %v1456_v34, 4 }
 0x27e   :  { %2066 = vst [vmem:[#allocation2 + $0x10] sm:$0xf] %v1434_v51  ;;  %v1467_v43 = vor.u32 %v1465_v5, %v14497_v32  ;;  %2075 = vst [vmem:[#allocation2 + $0x1c] sm:$0xf] %v1451_v11  ;;  %v1473_v38 = vrot.slane %v1471_v36, 7  ;;  %v14509_v33 = vrot.slane %v1479_v50, 7 }
 0x27f   :  { %v1482_v28 = vshll.u32 %v14199_v56, 16  ;;  %v1488_v17 = vshrl.u32 %v14204_v41, 16  ;;  %v1491_v51 = vshll.u32 %v14204_v41, 16  ;;  %v1496_v45 = vshrl.u32 %v14209_v31, 16 }
 0x280   :  { %v1468_v54 = vsel %vm13619_vm3, %v1460_v57, %v1467_v43  ;;  %v1499_v20 = vshll.u32 %v14209_v31, 16  ;;  %v14518_v34 = vor.u32 %v1474_v39, %v1473_v38  ;;  %v1477_v5 = vrot.slane %v1473_v38, 4 }
 0x281   :  { %v1484_v11 = vor.u32 %v1482_v28, %v14509_v33  ;;  %2082 = vst [vmem:[#allocation2 + $0x28] sm:$0xf] %v1468_v54  ;;  %v1490_v56 = vrot.slane %v1488_v17, 7  ;;  %v14522_v50 = vrot.slane %v1496_v45, 7  ;;  %v1505_v23 = vshrl.u32 %v14214_v62, 16 }
 0x282   :  { %v1508_v57 = vshll.u32 %v14214_v62, 16  ;;  %v1513_v31 = vshrl.u32 %v14219_v6, 16  ;;  %v1516_v39 = vshll.u32 %v14219_v6, 16  ;;  %v1522_v43 = vshrl.u32 %v14224_v48, 16 }
 0x283   :  { %v1485_v41 = vsel %vm13619_vm3, %v1477_v5, %v1484_v11  ;;  %v14531_v38 = vor.u32 %v1491_v51, %v1490_v56  ;;  %v1494_v28 = vrot.slane %v1490_v56, 4  ;;  %v1501_v17 = vor.u32 %v1499_v20, %v14522_v50 }
 0x284   :  { %2089 = vst [vmem:[#allocation2 + $0x34] sm:$0xf] %v1485_v41  ;;  %v1507_v45 = vrot.slane %v1505_v23, 7  ;;  %v14535_v36 = vrot.slane %v1513_v31, 7  ;;  %v1524_v62 = vrot.slane %v1522_v43, 7  ;;  %v1525_v5 = vshll.u32 %v14224_v48, 16 }
 0x285   :  { %v1502_v11 = vsel %vm13619_vm3, %v1494_v28, %v1501_v17  ;;  %v1530_v6 = vshrl.u32 %v14229_v58, 16  ;;  %v1533_v51 = vshll.u32 %v14229_v58, 16  ;;  %v1539_v56 = vshrl.u32 %v14234_v13, 16 }
 0x286   :  { %v14543_v22 = vor.u32 %v1508_v57, %v1507_v45  ;;  %v1511_v20 = vrot.slane %v1507_v45, 4  ;;  %v1518_v41 = vor.u32 %v1516_v39, %v14535_v36  ;;  %2096 = vst [vmem:[#allocation2 + $0x40] sm:$0xf] %v1502_v11  ;;  %v14547_v31 = vor.u32 %v1525_v5, %v1524_v62 }
 0x287   :  { %v1528_v48 = vrot.slane %v1524_v62, 4  ;;  %v14549_v43 = vrot.slane %v1530_v6, 7  ;;  %v1541_v28 = vrot.slane %v1539_v56, 7  ;;  %v1542_v58 = vshll.u32 %v14234_v13, 16 }
 0x288   :  { %v1519_v17 = vsel %vm13619_vm3, %v1511_v20, %v1518_v41  ;;  %v1547_v57 = vshrl.u32 %v14239_v8, 16  ;;  %v1550_v45 = vshll.u32 %v14239_v8, 16  ;;  %v1556_v5 = vshrl.u32 %v14244_v16, 16 }
 0x289   :  { %v1535_v39 = vor.u32 %v1533_v51, %v14549_v43  ;;  %v1545_v11 = vrot.slane %v1541_v28, 4  ;;  %2103 = vst [vmem:[#allocation2 + $0x4c] sm:$0xf] %v1519_v17  ;;  %v14559_v62 = vor.u32 %v1542_v58, %v1541_v28  ;;  %v1559_v56 = vshll.u32 %v14244_v16, 16 }
 0x28a   :  { %v14561_v6 = vrot.slane %v1547_v57, 7  ;;  %v1564_v13 = vshrl.u32 %v14250_v19, 16  ;;  %v1558_v8 = vrot.slane %v1556_v5, 7  ;;  %v1567_v51 = vshll.u32 %v14250_v19, 16 }
 0x28b   :  { %v1536_v20 = vsel %vm13619_vm3, %v1528_v48, %v1535_v39  ;;  %v1573_v41 = vshrl.u32 %v14255_v24, 16  ;;  %v1576_v58 = vshll.u32 %v14255_v24, 16  ;;  %v1581_v48 = vshrl.u32 %v14260_v10, 16 }
 0x28c   :  { %v1552_v23 = vor.u32 %v1550_v45, %v14561_v6  ;;  %v14571_v28 = vrot.slane %v1564_v13, 7  ;;  %2110 = vst [vmem:[#allocation2 + $0x58] sm:$0xf] %v1536_v20  ;;  %v14574_v16 = vor.u32 %v1559_v56, %v1558_v8  ;;  %v1562_v57 = vrot.slane %v1558_v8, 4 }
 0x28d   :  { %v1575_v54 = vrot.slane %v1573_v41, 7  ;;  %v1584_v5 = vshll.u32 %v14260_v10, 16  ;;  %v14584_v24 = vrot.slane %v1581_v48, 7  ;;  %v1590_v56 = vshrl.u32 %v14265_v21, 16 }
 0x28e   :  { %v1553_v19 = vsel %vm13619_vm3, %v1545_v11, %v1552_v23  ;;  %v1569_v39 = vor.u32 %v1567_v51, %v14571_v28  ;;  %v1593_v8 = vshll.u32 %v14265_v21, 16  ;;  %v1598_v23 = vshrl.u32 %v14270_v26, 16 }
 0x28f   :  { %v14582_v13 = vor.u32 %v1576_v58, %v1575_v54  ;;  %v1579_v17 = vrot.slane %v1575_v54, 4  ;;  %2117 = vst [vmem:[#allocation2 + $0x64] sm:$0xf] %v1553_v19  ;;  %v1601_v11 = vshll.u32 %v14270_v26, 16  ;;  %v1586_v51 = vor.u32 %v1584_v5, %v14584_v24 }
 0x290   :  { %v1570_v20 = vsel %vm13619_vm3, %v1562_v57, %v1569_v39  ;;  %v1592_v41 = vrot.slane %v1590_v56, 7  ;;  %v1607_v54 = vshrl.u32 %v14275_v42, 16  ;;  %v14595_v58 = vrot.slane %v1598_v23, 7 }
 0x291   :  { %2124 = vst [vmem:[#allocation2 + $0x70] sm:$0xf] %v1570_v20  ;;  %v1610_v48 = vshll.u32 %v14275_v42, 16  ;;  %v1615_v57 = vshrl.u32 %v14280_v47, 16  ;;  %v1618_v21 = vshll.u32 %v14280_v47, 16  ;;  %v1587_v19 = vsel %vm13619_vm3, %v1579_v17, %v1586_v51 }
 0x292   :  { %v14602_v26 = vor.u32 %v1593_v8, %v1592_v41  ;;  %v1596_v39 = vrot.slane %v1592_v41, 4  ;;  %v1609_v5 = vrot.slane %v1607_v54, 7  ;;  %v1603_v56 = vor.u32 %v1601_v11, %v14595_v58  ;;  %2131 = vst [vmem:[#allocation2 + $0x7c] sm:$0xf] %v1587_v19 }
 0x293   :  { %v14606_v20 = vrot.slane %v1615_v57, 7  ;;  %v1624_v23 = vshrl.u32 %v14285_v60, 16  ;;  %v1627_v47 = vshll.u32 %v14285_v60, 16  ;;  %v1632_v17 = vshrl.u32 %v14290_v55, 16 }
 0x294   :  { %v14609_v42 = vor.u32 %v1610_v48, %v1609_v5  ;;  %v1613_v45 = vrot.slane %v1609_v5, 4  ;;  %v1604_v8 = vsel %vm13619_vm3, %v1596_v39, %v1603_v56  ;;  %v1635_v57 = vshll.u32 %v14290_v55, 16 }
 0x295   :  { %v1620_v51 = vor.u32 %v1618_v21, %v14606_v20  ;;  %v1626_v41 = vrot.slane %v1624_v23, 7  ;;  %v14617_v54 = vrot.slane %v1632_v17, 7  ;;  %v1641_v48 = vshrl.u32 %v14295_v52, 16  ;;  %2138 = vst [vmem:[#allocation2 + $0x88] sm:$0xf] %v1604_v8 }
 0x296   :  { %v1644_v19 = vshll.u32 %v14295_v52, 16  ;;  %v1649_v21 = vshrl.u32 %v14300_v35, 16  ;;  %v1652_v55 = vshll.u32 %v14300_v35, 16  ;;  %v1658_v52 = vshrl.u32 %v14305_v1, 16 }
 0x297   :  { %v1621_v60 = vsel %vm13619_vm3, %v1613_v45, %v1620_v51  ;;  %v14624_v5 = vor.u32 %v1627_v47, %v1626_v41  ;;  %v1630_v39 = vrot.slane %v1626_v41, 4  ;;  %v1637_v56 = vor.u32 %v1635_v57, %v14617_v54 }
 0x298   :  { %v1643_v17 = vrot.slane %v1641_v48, 7  ;;  %2145 = vst [vmem:[#allocation2 + $0x94] sm:$0xf] %v1621_v60  ;;  %v14630_v11 = vrot.slane %v1649_v21, 7  ;;  %v1661_v8 = vshll.u32 %v14305_v1, 16  ;;  %v1666_v45 = vshrl.u32 %v14310_v53, 16 }
 0x299   :  { %v1638_v47 = vsel %vm13619_vm3, %v1630_v39, %v1637_v56  ;;  %v1669_v57 = vshll.u32 %v14310_v53, 16  ;;  %v1660_v60 = vrot.slane %v1658_v52, 7  ;;  %v1675_v1 = vshrl.u32 %v14315_v4, 16 }
 0x29a   :  { %18259 = vst [vmem:[#allocation19_spill] sm:$0xff] %v14630_v11  ;;  %v14637_v51 = vor.u32 %v1644_v19, %v1643_v17  ;;  %v1647_v41 = vrot.slane %v1643_v17, 4  ;;  %v1654_v48 = vor.u32 %v1652_v55, %v14630_v11  ;;  %v14642_v21 = vrot.slane %v1666_v45, 7  ;;  %2152 = vst [vmem:[#allocation2 + $0xa0] sm:$0xf] %v1638_v47  ;;  %v18262_v47 = vld [vmem:[#allocation14_spill] sm:$0xff] }
 0x29b   :  { %v1678_v23 = vshll.u32 %v14315_v4, 16  ;;  %v1683_v10 = vshrl.u32 %v14320_v29, 16  ;;  %v1686_v19 = vshll.u32 %v14320_v29, 16  ;;  %v14650_v53 = vor.u32 %v1661_v8, %v1660_v60  ;;  %v18263_v11 = vld [vmem:[#allocation11_spill] sm:$0xff] }
 0x29c   :  { %18260 = vst [vmem:[#allocation21_spill] sm:$0xff] %v14642_v21  ;;  %v1655_v39 = vsel %vm13619_vm3, %v1647_v41, %v1654_v48  ;;  %v1664_v56 = vrot.slane %v1660_v60, 4  ;;  %v1671_v17 = vor.u32 %v1669_v57, %v14642_v21  ;;  %v1677_v52 = vrot.slane %v1675_v1, 7 }
 0x29d   :  { %v14654_v45 = vrot.slane %v1683_v10, 7  ;;  %v1692_v35 = vshrl.u32 %v18262_v47, 16  ;;  %2159 = vst [vmem:[#allocation2 + $0xac] sm:$0xf] %v1655_v39  ;;  %v1695_v29 = vshll.u32 %v18262_v47, 16  ;;  %v1700_v41 = vshrl.u32 %v18263_v11, 16 }
 0x29e   :  { %v1672_v4 = vsel %vm13619_vm3, %v1664_v56, %v1671_v17  ;;  %v1703_v8 = vshll.u32 %v18263_v11, 16  ;;  %v14662_v48 = vor.u32 %v1678_v23, %v1677_v52  ;;  %v1681_v57 = vrot.slane %v1677_v52, 4  ;;  %v18264_v39 = vld [vmem:[#allocation13_spill] sm:$0xff]  ;;  %v18265_v47 = vld [vmem:[#allocation16_spill] sm:$0xff] }
 0x29f   :  { %18261 = vst [vmem:[#allocation25_spill] sm:$0xff] %v14654_v45  ;;  %v1688_v60 = vor.u32 %v1686_v19, %v14654_v45  ;;  %2166 = vst [vmem:[#allocation2 + $0xb8] sm:$0xf] %v1672_v4  ;;  %v1694_v1 = vrot.slane %v1692_v35, 7  ;;  %v14666_v55 = vrot.slane %v1700_v41, 7  ;;  %v1709_v21 = vshrl.u32 %v18264_v39, 16 }
 0x2a0   :  { %v1712_v56 = vshll.u32 %v18264_v39, 16  ;;  %v1717_v11 = vshrl.u32 %v18265_v47, 16  ;;  %v1720_v23 = vshll.u32 %v18265_v47, 16  ;;  %v1726_v52 = vshrl.u32 %v14345_v7, 16 }
 0x2a1   :  { %v1689_v17 = vsel %vm13619_vm3, %v1681_v57, %v1688_v60  ;;  %v14675_v19 = vor.u32 %v1695_v29, %v1694_v1  ;;  %v1698_v10 = vrot.slane %v1694_v1, 4  ;;  %v1705_v35 = vor.u32 %v1703_v8, %v14666_v55 }
 0x2a2   :  { %2173 = vst [vmem:[#allocation2 + $0xc4] sm:$0xf] %v1689_v17  ;;  %v1711_v41 = vrot.slane %v1709_v21, 7  ;;  %v14679_v45 = vrot.slane %v1717_v11, 7  ;;  %v1728_v39 = vrot.slane %v1726_v52, 7  ;;  %v1729_v57 = vshll.u32 %v14345_v7, 16 }
 0x2a3   :  { %18266 = vst [vmem:[#allocation10_spill] sm:$0xff] %v14675_v19  ;;  %v1706_v60 = vsel %vm13619_vm3, %v1698_v10, %v1705_v35  ;;  %v1734_v47 = vshrl.u32 %v14350_v15, 16  ;;  %v1737_v29 = vshll.u32 %v14350_v15, 16  ;;  %v1743_v1 = vshrl.u32 %v14355_v0, 16 }
 0x2a4   :  { %18267 = vst [vmem:[#allocation4_spill] sm:$0xff] %v14679_v45  ;;  %v14687_v19 = vor.u32 %v1712_v56, %v1711_v41  ;;  %v1715_v8 = vrot.slane %v1711_v41, 4  ;;  %v1722_v17 = vor.u32 %v1720_v23, %v14679_v45  ;;  %2180 = vst [vmem:[#allocation2 + $0xe8] sm:$0xf] %v1706_v60  ;;  %v14691_v11 = vor.u32 %v1729_v57, %v1728_v39  ;;  %v14854_v45 = vld [vmem:[#allocation2 + $0x6c] sm:$0xf] }
 0x2a5   :  { %v1732_v7 = vrot.slane %v1728_v39, 4  ;;  %v14693_v52 = vrot.slane %v1734_v47, 7  ;;  %v1745_v10 = vrot.slane %v1743_v1, 7  ;;  %v1746_v15 = vshll.u32 %v14355_v0, 16 }
 0x2a6   :  { %18268 = vst [vmem:[#allocation14_spill] sm:$0xff] %v14687_v19  ;;  %18269 = vst [vmem:[#allocation11_spill] sm:$0xff] %v14691_v11  ;;  %v1723_v35 = vsel %vm13619_vm3, %v1715_v8, %v1722_v17  ;;  %v1751_v56 = vshrl.u32 %v14360_v30, 16  ;;  %v1754_v41 = vshll.u32 %v14360_v30, 16  ;;  %v1760_v57 = vshrl.u32 %v14365_v25, 16  ;;  %v18273_v8 = vld [vmem:[#allocation24_spill] sm:$0xff] }
 0x2a7   :  { %18270 = vst [vmem:[#allocation13_spill] sm:$0xff] %v14693_v52  ;;  %v1739_v23 = vor.u32 %v1737_v29, %v14693_v52  ;;  %v1749_v60 = vrot.slane %v1745_v10, 4  ;;  %2187 = vst [vmem:[#allocation2 + $0xf4] sm:$0xf] %v1723_v35  ;;  %v14703_v39 = vor.u32 %v1746_v15, %v1745_v10  ;;  %v1763_v1 = vshll.u32 %v14365_v25, 16  ;;  %v18276_v52 = vld [vmem:[#allocation26_spill] sm:$0xff] }
 0x2a8   :  { %v14705_v47 = vrot.slane %v1751_v56, 7  ;;  %v1768_v0 = vshrl.u32 %v18273_v8, 16  ;;  %v1762_v30 = vrot.slane %v1760_v57, 7  ;;  %v1771_v29 = vshll.u32 %v18273_v8, 16  ;;  %v2111_v11 = vld [vmem:[#allocation2 + $0x5c] sm:$0x1] }
 0x2a9   :  { %18271 = vst [vmem:[#allocation16_spill] sm:$0xff] %v14703_v39  ;;  %v1740_v17 = vsel %vm13619_vm3, %v1732_v7, %v1739_v23  ;;  %v1777_v21 = vshrl.u32 %v14375_v61, 16  ;;  %v1780_v15 = vshll.u32 %v14375_v61, 16  ;;  %v1785_v7 = vshrl.u32 %v18276_v52, 16 }
 0x2aa   :  { %18272 = vst [vmem:[#allocation29_spill] sm:$0xff] %v14705_v47  ;;  %v1756_v4 = vor.u32 %v1754_v41, %v14705_v47  ;;  %v14715_v10 = vrot.slane %v1768_v0, 7  ;;  %2194 = vst [vmem:[#allocation2 + $0x100] sm:$0xf] %v1740_v17  ;;  %v14718_v25 = vor.u32 %v1763_v1, %v1762_v30  ;;  %v1766_v56 = vrot.slane %v1762_v30, 4 }
 0x2ab   :  { %v1779_v39 = vrot.slane %v1777_v21, 7  ;;  %v1788_v8 = vshll.u32 %v18276_v52, 16  ;;  %v14728_v61 = vrot.slane %v1785_v7, 7  ;;  %v1794_v1 = vshrl.u32 %v14385_v18, 16 }
 0x2ac   :  { %18274 = vst [vmem:[#allocation24_spill] sm:$0xff] %v14715_v10  ;;  %18275 = vst [vmem:[#allocation30_spill] sm:$0xff] %v14718_v25  ;;  %v1757_v23 = vsel %vm13619_vm3, %v1749_v60, %v1756_v4  ;;  %v1773_v57 = vor.u32 %v1771_v29, %v14715_v10  ;;  %v1797_v17 = vshll.u32 %v14385_v18, 16  ;;  %v1802_v4 = vshrl.u32 %v14390_v63, 16  ;;  %v2097_v25 = vld [vmem:[#allocation2 + $0x44] sm:$0x1] }
 0x2ad   :  { %v14726_v0 = vor.u32 %v1780_v15, %v1779_v39  ;;  %v1783_v35 = vrot.slane %v1779_v39, 4  ;;  %18278 = vst [vmem:[#allocation31_spill] sm:$0xff] %v14728_v61  ;;  %2201 = vst [vmem:[#allocation2 + $0x10c] sm:$0xf] %v1757_v23  ;;  %v1805_v60 = vshll.u32 %v14390_v63, 16  ;;  %v1790_v30 = vor.u32 %v1788_v8, %v14728_v61 }
 0x2ae   :  { %v1774_v21 = vsel %vm13619_vm3, %v1766_v56, %v1773_v57  ;;  %v1796_v29 = vrot.slane %v1794_v1, 7  ;;  %v1811_v39 = vshrl.u32 %v14395_v3, 16  ;;  %v14739_v15 = vrot.slane %v1802_v4, 7 }
 0x2af   :  { %18277 = vst [vmem:[#allocation26_spill] sm:$0xff] %v14726_v0  ;;  %2208 = vst [vmem:[#allocation2 + $0x118] sm:$0xf] %v1774_v21  ;;  %v1814_v7 = vshll.u32 %v14395_v3, 16  ;;  %v1819_v56 = vshrl.u32 %v14400_v9, 16  ;;  %v1822_v18 = vshll.u32 %v14400_v9, 16  ;;  %v1791_v23 = vsel %vm13619_vm3, %v1783_v35, %v1790_v30 }
 0x2b0   :  { %18279 = vst [vmem:[#allocation32_spill] sm:$0xff] %v14739_v15  ;;  %v14746_v63 = vor.u32 %v1797_v17, %v1796_v29  ;;  %v1800_v57 = vrot.slane %v1796_v29, 4  ;;  %v1813_v8 = vrot.slane %v1811_v39, 7  ;;  %v1807_v1 = vor.u32 %v1805_v60, %v14739_v15  ;;  %2215 = vst [vmem:[#allocation2 + $0x124] sm:$0xf] %v1791_v23 }
 0x2b1   :  { %v14750_v21 = vrot.slane %v1819_v56, 7  ;;  %v1828_v4 = vshrl.u32 %v14405_v12, 16  ;;  %v1831_v9 = vshll.u32 %v14405_v12, 16  ;;  %v1836_v35 = vshrl.u32 %v14410_v40, 16  ;;  %v14846_v0 = vld [vmem:[#allocation2 + $0x54] sm:$0xf] }
 0x2b2   :  { %18280 = vst [vmem:[#allocation33_spill] sm:$0xff] %v14746_v63  ;;  %v14753_v3 = vor.u32 %v1814_v7, %v1813_v8  ;;  %v1817_v41 = vrot.slane %v1813_v8, 4  ;;  %v1808_v17 = vsel %vm13619_vm3, %v1800_v57, %v1807_v1  ;;  %v1839_v56 = vshll.u32 %v14410_v40, 16 }
 0x2b3   :  { %18281 = vst [vmem:[#allocation34_spill] sm:$0xff] %v14750_v21  ;;  %v1824_v30 = vor.u32 %v1822_v18, %v14750_v21  ;;  %v1830_v29 = vrot.slane %v1828_v4, 7  ;;  %v14761_v39 = vrot.slane %v1836_v35, 7  ;;  %v1845_v7 = vshrl.u32 %v14415_v44, 16  ;;  %2222 = vst [vmem:[#allocation2 + $0x130] sm:$0xf] %v1808_v17 }
 0x2b4   :  { %18282 = vst [vmem:[#allocation35_spill] sm:$0xff] %v14753_v3  ;;  %v1848_v23 = vshll.u32 %v14415_v44, 16  ;;  %v1853_v8 = vshrl.u32 %v14420_v46, 16  ;;  %v1856_v35 = vshll.u32 %v14420_v46, 16  ;;  %v18286_v17 = vld [vmem:[#allocation23_spill] sm:$0xff]  ;;  %v18291_v21 = vld [vmem:[#allocation9_spill] sm:$0xff]  ;;  %v2108_v27 = vsel %vm14816_vm7, %v14547_v31, %v14846_v0 }
 0x2b5   :  { %18283 = vst [vmem:[#allocation36_spill] sm:$0xff] %v14761_v39  ;;  %v1825_v12 = vsel %vm13619_vm3, %v1817_v41, %v1824_v30  ;;  %v14768_v57 = vor.u32 %v1831_v9, %v1830_v29  ;;  %v1834_v18 = vrot.slane %v1830_v29, 4  ;;  %v1841_v1 = vor.u32 %v1839_v56, %v14761_v39  ;;  %v18287_v41 = vld [vmem:[#allocation27_spill] sm:$0xff]  ;;  %v18290_v39 = vld [vmem:[#allocation8_spill] sm:$0xff]  ;;  %2109 = vst [vmem:[#allocation2 + $0x54] sm:$0xf] %v2108_v27 }
 0x2b6   :  { %v1847_v40 = vrot.slane %v1845_v7, 7  ;;  %2229 = vst [vmem:[#allocation2 + $0x13c] sm:$0xf] %v1825_v12  ;;  %v14774_v44 = vrot.slane %v1853_v8, 7  ;;  %v1862_v60 = vshrl.u32 %v18286_v17, 16  ;;  %v1865_v52 = vshll.u32 %v18286_v17, 16 }
 0x2b7   :  { %18284 = vst [vmem:[#allocation37_spill] sm:$0xff] %v14768_v57  ;;  %v1870_v9 = vshrl.u32 %v18287_v41, 16  ;;  %v1842_v30 = vsel %vm13619_vm3, %v1834_v18, %v1841_v1  ;;  %v1873_v4 = vshll.u32 %v18287_v41, 16  ;;  %v1879_v17 = vshrl.u32 %v18290_v39, 16 }
 0x2b8   :  { %18285 = vst [vmem:[#allocation38_spill] sm:$0xff] %v14774_v44  ;;  %v14781_v29 = vor.u32 %v1848_v23, %v1847_v40  ;;  %v1851_v56 = vrot.slane %v1847_v40, 4  ;;  %v1858_v7 = vor.u32 %v1856_v35, %v14774_v44  ;;  %v1864_v12 = vrot.slane %v1862_v60, 7  ;;  %2236 = vst [vmem:[#allocation2 + $0x148] sm:$0xf] %v1842_v30  ;;  %v18294_v30 = vld [vmem:[#allocation12_spill] sm:$0xff] }
 0x2b9   :  { %v14786_v8 = vrot.slane %v1870_v9, 7  ;;  %v1882_v57 = vshll.u32 %v18290_v39, 16  ;;  %v1887_v3 = vshrl.u32 %v18291_v21, 16  ;;  %v1890_v23 = vshll.u32 %v18291_v21, 16  ;;  %v18295_v44 = vld [vmem:[#allocation18_spill] sm:$0xff] }
 0x2ba   :  { %18288 = vst [vmem:[#allocation23_spill] sm:$0xff] %v14781_v29  ;;  %v1859_v18 = vsel %vm13619_vm3, %v1851_v56, %v1858_v7  ;;  %v14794_v1 = vor.u32 %v1865_v52, %v1864_v12  ;;  %v1868_v40 = vrot.slane %v1864_v12, 4  ;;  %v1881_v41 = vrot.slane %v1879_v17, 7  ;;  %v2063_v17 = vld [vmem:[#allocation2 + $0xc] sm:$0xf] }
 0x2bb   :  { %18289 = vst [vmem:[#allocation27_spill] sm:$0xff] %v14786_v8  ;;  %v1875_v35 = vor.u32 %v1873_v4, %v14786_v8  ;;  %v14798_v9 = vrot.slane %v1887_v3, 7  ;;  %v1896_v46 = vshrl.u32 %v18294_v30, 16  ;;  %2243 = vst [vmem:[#allocation2 + $0x154] sm:$0xf] %v1859_v18  ;;  %v1899_v21 = vshll.u32 %v18294_v30, 16 }
 0x2bc   :  { %18292 = vst [vmem:[#allocation8_spill] sm:$0xff] %v14794_v1  ;;  %v1904_v56 = vshrl.u32 %v18295_v44, 16  ;;  %v1907_v52 = vshll.u32 %v18295_v44, 16  ;;  %v14806_v7 = vor.u32 %v1882_v57, %v1881_v41  ;;  %v1885_v4 = vrot.slane %v1881_v41, 4  ;;  %v18298_v8 = vld [vmem:[#allocation15_spill] sm:$0xff]  ;;  %v18301_v30 = vld [vmem:[#allocation17_spill] sm:$0xff] }
 0x2bd   :  { %18293 = vst [vmem:[#allocation9_spill] sm:$0xff] %v14798_v9  ;;  %v1876_v39 = vsel %vm13619_vm3, %v1868_v40, %v1875_v35  ;;  %v1892_v12 = vor.u32 %v1890_v23, %v14798_v9  ;;  %v1898_v60 = vrot.slane %v1896_v46, 7  ;;  %v1913_v40 = vshrl.u32 %v18298_v8, 16  ;;  %v2072_v57 = vld [vmem:[#allocation2 + $0x18] sm:$0xf]  ;;  %v18303_v3 = vld [vmem:[#allocation6_spill] sm:$0xff] }
 0x2be   :  { %18296 = vst [vmem:[#allocation12_spill] sm:$0xff] %v14806_v7  ;;  %2250 = vst [vmem:[#allocation2 + $0x160] sm:$0xf] %v1876_v39  ;;  %v14810_v18 = vrot.slane %v1904_v56, 7  ;;  %v1916_v35 = vshll.u32 %v18298_v8, 16  ;;  %v1921_v39 = vshrl.u32 %v18301_v30, 16 }
 0x2bf   :  { %v2069_v41 = vld [vmem:[#allocation2 + $0x14] sm:$0x1]  ;;  %v1893_v23 = vsel %vm13619_vm3, %v1885_v4, %v1892_v12  ;;  %v1924_v46 = vshll.u32 %v18301_v30, 16  ;;  %v18302_v56 = vld [vmem:[#allocation7_spill] sm:$0xff]  ;;  %v18304_v9 = vshll.u32 %v18303_v3, 16  ;;  %v14829_v15 = vor.u32 %v1899_v21, %v1898_v60 }
 0x2c0   :  { %18297 = vst [vmem:[#allocation18_spill] sm:$0xff] %v14810_v18  ;;  %v2076_v8 = vld [vmem:[#allocation2 + $0x20] sm:$0x1]  ;;  %v2079_v1 = vld [vmem:[#allocation2 + $0x24] sm:$0xf]  ;;  %v1902_v63 = vrot.slane %v1898_v60, 4  ;;  %v1909_v61 = vor.u32 %v1907_v52, %v14810_v18 }
 0x2c1   :  { %v14827_v7 = vor.u32 %v18304_v9, %v18302_v56  ;;  %v2083_v29 = vld [vmem:[#allocation2 + $0x2c] sm:$0x1]  ;;  %18306 = vst [vmem:[#allocation17_spill] sm:$0xff] %v14829_v15  ;;  %2257 = vst [vmem:[#allocation2 + $0x16c] sm:$0xf] %v1893_v23  ;;  %v1915_v4 = vrot.slane %v1913_v40, 7  ;;  %v2064_v40 = vsel %vm14816_vm7, %v14487_v37, %v2063_v17 }
 0x2c2   :  { %v14833_v12 = vrot.slane %v1921_v39, 7  ;;  %v18308_v30 = vld [vmem:[#allocation20_spill] sm:$0xff]  ;;  %v2090_v56 = vld [vmem:[#allocation2 + $0x38] sm:$0x1]  ;;  %v1910_v21 = vsel %vm13619_vm3, %v1902_v63, %v1909_v61  ;;  %v18309_v60 = vld [vmem:[#allocation22_spill] sm:$0xff]  ;;  %v18311_v19 = vrot.slane %v14479_v14, 4 }
 0x2c3   :  { %18305 = vst [vmem:[#allocation15_spill] sm:$0xff] %v14827_v7  ;;  %v1947_v10 = vshrl.u32 %v18308_v30, 16  ;;  %v1950_v3 = vshll.u32 %v18308_v30, 16  ;;  %v2086_v9 = vld [vmem:[#allocation2 + $0x30] sm:$0xf]  ;;  %v1955_v15 = vshrl.u32 %v18309_v60, 16  ;;  %v14848_v30 = vor.u32 %v1916_v35, %v1915_v4 }
 0x2c4   :  { %18307 = vst [vmem:[#allocation7_spill] sm:$0xff] %v14833_v12  ;;  %v2093_v7 = vld [vmem:[#allocation2 + $0x3c] sm:$0xf]  ;;  %v1958_v52 = vshll.u32 %v18309_v60, 16  ;;  %v14844_v23 = vld [vmem:[#allocation2 + $0x48] sm:$0xf]  ;;  %v1926_v47 = vor.u32 %v1924_v46, %v14833_v12  ;;  %v2073_v46 = vsel %vm14816_vm7, %v14491_v2, %v2072_v57  ;;  %v2080_v2 = vsel %vm14816_vm7, %v14505_v59, %v2079_v1 }
 0x2c5   :  { %v2104_v39 = vld [vmem:[#allocation2 + $0x50] sm:$0x1]  ;;  %18310 = vst [vmem:[#allocation6_spill] sm:$0xff] %v14848_v30  ;;  %v1919_v18 = vrot.slane %v1915_v4, 4  ;;  %2065 = vst [vmem:[#allocation2 + $0xc] sm:$0xf] %v2064_v40  ;;  %v2070_v4 = vsel %vm13651_vm4, %v18311_v19, %v2069_v41 }
 0x2c6   :  { %2264 = vst [vmem:[#allocation2 + $0x178] sm:$0xf] %v1910_v21  ;;  %v14852_v63 = vld [vmem:[#allocation2 + $0x60] sm:$0xf]  ;;  %v2118_v60 = vld [vmem:[#allocation2 + $0x68] sm:$0x1] }
 0x2c7   :  { %v1949_v37 = vrot.slane %v1947_v10, 7  ;;  %v14856_v17 = vrot.slane %v1955_v15, 7  ;;  %v14865_v40 = vld [vmem:[#allocation2 + $0x78] sm:$0xf]  ;;  %v14867_v21 = vld [vmem:[#allocation2 + $0x80] sm:$0x1]  ;;  %v1927_v10 = vsel %vm13619_vm3, %v1919_v18, %v1926_v47  ;;  %v2115_v31 = vsel %vm14816_vm7, %v14559_v62, %v14852_v63 }
 0x2c8   :  { %v2125_v61 = vld [vmem:[#allocation2 + $0x74] sm:$0x1]  ;;  %v14869_v12 = vld [vmem:[#allocation2 + $0x84] sm:$0xf]  ;;  %2071 = vst [vmem:[#allocation2 + $0x14] sm:$0x1] %v2070_v4 }
 0x2c9   :  { %2074 = vst [vmem:[#allocation2 + $0x18] sm:$0xf] %v2073_v46  ;;  %v18313_v14 = vrot.slane %v14483_v49, 4  ;;  %v18314_v15 = vrot.slane %v14497_v32, 4  ;;  %v14884_v41 = vld [vmem:[#allocation2 + $0x90] sm:$0xf]  ;;  %v14892_v49 = vor.u32 %v1950_v3, %v1949_v37  ;;  %v1960_v4 = vor.u32 %v1958_v52, %v14856_v17 }
 0x2ca   :  { %v14886_v30 = vld [vmem:[#allocation2 + $0x98] sm:$0x1]  ;;  %v14888_v47 = vld [vmem:[#allocation2 + $0x8c] sm:$0x1]  ;;  %v14890_v18 = vld [vmem:[#allocation2 + $0x9c] sm:$0xf]  ;;  %v2087_v3 = vsel %vm14816_vm7, %v14518_v34, %v2086_v9 }
 0x2cb   :  { %v2077_v19 = vsel %vm13651_vm4, %v18313_v14, %v2076_v8  ;;  %v2084_v57 = vsel %vm13651_vm4, %v18314_v15, %v2083_v29  ;;  %v1953_v8 = vrot.slane %v1949_v37, 4  ;;  %v1962_v59 = vrot.slane %v14856_v17, 4  ;;  %2081 = vst [vmem:[#allocation2 + $0x24] sm:$0xf] %v2080_v2  ;;  %2271 = vst [vmem:[#allocation2 + $0x184] sm:$0xf] %v1927_v10 }
 0x2cc   :  { %2078 = vst [vmem:[#allocation2 + $0x20] sm:$0x1] %v2077_v19  ;;  %2085 = vst [vmem:[#allocation2 + $0x2c] sm:$0x1] %v2084_v57  ;;  %v14896_v32 = vld [vmem:[#allocation2 + $0xa8] sm:$0xf]  ;;  %v2094_v10 = vsel %vm14816_vm7, %v14531_v38, %v2093_v7 }
 0x2cd   :  { %v14898_v29 = vld [vmem:[#allocation2 + $0xb0] sm:$0x1]  ;;  %v2153_v1 = vld [vmem:[#allocation2 + $0xa4] sm:$0x1]  ;;  %v14900_v46 = vld [vmem:[#allocation2 + $0xb4] sm:$0xf] }
 0x2ce   :  { %v18315_v37 = vrot.slane %v14509_v33, 4  ;;  %v18316_v14 = vrot.slane %v14522_v50, 4  ;;  %v14916_v2 = vld [vmem:[#allocation2 + $0xc0] sm:$0xf]  ;;  %v14918_v15 = vld [vmem:[#allocation2 + $0xc8] sm:$0x1]  ;;  %v1961_v33 = vsel %vm13619_vm3, %v1953_v8, %v1960_v4  ;;  %v2101_v50 = vsel %vm14816_vm7, %v14543_v22, %v14844_v23 }
 0x2cf   :  { %v14920_v57 = vld [vmem:[#allocation2 + $0xbc] sm:$0x1]  ;;  %v14922_v34 = vld [vmem:[#allocation2 + $0xe4] sm:$0xf]  ;;  %2088 = vst [vmem:[#allocation2 + $0x30] sm:$0xf] %v2087_v3 }
 0x2d0   :  { %v2091_v52 = vsel %vm13651_vm4, %v18315_v37, %v2090_v56  ;;  %v2098_v19 = vsel %vm13651_vm4, %v18316_v14, %v2097_v25  ;;  %2095 = vst [vmem:[#allocation2 + $0x3c] sm:$0xf] %v2094_v10  ;;  %v18317_v38 = vrot.slane %v14535_v36, 4  ;;  %v14938_v7 = vld [vmem:[#allocation2 + $0xf0] sm:$0xf]  ;;  %v18318_v22 = vrot.slane %v14549_v43, 4 }
 0x2d1   :  { %2092 = vst [vmem:[#allocation2 + $0x38] sm:$0x1] %v2091_v52  ;;  %2099 = vst [vmem:[#allocation2 + $0x44] sm:$0x1] %v2098_v19  ;;  %v14940_v9 = vld [vmem:[#allocation2 + $0xf8] sm:$0x1]  ;;  %v2164_v14 = vsel %vm14816_vm7, %v14650_v53, %v14900_v46  ;;  %v2171_v53 = vsel %vm14816_vm7, %v14662_v48, %v14916_v2 }
 0x2d2   :  { %v2105_v25 = vsel %vm13651_vm4, %v18317_v38, %v2104_v39  ;;  %v14942_v56 = vld [vmem:[#allocation2 + $0xec] sm:$0x1]  ;;  %v14944_v8 = vld [vmem:[#allocation2 + $0xfc] sm:$0xf]  ;;  %2102 = vst [vmem:[#allocation2 + $0x48] sm:$0xf] %v2101_v50  ;;  %v2112_v36 = vsel %vm13651_vm4, %v18318_v22, %v2111_v11  ;;  %v2122_v39 = vsel %vm14816_vm7, %v14574_v16, %v14854_v45  ;;  %v2129_v16 = vsel %vm14816_vm7, %v14582_v13, %v14865_v40 }
 0x2d3   :  { %2106 = vst [vmem:[#allocation2 + $0x50] sm:$0x1] %v2105_v25  ;;  %v18319_v0 = vrot.slane %v14561_v6, 4  ;;  %2285 = vst [vmem:[#allocation2 + $0x19c] sm:$0xf] %v1961_v33  ;;  %v18320_v62 = vrot.slane %v14571_v28, 4 }
 0x2d4   :  { %v14962_v43 = vld [vmem:[#allocation2 + $0x108] sm:$0xf]  ;;  %v14964_v4 = vld [vmem:[#allocation2 + $0x110] sm:$0x1]  ;;  %v2195_v11 = vld [vmem:[#allocation2 + $0x104] sm:$0x1] }
 0x2d5   :  { %v2119_v23 = vsel %vm13651_vm4, %v18319_v0, %v2118_v60  ;;  %v14966_v3 = vld [vmem:[#allocation2 + $0x114] sm:$0xf]  ;;  %2113 = vst [vmem:[#allocation2 + $0x5c] sm:$0x1] %v2112_v36  ;;  %2116 = vst [vmem:[#allocation2 + $0x60] sm:$0xf] %v2115_v31  ;;  %v2126_v6 = vsel %vm13651_vm4, %v18320_v62, %v2125_v61  ;;  %v2136_v60 = vsel %vm14816_vm7, %v14602_v26, %v14869_v12 }
 0x2d6   :  { %2120 = vst [vmem:[#allocation2 + $0x68] sm:$0x1] %v2119_v23  ;;  %2123 = vst [vmem:[#allocation2 + $0x6c] sm:$0xf] %v2122_v39  ;;  %v18321_v45 = vrot.slane %v14584_v24, 4  ;;  %v18322_v13 = vrot.slane %v14595_v58, 4  ;;  %v2143_v26 = vsel %vm14816_vm7, %v14609_v42, %v14884_v41 }
 0x2d7   :  { %v14985_v28 = vld [vmem:[#allocation2 + $0x120] sm:$0xf]  ;;  %v14987_v37 = vld [vmem:[#allocation2 + $0x128] sm:$0x1]  ;;  %v2209_v61 = vld [vmem:[#allocation2 + $0x11c] sm:$0x1] }
 0x2d8   :  { %v2133_v63 = vsel %vm13651_vm4, %v18321_v45, %v14867_v21  ;;  %v14989_v52 = vld [vmem:[#allocation2 + $0x12c] sm:$0xf]  ;;  %2127 = vst [vmem:[#allocation2 + $0x74] sm:$0x1] %v2126_v6  ;;  %2130 = vst [vmem:[#allocation2 + $0x78] sm:$0xf] %v2129_v16  ;;  %v2140_v24 = vsel %vm13651_vm4, %v18322_v13, %v14888_v47  ;;  %v2150_v21 = vsel %vm14816_vm7, %v14624_v5, %v14890_v18 }
 0x2d9   :  { %2134 = vst [vmem:[#allocation2 + $0x80] sm:$0x1] %v2133_v63  ;;  %2137 = vst [vmem:[#allocation2 + $0x84] sm:$0xf] %v2136_v60  ;;  %v18323_v12 = vrot.slane %v14606_v20, 4  ;;  %v18324_v42 = vrot.slane %v14617_v54, 4 }
 0x2da   :  { %v15009_v58 = vld [vmem:[#allocation2 + $0x138] sm:$0xf]  ;;  %v2230_v10 = vld [vmem:[#allocation2 + $0x140] sm:$0x1]  ;;  %v2223_v47 = vld [vmem:[#allocation2 + $0x134] sm:$0x1] }
 0x2db   :  { %v2147_v40 = vsel %vm13651_vm4, %v18323_v12, %v14886_v30  ;;  %2141 = vst [vmem:[#allocation2 + $0x8c] sm:$0x1] %v2140_v24  ;;  %2144 = vst [vmem:[#allocation2 + $0x90] sm:$0xf] %v2143_v26  ;;  %v2154_v20 = vsel %vm13651_vm4, %v18324_v42, %v2153_v1  ;;  %v2157_v30 = vsel %vm14816_vm7, %v14637_v51, %v14896_v32  ;;  %v18325_v5 = vld [vmem:[#allocation19_spill] sm:$0xff]  ;;  %v18327_v51 = vld [vmem:[#allocation21_spill] sm:$0xff] }
 0x2dc   :  { %2148 = vst [vmem:[#allocation2 + $0x98] sm:$0x1] %v2147_v40  ;;  %2151 = vst [vmem:[#allocation2 + $0x9c] sm:$0xf] %v2150_v21  ;;  %v18326_v41 = vrot.slane %v18325_v5, 4  ;;  %v18328_v32 = vrot.slane %v18327_v51, 4 }
 0x2dd   :  { %v15028_v54 = vld [vmem:[#allocation2 + $0x150] sm:$0xf]  ;;  %v2233_v19 = vld [vmem:[#allocation2 + $0x144] sm:$0xf]  ;;  %v2244_v1 = vld [vmem:[#allocation2 + $0x158] sm:$0x1] }
 0x2de   :  { %v2161_v18 = vsel %vm13651_vm4, %v18326_v41, %v14898_v29  ;;  %v2237_v33 = vld [vmem:[#allocation2 + $0x14c] sm:$0x1]  ;;  %2155 = vst [vmem:[#allocation2 + $0xa4] sm:$0x1] %v2154_v20  ;;  %2158 = vst [vmem:[#allocation2 + $0xa8] sm:$0xf] %v2157_v30  ;;  %v2168_v29 = vsel %vm13651_vm4, %v18328_v32, %v14920_v57 }
 0x2df   :  { %2162 = vst [vmem:[#allocation2 + $0xb0] sm:$0x1] %v2161_v18  ;;  %2165 = vst [vmem:[#allocation2 + $0xb4] sm:$0xf] %v2164_v14  ;;  %v18329_v46 = vld [vmem:[#allocation25_spill] sm:$0xff]  ;;  %v18331_v25 = vld [vmem:[#allocation10_spill] sm:$0xff] }
 0x2e0   :  { %v18330_v50 = vrot.slane %v18329_v46, 4  ;;  %v2178_v27 = vsel %vm14816_vm7, %v18331_v25, %v14922_v34  ;;  %v2254_v22 = vld [vmem:[#allocation2 + $0x168] sm:$0xf]  ;;  %v2247_v36 = vld [vmem:[#allocation2 + $0x15c] sm:$0xf]  ;;  %v18332_v48 = vrot.slane %v14666_v55, 4 }
 0x2e1   :  { %2169 = vst [vmem:[#allocation2 + $0xbc] sm:$0x1] %v2168_v29  ;;  %2172 = vst [vmem:[#allocation2 + $0xc0] sm:$0xf] %v2171_v53  ;;  %v18333_v57 = vld [vmem:[#allocation14_spill] sm:$0xff]  ;;  %v18334_v31 = vld [vmem:[#allocation4_spill] sm:$0xff] }
 0x2e2   :  { %v2175_v38 = vsel %vm13651_vm4, %v18330_v50, %v14918_v15  ;;  %2179 = vst [vmem:[#allocation2 + $0xe4] sm:$0xf] %v2178_v27  ;;  %v2182_v2 = vsel %vm13651_vm4, %v18332_v48, %v14942_v56  ;;  %v2185_v15 = vsel %vm14816_vm7, %v18333_v57, %v14938_v7  ;;  %v18335_v34 = vrot.slane %v18334_v31, 4  ;;  %v18336_v23 = vld [vmem:[#allocation11_spill] sm:$0xff]  ;;  %v2258_v55 = vld [vmem:[#allocation2 + $0x170] sm:$0x1] }
 0x2e3   :  { %2176 = vst [vmem:[#allocation2 + $0xc8] sm:$0x1] %v2175_v38  ;;  %v2192_v39 = vsel %vm14816_vm7, %v18336_v23, %v14944_v8  ;;  %v2251_v62 = vld [vmem:[#allocation2 + $0x164] sm:$0x1]  ;;  %2183 = vst [vmem:[#allocation2 + $0xec] sm:$0x1] %v2182_v2 }
 0x2e4   :  { %v2189_v0 = vsel %vm13651_vm4, %v18335_v34, %v14940_v9  ;;  %2186 = vst [vmem:[#allocation2 + $0xf0] sm:$0xf] %v2185_v15  ;;  %2193 = vst [vmem:[#allocation2 + $0xfc] sm:$0xf] %v2192_v39  ;;  %v18337_v56 = vld [vmem:[#allocation13_spill] sm:$0xff]  ;;  %v18339_v16 = vld [vmem:[#allocation16_spill] sm:$0xff] }
 0x2e5   :  { %2190 = vst [vmem:[#allocation2 + $0xf8] sm:$0x1] %v2189_v0  ;;  %v18338_v6 = vrot.slane %v18337_v56, 4  ;;  %v2199_v9 = vsel %vm14816_vm7, %v18339_v16, %v14962_v43  ;;  %v18340_v45 = vld [vmem:[#allocation29_spill] sm:$0xff]  ;;  %v18342_v60 = vld [vmem:[#allocation30_spill] sm:$0xff]  ;;  %v18346_v42 = vld [vmem:[#allocation31_spill] sm:$0xff] }
 0x2e6   :  { %v18341_v63 = vrot.slane %v18340_v45, 4  ;;  %v2206_v13 = vsel %vm14816_vm7, %v18342_v60, %v14966_v3  ;;  %v2268_v24 = vld [vmem:[#allocation2 + $0x180] sm:$0xf]  ;;  %v2261_v26 = vld [vmem:[#allocation2 + $0x174] sm:$0xf]  ;;  %v18347_v3 = vrot.slane %v18346_v42, 4 }
 0x2e7   :  { %v2196_v7 = vsel %vm13651_vm4, %v18338_v6, %v2195_v11  ;;  %v2272_v12 = vld [vmem:[#allocation2 + $0x188] sm:$0x1]  ;;  %2200 = vst [vmem:[#allocation2 + $0x108] sm:$0xf] %v2199_v9  ;;  %2207 = vst [vmem:[#allocation2 + $0x114] sm:$0xf] %v2206_v13 }
 0x2e8   :  { %v2203_v8 = vsel %vm13651_vm4, %v18341_v63, %v14964_v4  ;;  %2197 = vst [vmem:[#allocation2 + $0x104] sm:$0x1] %v2196_v7  ;;  %v18343_v11 = vld [vmem:[#allocation24_spill] sm:$0xff]  ;;  %v18345_v21 = vld [vmem:[#allocation26_spill] sm:$0xff]  ;;  %v2217_v20 = vsel %vm13651_vm4, %v18347_v3, %v14987_v37  ;;  %v18348_v30 = vld [vmem:[#allocation33_spill] sm:$0xff] }
 0x2e9   :  { %2204 = vst [vmem:[#allocation2 + $0x110] sm:$0x1] %v2203_v8  ;;  %v18344_v43 = vrot.slane %v18343_v11, 4  ;;  %v2213_v4 = vsel %vm14816_vm7, %v18345_v21, %v14985_v28  ;;  %v2220_v5 = vsel %vm14816_vm7, %v18348_v30, %v14989_v52  ;;  %v2265_v41 = vld [vmem:[#allocation2 + $0x17c] sm:$0x1]  ;;  %v18351_v51 = vld [vmem:[#allocation35_spill] sm:$0xff] }
 0x2ea   :  { %v2275_v18 = vld [vmem:[#allocation2 + $0x18c] sm:$0xf]  ;;  %2214 = vst [vmem:[#allocation2 + $0x120] sm:$0xf] %v2213_v4  ;;  %2218 = vst [vmem:[#allocation2 + $0x128] sm:$0x1] %v2217_v20  ;;  %v2227_v37 = vsel %vm14816_vm7, %v18351_v51, %v15009_v58 }
 0x2eb   :  { %v2210_v40 = vsel %vm13651_vm4, %v18344_v43, %v2209_v61  ;;  %2221 = vst [vmem:[#allocation2 + $0x12c] sm:$0xf] %v2220_v5  ;;  %v18349_v61 = vld [vmem:[#allocation32_spill] sm:$0xff]  ;;  %v18352_v32 = vld [vmem:[#allocation34_spill] sm:$0xff]  ;;  %v18354_v53 = vld [vmem:[#allocation37_spill] sm:$0xff] }
 0x2ec   :  { %2211 = vst [vmem:[#allocation2 + $0x11c] sm:$0x1] %v2210_v40  ;;  %v18350_v14 = vrot.slane %v18349_v61, 4  ;;  %v18353_v29 = vrot.slane %v18352_v32, 4  ;;  %v2234_v46 = vsel %vm14816_vm7, %v18354_v53, %v2233_v19  ;;  %v2282_v50 = vld [vmem:[#allocation2 + $0x198] sm:$0xf] }
 0x2ed   :  { %v2286_v38 = vld [vmem:[#allocation2 + $0x1a0] sm:$0x1]  ;;  %2228 = vst [vmem:[#allocation2 + $0x138] sm:$0xf] %v2227_v37  ;;  %2235 = vst [vmem:[#allocation2 + $0x144] sm:$0xf] %v2234_v46  ;;  %v2283_v11 = vsel %vm14816_vm7, %v14892_v49, %v2282_v50 }
 0x2ee   :  { %v2224_v28 = vsel %vm13651_vm4, %v18350_v14, %v2223_v47  ;;  %v2231_v52 = vsel %vm13651_vm4, %v18353_v29, %v2230_v10  ;;  %v18355_v47 = vld [vmem:[#allocation36_spill] sm:$0xff]  ;;  %v18357_v27 = vld [vmem:[#allocation23_spill] sm:$0xff]  ;;  %v18358_v48 = vld [vmem:[#allocation38_spill] sm:$0xff]  ;;  %2284 = vst [vmem:[#allocation2 + $0x198] sm:$0xf] %v2283_v11 }
 0x2ef   :  { %2225 = vst [vmem:[#allocation2 + $0x134] sm:$0x1] %v2224_v28  ;;  %2232 = vst [vmem:[#allocation2 + $0x140] sm:$0x1] %v2231_v52  ;;  %v18356_v25 = vrot.slane %v18355_v47, 4  ;;  %v2241_v10 = vsel %vm14816_vm7, %v18357_v27, %v15028_v54  ;;  %v18359_v2 = vrot.slane %v18358_v48, 4 }
 0x2f0   :  { %v18360_v57 = vld [vmem:[#allocation8_spill] sm:$0xff]  ;;  %2242 = vst [vmem:[#allocation2 + $0x150] sm:$0xf] %v2241_v10  ;;  %v18361_v31 = vld [vmem:[#allocation27_spill] sm:$0xff]  ;;  %v18364_v23 = vld [vmem:[#allocation9_spill] sm:$0xff] }
 0x2f1   :  { %v2238_v58 = vsel %vm13651_vm4, %v18356_v25, %v2237_v33  ;;  %v2245_v19 = vsel %vm13651_vm4, %v18359_v2, %v2244_v1  ;;  %v2248_v15 = vsel %vm14816_vm7, %v18360_v57, %v2247_v36  ;;  %v18362_v33 = vrot.slane %v18361_v31, 4  ;;  %v18363_v0 = vld [vmem:[#allocation12_spill] sm:$0xff]  ;;  %v18366_v56 = vld [vmem:[#allocation17_spill] sm:$0xff]  ;;  %v2577_v6 = vld [vmem:[#allocation2] sm:$0xf] }
 0x2f2   :  { %2239 = vst [vmem:[#allocation2 + $0x14c] sm:$0x1] %v2238_v58  ;;  %2246 = vst [vmem:[#allocation2 + $0x158] sm:$0x1] %v2245_v19  ;;  %v2255_v54 = vsel %vm14816_vm7, %v18363_v0, %v2254_v22  ;;  %v18365_v39 = vrot.slane %v18364_v23, 4  ;;  %v2262_v36 = vsel %vm14816_vm7, %v18366_v56, %v2261_v26  ;;  %v18369_v9 = vld [vmem:[#allocation6_spill] sm:$0xff] }
 0x2f3   :  { %2249 = vst [vmem:[#allocation2 + $0x15c] sm:$0xf] %v2248_v15  ;;  %v2252_v34 = vsel %vm13651_vm4, %v18362_v33, %v2251_v62  ;;  %v2578_v7 = vld [vmem:[#allocation2 + $0x4] sm:$0xf]  ;;  %2256 = vst [vmem:[#allocation2 + $0x168] sm:$0xf] %v2255_v54  ;;  %v2269_v45 = vsel %vm14816_vm7, %v18369_v9, %v2268_v24  ;;  %v2287_v24 = vsel %vm13651_vm4, %v1962_v59, %v2286_v38 }
 0x2f4   :  { %v2259_v1 = vsel %vm13651_vm4, %v18365_v39, %v2258_v55  ;;  %2253 = vst [vmem:[#allocation2 + $0x164] sm:$0x1] %v2252_v34  ;;  %2263 = vst [vmem:[#allocation2 + $0x174] sm:$0xf] %v2262_v36  ;;  %v18367_v62 = vld [vmem:[#allocation18_spill] sm:$0xff]  ;;  %v18370_v55 = vld [vmem:[#allocation7_spill] sm:$0xff] }
 0x2f5   :  { %2260 = vst [vmem:[#allocation2 + $0x170] sm:$0x1] %v2259_v1  ;;  %v18368_v16 = vrot.slane %v18367_v62, 4  ;;  %v18371_v63 = vrot.slane %v18370_v55, 4  ;;  %v18372_v60 = vld [vmem:[#allocation15_spill] sm:$0xff]  ;;  %v12679_v40 = vld [vmem:[#allocation2 + $0xfc] sm:$0xff]  }
 0x2f6   :  { %v2276_v13 = vsel %vm14816_vm7, %v18372_v60, %v2275_v18  ;;  %v2579_v26 = vld [vmem:[#allocation2 + $0x8] sm:$0x1]  ;;  %2270 = vst [vmem:[#allocation2 + $0x180] sm:$0xf] %v2269_v45  ;;  %v2580_v43 = vld [vmem:[#allocation2 + $0xc] sm:$0xf]  ;;  %9289 = vmatprep.mubr.bf16.mxu1 %v12679_v40 }
 0x2f7   :  { %v2266_v22 = vsel %vm13651_vm4, %v18368_v16, %v2265_v41  ;;  %v2273_v8 = vsel %vm13651_vm4, %v18371_v63, %v2272_v12  ;;  %2277 = vst [vmem:[#allocation2 + $0x18c] sm:$0xf] %v2276_v13  ;;  %v3659_v12 = vld [vmem:[#allocation2 + $0xf4] sm:$0xf]  ;;  %2288 = vst [vmem:[#allocation2 + $0x1a0] sm:$0x1] %v2287_v24 }
 0x2f8   :  { %2267 = vst [vmem:[#allocation2 + $0x17c] sm:$0x1] %v2266_v22  ;;  %2274 = vst [vmem:[#allocation2 + $0x188] sm:$0x1] %v2273_v8  ;;  %v2677_v21 = vshrl.u32 %v2577_v6, 16  ;;  %v2680_v4 = vshll.u32 %v2577_v6, 16 }
 0x2f9   :  { %v2686_v42 = vshll.u32 %v2578_v7, 16  ;;  %v2581_v3 = vld [vmem:[#allocation2 + $0x10] sm:$0xf]  ;;  %v2690_v20 = vshrl.u32 %v2578_v7, 16  ;;  %v2696_v30 = vshll.u32 %v2579_v26, 16  ;;  %v3927_v28 = vrot.slane %v3659_v12, 5 }
 0x2fa   :  { %v3658_v44 = vld [vmem:[#allocation2 + $0xf0] sm:$0xe]  ;;  %v3660_v49 = vld [vmem:[#allocation2 + $0xf8] sm:$0x1]  ;;  %v2679_v17 = vrot.slane %v2677_v21, 4  ;;  %v2682_v5 = vrot.slane %v2680_v4, 5 }
 0x2fb   :  { %v2688_v35 = vrot.slane %v2686_v42, 5  ;;  %v2692_v59 = vrot.slane %v2690_v20, 4  ;;  %v2698_v41 = vrot.slane %v2696_v30, 5  ;;  %v11258_v18 = vrot.slane %v3658_v44, 9  ;;  %v2582_v37 = vld [vmem:[#allocation2 + $0x14] sm:$0x1] }
 0x2fc   :  { %v2683_v61 = vor.u32 %v2682_v5, %v2679_v17  ;;  %v3930_v51 = vrot.slane %v3660_v49, 5  ;;  %v2701_v32 = vshrl.u32 %v2580_v43, 16  ;;  %v2704_v53 = vshll.u32 %v2580_v43, 16  ;;  %v2583_v38 = vld [vmem:[#allocation2 + $0x18] sm:$0xf]  ;;  %v12682_v27 = vld [vmem:[%s17897_s4 + $0x100] sm:$0xff]  }
 0x2fd   :  { %v2693_v52 = vor.u32 %v2692_v59, %v2688_v35  ;;  %v2710_v46 = vshll.u32 %v2581_v3, 16  ;;  %v2714_v50 = vshrl.u32 %v2581_v3, 16  ;;  %v3928_v25 = vsel %vm15165_vm12, %v11258_v18, %v3927_v28  ;;  %v12681_v2 = vld [vmem:[#allocation2] sm:$0xff]   ;;  %v2584_v31 = vld [vmem:[#allocation2 + $0x1c] sm:$0xf]  ;;  %v12683_v16 = vld [vmem:[#allocation2 + $0x108] sm:$0xff]  }
 0x2fe   :  { %v2684_v47 = vrot.slane %v2683_v61, 4  ;;  %v3929_v58 = vrot.slane %v3927_v28, 4  ;;  %v2703_v10 = vrot.slane %v2701_v32, 4  ;;  %v2706_v19 = vrot.slane %v2704_v53, 5  ;;  %v3662_v23 = vld [vmem:[#allocation2 + $0x100] sm:$0xf] }
 0x2ff   :  { %v2694_v48 = vrot.slane %v2693_v52, 4  ;;  %v2712_v57 = vrot.slane %v2710_v46, 5  ;;  %v2716_v15 = vrot.slane %v2714_v50, 4  ;;  %v2720_v0 = vshll.u32 %v2582_v37, 16  ;;  %v2585_v6 = vld [vmem:[#allocation2 + $0x20] sm:$0x1] }
 0x300   :  { %v2689_v33 = vsel %vm15171_vm13, %v2684_v47, %v2688_v35  ;;  %v3931_v34 = vsel %vm15165_vm12, %v3929_v58, %v3930_v51  ;;  %v2725_v54 = vshrl.u32 %v2583_v38, 16  ;;  %v2707_v56 = vor.u32 %v2706_v19, %v2703_v10  ;;  %v3661_v7 = vld [vmem:[#allocation2 + $0xfc] sm:$0xe]  ;;  %v12685_v55 = vld [vmem:[%s17897_s4 + $0x108] sm:$0xff]   ;;  %v2586_v63 = vld [vmem:[#allocation2 + $0x24] sm:$0xf] }
 0x301   :  { %v2699_v39 = vsel %vm15171_vm13, %v2694_v48, %v2698_v41  ;;  %v11290_v1 = vcombine.low %v3928_v25, %v3931_v34  ;;  %v2717_v36 = vor.u32 %v2716_v15, %v2712_v57  ;;  %v2722_v22 = vrot.slane %v2720_v0, 5  ;;  %v3663_v11 = vld [vmem:[#allocation2 + $0x104] sm:$0x1]  ;;  %v2587_v20 = vld [vmem:[#allocation2 + $0x28] sm:$0xf]  ;;  %v12686_v0 = vld [vmem:[#allocation2 + $0x114] sm:$0xff]  }
 0x302   :  { %v11208_v62 = vcombine.low %v2689_v33, %v2699_v39  ;;  %v2727_v9 = vrot.slane %v2725_v54, 4  ;;  %v2728_v45 = vshll.u32 %v2583_v38, 16  ;;  %v2708_v8 = vrot.slane %v2707_v56, 4  ;;  %v2588_v35 = vld [vmem:[#allocation2 + $0x2c] sm:$0x1]  ;;  %v12820_v59 = vld [vmem:[%s17897_s4 + $0x80] sm:$0xff]  }
 0x303   :  { %9290 = vmatmul.mubr.bf16.vlgmr.msra.gmra.mrb[0].mxu1 %v11290_v1  ;;  %v2718_v60 = vrot.slane %v2717_v36, 4  ;;  %v2734_v13 = vshll.u32 %v2584_v31, 16  ;;  %v2738_v26 = vshrl.u32 %v2584_v31, 16  ;;  %v2744_v12 = vshll.u32 %v2585_v6, 16  ;;  %v3664_v51 = vld [vmem:[#allocation2 + $0x108] sm:$0xe] }
 0x304   :  { %8856 = vmatprep.mubr.bf16.mxu0 %v11208_v62  ;;  %9403 = vmatpush1.bf16.msra.mxu1 %v12682_v27  ;;  %v2730_v24 = vrot.slane %v2728_v45, 5  ;;  %v11259_v43 = vrot.slane %v3661_v7, 9  ;;  %v3934_v40 = vrot.slane %v3662_v23, 5  ;;  %v2713_v21 = vsel %vm15171_vm13, %v2708_v8, %v2712_v57  ;;  %v3665_v37 = vld [vmem:[#allocation2 + $0x10c] sm:$0xf]  ;;  %v12688_v27 = vld [vmem:[%s17897_s4 + $0x110] sm:$0xff]  }
 0x305   :  { %8857 = vmatmul.mubr.bf16.vlgmr.msra.gmra.mrb[64].mxu0 %v12681_v2  ;;  %9297 = vmatprep.mubr.bf16.mxu1 %v12683_v16  ;;  %v2723_v4 = vsel %vm15171_vm13, %v2718_v60, %v2722_v22  ;;  %v2736_v42 = vrot.slane %v2734_v13, 5  ;;  %v2740_v3 = vrot.slane %v2738_v26, 4  ;;  %v2746_v49 = vrot.slane %v2744_v12, 5  ;;  %v2590_v50 = vld [vmem:[#allocation2 + $0x34] sm:$0xf]  ;;  %v12821_v31 = vld [vmem:[%s17897_s4 + $0x88] sm:$0xff]  }
 0x306   :  { %v11209_v30 = vcombine.low %v2713_v21, %v2723_v4  ;;  %v2731_v44 = vor.u32 %v2730_v24, %v2727_v9  ;;  %v18377_v17 = vmov 0   ;;  %v3935_v5 = vsel %vm15165_vm12, %v11259_v43, %v3934_v40  ;;  %9114 = vmatpush1.bf16.msra.mxu0 %v12820_v59  ;;  %v3666_v10 = vld [vmem:[#allocation2 + $0x110] sm:$0x1]  ;;  %v2591_v7 = vld [vmem:[#allocation2 + $0x38] sm:$0x1]  ;;  %v12693_v59 = vld [vmem:[%s17897_s4 + $0x120] sm:$0xff]  }
 0x307   :  { %9404 = vmatprep.subr.bf16.mxu1 %v18377_v17  ;;  %v2741_v41 = vor.u32 %v2740_v3, %v2736_v42  ;;  %v3936_v18 = vrot.slane %v3934_v40, 4  ;;  %v3937_v61 = vrot.slane %v3663_v11, 5  ;;  %v2749_v28 = vshrl.u32 %v2586_v63, 16  ;;  %9115 = vmatprep.subr.bf16.mxu0 %v18377_v17  ;;  %v2589_v15 = vld [vmem:[#allocation2 + $0x30] sm:$0xf]  ;;  %v12691_v13 = vld [vmem:[%s17897_s4 + $0x118] sm:$0xff]  }
 0x308   :  { %8864 = vmatprep.mubr.bf16.mxu0 %v11209_v30  ;;  %v2732_v32 = vrot.slane %v2731_v44, 4  ;;  %9405 = vmatpush1.bf16.msra.mxu1 %v12685_v55  ;;  %v2752_v52 = vshll.u32 %v2586_v63, 16  ;;  %v2758_v53 = vshll.u32 %v2587_v20, 16  ;;  %v2762_v46 = vshrl.u32 %v2587_v20, 16  ;;  %v12684_v33 = vld [vmem:[#allocation2 + $0xc] sm:$0xff]  }
 0x309   :  { %v2742_v38 = vrot.slane %v2741_v41, 4  ;;  %v3938_v47 = vsel %vm15165_vm12, %v3936_v18, %v3937_v61  ;;  %9406 = vmatprep.subr.bf16.mxu1 %v18377_v17  ;;  %v2751_v25 = vrot.slane %v2749_v28, 4  ;;  %v2768_v58 = vshll.u32 %v2588_v35, 16  ;;  %v3667_v45 = vld [vmem:[#allocation2 + $0x114] sm:$0xe] }
 0x30a   :  { %v2737_v48 = vsel %vm15171_vm13, %v2732_v32, %v2736_v42  ;;  %v11291_v2 = vcombine.low %v3935_v5, %v3938_v47  ;;  %v2754_v19 = vrot.slane %v2752_v52, 5  ;;  %v2760_v57 = vrot.slane %v2758_v53, 5  ;;  %9116 = vmatpush1.bf16.msra.mxu0 %v12821_v31  ;;  %v3668_v55 = vld [vmem:[#allocation2 + $0x118] sm:$0xf]  ;;  %v12822_v40 = vld [vmem:[%s17897_s4 + $0x90] sm:$0xff]   ;;  %v12689_v52 = vld [vmem:[#allocation2 + $0x120] sm:$0xff]  }
 0x30b   :  { %v2747_v34 = vsel %vm15171_vm13, %v2742_v38, %v2746_v49  ;;  %v2764_v54 = vrot.slane %v2762_v46, 4  ;;  %v2770_v23 = vrot.slane %v2768_v58, 5  ;;  %v11260_v39 = vrot.slane %v3664_v51, 9  ;;  %9117 = vmatprep.subr.bf16.mxu0 %v18377_v17  ;;  %v3669_v20 = vld [vmem:[#allocation2 + $0x11c] sm:$0x1] }
 0x30c   :  { %v11210_v1 = vcombine.low %v2737_v48, %v2747_v34  ;;  %9298 = vmatmul.mubr.bf16.gmra.mrb[4].mxu1 %v11291_v2  ;;  %v2755_v56 = vor.u32 %v2754_v19, %v2751_v25  ;;  %v3941_v36 = vrot.slane %v3665_v37, 5  ;;  %v3944_v6 = vrot.slane %v3666_v10, 5  ;;  %v2592_v30 = vld [vmem:[#allocation2 + $0x3c] sm:$0xf]  ;;  %v2593_v41 = vld [vmem:[#allocation2 + $0x40] sm:$0xf] }
 0x30d   :  { %8865 = vmatmul.mubr.bf16.gmra.mrb[68].mxu0 %v12684_v33  ;;  %9305 = vmatprep.mubr.bf16.mxu1 %v12686_v0  ;;  %v2765_v62 = vor.u32 %v2764_v54, %v2760_v57  ;;  %v2773_v16 = vshrl.u32 %v2589_v15, 16  ;;  %v2776_v22 = vshll.u32 %v2589_v15, 16  ;;  %v2782_v9 = vshll.u32 %v2590_v50, 16  ;;  %v2594_v18 = vld [vmem:[#allocation2 + $0x44] sm:$0x1]  ;;  %v12687_v32 = vld [vmem:[#allocation2 + $0x18] sm:$0xff]  }
 0x30e   :  { %8872 = vmatprep.mubr.bf16.mxu0 %v11210_v1  ;;  %v2756_v63 = vrot.slane %v2755_v56, 4  ;;  %9407 = vmatpush1.bf16.msra.mxu1 %v12688_v27  ;;  %v3942_v8 = vsel %vm15165_vm12, %v11260_v39, %v3941_v36  ;;  %v3943_v60 = vrot.slane %v3941_v36, 4  ;;  %v2786_v26 = vshrl.u32 %v2590_v50, 16  ;;  %v3671_v47 = vld [vmem:[#allocation2 + $0x124] sm:$0xf]  ;;  %v12823_v25 = vld [vmem:[%s17897_s4 + $0x98] sm:$0xff]  }
 0x30f   :  { %v2766_v11 = vrot.slane %v2765_v62, 4  ;;  %9408 = vmatprep.subr.bf16.mxu1 %v18377_v17  ;;  %v2775_v24 = vrot.slane %v2773_v16, 4  ;;  %v2778_v12 = vrot.slane %v2776_v22, 5  ;;  %v2784_v43 = vrot.slane %v2782_v9, 5  ;;  %9118 = vmatpush1.bf16.msra.mxu0 %v12822_v40  ;;  %v3670_v2 = vld [vmem:[#allocation2 + $0x120] sm:$0xe] }
 0x310   :  { %v2761_v21 = vsel %vm15171_vm13, %v2756_v63, %v2760_v57  ;;  %v3945_v4 = vsel %vm15165_vm12, %v3943_v60, %v3944_v6  ;;  %v2788_v42 = vrot.slane %v2786_v26, 4  ;;  %v2792_v3 = vshll.u32 %v2591_v7, 16  ;;  %9119 = vmatprep.subr.bf16.mxu0 %v18377_v17  ;;  %v3672_v33 = vld [vmem:[#allocation2 + $0x128] sm:$0x1]  ;;  %v2596_v0 = vld [vmem:[#allocation2 + $0x4c] sm:$0xf] }
 0x311   :  { %v2771_v44 = vsel %vm15171_vm13, %v2766_v11, %v2770_v23  ;;  %v11292_v49 = vcombine.low %v3942_v8, %v3945_v4  ;;  %v2779_v5 = vor.u32 %v2778_v12, %v2775_v24  ;;  %v11261_v35 = vrot.slane %v3667_v45, 9  ;;  %v12696_v34 = vld [vmem:[%s17897_s4 + $0x128] sm:$0xff]   ;;  %v12824_v16 = vld [vmem:[%s17897_s4 + $0xa0] sm:$0xff]   ;;  %v2597_v60 = vld [vmem:[#allocation2 + $0x50] sm:$0x1] }
 0x312   :  { %v11211_v61 = vcombine.low %v2761_v21, %v2771_v44  ;;  %9409 = vmatpush1.bf16.msra.mxu1 %v12691_v13  ;;  %v2789_v28 = vor.u32 %v2788_v42, %v2784_v43  ;;  %v2794_v51 = vrot.slane %v2792_v3, 5  ;;  %v3948_v37 = vrot.slane %v3668_v55, 5  ;;  %v2595_v56 = vld [vmem:[#allocation2 + $0x48] sm:$0xf]  ;;  %v3674_v11 = vld [vmem:[#allocation2 + $0x130] sm:$0xf] }
 0x313   :  { %v2780_v53 = vrot.slane %v2779_v5, 4  ;;  %v3951_v46 = vrot.slane %v3669_v20, 5  ;;  %9410 = vmatprep.subr.bf16.mxu1 %v18377_v17  ;;  %v2797_v50 = vshrl.u32 %v2592_v30, 16  ;;  %v2800_v38 = vshll.u32 %v2592_v30, 16  ;;  %9120 = vmatpush1.bf16.msra.mxu0 %v12823_v25  ;;  %v12699_v24 = vld [vmem:[%s17897_s4 + $0x130] sm:$0xff]   ;;  %v12690_v12 = vld [vmem:[#allocation2 + $0x24] sm:$0xff]  }
 0x314   :  { %9306 = vmatmul.mubr.bf16.gmra.mrb[8].mxu1 %v11292_v49  ;;  %v2790_v58 = vrot.slane %v2789_v28, 4  ;;  %v3949_v27 = vsel %vm15165_vm12, %v11261_v35, %v3948_v37  ;;  %v3950_v10 = vrot.slane %v3948_v37, 4  ;;  %v2806_v48 = vshll.u32 %v2593_v41, 16  ;;  %9121 = vmatprep.subr.bf16.mxu0 %v18377_v17  ;;  %v3673_v42 = vld [vmem:[#allocation2 + $0x12c] sm:$0xe] }
 0x315   :  { %8873 = vmatmul.mubr.bf16.gmra.mrb[72].mxu0 %v12687_v32  ;;  %9313 = vmatprep.mubr.bf16.mxu1 %v12689_v52  ;;  %v2785_v19 = vsel %vm15171_vm13, %v2780_v53, %v2784_v43  ;;  %v2799_v57 = vrot.slane %v2797_v50, 4  ;;  %v2802_v15 = vrot.slane %v2800_v38, 5  ;;  %v2810_v31 = vshrl.u32 %v2593_v41, 16  ;;  %v2598_v3 = vld [vmem:[#allocation2 + $0x54] sm:$0xf]  ;;  %v12692_v20 = vld [vmem:[#allocation2 + $0x12c] sm:$0xff]  }
 0x316   :  { %8880 = vmatprep.mubr.bf16.mxu0 %v11211_v61  ;;  %v2795_v54 = vsel %vm15171_vm13, %v2790_v58, %v2794_v51  ;;  %v3952_v23 = vsel %vm15165_vm12, %v3950_v10, %v3951_v46  ;;  %9411 = vmatpush1.bf16.msra.mxu1 %v12693_v59  ;;  %v2808_v39 = vrot.slane %v2806_v48, 5  ;;  %v2816_v1 = vshll.u32 %v2594_v18, 16  ;;  %v3675_v35 = vld [vmem:[#allocation2 + $0x134] sm:$0x1]  ;;  %v12825_v59 = vld [vmem:[%s17897_s4 + $0xa8] sm:$0xff]   ;;  %v12702_v58 = vld [vmem:[%s17897_s4 + $0x138] sm:$0xff]  }
 0x317   :  { %v11212_v36 = vcombine.low %v2785_v19, %v2795_v54  ;;  %v11293_v6 = vcombine.low %v3949_v27, %v3952_v23  ;;  %v2803_v7 = vor.u32 %v2802_v15, %v2799_v57  ;;  %v2812_v62 = vrot.slane %v2810_v31, 4  ;;  %9412 = vmatprep.subr.bf16.mxu1 %v18377_v17  ;;  %9122 = vmatpush1.bf16.msra.mxu0 %v12824_v16  ;;  %v2599_v53 = vld [vmem:[#allocation2 + $0x58] sm:$0xf]  ;;  %v2600_v25 = vld [vmem:[#allocation2 + $0x5c] sm:$0x1]  ;;  %v12826_v15 = vld [vmem:[%s17897_s4 + $0xb0] sm:$0xff]  }
 0x318   :  { %v2818_v22 = vrot.slane %v2816_v1, 5  ;;  %v11262_v9 = vrot.slane %v3670_v2, 9  ;;  %v3955_v45 = vrot.slane %v3671_v47, 5  ;;  %v3958_v55 = vrot.slane %v3672_v33, 5  ;;  %9123 = vmatprep.subr.bf16.mxu0 %v18377_v17  ;;  %v3676_v19 = vld [vmem:[#allocation2 + $0x138] sm:$0xe] }
 0x319   :  { %v2804_v63 = vrot.slane %v2803_v7, 4  ;;  %v2813_v8 = vor.u32 %v2812_v62, %v2808_v39  ;;  %v2821_v13 = vshrl.u32 %v2595_v56, 16  ;;  %v2824_v26 = vshll.u32 %v2595_v56, 16  ;;  %v3677_v57 = vld [vmem:[#allocation2 + $0x13c] sm:$0xf] }
 0x31a   :  { %v15259_v43 = vsel %vm15165_vm12, %v11262_v9, %v3955_v45  ;;  %v3957_v40 = vrot.slane %v3955_v45, 4  ;;  %9413 = vmatpush1.bf16.msra.mxu1 %v12696_v34  ;;  %v2830_v21 = vshll.u32 %v2596_v0, 16  ;;  %v2834_v4 = vshrl.u32 %v2596_v0, 16  ;;  %v3678_v54 = vld [vmem:[#allocation2 + $0x140] sm:$0x1]  ;;  %v12694_v9 = vld [vmem:[#allocation2 + $0x30] sm:$0xff]  }
 0x31b   :  { %v2809_v30 = vsel %vm15171_vm13, %v2804_v63, %v2808_v39  ;;  %v2814_v44 = vrot.slane %v2813_v8, 4  ;;  %v2823_v49 = vrot.slane %v2821_v13, 4  ;;  %v2826_v5 = vrot.slane %v2824_v26, 5  ;;  %9414 = vmatprep.subr.bf16.mxu1 %v18377_v17  ;;  %9124 = vmatpush1.bf16.msra.mxu0 %v12825_v59  ;;  %v2601_v23 = vld [vmem:[#allocation2 + $0x60] sm:$0xf]  ;;  %v12695_v45 = vld [vmem:[#allocation2 + $0x138] sm:$0xff]  }
 0x31c   :  { %9314 = vmatmul.mubr.bf16.gmra.mrb[12].mxu1 %v11293_v6  ;;  %v3959_v41 = vsel %vm15165_vm12, %v3957_v40, %v3958_v55  ;;  %v2832_v18 = vrot.slane %v2830_v21, 5  ;;  %v2836_v61 = vrot.slane %v2834_v4, 4  ;;  %v2840_v28 = vshll.u32 %v2597_v60, 16  ;;  %9125 = vmatprep.subr.bf16.mxu0 %v18377_v17  ;;  %v12704_v6 = vld [vmem:[%s17897_s4 + $0x140] sm:$0xff]   ;;  %v12827_v26 = vld [vmem:[%s17897_s4 + $0xb8] sm:$0xff]   ;;  %v12707_v59 = vld [vmem:[%s17897_s4 + $0x148] sm:$0xff]  }
 0x31d   :  { %8881 = vmatmul.mubr.bf16.gmra.mrb[76].mxu0 %v12690_v12  ;;  %9321 = vmatprep.mubr.bf16.mxu1 %v12692_v20  ;;  %v2819_v51 = vsel %vm15171_vm13, %v2814_v44, %v2818_v22  ;;  %v11294_v37 = vcombine.low %v15259_v43, %v3959_v41  ;;  %v2827_v32 = vor.u32 %v2826_v5, %v2823_v49  ;;  %v11263_v52 = vrot.slane %v3673_v42, 9  ;;  %v2602_v13 = vld [vmem:[#allocation2 + $0x64] sm:$0xf]  ;;  %v2603_v40 = vld [vmem:[#allocation2 + $0x68] sm:$0x1] }
 0x31e   :  { %8888 = vmatprep.mubr.bf16.mxu0 %v11212_v36  ;;  %v11213_v46 = vcombine.low %v2809_v30, %v2819_v51  ;;  %v2837_v50 = vor.u32 %v2836_v61, %v2832_v18  ;;  %v2842_v38 = vrot.slane %v2840_v28, 5  ;;  %v3962_v47 = vrot.slane %v3674_v11, 5  ;;  %9415 = vmatpush1.bf16.msra.mxu1 %v12699_v24  ;;  %v3679_v20 = vld [vmem:[#allocation2 + $0x144] sm:$0xe]  ;;  %v3680_v30 = vld [vmem:[#allocation2 + $0x148] sm:$0xf] }
 0x31f   :  { %v2828_v27 = vrot.slane %v2827_v32, 4  ;;  %v3965_v10 = vrot.slane %v3675_v35, 5  ;;  %v2845_v48 = vshrl.u32 %v2598_v3, 16  ;;  %v2848_v2 = vshll.u32 %v2598_v3, 16  ;;  %9416 = vmatprep.subr.bf16.mxu1 %v18377_v17  ;;  %9126 = vmatpush1.bf16.msra.mxu0 %v12826_v15  ;;  %v3681_v51 = vld [vmem:[#allocation2 + $0x14c] sm:$0x1] }
 0x320   :  { %v2838_v31 = vrot.slane %v2837_v50, 4  ;;  %v15282_v33 = vsel %vm15165_vm12, %v11263_v52, %v3962_v47  ;;  %v3964_v34 = vrot.slane %v3962_v47, 4  ;;  %v2854_v0 = vshll.u32 %v2599_v53, 16  ;;  %9127 = vmatprep.subr.bf16.mxu0 %v18377_v17  ;;  %v2604_v50 = vld [vmem:[#allocation2 + $0x6c] sm:$0xf] }
 0x321   :  { %v2833_v39 = vsel %vm15171_vm13, %v2828_v27, %v2832_v18  ;;  %v2847_v1 = vrot.slane %v2845_v48, 4  ;;  %v2850_v56 = vrot.slane %v2848_v2, 5  ;;  %v2858_v36 = vshrl.u32 %v2599_v53, 16  ;;  %v2605_v27 = vld [vmem:[#allocation2 + $0x70] sm:$0xf]  ;;  %v12697_v48 = vld [vmem:[#allocation2 + $0x3c] sm:$0xff]  }
 0x322   :  { %v2843_v7 = vsel %vm15171_vm13, %v2838_v31, %v2842_v38  ;;  %v15294_v62 = vsel %vm15165_vm12, %v3964_v34, %v3965_v10  ;;  %v2856_v16 = vrot.slane %v2854_v0, 5  ;;  %v2864_v22 = vshll.u32 %v2600_v25, 16  ;;  %9417 = vmatpush1.bf16.msra.mxu1 %v12702_v58  ;;  %v12710_v10 = vld [vmem:[%s17897_s4 + $0x150] sm:$0xff]   ;;  %v12698_v2 = vld [vmem:[#allocation2 + $0x144] sm:$0xff]  }
 0x323   :  { %v15296_v55 = vcombine.low %v2833_v39, %v2843_v7  ;;  %v11295_v63 = vcombine.low %v15282_v33, %v15294_v62  ;;  %v2851_v8 = vor.u32 %v2850_v56, %v2847_v1  ;;  %v2860_v60 = vrot.slane %v2858_v36, 4  ;;  %9418 = vmatprep.subr.bf16.mxu1 %v18377_v17  ;;  %9128 = vmatpush1.bf16.msra.mxu0 %v12827_v26  ;;  %v2606_v34 = vld [vmem:[#allocation2 + $0x74] sm:$0x1]  ;;  %v12829_v56 = vld [vmem:[%s17897_s4 + $0xc8] sm:$0xff]   ;;  %v3684_v33 = vld [vmem:[#allocation2 + $0x158] sm:$0x1] }
 0x324   :  { %9322 = vmatmul.mubr.bf16.gmra.mrb[16].mxu1 %v11294_v37  ;;  %v2866_v11 = vrot.slane %v2864_v22, 5  ;;  %v11264_v24 = vrot.slane %v3676_v19, 9  ;;  %v3969_v12 = vrot.slane %v3677_v57, 5  ;;  %v3972_v43 = vrot.slane %v3678_v54, 5  ;;  %9129 = vmatprep.subr.bf16.mxu0 %v18377_v17  ;;  %v12828_v37 = vld [vmem:[%s17897_s4 + $0xc0] sm:$0xff]  }
 0x325   :  { %8889 = vmatmul.mubr.bf16.gmra.mrb[80].mxu0 %v12694_v9  ;;  %9329 = vmatprep.mubr.bf16.mxu1 %v12695_v45  ;;  %v2852_v21 = vrot.slane %v2851_v8, 4  ;;  %v2861_v4 = vor.u32 %v2860_v60, %v2856_v16  ;;  %v2869_v42 = vshrl.u32 %v2601_v23, 16  ;;  %v2872_v3 = vshll.u32 %v2601_v23, 16  ;;  %v3683_v1 = vld [vmem:[#allocation2 + $0x154] sm:$0xf] }
 0x326   :  { %8896 = vmatprep.mubr.bf16.mxu0 %v11213_v46  ;;  %v15307_v44 = vsel %vm15165_vm12, %v11264_v24, %v3969_v12  ;;  %v3971_v49 = vrot.slane %v3969_v12, 4  ;;  %v2878_v5 = vshll.u32 %v2602_v13, 16  ;;  %v2882_v35 = vshrl.u32 %v2602_v13, 16  ;;  %9419 = vmatpush1.bf16.msra.mxu1 %v12704_v6  ;;  %v3682_v22 = vld [vmem:[#allocation2 + $0x150] sm:$0xe]  ;;  %v12713_v24 = vld [vmem:[%s17897_s4 + $0x158] sm:$0xff]  }
 0x327   :  { %v2857_v41 = vsel %vm15171_vm13, %v2852_v21, %v2856_v16  ;;  %v2862_v18 = vrot.slane %v2861_v4, 4  ;;  %v2871_v61 = vrot.slane %v2869_v42, 4  ;;  %v2874_v28 = vrot.slane %v2872_v3, 5  ;;  %9420 = vmatprep.subr.bf16.mxu1 %v18377_v17  ;;  %9130 = vmatpush1.bf16.msra.mxu0 %v12828_v37  ;;  %v2608_v21 = vld [vmem:[#allocation2 + $0x7c] sm:$0xf]  ;;  %v12830_v4 = vld [vmem:[%s17897_s4 + $0xd0] sm:$0xff]  }
 0x328   :  { %v15320_v32 = vsel %vm15165_vm12, %v3971_v49, %v3972_v43  ;;  %v2880_v52 = vrot.slane %v2878_v5, 5  ;;  %v2884_v53 = vrot.slane %v2882_v35, 4  ;;  %v2888_v46 = vshll.u32 %v2603_v40, 16  ;;  %9131 = vmatprep.subr.bf16.mxu0 %v18377_v17  ;;  %v2609_v35 = vld [vmem:[#allocation2 + $0x80] sm:$0x1] }
 0x329   :  { %v2867_v38 = vsel %vm15171_vm13, %v2862_v18, %v2866_v11  ;;  %v11296_v47 = vcombine.low %v15307_v44, %v15320_v32  ;;  %v2875_v25 = vor.u32 %v2874_v28, %v2871_v61  ;;  %v11265_v58 = vrot.slane %v3679_v20, 9  ;;  %v2607_v11 = vld [vmem:[#allocation2 + $0x78] sm:$0xf]  ;;  %v3686_v18 = vld [vmem:[#allocation2 + $0x160] sm:$0xf]  ;;  %v12700_v28 = vld [vmem:[#allocation2 + $0x48] sm:$0xff]  }
 0x32a   :  { %v15330_v19 = vcombine.low %v2857_v41, %v2867_v38  ;;  %v2885_v57 = vor.u32 %v2884_v53, %v2880_v52  ;;  %v2890_v15 = vrot.slane %v2888_v46, 5  ;;  %v3976_v31 = vrot.slane %v3680_v30, 5  ;;  %9421 = vmatpush1.bf16.msra.mxu1 %v12707_v59  ;;  %v12715_v61 = vld [vmem:[%s17897_s4 + $0x160] sm:$0xff]   ;;  %v3685_v46 = vld [vmem:[#allocation2 + $0x15c] sm:$0xe] }
 0x32b   :  { %v2876_v0 = vrot.slane %v2875_v25, 4  ;;  %v3979_v54 = vrot.slane %v3681_v51, 5  ;;  %v2893_v23 = vshrl.u32 %v2604_v50, 16  ;;  %v2896_v39 = vshll.u32 %v2604_v50, 16  ;;  %9422 = vmatprep.subr.bf16.mxu1 %v18377_v17  ;;  %9132 = vmatpush1.bf16.msra.mxu0 %v12829_v56  ;;  %v12701_v50 = vld [vmem:[#allocation2 + $0x150] sm:$0xff]  }
 0x32c   :  { %9330 = vmatmul.mubr.bf16.gmra.mrb[20].mxu1 %v11295_v63  ;;  %v2886_v36 = vrot.slane %v2885_v57, 4  ;;  %v15341_v6 = vsel %vm15165_vm12, %v11265_v58, %v3976_v31  ;;  %v3978_v7 = vrot.slane %v3976_v31, 4  ;;  %v2902_v16 = vshll.u32 %v2605_v27, 16  ;;  %9133 = vmatprep.subr.bf16.mxu0 %v18377_v17 }
 0x32d   :  { %8897 = vmatmul.mubr.bf16.gmra.mrb[84].mxu0 %v12697_v48  ;;  %9337 = vmatprep.mubr.bf16.mxu1 %v12698_v2  ;;  %v2881_v9 = vsel %vm15171_vm13, %v2876_v0, %v2880_v52  ;;  %v2895_v45 = vrot.slane %v2893_v23, 4  ;;  %v2898_v8 = vrot.slane %v2896_v39, 5  ;;  %v2906_v60 = vshrl.u32 %v2605_v27, 16  ;;  %v12831_v48 = vld [vmem:[%s17897_s4 + $0xd8] sm:$0xff]  }
 0x32e   :  { %8904 = vmatprep.mubr.bf16.mxu0 %v15296_v55  ;;  %v2891_v62 = vsel %vm15171_vm13, %v2886_v36, %v2890_v15  ;;  %v15351_v63 = vsel %vm15165_vm12, %v3978_v7, %v3979_v54  ;;  %v2904_v13 = vrot.slane %v2902_v16, 5  ;;  %v2912_v26 = vshll.u32 %v2606_v34, 16  ;;  %9423 = vmatpush1.bf16.msra.mxu1 %v12710_v10  ;;  %v3687_v10 = vld [vmem:[#allocation2 + $0x164] sm:$0x1]  ;;  %v12718_v36 = vld [vmem:[%s17897_s4 + $0x168] sm:$0xff]  }
 0x32f   :  { %v15356_v12 = vcombine.low %v2881_v9, %v2891_v62  ;;  %v11297_v55 = vcombine.low %v15341_v6, %v15351_v63  ;;  %v2899_v43 = vor.u32 %v2898_v8, %v2895_v45  ;;  %v2908_v40 = vrot.slane %v2906_v60, 4  ;;  %9424 = vmatprep.subr.bf16.mxu1 %v18377_v17  ;;  %9134 = vmatpush1.bf16.msra.mxu0 %v12830_v4  ;;  %v2610_v34 = vld [vmem:[#allocation2 + $0x84] sm:$0xf]  ;;  %v3689_v8 = vld [vmem:[#allocation2 + $0x16c] sm:$0xf] }
 0x330   :  { %v2914_v42 = vrot.slane %v2912_v26, 5  ;;  %v11266_v3 = vrot.slane %v3682_v22, 9  ;;  %v3983_v20 = vrot.slane %v3683_v1, 5  ;;  %v3986_v30 = vrot.slane %v3684_v33, 5  ;;  %9135 = vmatprep.subr.bf16.mxu0 %v18377_v17  ;;  %v2612_v22 = vld [vmem:[#allocation2 + $0x8c] sm:$0x1] }
 0x331   :  { %v2900_v49 = vrot.slane %v2899_v43, 4  ;;  %v2909_v5 = vor.u32 %v2908_v40, %v2904_v13  ;;  %v2917_v59 = vshrl.u32 %v2607_v11, 16  ;;  %v2920_v41 = vshll.u32 %v2607_v11, 16  ;;  %v3688_v26 = vld [vmem:[#allocation2 + $0x168] sm:$0xe] }
 0x332   :  { %v15370_v51 = vsel %vm15165_vm12, %v11266_v3, %v3983_v20  ;;  %v3985_v37 = vrot.slane %v3983_v20, 4  ;;  %v2926_v52 = vshll.u32 %v2608_v21, 16  ;;  %v2930_v53 = vshrl.u32 %v2608_v21, 16  ;;  %9425 = vmatpush1.bf16.msra.mxu1 %v12713_v24  ;;  %v3690_v21 = vld [vmem:[#allocation2 + $0x170] sm:$0x1] }
 0x333   :  { %v2905_v38 = vsel %vm15171_vm13, %v2900_v49, %v2904_v13  ;;  %v2910_v25 = vrot.slane %v2909_v5, 4  ;;  %v2919_v58 = vrot.slane %v2917_v59, 4  ;;  %v2922_v27 = vrot.slane %v2920_v41, 5  ;;  %9426 = vmatprep.subr.bf16.mxu1 %v18377_v17  ;;  %9136 = vmatpush1.bf16.msra.mxu0 %v12831_v48  ;;  %v12721_v49 = vld [vmem:[%s17897_s4 + $0x170] sm:$0xff]   ;;  %v3692_v48 = vld [vmem:[#allocation2 + $0x178] sm:$0xf] }
 0x334   :  { %9338 = vmatmul.mubr.bf16.gmra.mrb[24].mxu1 %v11296_v47  ;;  %v15383_v2 = vsel %vm15165_vm12, %v3985_v37, %v3986_v30  ;;  %v2928_v57 = vrot.slane %v2926_v52, 5  ;;  %v2932_v15 = vrot.slane %v2930_v53, 4  ;;  %v2936_v31 = vshll.u32 %v2609_v35, 16  ;;  %9137 = vmatprep.subr.bf16.mxu0 %v18377_v17  ;;  %v2611_v47 = vld [vmem:[#allocation2 + $0x88] sm:$0xf]  ;;  %v12703_v5 = vld [vmem:[#allocation2 + $0x54] sm:$0xff]  }
 0x335   :  { %8905 = vmatmul.mubr.bf16.gmra.mrb[88].mxu0 %v12700_v28  ;;  %9345 = vmatprep.mubr.bf16.mxu1 %v12701_v50  ;;  %v2915_v0 = vsel %vm15171_vm13, %v2910_v25, %v2914_v42  ;;  %v11298_v54 = vcombine.low %v15370_v51, %v15383_v2  ;;  %v2923_v44 = vor.u32 %v2922_v27, %v2919_v58  ;;  %v11267_v32 = vrot.slane %v3685_v46, 9  ;;  %v2613_v30 = vld [vmem:[#allocation2 + $0x90] sm:$0xf]  ;;  %v12705_v35 = vld [vmem:[#allocation2 + $0x15c] sm:$0xff]   ;;  %v2614_v28 = vld [vmem:[#allocation2 + $0x94] sm:$0xf] }
 0x336   :  { %8912 = vmatprep.mubr.bf16.mxu0 %v15330_v19  ;;  %v15391_v23 = vcombine.low %v2905_v38, %v2915_v0  ;;  %v2933_v39 = vor.u32 %v2932_v15, %v2928_v57  ;;  %v2938_v1 = vrot.slane %v2936_v31, 5  ;;  %v3990_v56 = vrot.slane %v3686_v18, 5  ;;  %9427 = vmatpush1.bf16.msra.mxu1 %v12715_v61  ;;  %v12832_v19 = vld [vmem:[%s17897_s4 + $0xe0] sm:$0xff]   ;;  %v12833_v37 = vld [vmem:[%s17897_s4 + $0xe8] sm:$0xff]   ;;  %v2615_v38 = vld [vmem:[#allocation2 + $0x98] sm:$0x1] }
 0x337   :  { %v2924_v7 = vrot.slane %v2923_v44, 4  ;;  %v3993_v16 = vrot.slane %v3687_v10, 5  ;;  %v2941_v9 = vshrl.u32 %v2610_v34, 16  ;;  %v2944_v45 = vshll.u32 %v2610_v34, 16  ;;  %9428 = vmatprep.subr.bf16.mxu1 %v18377_v17  ;;  %9138 = vmatpush1.bf16.msra.mxu0 %v12832_v19  ;;  %v3691_v15 = vld [vmem:[#allocation2 + $0x174] sm:$0xe] }
 0x338   :  { %v2934_v60 = vrot.slane %v2933_v39, 4  ;;  %v15402_v33 = vsel %vm15165_vm12, %v11267_v32, %v3990_v56  ;;  %v3992_v62 = vrot.slane %v3990_v56, 4  ;;  %v2950_v13 = vshll.u32 %v2611_v47, 16  ;;  %9139 = vmatprep.subr.bf16.mxu0 %v18377_v17  ;;  %v12723_v31 = vld [vmem:[%s17897_s4 + $0x178] sm:$0xff]   ;;  %v12706_v19 = vld [vmem:[#allocation2 + $0x60] sm:$0xff]  }
 0x339   :  { %v2929_v11 = vsel %vm15171_vm13, %v2924_v7, %v2928_v57  ;;  %v2943_v24 = vrot.slane %v2941_v9, 4  ;;  %v2946_v43 = vrot.slane %v2944_v45, 5  ;;  %v2954_v40 = vshrl.u32 %v2611_v47, 16  ;;  %v12834_v47 = vld [vmem:[%s17897_s4 + $0xf0] sm:$0xff]   ;;  %v2616_v7 = vld [vmem:[#allocation2 + $0x9c] sm:$0xf] }
 0x33a   :  { %v2939_v4 = vsel %vm15171_vm13, %v2934_v60, %v2938_v1  ;;  %v15411_v42 = vsel %vm15165_vm12, %v3992_v62, %v3993_v16  ;;  %v2952_v3 = vrot.slane %v2950_v13, 5  ;;  %v2960_v20 = vshll.u32 %v2612_v22, 16  ;;  %9429 = vmatpush1.bf16.msra.mxu1 %v12718_v36  ;;  %v12708_v60 = vld [vmem:[#allocation2 + $0x168] sm:$0xff]  }
 0x33b   :  { %v15416_v59 = vcombine.low %v2929_v11, %v2939_v4  ;;  %v11299_v41 = vcombine.low %v15402_v33, %v15411_v42  ;;  %v2947_v18 = vor.u32 %v2946_v43, %v2943_v24  ;;  %v2956_v61 = vrot.slane %v2954_v40, 4  ;;  %9430 = vmatprep.subr.bf16.mxu1 %v18377_v17  ;;  %9140 = vmatpush1.bf16.msra.mxu0 %v12833_v37  ;;  %v2618_v24 = vld [vmem:[#allocation2 + $0xa4] sm:$0x1]  ;;  %v5497_v33 = vld [vmem:[#allocation2 + $0x14] sm:$0x1] }
 0x33c   :  { %9346 = vmatmul.mubr.bf16.gmra.mrb[28].mxu1 %v11297_v55  ;;  %v2962_v52 = vrot.slane %v2960_v20, 5  ;;  %v11268_v53 = vrot.slane %v3688_v26, 9  ;;  %v3997_v46 = vrot.slane %v3689_v8, 5  ;;  %v4000_v50 = vrot.slane %v3690_v21, 5  ;;  %9141 = vmatprep.subr.bf16.mxu0 %v18377_v17  ;;  %v2617_v8 = vld [vmem:[#allocation2 + $0xa0] sm:$0xf] }
 0x33d   :  { %8913 = vmatmul.mubr.bf16.gmra.mrb[92].mxu0 %v12703_v5  ;;  %9353 = vmatprep.mubr.bf16.mxu1 %v12705_v35  ;;  %v2948_v25 = vrot.slane %v2947_v18, 4  ;;  %v2957_v58 = vor.u32 %v2956_v61, %v2952_v3  ;;  %v2965_v27 = vshrl.u32 %v2613_v30, 16  ;;  %v2968_v10 = vshll.u32 %v2613_v30, 16  ;;  %v3695_v20 = vld [vmem:[#allocation2 + $0x184] sm:$0xf]  ;;  %v12835_v30 = vld [vmem:[%s17897_s4 + $0xf8] sm:$0xff]  }
 0x33e   :  { %8920 = vmatprep.mubr.bf16.mxu0 %v15356_v12  ;;  %v15431_v6 = vsel %vm15165_vm12, %v11268_v53, %v3997_v46  ;;  %v3999_v63 = vrot.slane %v3997_v46, 4  ;;  %v2974_v55 = vshll.u32 %v2614_v28, 16  ;;  %v2978_v57 = vshrl.u32 %v2614_v28, 16  ;;  %9431 = vmatpush1.bf16.msra.mxu1 %v12721_v49  ;;  %v3693_v12 = vld [vmem:[#allocation2 + $0x17c] sm:$0x1] }
 0x33f   :  { %v2953_v34 = vsel %vm15171_vm13, %v2948_v25, %v2952_v3  ;;  %v2958_v0 = vrot.slane %v2957_v58, 4  ;;  %v2967_v44 = vrot.slane %v2965_v27, 4  ;;  %v2970_v32 = vrot.slane %v2968_v10, 5  ;;  %9432 = vmatprep.subr.bf16.mxu1 %v18377_v17  ;;  %9142 = vmatpush1.bf16.msra.mxu0 %v12834_v47  ;;  %v3694_v3 = vld [vmem:[#allocation2 + $0x180] sm:$0xe] }
 0x340   :  { %v15444_v39 = vsel %vm15165_vm12, %v3999_v63, %v4000_v50  ;;  %v2976_v1 = vrot.slane %v2974_v55, 5  ;;  %v2980_v56 = vrot.slane %v2978_v57, 4  ;;  %v2984_v36 = vshll.u32 %v2615_v38, 16  ;;  %9143 = vmatprep.subr.bf16.mxu0 %v18377_v17  ;;  %v3696_v61 = vld [vmem:[#allocation2 + $0x188] sm:$0x1] }
 0x341   :  { %v2963_v16 = vsel %vm15171_vm13, %v2958_v0, %v2962_v52  ;;  %v11300_v22 = vcombine.low %v15431_v6, %v15444_v39  ;;  %v2971_v9 = vor.u32 %v2970_v32, %v2967_v44  ;;  %v11269_v45 = vrot.slane %v3691_v15, 9  ;;  %v2619_v50 = vld [vmem:[#allocation2 + $0xa8] sm:$0xf]  ;;  %v2620_v10 = vld [vmem:[#allocation2 + $0xac] sm:$0xf] }
 0x342   :  { %v15451_v62 = vcombine.low %v2953_v34, %v2963_v16  ;;  %v2981_v13 = vor.u32 %v2980_v56, %v2976_v1  ;;  %v2986_v26 = vrot.slane %v2984_v36, 5  ;;  %v4004_v11 = vrot.slane %v3692_v48, 5  ;;  %9433 = vmatpush1.bf16.msra.mxu1 %v12723_v31  ;;  %v2621_v31 = vld [vmem:[#allocation2 + $0xb0] sm:$0x1]  ;;  %v3697_v56 = vld [vmem:[#allocation2 + $0x18c] sm:$0xe] }
 0x343   :  { %v2972_v43 = vrot.slane %v2971_v9, 4  ;;  %v4007_v40 = vrot.slane %v3693_v12, 5  ;;  %v2989_v21 = vshrl.u32 %v2616_v7, 16  ;;  %v2992_v4 = vshll.u32 %v2616_v7, 16  ;;  %9691 = vmatprep.subr.bf16.mxu1 %v18377_v17  ;;  %9144 = vmatpush1.bf16.msra.mxu0 %v12835_v30  ;;  %v3698_v44 = vld [vmem:[#allocation2 + $0x190] sm:$0xf] }
 0x344   :  { %9354 = vmatmul.mubr.bf16.gmra.mrb[32].mxu1 %v11298_v54  ;;  %v2982_v49 = vrot.slane %v2981_v13, 4  ;;  %v15462_v5 = vsel %vm15165_vm12, %v11269_v45, %v4004_v11  ;;  %v4006_v35 = vrot.slane %v4004_v11, 4  ;;  %v2998_v18 = vshll.u32 %v2617_v8, 16  ;;  %v3699_v36 = vld [vmem:[#allocation2 + $0x194] sm:$0x1]  ;;  %v12709_v16 = vld [vmem:[#allocation2 + $0x6c] sm:$0xff]  }
 0x345   :  { %8921 = vmatmul.mubr.bf16.gmra.mrb[96].mxu0 %v12706_v19  ;;  %9361 = vmatprep.mubr.bf16.mxu1 %v12708_v60  ;;  %v2977_v28 = vsel %vm15171_vm13, %v2972_v43, %v2976_v1  ;;  %v2991_v37 = vrot.slane %v2989_v21, 4  ;;  %v2994_v52 = vrot.slane %v2992_v4, 5  ;;  %v3002_v53 = vshrl.u32 %v2617_v8, 16  ;;  %v5496_v7 = vld [vmem:[#allocation2 + $0x10] sm:$0xf]  ;;  %v12711_v9 = vld [vmem:[#allocation2 + $0x174] sm:$0xff]  }
 0x346   :  { %8928 = vmatprep.mubr.bf16.mxu0 %v15391_v23  ;;  %v2987_v51 = vsel %vm15171_vm13, %v2982_v49, %v2986_v26  ;;  %v15471_v2 = vsel %vm15165_vm12, %v4006_v35, %v4007_v40  ;;  %v3000_v54 = vrot.slane %v2998_v18, 5  ;;  %v3008_v46 = vshll.u32 %v2618_v24, 16  ;;  %v5495_v43 = vld [vmem:[#allocation2 + $0xc] sm:$0xe]  ;;  %v2622_v49 = vld [vmem:[#allocation2 + $0xb4] sm:$0xf] }
 0x347   :  { %v15473_v38 = vcombine.low %v2977_v28, %v2987_v51  ;;  %v11301_v25 = vcombine.low %v15462_v5, %v15471_v2  ;;  %v2995_v58 = vor.u32 %v2994_v52, %v2991_v37  ;;  %v3004_v27 = vrot.slane %v3002_v53, 4  ;;  %v2623_v37 = vld [vmem:[#allocation2 + $0xb8] sm:$0xf]  ;;  %v5503_v2 = vld [vmem:[#allocation2 + $0x2c] sm:$0x1] }
 0x348   :  { %v3010_v48 = vrot.slane %v3008_v46, 5  ;;  %v11270_v23 = vrot.slane %v3694_v3, 9  ;;  %v4011_v63 = vrot.slane %v3695_v20, 5  ;;  %v4014_v55 = vrot.slane %v3696_v61, 5  ;;  %v12712_v46 = vld [vmem:[#allocation2 + $0x78] sm:$0xff]  }
 0x349   :  { %v2996_v57 = vrot.slane %v2995_v58, 4  ;;  %v3005_v15 = vor.u32 %v3004_v27, %v3000_v54  ;;  %v3013_v34 = vshrl.u32 %v2619_v50, 16  ;;  %v3016_v0 = vshll.u32 %v2619_v50, 16 }
 0x34a   :  { %v15479_v32 = vsel %vm15165_vm12, %v11270_v23, %v4011_v63  ;;  %v4013_v12 = vrot.slane %v4011_v63, 4  ;;  %v3022_v47 = vshll.u32 %v2620_v10, 16  ;;  %v3026_v1 = vshrl.u32 %v2620_v10, 16  ;;  %v4472_v10 = vld [vmem:[#allocation2 + $0x10] sm:$0xf] }
 0x34b   :  { %v3001_v45 = vsel %vm15171_vm13, %v2996_v57, %v3000_v54  ;;  %v3006_v8 = vrot.slane %v3005_v15, 4  ;;  %v3015_v19 = vrot.slane %v3013_v34, 4  ;;  %v3018_v60 = vrot.slane %v3016_v0, 5  ;;  %v2624_v63 = vld [vmem:[#allocation2 + $0xbc] sm:$0x1] }
 0x34c   :  { %9362 = vmatmul.mubr.bf16.gmra.mrb[36].mxu1 %v11299_v41  ;;  %v15488_v13 = vsel %vm15165_vm12, %v4013_v12, %v4014_v55  ;;  %v3024_v26 = vrot.slane %v3022_v47, 5  ;;  %v3028_v11 = vrot.slane %v3026_v1, 4  ;;  %v3032_v24 = vshll.u32 %v2621_v31, 16  ;;  %v4471_v15 = vld [vmem:[#allocation2 + $0xc] sm:$0xf]  ;;  %v12714_v31 = vld [vmem:[#allocation2 + $0x180] sm:$0xff]  }
 0x34d   :  { %8929 = vmatmul.mubr.bf16.gmra.mrb[100].mxu0 %v12709_v16  ;;  %9369 = vmatprep.mubr.bf16.mxu1 %v12711_v9  ;;  %v3011_v40 = vsel %vm15171_vm13, %v3006_v8, %v3010_v48  ;;  %v11302_v21 = vcombine.low %v15479_v32, %v15488_v13  ;;  %v3019_v4 = vor.u32 %v3018_v60, %v3015_v19  ;;  %v11271_v3 = vrot.slane %v3697_v56, 9  ;;  %v4473_v47 = vld [vmem:[#allocation2 + $0x14] sm:$0x1]  ;;  %v5499_v16 = vld [vmem:[#allocation2 + $0x1c] sm:$0xf] }
 0x34e   :  { %8936 = vmatprep.mubr.bf16.mxu0 %v15416_v59  ;;  %v15495_v42 = vcombine.low %v3001_v45, %v3011_v40  ;;  %v3029_v41 = vor.u32 %v3028_v11, %v3024_v26  ;;  %v3034_v20 = vrot.slane %v3032_v24, 5  ;;  %v4018_v30 = vrot.slane %v3698_v44, 5  ;;  %v5498_v60 = vld [vmem:[#allocation2 + $0x18] sm:$0xe] }
 0x34f   :  { %v3020_v35 = vrot.slane %v3019_v4, 4  ;;  %v4021_v18 = vrot.slane %v3699_v36, 5  ;;  %v11368_v61 = vrot.slane %v5495_v43, 9  ;;  %v5689_v28 = vrot.slane %v5496_v7, 5 }
 0x350   :  { %v3030_v52 = vrot.slane %v3029_v41, 4  ;;  %v15499_v53 = vsel %vm15165_vm12, %v11271_v3, %v4018_v30  ;;  %v4020_v51 = vrot.slane %v4018_v30, 4  ;;  %v5692_v54 = vrot.slane %v5497_v33, 5  ;;  %v4474_v3 = vld [vmem:[#allocation2 + $0x18] sm:$0xf] }
 0x351   :  { %v3025_v59 = vsel %vm15171_vm13, %v3020_v35, %v3024_v26  ;;  %v15505_v50 = vsel %vm15165_vm12, %v11368_v61, %v5689_v28  ;;  %v5691_v58 = vrot.slane %v5689_v28, 4  ;;  %v3037_v27 = vshrl.u32 %v2622_v49, 16  ;;  %v4475_v28 = vld [vmem:[#allocation2 + $0x1c] sm:$0xf] }
 0x352   :  { %v3035_v48 = vsel %vm15171_vm13, %v3030_v52, %v3034_v20  ;;  %v15511_v23 = vsel %vm15165_vm12, %v4020_v51, %v4021_v18  ;;  %v3040_v55 = vshll.u32 %v2622_v49, 16  ;;  %v3046_v57 = vshll.u32 %v2623_v37, 16 }
 0x353   :  { %v15513_v34 = vcombine.low %v3025_v59, %v3035_v48  ;;  %v11303_v0 = vcombine.low %v15499_v53, %v15511_v23  ;;  %v15519_v44 = vsel %vm15165_vm12, %v5691_v58, %v5692_v54  ;;  %v3039_v12 = vrot.slane %v3037_v27, 4  ;;  %v4476_v54 = vld [vmem:[#allocation2 + $0x20] sm:$0x1]  ;;  %v12717_v59 = vld [vmem:[#allocation2 + $0x18c] sm:$0xff]  }
 0x354   :  { %9370 = vmatmul.mubr.bf16.gmra.mrb[40].mxu1 %v11300_v22  ;;  %v11400_v1 = vcombine.low %v15505_v50, %v15519_v44  ;;  %v3042_v56 = vrot.slane %v3040_v55, 5  ;;  %v3048_v36 = vrot.slane %v3046_v57, 5  ;;  %v3050_v7 = vshrl.u32 %v2623_v37, 16  ;;  %v5500_v22 = vld [vmem:[#allocation2 + $0x20] sm:$0x1] }
 0x355   :  { %8937 = vmatmul.mubr.bf16.gmra.mrb[104].mxu0 %v12712_v46  ;;  %9377 = vmatprep.mubr.bf16.mxu1 %v12714_v31  ;;  %v3056_v9 = vshll.u32 %v2624_v63, 16  ;;  %v4568_v45 = vshrl.u32 %v4471_v15, 16  ;;  %v4571_v8 = vshll.u32 %v4471_v15, 16  ;;  %v4577_v19 = vshll.u32 %v4472_v10, 16  ;;  %v5502_v63 = vld [vmem:[#allocation2 + $0x28] sm:$0xf] }
 0x356   :  { %8944 = vmatprep.mubr.bf16.mxu0 %v15451_v62  ;;  %v3043_v26 = vor.u32 %v3042_v56, %v3039_v12  ;;  %v3052_v11 = vrot.slane %v3050_v7, 4  ;;  %v4581_v6 = vshrl.u32 %v4472_v10, 16  ;;  %v4587_v39 = vshll.u32 %v4473_v47, 16  ;;  %v12716_v62 = vld [vmem:[#allocation2 + $0x84] sm:$0xff]  }
 0x357   :  { %v3058_v24 = vrot.slane %v3056_v9, 5  ;;  %v4570_v43 = vrot.slane %v4568_v45, 4  ;;  %v4573_v40 = vrot.slane %v4571_v8, 5  ;;  %v4579_v4 = vrot.slane %v4577_v19, 5  ;;  %v5501_v12 = vld [vmem:[#allocation2 + $0x24] sm:$0xe] }
 0x358   :  { %v3044_v33 = vrot.slane %v3043_v26, 4  ;;  %v3053_v41 = vor.u32 %v3052_v11, %v3048_v36  ;;  %v4583_v20 = vrot.slane %v4581_v6, 4  ;;  %v4589_v30 = vrot.slane %v4587_v39, 5  ;;  %v2626_v8 = vld [vmem:[#allocation2 + $0xdc] sm:$0xf] }
 0x359   :  { %v4574_v49 = vor.u32 %v4573_v40, %v4570_v43  ;;  %v11369_v35 = vrot.slane %v5498_v60, 9  ;;  %v5696_v18 = vrot.slane %v5499_v16, 5  ;;  %v5699_v61 = vrot.slane %v5500_v22, 5 }
 0x35a   :  { %v3049_v37 = vsel %vm15171_vm13, %v3044_v33, %v3048_v36  ;;  %v3054_v52 = vrot.slane %v3053_v41, 4  ;;  %v4584_v51 = vor.u32 %v4583_v20, %v4579_v4  ;;  %v4592_v46 = vshrl.u32 %v4474_v3, 16  ;;  %v2628_v33 = vld [vmem:[#allocation2 + $0xe4] sm:$0xf] }
 0x35b   :  { %v4575_v58 = vrot.slane %v4574_v49, 4  ;;  %v15531_v27 = vsel %vm15165_vm12, %v11369_v35, %v5696_v18  ;;  %v5698_v10 = vrot.slane %v5696_v18, 4  ;;  %v4595_v48 = vshll.u32 %v4474_v3, 16  ;;  %v2629_v35 = vld [vmem:[#allocation2 + $0xe8] sm:$0xf]  ;;  %v12719_v18 = vld [vmem:[#allocation2 + $0x90] sm:$0xff]  }
 0x35c   :  { %9378 = vmatmul.mubr.bf16.gmra.mrb[44].mxu1 %v11301_v25  ;;  %v3059_v55 = vsel %vm15171_vm13, %v3054_v52, %v3058_v24  ;;  %v4585_v57 = vrot.slane %v4584_v51, 4  ;;  %v4594_v15 = vrot.slane %v4592_v46, 4  ;;  %v4601_v31 = vshll.u32 %v4475_v28, 16  ;;  %v2625_v25 = vld [vmem:[#allocation2 + $0xd8] sm:$0xf] }
 0x35d   :  { %8945 = vmatmul.mubr.bf16.gmra.mrb[108].mxu0 %v12716_v62  ;;  %9385 = vmatprep.mubr.bf16.mxu1 %v12717_v59  ;;  %v15538_v47 = vcombine.low %v3049_v37, %v3059_v55  ;;  %v4580_v56 = vsel %vm15171_vm13, %v4575_v58, %v4579_v4  ;;  %v15544_v36 = vsel %vm15165_vm12, %v5698_v10, %v5699_v61  ;;  %v4597_v5 = vrot.slane %v4595_v48, 5  ;;  %v2627_v24 = vld [vmem:[#allocation2 + $0xe0] sm:$0x1]  ;;  %v12720_v61 = vld [vmem:[#allocation2 + $0x198] sm:$0xff]  }
 0x35e   :  { %8952 = vmatprep.mubr.bf16.mxu0 %v15473_v38  ;;  %v4590_v7 = vsel %vm15171_vm13, %v4585_v57, %v4589_v30  ;;  %v11401_v16 = vcombine.low %v15531_v27, %v15544_v36  ;;  %v4603_v9 = vrot.slane %v4601_v31, 5  ;;  %v4605_v45 = vshrl.u32 %v4475_v28, 16  ;;  %v4477_v57 = vld [vmem:[#allocation2 + $0x24] sm:$0xf] }
 0x35f   :  { %v15551_v19 = vcombine.low %v4580_v56, %v4590_v7  ;;  %v4598_v60 = vor.u32 %v4597_v5, %v4594_v15  ;;  %v4611_v26 = vshll.u32 %v4476_v54, 16  ;;  %v11370_v11 = vrot.slane %v5501_v12, 9 }
 0x360   :  { %v4607_v6 = vrot.slane %v4605_v45, 4  ;;  %v5703_v39 = vrot.slane %v5502_v63, 5  ;;  %v5706_v22 = vrot.slane %v5503_v2, 5  ;;  %v3061_v43 = vshrl.u32 %v2625_v25, 16  ;;  %v2630_v63 = vld [vmem:[#allocation2 + $0xec] sm:$0x1] }
 0x361   :  { %v4599_v38 = vrot.slane %v4598_v60, 4  ;;  %v4613_v40 = vrot.slane %v4611_v26, 5  ;;  %v3064_v4 = vshll.u32 %v2625_v25, 16  ;;  %v3070_v3 = vshll.u32 %v2626_v8, 16  ;;  %v4478_v2 = vld [vmem:[#allocation2 + $0x28] sm:$0xf] }
 0x362   :  { %v4608_v41 = vor.u32 %v4607_v6, %v4603_v9  ;;  %v15555_v20 = vsel %vm15165_vm12, %v11370_v11, %v5703_v39  ;;  %v5705_v30 = vrot.slane %v5703_v39, 4  ;;  %v3063_v49 = vrot.slane %v3061_v43, 4  ;;  %v4479_v26 = vld [vmem:[#allocation2 + $0x2c] sm:$0x1]  ;;  %v5505_v6 = vld [vmem:[#allocation2 + $0x34] sm:$0xf] }
 0x363   :  { %v4604_v28 = vsel %vm15171_vm13, %v4599_v38, %v4603_v9  ;;  %v3066_v62 = vrot.slane %v3064_v4, 5  ;;  %v3072_v37 = vrot.slane %v3070_v3, 5  ;;  %v3074_v52 = vshrl.u32 %v2626_v8, 16  ;;  %v5504_v38 = vld [vmem:[#allocation2 + $0x30] sm:$0xe] }
 0x364   :  { %9386 = vmatmul.mubr.bf16.gmra.mrb[48].mxu1 %v11302_v21  ;;  %v4609_v51 = vrot.slane %v4608_v41, 4  ;;  %v15564_v54 = vsel %vm15165_vm12, %v5705_v30, %v5706_v22  ;;  %v3080_v46 = vshll.u32 %v2627_v24, 16  ;;  %v3085_v59 = vshrl.u32 %v2628_v33, 16  ;;  %v5506_v30 = vld [vmem:[#allocation2 + $0x38] sm:$0x1] }
 0x365   :  { %8953 = vmatmul.mubr.bf16.gmra.mrb[112].mxu0 %v12719_v18  ;;  %9393 = vmatprep.mubr.bf16.mxu1 %v12720_v61  ;;  %v11402_v58 = vcombine.low %v15555_v20, %v15564_v54  ;;  %v3067_v10 = vor.u32 %v3066_v62, %v3063_v49  ;;  %v3076_v48 = vrot.slane %v3074_v52, 4  ;;  %v3088_v55 = vshll.u32 %v2628_v33, 16  ;;  %v5510_v20 = vld [vmem:[#allocation2 + $0x48] sm:$0xe]  ;;  %v5511_v54 = vld [vmem:[#allocation2 + $0x4c] sm:$0xf] }
 0x366   :  { %8960 = vmatprep.mubr.bf16.mxu0 %v15495_v42  ;;  %v4614_v32 = vsel %vm15171_vm13, %v4609_v51, %v4613_v40  ;;  %v3082_v13 = vrot.slane %v3080_v46, 5  ;;  %v3087_v21 = vrot.slane %v3085_v59, 4  ;;  %v3094_v15 = vshll.u32 %v2629_v35, 16  ;;  %v12722_v40 = vld [vmem:[#allocation2 + $0x9c] sm:$0xff]   ;;  %v2632_v46 = vld [vmem:[#allocation2 + $0xf4] sm:$0xf] }
 0x367   :  { %v15571_v31 = vcombine.low %v4604_v28, %v4614_v32  ;;  %v3068_v12 = vrot.slane %v3067_v10, 4  ;;  %v3077_v56 = vor.u32 %v3076_v48, %v3072_v37  ;;  %v3090_v5 = vrot.slane %v3088_v55, 5  ;;  %v2631_v28 = vld [vmem:[#allocation2 + $0xf0] sm:$0xf] }
 0x368   :  { %v3096_v25 = vrot.slane %v3094_v15, 5  ;;  %v3098_v7 = vshrl.u32 %v2629_v35, 16  ;;  %v3104_v9 = vshll.u32 %v2630_v63, 16  ;;  %v4616_v45 = vshrl.u32 %v4477_v57, 16  ;;  %v2633_v63 = vld [vmem:[#allocation2 + $0xf8] sm:$0x1] }
 0x369   :  { %v3073_v8 = vsel %vm15171_vm13, %v3068_v12, %v3072_v37  ;;  %v3078_v42 = vrot.slane %v3077_v56, 4  ;;  %v3091_v60 = vor.u32 %v3090_v5, %v3087_v21  ;;  %v4619_v11 = vshll.u32 %v4477_v57, 16 }
 0x36a   :  { %v3100_v39 = vrot.slane %v3098_v7, 4  ;;  %v3106_v22 = vrot.slane %v3104_v9, 5  ;;  %v4618_v24 = vrot.slane %v4616_v45, 4  ;;  %v4625_v43 = vshll.u32 %v4478_v2, 16  ;;  %v4481_v9 = vld [vmem:[#allocation2 + $0x34] sm:$0xf] }
 0x36b   :  { %v3083_v4 = vsel %vm15171_vm13, %v3078_v42, %v3082_v13  ;;  %v3092_v3 = vrot.slane %v3091_v60, 4  ;;  %v4621_v33 = vrot.slane %v4619_v11, 5  ;;  %v4629_v41 = vshrl.u32 %v4478_v2, 16  ;;  %v4480_v13 = vld [vmem:[#allocation2 + $0x30] sm:$0xf]  ;;  %v12724_v45 = vld [vmem:[#allocation2 + $0xa8] sm:$0xff]  }
 0x36c   :  { %9394 = vmatmul.mubr.bf16.gmra.mrb[52].mxu1 %v11303_v0  ;;  %v15580_v49 = vcombine.low %v3073_v8, %v3083_v4  ;;  %v3101_v35 = vor.u32 %v3100_v39, %v3096_v25  ;;  %v4627_v18 = vrot.slane %v4625_v43, 5  ;;  %v4635_v61 = vshll.u32 %v4479_v26, 16  ;;  %v12728_v42 = vld [vmem:[%s17897_s4 + $0x188] sm:$0xff]   ;;  %v4482_v11 = vld [vmem:[#allocation2 + $0x38] sm:$0x1] }
 0x36d   :  { %8961 = vmatmul.mubr.bf16.gmra.mrb[116].mxu0 %v12722_v40  ;;  %9434 = vmatprep.mubr.bf16.mxu1 %v11400_v1  ;;  %v3097_v62 = vsel %vm15171_vm13, %v3092_v3, %v3096_v25  ;;  %v4622_v37 = vor.u32 %v4621_v33, %v4618_v24  ;;  %v4631_v52 = vrot.slane %v4629_v41, 4  ;;  %v11371_v51 = vrot.slane %v5504_v38, 9  ;;  %v5507_v38 = vld [vmem:[#allocation2 + $0x3c] sm:$0xe]  ;;  %v5508_v40 = vld [vmem:[#allocation2 + $0x40] sm:$0xf] }
 0x36e   :  { %8968 = vmatprep.mubr.bf16.mxu0 %v15513_v34  ;;  %v3102_v53 = vrot.slane %v3101_v35, 4  ;;  %v4637_v23 = vrot.slane %v4635_v61, 5  ;;  %v5710_v0 = vrot.slane %v5505_v6, 5  ;;  %v5713_v59 = vrot.slane %v5506_v30, 5  ;;  %v12725_v34 = vld [vmem:[%s17897_s4 + $0x180] sm:$0xff]  }
 0x36f   :  { %v4623_v10 = vrot.slane %v4622_v37, 4  ;;  %v4632_v48 = vor.u32 %v4631_v52, %v4627_v18  ;;  %v3109_v55 = vshrl.u32 %v2631_v28, 16  ;;  %v3112_v57 = vshll.u32 %v2631_v28, 16  ;;  %v5509_v30 = vld [vmem:[#allocation2 + $0x44] sm:$0x1] }
 0x370   :  { %v3107_v50 = vsel %vm15171_vm13, %v3102_v53, %v3106_v22  ;;  %v15592_v44 = vsel %vm15165_vm12, %v11371_v51, %v5710_v0  ;;  %v5712_v1 = vrot.slane %v5710_v0, 4  ;;  %v3118_v32 = vshll.u32 %v2632_v46, 16  ;;  %v2634_v51 = vld [vmem:[#allocation2 + $0xfc] sm:$0xf]  ;;  %v2635_v0 = vld [vmem:[#allocation2 + $0x100] sm:$0xf] }
 0x371   :  { %v15597_v21 = vcombine.low %v3097_v62, %v3107_v50  ;;  %v4628_v15 = vsel %vm15171_vm13, %v4623_v10, %v4627_v18  ;;  %v4633_v12 = vrot.slane %v4632_v48, 4  ;;  %v3111_v56 = vrot.slane %v3109_v55, 4  ;;  %v12731_v50 = vld [vmem:[%s17897_s4 + $0x190] sm:$0xff]  }
 0x372   :  { %v15603_v5 = vsel %vm15165_vm12, %v5712_v1, %v5713_v59  ;;  %v3114_v2 = vrot.slane %v3112_v57, 5  ;;  %v3120_v25 = vrot.slane %v3118_v32, 5  ;;  %v3122_v7 = vshrl.u32 %v2632_v46, 16  ;;  %v12726_v1 = vld [vmem:[#allocation2 + $0xb4] sm:$0xff]  }
 0x373   :  { %v4638_v8 = vsel %vm15171_vm13, %v4633_v12, %v4637_v23  ;;  %v11403_v60 = vcombine.low %v15592_v44, %v15603_v5  ;;  %v3128_v26 = vshll.u32 %v2633_v63, 16  ;;  %v4640_v6 = vshrl.u32 %v4480_v13, 16  ;;  %v2636_v63 = vld [vmem:[#allocation2 + $0x104] sm:$0x1]  ;;  %v4483_v12 = vld [vmem:[#allocation2 + $0x3c] sm:$0xf] }
 0x374   :  { %9435 = vmatmul.mubr.bf16.vlgmr.msra.gmra.mrb[56].mxu1 %v15551_v19  ;;  %v15613_v39 = vcombine.low %v4628_v15, %v4638_v8  ;;  %v3115_v22 = vor.u32 %v3114_v2, %v3111_v56  ;;  %v3124_v24 = vrot.slane %v3122_v7, 4  ;;  %v4643_v43 = vshll.u32 %v4480_v13, 16  ;;  %v4487_v5 = vld [vmem:[#allocation2 + $0x4c] sm:$0xf] }
 0x375   :  { %8969 = vmatmul.mubr.bf16.gmra.mrb[120].mxu0 %v12724_v45  ;;  %9692 = vmatpush1.bf16.msra.mxu1 %v12725_v34  ;;  %v3130_v4 = vrot.slane %v3128_v26, 5  ;;  %v4642_v3 = vrot.slane %v4640_v6, 4  ;;  %v4649_v33 = vshll.u32 %v4481_v9, 16  ;;  %v4653_v41 = vshrl.u32 %v4481_v9, 16  ;;  %v4484_v9 = vld [vmem:[#allocation2 + $0x40] sm:$0xf] }
 0x376   :  { %8976 = vmatprep.mubr.bf16.mxu0 %v15538_v47  ;;  %9442 = vmatprep.mubr.bf16.mxu1 %v11401_v16  ;;  %v3116_v19 = vrot.slane %v3115_v22, 4  ;;  %v3125_v35 = vor.u32 %v3124_v24, %v3120_v25  ;;  %v4645_v18 = vrot.slane %v4643_v43, 5  ;;  %v4659_v61 = vshll.u32 %v4482_v11, 16  ;;  %v4485_v26 = vld [vmem:[#allocation2 + $0x44] sm:$0x1]  ;;  %v12734_v11 = vld [vmem:[%s17897_s4 + $0x198] sm:$0xff]  }
 0x377   :  { %9693 = vmatprep.subr.bf16.mxu1 %v18377_v17  ;;  %v4651_v28 = vrot.slane %v4649_v33, 5  ;;  %v4655_v62 = vrot.slane %v4653_v41, 4  ;;  %v11372_v37 = vrot.slane %v5507_v38, 9  ;;  %v5717_v52 = vrot.slane %v5508_v40, 5 }
 0x378   :  { %v3121_v46 = vsel %vm15171_vm13, %v3116_v19, %v3120_v25  ;;  %v3126_v53 = vrot.slane %v3125_v35, 4  ;;  %v4646_v47 = vor.u32 %v4645_v18, %v4642_v3  ;;  %v4661_v23 = vrot.slane %v4659_v61, 5  ;;  %v5512_v3 = vld [vmem:[#allocation2 + $0x50] sm:$0x1]  ;;  %v12727_v35 = vld [vmem:[#allocation2 + $0xd8] sm:$0xff]  }
 0x379   :  { %9694 = vmatpush1.bf16.msra.mxu1 %v12728_v42  ;;  %v4656_v27 = vor.u32 %v4655_v62, %v4651_v28  ;;  %v15624_v36 = vsel %vm15165_vm12, %v11372_v37, %v5717_v52  ;;  %v5719_v16 = vrot.slane %v5717_v52, 4  ;;  %v5720_v59 = vrot.slane %v5509_v30, 5 }
 0x37a   :  { %v3131_v10 = vsel %vm15171_vm13, %v3126_v53, %v3130_v4  ;;  %v4647_v48 = vrot.slane %v4646_v47, 4  ;;  %v3133_v55 = vshrl.u32 %v2634_v51, 16  ;;  %v3136_v57 = vshll.u32 %v2634_v51, 16  ;;  %9695 = vmatprep.subr.bf16.mxu1 %v18377_v17  ;;  %v2638_v53 = vld [vmem:[#allocation2 + $0x10c] sm:$0xf]  ;;  %v12737_v47 = vld [vmem:[%s17897_s4 + $0x1a0] sm:$0xff]  }
 0x37b   :  { %v15632_v32 = vcombine.low %v3121_v46, %v3131_v10  ;;  %v4657_v13 = vrot.slane %v4656_v27, 4  ;;  %v15636_v34 = vsel %vm15165_vm12, %v5719_v16, %v5720_v59  ;;  %v3142_v15 = vshll.u32 %v2635_v0, 16  ;;  %v2639_v16 = vld [vmem:[#allocation2 + $0x110] sm:$0x1] }
 0x37c   :  { %9443 = vmatmul.mubr.bf16.gmra.mrb[60].mxu1 %v15571_v31  ;;  %v4652_v56 = vsel %vm15171_vm13, %v4647_v48, %v4651_v28  ;;  %v11404_v2 = vcombine.low %v15624_v36, %v15636_v34  ;;  %v3135_v25 = vrot.slane %v3133_v55, 4  ;;  %v3138_v7 = vrot.slane %v3136_v57, 5 }
 0x37d   :  { %8977 = vmatmul.mubr.bf16.gmra.mrb[124].mxu0 %v12726_v1  ;;  %9450 = vmatprep.mubr.bf16.mxu1 %v11402_v58  ;;  %v4662_v45 = vsel %vm15171_vm13, %v4657_v13, %v4661_v23  ;;  %v3144_v8 = vrot.slane %v3142_v15, 5  ;;  %v3146_v42 = vshrl.u32 %v2635_v0, 16  ;;  %v3152_v31 = vshll.u32 %v2636_v63, 16  ;;  %v4486_v15 = vld [vmem:[#allocation2 + $0x48] sm:$0xf] }
 0x37e   :  { %8984 = vmatprep.mubr.bf16.mxu0 %v15580_v49  ;;  %v15652_v6 = vcombine.low %v4652_v56, %v4662_v45  ;;  %v3139_v22 = vor.u32 %v3138_v7, %v3135_v25  ;;  %v4664_v24 = vshrl.u32 %v4483_v12, 16  ;;  %v4667_v43 = vshll.u32 %v4483_v12, 16  ;;  %9696 = vmatpush1.bf16.msra.mxu1 %v12731_v50  ;;  %v2637_v49 = vld [vmem:[#allocation2 + $0x108] sm:$0xf]  ;;  %v4488_v45 = vld [vmem:[#allocation2 + $0x50] sm:$0x1] }
 0x37f   :  { %v3148_v58 = vrot.slane %v3146_v42, 4  ;;  %v3154_v38 = vrot.slane %v3152_v31, 5  ;;  %v4673_v40 = vshll.u32 %v4484_v9, 16  ;;  %v4677_v4 = vshrl.u32 %v4484_v9, 16  ;;  %9697 = vmatprep.subr.bf16.mxu1 %v18377_v17 }
 0x380   :  { %v3140_v33 = vrot.slane %v3139_v22, 4  ;;  %v4666_v41 = vrot.slane %v4664_v24, 4  ;;  %v4669_v30 = vrot.slane %v4667_v43, 5  ;;  %v4683_v19 = vshll.u32 %v4485_v26, 16  ;;  %v5514_v22 = vld [vmem:[#allocation2 + $0x58] sm:$0xf] }
 0x381   :  { %v3149_v18 = vor.u32 %v3148_v58, %v3144_v8  ;;  %v4675_v61 = vrot.slane %v4673_v40, 5  ;;  %v4679_v28 = vrot.slane %v4677_v4, 4  ;;  %v11373_v62 = vrot.slane %v5510_v20, 9  ;;  %v5515_v24 = vld [vmem:[#allocation2 + $0x5c] sm:$0x1] }
 0x382   :  { %v3145_v37 = vsel %vm15171_vm13, %v3140_v33, %v3144_v8  ;;  %v4670_v52 = vor.u32 %v4669_v30, %v4666_v41  ;;  %v4685_v51 = vrot.slane %v4683_v19, 5  ;;  %v5724_v46 = vrot.slane %v5511_v54, 5  ;;  %9698 = vmatpush1.bf16.msra.mxu1 %v12734_v11  ;;  %v5513_v8 = vld [vmem:[#allocation2 + $0x54] sm:$0xe]  ;;  %v2641_v41 = vld [vmem:[#allocation2 + $0x118] sm:$0xf] }
 0x383   :  { %v3150_v23 = vrot.slane %v3149_v18, 4  ;;  %v4680_v0 = vor.u32 %v4679_v28, %v4675_v61  ;;  %v5727_v27 = vrot.slane %v5512_v3, 5  ;;  %v3157_v59 = vshrl.u32 %v2637_v49, 16  ;;  %9699 = vmatprep.subr.bf16.mxu1 %v18377_v17  ;;  %v12743_v30 = vld [vmem:[%s17897_s4 + $0x1b0] sm:$0xff]   ;;  %v12729_v19 = vld [vmem:[#allocation2 + $0xe4] sm:$0xff]  }
 0x384   :  { %9451 = vmatmul.mubr.bf16.gmra.mrb[64].mxu1 %v15613_v39  ;;  %v4671_v10 = vrot.slane %v4670_v52, 4  ;;  %v15664_v48 = vsel %vm15165_vm12, %v11373_v62, %v5724_v46  ;;  %v5726_v63 = vrot.slane %v5724_v46, 4  ;;  %v3160_v55 = vshll.u32 %v2637_v49, 16 }
 0x385   :  { %8985 = vmatmul.mubr.bf16.gmra.mrb[128].mxu0 %v12727_v35  ;;  %9458 = vmatprep.mubr.bf16.mxu1 %v11403_v60  ;;  %v3155_v57 = vsel %vm15171_vm13, %v3150_v23, %v3154_v38  ;;  %v4681_v50 = vrot.slane %v4680_v0, 4  ;;  %v3159_v1 = vrot.slane %v3157_v59, 4  ;;  %v3166_v13 = vshll.u32 %v2638_v53, 16  ;;  %v12740_v60 = vld [vmem:[%s17897_s4 + $0x1a8] sm:$0xff]   ;;  %v2640_v38 = vld [vmem:[#allocation2 + $0x114] sm:$0xf] }
 0x386   :  { %8992 = vmatprep.mubr.bf16.mxu0 %v15597_v21  ;;  %v15672_v39 = vcombine.low %v3145_v37, %v3155_v57  ;;  %v4676_v12 = vsel %vm15171_vm13, %v4671_v10, %v4675_v61  ;;  %v15678_v56 = vsel %vm15165_vm12, %v5726_v63, %v5727_v27  ;;  %v3162_v44 = vrot.slane %v3160_v55, 5  ;;  %9700 = vmatpush1.bf16.msra.mxu1 %v12737_v47  ;;  %v2642_v59 = vld [vmem:[#allocation2 + $0x11c] sm:$0x1] }
 0x387   :  { %v4686_v25 = vsel %vm15171_vm13, %v4681_v50, %v4685_v51  ;;  %v11405_v21 = vcombine.low %v15664_v48, %v15678_v56  ;;  %v3168_v7 = vrot.slane %v3166_v13, 5  ;;  %v3170_v9 = vshrl.u32 %v2638_v53, 16  ;;  %9701 = vmatprep.subr.bf16.mxu1 %v18377_v17  ;;  %v4489_v50 = vld [vmem:[#allocation2 + $0x54] sm:$0xf]  ;;  %v2645_v56 = vld [vmem:[#allocation2 + $0x128] sm:$0x1] }
 0x388   :  { %v15688_v42 = vcombine.low %v4676_v12, %v4686_v25  ;;  %v3163_v31 = vor.u32 %v3162_v44, %v3159_v1  ;;  %v3176_v26 = vshll.u32 %v2639_v16, 16  ;;  %v4688_v11 = vshrl.u32 %v4486_v15, 16  ;;  %v12746_v16 = vld [vmem:[%s17897_s4 + $0x1b8] sm:$0xff]   ;;  %v12730_v25 = vld [vmem:[#allocation2 + $0xf0] sm:$0xff]  }
 0x389   :  { %v3172_v43 = vrot.slane %v3170_v9, 4  ;;  %v4691_v20 = vshll.u32 %v4486_v15, 16  ;;  %v4697_v54 = vshll.u32 %v4487_v5, 16  ;;  %v4701_v58 = vshrl.u32 %v4487_v5, 16  ;;  %v4490_v1 = vld [vmem:[#allocation2 + $0x58] sm:$0xf] }
 0x38a   :  { %v3164_v40 = vrot.slane %v3163_v31, 4  ;;  %v3178_v4 = vrot.slane %v3176_v26, 5  ;;  %v4690_v3 = vrot.slane %v4688_v11, 4  ;;  %v4707_v33 = vshll.u32 %v4488_v45, 16  ;;  %9702 = vmatpush1.bf16.msra.mxu1 %v12740_v60  ;;  %v4491_v5 = vld [vmem:[#allocation2 + $0x5c] sm:$0x1] }
 0x38b   :  { %v3173_v49 = vor.u32 %v3172_v43, %v3168_v7  ;;  %v4693_v35 = vrot.slane %v4691_v20, 5  ;;  %v4699_v18 = vrot.slane %v4697_v54, 5  ;;  %v4703_v61 = vrot.slane %v4701_v58, 4  ;;  %9703 = vmatprep.subr.bf16.mxu1 %v18377_v17  ;;  %v5516_v60 = vld [vmem:[#allocation2 + $0x60] sm:$0xe] }
 0x38c   :  { %9459 = vmatmul.mubr.bf16.gmra.mrb[68].mxu1 %v15652_v6  ;;  %v3169_v28 = vsel %vm15171_vm13, %v3164_v40, %v3168_v7  ;;  %v4709_v62 = vrot.slane %v4707_v33, 5  ;;  %v11374_v37 = vrot.slane %v5513_v8, 9  ;;  %v5731_v52 = vrot.slane %v5514_v22, 5  ;;  %v5517_v31 = vld [vmem:[#allocation2 + $0x64] sm:$0xf] }
 0x38d   :  { %8993 = vmatmul.mubr.bf16.gmra.mrb[132].mxu0 %v12729_v19  ;;  %9466 = vmatprep.mubr.bf16.mxu1 %v11404_v2  ;;  %v3174_v51 = vrot.slane %v3173_v49, 4  ;;  %v4694_v46 = vor.u32 %v4693_v35, %v4690_v3  ;;  %v4704_v53 = vor.u32 %v4703_v61, %v4699_v18  ;;  %v5734_v47 = vrot.slane %v5515_v24, 5  ;;  %v5518_v26 = vld [vmem:[#allocation2 + $0x68] sm:$0x1]  ;;  %v12749_v11 = vld [vmem:[%s17897_s4 + $0x1c0] sm:$0xff]  }
 0x38e   :  { %9000 = vmatprep.mubr.bf16.mxu0 %v15632_v32  ;;  %v15703_v6 = vsel %vm15165_vm12, %v11374_v37, %v5731_v52  ;;  %v5733_v23 = vrot.slane %v5731_v52, 4  ;;  %v3181_v0 = vshrl.u32 %v2640_v38, 16  ;;  %v3184_v27 = vshll.u32 %v2640_v38, 16  ;;  %9704 = vmatpush1.bf16.msra.mxu1 %v12743_v30  ;;  %v2644_v19 = vld [vmem:[#allocation2 + $0x124] sm:$0xf] }
 0x38f   :  { %v3179_v36 = vsel %vm15171_vm13, %v3174_v51, %v3178_v4  ;;  %v4695_v34 = vrot.slane %v4694_v46, 4  ;;  %v4705_v2 = vrot.slane %v4704_v53, 4  ;;  %v3190_v10 = vshll.u32 %v2641_v41, 16  ;;  %9705 = vmatprep.subr.bf16.mxu1 %v18377_v17  ;;  %v2643_v4 = vld [vmem:[#allocation2 + $0x120] sm:$0xf] }
 0x390   :  { %v15711_v32 = vcombine.low %v3169_v28, %v3179_v36  ;;  %v15715_v63 = vsel %vm15165_vm12, %v5733_v23, %v5734_v47  ;;  %v3183_v55 = vrot.slane %v3181_v0, 4  ;;  %v3186_v57 = vrot.slane %v3184_v27, 5  ;;  %v4492_v23 = vld [vmem:[#allocation2 + $0x60] sm:$0xf]  ;;  %v12753_v0 = vld [vmem:[%s17897_s4 + $0x1c8] sm:$0xff]  }
 0x391   :  { %v4700_v13 = vsel %vm15171_vm13, %v4695_v34, %v4699_v18  ;;  %v4710_v15 = vsel %vm15171_vm13, %v4705_v2, %v4709_v62  ;;  %v11406_v12 = vcombine.low %v15703_v6, %v15715_v63  ;;  %v3192_v44 = vrot.slane %v3190_v10, 5  ;;  %v12732_v27 = vld [vmem:[#allocation2 + $0xfc] sm:$0xff]  }
 0x392   :  { %v11341_v7 = vcombine.low %v4700_v13, %v4710_v15  ;;  %v3187_v9 = vor.u32 %v3186_v57, %v3183_v55  ;;  %v3194_v45 = vshrl.u32 %v2641_v41, 16  ;;  %v3200_v8 = vshll.u32 %v2642_v59, 16  ;;  %9706 = vmatpush1.bf16.msra.mxu1 %v12746_v16  ;;  %v4493_v59 = vld [vmem:[#allocation2 + $0x64] sm:$0xf] }
 0x393   :  { %v4712_v22 = vshrl.u32 %v4489_v50, 16  ;;  %v4715_v24 = vshll.u32 %v4489_v50, 16  ;;  %v4721_v43 = vshll.u32 %v4490_v1, 16  ;;  %v4725_v20 = vshrl.u32 %v4490_v1, 16  ;;  %9707 = vmatprep.subr.bf16.mxu1 %v18377_v17  ;;  %v4494_v1 = vld [vmem:[#allocation2 + $0x68] sm:$0x1] }
 0x394   :  { %9467 = vmatmul.mubr.bf16.gmra.mrb[72].mxu1 %v15688_v42  ;;  %v3188_v54 = vrot.slane %v3187_v9, 4  ;;  %v3196_v58 = vrot.slane %v3194_v45, 4  ;;  %v3202_v38 = vrot.slane %v3200_v8, 5  ;;  %v4731_v40 = vshll.u32 %v4491_v5, 16 }
 0x395   :  { %9001 = vmatmul.mubr.bf16.gmra.mrb[136].mxu0 %v12730_v25  ;;  %9474 = vmatprep.mubr.bf16.mxu1 %v11405_v21  ;;  %v4714_v3 = vrot.slane %v4712_v22, 4  ;;  %v4717_v33 = vrot.slane %v4715_v24, 5  ;;  %v4723_v41 = vrot.slane %v4721_v43, 5  ;;  %v4727_v30 = vrot.slane %v4725_v20, 4  ;;  %v5521_v24 = vld [vmem:[#allocation2 + $0x74] sm:$0x1] }
 0x396   :  { %9008 = vmatprep.mubr.bf16.mxu0 %v15672_v39  ;;  %v3193_v42 = vsel %vm15171_vm13, %v3188_v54, %v3192_v44  ;;  %v3197_v49 = vor.u32 %v3196_v58, %v3192_v44  ;;  %v4733_v35 = vrot.slane %v4731_v40, 5  ;;  %v11375_v18 = vrot.slane %v5516_v60, 9  ;;  %9708 = vmatpush1.bf16.msra.mxu1 %v12749_v11  ;;  %v5519_v60 = vld [vmem:[#allocation2 + $0x6c] sm:$0xe] }
 0x397   :  { %v4718_v61 = vor.u32 %v4717_v33, %v4714_v3  ;;  %v4728_v28 = vor.u32 %v4727_v30, %v4723_v41  ;;  %v5738_v62 = vrot.slane %v5517_v31, 5  ;;  %v5741_v37 = vrot.slane %v5518_v26, 5  ;;  %9709 = vmatprep.subr.bf16.mxu1 %v18377_v17  ;;  %v5520_v31 = vld [vmem:[#allocation2 + $0x70] sm:$0xf] }
 0x398   :  { %v3198_v48 = vrot.slane %v3197_v49, 4  ;;  %v3205_v21 = vshrl.u32 %v2643_v4, 16  ;;  %v3208_v52 = vshll.u32 %v2643_v4, 16  ;;  %v3214_v51 = vshll.u32 %v2644_v19, 16  ;;  %v2647_v4 = vld [vmem:[#allocation2 + $0x130] sm:$0xf] }
 0x399   :  { %v4719_v46 = vrot.slane %v4718_v61, 4  ;;  %v4729_v39 = vrot.slane %v4728_v28, 4  ;;  %v15737_v53 = vsel %vm15165_vm12, %v11375_v18, %v5738_v62  ;;  %v5740_v47 = vrot.slane %v5738_v62, 4  ;;  %v2648_v62 = vld [vmem:[#allocation2 + $0x134] sm:$0x1] }
 0x39a   :  { %v3203_v16 = vsel %vm15171_vm13, %v3198_v48, %v3202_v38  ;;  %v3207_v36 = vrot.slane %v3205_v21, 4  ;;  %v3210_v34 = vrot.slane %v3208_v52, 5  ;;  %v3216_v2 = vrot.slane %v3214_v51, 5  ;;  %9710 = vmatpush1.bf16.msra.mxu1 %v12753_v0  ;;  %v2646_v38 = vld [vmem:[#allocation2 + $0x12c] sm:$0xf]  ;;  %v12756_v0 = vld [vmem:[%s17897_s4 + $0x1d0] sm:$0xff]  }
 0x39b   :  { %v15744_v10 = vcombine.low %v3193_v42, %v3203_v16  ;;  %v4724_v55 = vsel %vm15171_vm13, %v4719_v46, %v4723_v41  ;;  %v4734_v57 = vsel %vm15171_vm13, %v4729_v39, %v4733_v35  ;;  %v5742_v50 = vsel %vm15165_vm12, %v5740_v47, %v5741_v37  ;;  %9711 = vmatprep.subr.bf16.mxu1 %v18377_v17  ;;  %v12733_v35 = vld [vmem:[#allocation2 + $0x108] sm:$0xff]  }
 0x39c   :  { %9475 = vmatmul.mubr.bf16.gmra.mrb[76].mxu1 %v11341_v7  ;;  %v11342_v13 = vcombine.low %v4724_v55, %v4734_v57  ;;  %v11407_v15 = vcombine.low %v15737_v53, %v5742_v50  ;;  %v3211_v44 = vor.u32 %v3210_v34, %v3207_v36  ;;  %v3218_v5 = vshrl.u32 %v2644_v19, 16  ;;  %v4495_v51 = vld [vmem:[#allocation2 + $0x6c] sm:$0xf] }
 0x39d   :  { %9009 = vmatmul.mubr.bf16.gmra.mrb[140].mxu0 %v12732_v27  ;;  %9482 = vmatprep.mubr.bf16.mxu1 %v11406_v12  ;;  %v3224_v25 = vshll.u32 %v2645_v56, 16  ;;  %v4736_v9 = vshrl.u32 %v4492_v23, 16  ;;  %v4739_v45 = vshll.u32 %v4492_v23, 16  ;;  %v4745_v8 = vshll.u32 %v4493_v59, 16  ;;  %v4496_v23 = vld [vmem:[#allocation2 + $0x70] sm:$0xf] }
 0x39e   :  { %9016 = vmatprep.mubr.bf16.mxu0 %v15711_v32  ;;  %v3212_v7 = vrot.slane %v3211_v44, 4  ;;  %v3220_v26 = vrot.slane %v3218_v5, 4  ;;  %v4749_v11 = vshrl.u32 %v4493_v59, 16  ;;  %v4755_v22 = vshll.u32 %v4494_v1, 16  ;;  %v5522_v59 = vld [vmem:[#allocation2 + $0x78] sm:$0xe]  ;;  %9712 = vmatpush1.bf16.msra.mxu1 %v12756_v0 }
 0x39f   :  { %v3226_v43 = vrot.slane %v3224_v25, 5  ;;  %v4738_v20 = vrot.slane %v4736_v9, 4  ;;  %v4741_v54 = vrot.slane %v4739_v45, 5  ;;  %v4747_v58 = vrot.slane %v4745_v8, 5  ;;  %v5524_v25 = vld [vmem:[#allocation2 + $0x80] sm:$0x1]  ;;  %9713 = vmatprep.subr.bf16.mxu1 %v18377_v17 }
 0x3a0   :  { %v3217_v6 = vsel %vm15171_vm13, %v3212_v7, %v3216_v2  ;;  %v3221_v63 = vor.u32 %v3220_v26, %v3216_v2  ;;  %v4751_v12 = vrot.slane %v4749_v11, 4  ;;  %v4757_v40 = vrot.slane %v4755_v22, 5  ;;  %v4497_v2 = vld [vmem:[#allocation2 + $0x74] sm:$0x1]  ;;  %v5525_v0 = vld [vmem:[#allocation2 + $0x84] sm:$0xe] }
 0x3a1   :  { %v4742_v3 = vor.u32 %v4741_v54, %v4738_v20  ;;  %v11376_v33 = vrot.slane %v5519_v60, 9  ;;  %v5745_v32 = vrot.slane %v5520_v31, 5  ;;  %v5748_v41 = vrot.slane %v5521_v24, 5  ;;  %v2649_v31 = vld [vmem:[#allocation2 + $0x138] sm:$0xf] }
 0x3a2   :  { %v3222_v30 = vrot.slane %v3221_v63, 4  ;;  %v4752_v19 = vor.u32 %v4751_v12, %v4747_v58  ;;  %v3229_v42 = vshrl.u32 %v2646_v38, 16  ;;  %v3232_v49 = vshll.u32 %v2646_v38, 16  ;;  %v12735_v24 = vld [vmem:[#allocation2 + $0x114] sm:$0xff]   ;;  %v2650_v38 = vld [vmem:[#allocation2 + $0x13c] sm:$0xf] }
 0x3a3   :  { %v4743_v18 = vrot.slane %v4742_v3, 4  ;;  %v5746_v61 = vsel %vm15165_vm12, %v11376_v33, %v5745_v32  ;;  %v5747_v28 = vrot.slane %v5745_v32, 4  ;;  %v3238_v37 = vshll.u32 %v2647_v4, 16  ;;  %v2651_v32 = vld [vmem:[#allocation2 + $0x140] sm:$0x1] }
 0x3a4   :  { %9483 = vmatmul.mubr.bf16.gmra.mrb[80].mxu1 %v11342_v13  ;;  %v3227_v48 = vsel %vm15171_vm13, %v3222_v30, %v3226_v43  ;;  %v4753_v56 = vrot.slane %v4752_v19, 4  ;;  %v3231_v21 = vrot.slane %v3229_v42, 4  ;;  %v3234_v52 = vrot.slane %v3232_v49, 5  ;;  %v5523_v13 = vld [vmem:[#allocation2 + $0x7c] sm:$0xf] }
 0x3a5   :  { %9017 = vmatmul.mubr.bf16.gmra.mrb[144].mxu0 %v12733_v35  ;;  %9490 = vmatprep.mubr.bf16.mxu1 %v11407_v15  ;;  %v11230_v46 = vcombine.low %v3217_v6, %v3227_v48  ;;  %v4748_v39 = vsel %vm15171_vm13, %v4743_v18, %v4747_v58  ;;  %v5749_v53 = vsel %vm15165_vm12, %v5747_v28, %v5748_v41  ;;  %v3240_v47 = vrot.slane %v3238_v37, 5  ;;  %v4498_v35 = vld [vmem:[#allocation2 + $0x78] sm:$0xf]  ;;  %v4499_v37 = vld [vmem:[#allocation2 + $0x7c] sm:$0xf] }
 0x3a6   :  { %9024 = vmatprep.mubr.bf16.mxu0 %v15744_v10  ;;  %v4758_v27 = vsel %vm15171_vm13, %v4753_v56, %v4757_v40  ;;  %v11408_v16 = vcombine.low %v5746_v61, %v5749_v53  ;;  %v3235_v36 = vor.u32 %v3234_v52, %v3231_v21  ;;  %v3242_v34 = vshrl.u32 %v2647_v4, 16 }
 0x3a7   :  { %v11343_v55 = vcombine.low %v4748_v39, %v4758_v27  ;;  %v3248_v57 = vshll.u32 %v2648_v62, 16  ;;  %v4760_v50 = vshrl.u32 %v4495_v51, 16  ;;  %v4763_v1 = vshll.u32 %v4495_v51, 16  ;;  %v4500_v51 = vld [vmem:[#allocation2 + $0x80] sm:$0x1] }
 0x3a8   :  { %v3236_v15 = vrot.slane %v3235_v36, 4  ;;  %v3244_v44 = vrot.slane %v3242_v34, 4  ;;  %v4769_v5 = vshll.u32 %v4496_v23, 16  ;;  %v4773_v60 = vshrl.u32 %v4496_v23, 16 }
 0x3a9   :  { %v3250_v10 = vrot.slane %v3248_v57, 5  ;;  %v4762_v9 = vrot.slane %v4760_v50, 4  ;;  %v4765_v45 = vrot.slane %v4763_v1, 5  ;;  %v4779_v8 = vshll.u32 %v4497_v2, 16  ;;  %v5526_v2 = vld [vmem:[#allocation2 + $0x88] sm:$0xf] }
 0x3aa   :  { %v3241_v7 = vsel %vm15171_vm13, %v3236_v15, %v3240_v47  ;;  %v3245_v26 = vor.u32 %v3244_v44, %v3240_v47  ;;  %v4771_v11 = vrot.slane %v4769_v5, 5  ;;  %v4775_v22 = vrot.slane %v4773_v60, 4  ;;  %v5527_v1 = vld [vmem:[#allocation2 + $0x8c] sm:$0x1]  ;;  %v2652_v60 = vld [vmem:[#allocation2 + $0x144] sm:$0xf] }
 0x3ab   :  { %v4766_v43 = vor.u32 %v4765_v45, %v4762_v9  ;;  %v4781_v20 = vrot.slane %v4779_v8, 5  ;;  %v11377_v54 = vrot.slane %v5522_v59, 9  ;;  %v5752_v58 = vrot.slane %v5523_v13, 5  ;;  %v2653_v8 = vld [vmem:[#allocation2 + $0x148] sm:$0xf] }
 0x3ac   :  { %9491 = vmatmul.mubr.bf16.gmra.mrb[84].mxu1 %v11343_v55  ;;  %v3246_v6 = vrot.slane %v3245_v26, 4  ;;  %v4776_v63 = vor.u32 %v4775_v22, %v4771_v11  ;;  %v5755_v12 = vrot.slane %v5524_v25, 5  ;;  %v3253_v40 = vshrl.u32 %v2649_v31, 16 }
 0x3ad   :  { %9025 = vmatmul.mubr.bf16.gmra.mrb[148].mxu0 %v12735_v24  ;;  %9498 = vmatprep.mubr.bf16.mxu1 %v11408_v16  ;;  %v4767_v4 = vrot.slane %v4766_v43, 4  ;;  %v5753_v3 = vsel %vm15165_vm12, %v11377_v54, %v5752_v58  ;;  %v5754_v33 = vrot.slane %v5752_v58, 4  ;;  %v3256_v41 = vshll.u32 %v2649_v31, 16  ;;  %v12759_v31 = vld [vmem:[%s17897_s4 + $0x1d8] sm:$0xff]  }
 0x3ae   :  { %9032 = vmatprep.mubr.bf16.mxu0 %v11230_v46  ;;  %v3251_v30 = vsel %vm15171_vm13, %v3246_v6, %v3250_v10  ;;  %v4777_v19 = vrot.slane %v4776_v63, 4  ;;  %v3255_v42 = vrot.slane %v3253_v40, 4  ;;  %v3262_v49 = vshll.u32 %v2650_v38, 16  ;;  %v12736_v46 = vld [vmem:[#allocation2 + $0x120] sm:$0xff]   ;;  %9714 = vmatpush1.bf16.msra.mxu1 %v12759_v31 }
 0x3af   :  { %v11231_v18 = vcombine.low %v3241_v7, %v3251_v30  ;;  %v4772_v61 = vsel %vm15171_vm13, %v4767_v4, %v4771_v11  ;;  %v5756_v28 = vsel %vm15165_vm12, %v5754_v33, %v5755_v12  ;;  %v3258_v62 = vrot.slane %v3256_v41, 5  ;;  %v4501_v40 = vld [vmem:[#allocation2 + $0x84] sm:$0xf]  ;;  %9715 = vmatprep.subr.bf16.mxu1 %v18377_v17  ;;  %v4502_v41 = vld [vmem:[#allocation2 + $0x88] sm:$0xf]  ;;  %v12738_v30 = vld [vmem:[#allocation2 + $0x12c] sm:$0xff]  }
 0x3b0   :  { %v4782_v48 = vsel %vm15171_vm13, %v4777_v19, %v4781_v20  ;;  %v11409_v56 = vcombine.low %v5753_v3, %v5756_v28  ;;  %v3264_v21 = vrot.slane %v3262_v49, 5  ;;  %v3266_v52 = vshrl.u32 %v2650_v38, 16  ;;  %v2654_v20 = vld [vmem:[#allocation2 + $0x14c] sm:$0x1] }
 0x3b1   :  { %v11344_v39 = vcombine.low %v4772_v61, %v4782_v48  ;;  %v3259_v53 = vor.u32 %v3258_v62, %v3255_v42  ;;  %v3272_v47 = vshll.u32 %v2651_v32, 16  ;;  %v4784_v23 = vshrl.u32 %v4498_v35, 16  ;;  %v5528_v48 = vld [vmem:[#allocation2 + $0x90] sm:$0xe] }
 0x3b2   :  { %v3268_v27 = vrot.slane %v3266_v52, 4  ;;  %v4787_v16 = vshll.u32 %v4498_v35, 16  ;;  %v4793_v36 = vshll.u32 %v4499_v37, 16  ;;  %v4797_v34 = vshrl.u32 %v4499_v37, 16 }
 0x3b3   :  { %v3260_v59 = vrot.slane %v3259_v53, 4  ;;  %v3274_v55 = vrot.slane %v3272_v47, 5  ;;  %v4786_v57 = vrot.slane %v4784_v23, 4  ;;  %v4803_v50 = vshll.u32 %v4500_v51, 16 }
 0x3b4   :  { %9499 = vmatmul.mubr.bf16.gmra.mrb[88].mxu1 %v11344_v39  ;;  %v3269_v13 = vor.u32 %v3268_v27, %v3264_v21  ;;  %v4789_v15 = vrot.slane %v4787_v16, 5  ;;  %v4795_v44 = vrot.slane %v4793_v36, 5  ;;  %v4799_v5 = vrot.slane %v4797_v34, 4  ;;  %v5530_v39 = vld [vmem:[#allocation2 + $0x98] sm:$0x1] }
 0x3b5   :  { %9033 = vmatmul.mubr.bf16.gmra.mrb[152].mxu0 %v12736_v46  ;;  %9506 = vmatprep.mubr.bf16.mxu1 %v11409_v56  ;;  %v3265_v25 = vsel %vm15171_vm13, %v3260_v59, %v3264_v21  ;;  %v4805_v10 = vrot.slane %v4803_v50, 5  ;;  %v11378_v9 = vrot.slane %v5525_v0, 9  ;;  %v5759_v45 = vrot.slane %v5526_v2, 5  ;;  %v5529_v56 = vld [vmem:[#allocation2 + $0x94] sm:$0xf] }
 0x3b6   :  { %9040 = vmatprep.mubr.bf16.mxu0 %v11231_v18  ;;  %v3270_v7 = vrot.slane %v3269_v13, 4  ;;  %v4790_v26 = vor.u32 %v4789_v15, %v4786_v57  ;;  %v4800_v11 = vor.u32 %v4799_v5, %v4795_v44  ;;  %v5762_v22 = vrot.slane %v5527_v1, 5  ;;  %v4503_v18 = vld [vmem:[#allocation2 + $0x8c] sm:$0x1]  ;;  %v2655_v27 = vld [vmem:[#allocation2 + $0x150] sm:$0xf] }
 0x3b7   :  { %v5760_v24 = vsel %vm15165_vm12, %v11378_v9, %v5759_v45  ;;  %v5761_v43 = vrot.slane %v5759_v45, 4  ;;  %v3277_v54 = vshrl.u32 %v2652_v60, 16  ;;  %v3280_v58 = vshll.u32 %v2652_v60, 16  ;;  %v2656_v59 = vld [vmem:[#allocation2 + $0x154] sm:$0xf] }
 0x3b8   :  { %v3275_v38 = vsel %vm15171_vm13, %v3270_v7, %v3274_v55  ;;  %v4791_v6 = vrot.slane %v4790_v26, 4  ;;  %v4801_v63 = vrot.slane %v4800_v11, 4  ;;  %v3286_v12 = vshll.u32 %v2653_v8, 16  ;;  %v4504_v11 = vld [vmem:[#allocation2 + $0x90] sm:$0xf] }
 0x3b9   :  { %v11232_v4 = vcombine.low %v3265_v25, %v3275_v38  ;;  %v5763_v3 = vsel %vm15165_vm12, %v5761_v43, %v5762_v22  ;;  %v3279_v33 = vrot.slane %v3277_v54, 4  ;;  %v3282_v32 = vrot.slane %v3280_v58, 5  ;;  %v2657_v25 = vld [vmem:[#allocation2 + $0x158] sm:$0x1]  ;;  %v4505_v58 = vld [vmem:[#allocation2 + $0x94] sm:$0xf] }
 0x3ba   :  { %v4796_v19 = vsel %vm15171_vm13, %v4791_v6, %v4795_v44  ;;  %v4806_v42 = vsel %vm15171_vm13, %v4801_v63, %v4805_v10  ;;  %v11410_v49 = vcombine.low %v5760_v24, %v5763_v3  ;;  %v3288_v35 = vrot.slane %v3286_v12, 5  ;;  %v12739_v22 = vld [vmem:[#allocation2 + $0x138] sm:$0xff]  }
 0x3bb   :  { %v11345_v61 = vcombine.low %v4796_v19, %v4806_v42  ;;  %v3283_v28 = vor.u32 %v3282_v32, %v3279_v33  ;;  %v3290_v62 = vshrl.u32 %v2653_v8, 16  ;;  %v3296_v37 = vshll.u32 %v2654_v20, 16 }
 0x3bc   :  { %v4808_v21 = vshrl.u32 %v4501_v40, 16  ;;  %v4811_v52 = vshll.u32 %v4501_v40, 16  ;;  %v4817_v51 = vshll.u32 %v4502_v41, 16  ;;  %v4821_v46 = vshrl.u32 %v4502_v41, 16  ;;  %v4506_v40 = vld [vmem:[#allocation2 + $0x98] sm:$0x1] }
 0x3bd   :  { %9041 = vmatmul.mubr.bf16.gmra.mrb[156].mxu0 %v12738_v30  ;;  %9507 = vmatmul.mubr.bf16.gmra.mrb[92].mxu1 %v11345_v61  ;;  %v3284_v53 = vrot.slane %v3283_v28, 4  ;;  %v3292_v47 = vrot.slane %v3290_v62, 4  ;;  %v3298_v23 = vrot.slane %v3296_v37, 5  ;;  %v4827_v0 = vshll.u32 %v4503_v18, 16  ;;  %v5531_v41 = vld [vmem:[#allocation2 + $0x9c] sm:$0xe] }
 0x3be   :  { %9048 = vmatprep.mubr.bf16.mxu0 %v11232_v4  ;;  %9514 = vmatprep.mubr.bf16.mxu1 %v11410_v49  ;;  %v4810_v16 = vrot.slane %v4808_v21, 4  ;;  %v4813_v36 = vrot.slane %v4811_v52, 5  ;;  %v4819_v34 = vrot.slane %v4817_v51, 5  ;;  %v4823_v2 = vrot.slane %v4821_v46, 4  ;;  %v12762_v30 = vld [vmem:[%s17897_s4 + $0x1e0] sm:$0xff]  }
 0x3bf   :  { %v3289_v55 = vsel %vm15171_vm13, %v3284_v53, %v3288_v35  ;;  %v3293_v57 = vor.u32 %v3292_v47, %v3288_v35  ;;  %v4829_v50 = vrot.slane %v4827_v0, 5  ;;  %v11379_v1 = vrot.slane %v5528_v48, 9  ;;  %v5532_v18 = vld [vmem:[#allocation2 + $0xa0] sm:$0xf]  ;;  %v5533_v48 = vld [vmem:[#allocation2 + $0xa4] sm:$0x1]  ;;  %9716 = vmatpush1.bf16.msra.mxu1 %v12762_v30 }
 0x3c0   :  { %v4814_v13 = vor.u32 %v4813_v36, %v4810_v16  ;;  %v4824_v15 = vor.u32 %v4823_v2, %v4819_v34  ;;  %v5766_v44 = vrot.slane %v5529_v56, 5  ;;  %v5769_v5 = vrot.slane %v5530_v39, 5  ;;  %v2658_v46 = vld [vmem:[#allocation2 + $0x15c] sm:$0xf]  ;;  %v2659_v0 = vld [vmem:[#allocation2 + $0x160] sm:$0xf]  ;;  %9717 = vmatprep.subr.bf16.mxu1 %v18377_v17 }
 0x3c1   :  { %v3294_v60 = vrot.slane %v3293_v57, 4  ;;  %v3301_v10 = vshrl.u32 %v2655_v27, 16  ;;  %v3304_v9 = vshll.u32 %v2655_v27, 16  ;;  %v3310_v45 = vshll.u32 %v2656_v59, 16  ;;  %v12741_v2 = vld [vmem:[#allocation2 + $0x144] sm:$0xff]  }
 0x3c2   :  { %v4815_v8 = vrot.slane %v4814_v13, 4  ;;  %v4825_v31 = vrot.slane %v4824_v15, 4  ;;  %v5767_v7 = vsel %vm15165_vm12, %v11379_v1, %v5766_v44  ;;  %v5768_v26 = vrot.slane %v5766_v44, 4  ;;  %v2660_v44 = vld [vmem:[#allocation2 + $0x164] sm:$0x1] }
 0x3c3   :  { %v3299_v24 = vsel %vm15171_vm13, %v3294_v60, %v3298_v23  ;;  %v3303_v43 = vrot.slane %v3301_v10, 4  ;;  %v3306_v20 = vrot.slane %v3304_v9, 5  ;;  %v3312_v54 = vrot.slane %v3310_v45, 5  ;;  %v4507_v45 = vld [vmem:[#allocation2 + $0x9c] sm:$0xf] }
 0x3c4   :  { %v11233_v38 = vcombine.low %v3289_v55, %v3299_v24  ;;  %v4820_v6 = vsel %vm15171_vm13, %v4815_v8, %v4819_v34  ;;  %v4830_v63 = vsel %vm15171_vm13, %v4825_v31, %v4829_v50  ;;  %v5770_v12 = vsel %vm15165_vm12, %v5768_v26, %v5769_v5 }
 0x3c5   :  { %9049 = vmatmul.mubr.bf16.gmra.mrb[160].mxu0 %v12739_v22  ;;  %v11346_v4 = vcombine.low %v4820_v6, %v4830_v63  ;;  %v11411_v3 = vcombine.low %v5767_v7, %v5770_v12  ;;  %v3307_v33 = vor.u32 %v3306_v20, %v3303_v43  ;;  %v3314_v32 = vshrl.u32 %v2656_v59, 16 }
 0x3c6   :  { %9056 = vmatprep.mubr.bf16.mxu0 %v11233_v38  ;;  %v3320_v19 = vshll.u32 %v2657_v25, 16  ;;  %v4832_v42 = vshrl.u32 %v4504_v11, 16  ;;  %v4835_v49 = vshll.u32 %v4504_v11, 16  ;;  %v4841_v35 = vshll.u32 %v4505_v58, 16  ;;  %v4508_v11 = vld [vmem:[#allocation2 + $0xa0] sm:$0xf] }
 0x3c7   :  { %9515 = vmatmul.mubr.bf16.gmra.mrb[96].mxu1 %v11346_v4  ;;  %v3308_v61 = vrot.slane %v3307_v33, 4  ;;  %v3316_v28 = vrot.slane %v3314_v32, 4  ;;  %v4845_v62 = vshrl.u32 %v4505_v58, 16  ;;  %v4851_v37 = vshll.u32 %v4506_v40, 16  ;;  %v5534_v58 = vld [vmem:[#allocation2 + $0xa8] sm:$0xe] }
 0x3c8   :  { %9522 = vmatprep.mubr.bf16.mxu1 %v11411_v3  ;;  %v3322_v56 = vrot.slane %v3320_v19, 5  ;;  %v4834_v21 = vrot.slane %v4832_v42, 4  ;;  %v4837_v52 = vrot.slane %v4835_v49, 5  ;;  %v4843_v51 = vrot.slane %v4841_v35, 5  ;;  %v5535_v40 = vld [vmem:[#allocation2 + $0xac] sm:$0xf] }
 0x3c9   :  { %v3313_v39 = vsel %vm15171_vm13, %v3308_v61, %v3312_v54  ;;  %v3317_v53 = vor.u32 %v3316_v28, %v3312_v54  ;;  %v4847_v47 = vrot.slane %v4845_v62, 4  ;;  %v4853_v23 = vrot.slane %v4851_v37, 5  ;;  %v4509_v54 = vld [vmem:[#allocation2 + $0xa4] sm:$0x1]  ;;  %v2661_v35 = vld [vmem:[#allocation2 + $0x168] sm:$0xf] }
 0x3ca   :  { %v4838_v27 = vor.u32 %v4837_v52, %v4834_v21  ;;  %v11380_v16 = vrot.slane %v5531_v41, 9  ;;  %v5773_v36 = vrot.slane %v5532_v18, 5  ;;  %v5776_v34 = vrot.slane %v5533_v48, 5  ;;  %v5536_v41 = vld [vmem:[#allocation2 + $0xb0] sm:$0x1] }
 0x3cb   :  { %v3318_v59 = vrot.slane %v3317_v53, 4  ;;  %v4848_v55 = vor.u32 %v4847_v47, %v4843_v51  ;;  %v3325_v57 = vshrl.u32 %v2658_v46, 16  ;;  %v3328_v50 = vshll.u32 %v2658_v46, 16  ;;  %v12742_v18 = vld [vmem:[#allocation2 + $0x150] sm:$0xff]  }
 0x3cc   :  { %v4839_v1 = vrot.slane %v4838_v27, 4  ;;  %v5774_v13 = vsel %vm15165_vm12, %v11380_v16, %v5773_v36  ;;  %v5775_v15 = vrot.slane %v5773_v36, 4  ;;  %v3334_v5 = vshll.u32 %v2659_v0, 16  ;;  %v2663_v36 = vld [vmem:[#allocation2 + $0x170] sm:$0x1] }
 0x3cd   :  { %9057 = vmatmul.mubr.bf16.gmra.mrb[164].mxu0 %v12741_v2  ;;  %v3323_v60 = vsel %vm15171_vm13, %v3318_v59, %v3322_v56  ;;  %v4849_v25 = vrot.slane %v4848_v55, 4  ;;  %v3327_v10 = vrot.slane %v3325_v57, 4  ;;  %v3330_v9 = vrot.slane %v3328_v50, 5  ;;  %v4510_v50 = vld [vmem:[#allocation2 + $0xa8] sm:$0xf] }
 0x3ce   :  { %v11234_v8 = vcombine.low %v3313_v39, %v3323_v60  ;;  %v4844_v31 = vsel %vm15171_vm13, %v4839_v1, %v4843_v51  ;;  %v5777_v7 = vsel %vm15165_vm12, %v5775_v15, %v5776_v34  ;;  %v3336_v26 = vrot.slane %v3334_v5, 5  ;;  %v2662_v51 = vld [vmem:[#allocation2 + $0x16c] sm:$0xf] }
 0x3cf   :  { %v4854_v22 = vsel %vm15171_vm13, %v4849_v25, %v4853_v23  ;;  %v11412_v24 = vcombine.low %v5774_v13, %v5777_v7  ;;  %v3331_v43 = vor.u32 %v3330_v9, %v3327_v10  ;;  %v3338_v20 = vshrl.u32 %v2659_v0, 16  ;;  %v12765_v23 = vld [vmem:[%s17897_s4 + $0x1e8] sm:$0xff]   ;;  %v12744_v10 = vld [vmem:[#allocation2 + $0x15c] sm:$0xff]  }
 0x3d0   :  { %9064 = vmatprep.mubr.bf16.mxu0 %v11234_v8  ;;  %v11347_v38 = vcombine.low %v4844_v31, %v4854_v22  ;;  %v3344_v6 = vshll.u32 %v2660_v44, 16  ;;  %v4856_v63 = vshrl.u32 %v4507_v45, 16  ;;  %v4859_v12 = vshll.u32 %v4507_v45, 16  ;;  %9718 = vmatpush1.bf16.msra.mxu1 %v12765_v23  ;;  %v4511_v5 = vld [vmem:[#allocation2 + $0xac] sm:$0xf] }
 0x3d1   :  { %v3332_v4 = vrot.slane %v3331_v43, 4  ;;  %v3340_v3 = vrot.slane %v3338_v20, 4  ;;  %v4865_v33 = vshll.u32 %v4508_v11, 16  ;;  %v4869_v32 = vshrl.u32 %v4508_v11, 16  ;;  %9719 = vmatprep.subr.bf16.mxu1 %v18377_v17  ;;  %v4512_v8 = vld [vmem:[#allocation2 + $0xb0] sm:$0x1] }
 0x3d2   :  { %9523 = vmatmul.mubr.bf16.gmra.mrb[100].mxu1 %v11347_v38  ;;  %v3346_v30 = vrot.slane %v3344_v6, 5  ;;  %v4858_v19 = vrot.slane %v4856_v63, 4  ;;  %v4861_v42 = vrot.slane %v4859_v12, 5  ;;  %v4875_v49 = vshll.u32 %v4509_v54, 16  ;;  %v5537_v22 = vld [vmem:[#allocation2 + $0xb4] sm:$0xe] }
 0x3d3   :  { %9530 = vmatprep.mubr.bf16.mxu1 %v11412_v24  ;;  %v3337_v61 = vsel %vm15171_vm13, %v3332_v4, %v3336_v26  ;;  %v3341_v28 = vor.u32 %v3340_v3, %v3336_v26  ;;  %v4867_v62 = vrot.slane %v4865_v33, 5  ;;  %v4871_v37 = vrot.slane %v4869_v32, 4  ;;  %v5538_v24 = vld [vmem:[#allocation2 + $0xb8] sm:$0xf]  ;;  %v5539_v38 = vld [vmem:[#allocation2 + $0xbc] sm:$0x1] }
 0x3d4   :  { %v4862_v48 = vor.u32 %v4861_v42, %v4858_v19  ;;  %v4877_v56 = vrot.slane %v4875_v49, 5  ;;  %v11381_v21 = vrot.slane %v5534_v58, 9  ;;  %v5780_v52 = vrot.slane %v5535_v40, 5 }
 0x3d5   :  { %9065 = vmatmul.mubr.bf16.gmra.mrb[168].mxu0 %v12742_v18  ;;  %v3342_v46 = vrot.slane %v3341_v28, 4  ;;  %v4872_v39 = vor.u32 %v4871_v37, %v4867_v62  ;;  %v5783_v53 = vrot.slane %v5536_v41, 5  ;;  %v3349_v47 = vshrl.u32 %v2661_v35, 16  ;;  %v2664_v41 = vld [vmem:[#allocation2 + $0x174] sm:$0xf] }
 0x3d6   :  { %v4863_v0 = vrot.slane %v4862_v48, 4  ;;  %v5781_v27 = vsel %vm15165_vm12, %v11381_v21, %v5780_v52  ;;  %v5782_v16 = vrot.slane %v5780_v52, 4  ;;  %v3352_v34 = vshll.u32 %v2661_v35, 16  ;;  %v2665_v35 = vld [vmem:[#allocation2 + $0x178] sm:$0xf] }
 0x3d7   :  { %v3347_v2 = vsel %vm15171_vm13, %v3342_v46, %v3346_v30  ;;  %v4873_v59 = vrot.slane %v4872_v39, 4  ;;  %v3351_v55 = vrot.slane %v3349_v47, 4  ;;  %v3358_v57 = vshll.u32 %v2662_v51, 16  ;;  %v2666_v39 = vld [vmem:[#allocation2 + $0x17c] sm:$0x1] }
 0x3d8   :  { %v11235_v1 = vcombine.low %v3337_v61, %v3347_v2  ;;  %v4868_v13 = vsel %vm15171_vm13, %v4863_v0, %v4867_v62  ;;  %v5784_v15 = vsel %vm15165_vm12, %v5782_v16, %v5783_v53  ;;  %v3354_v44 = vrot.slane %v3352_v34, 5  ;;  %v4513_v16 = vld [vmem:[#allocation2 + $0xb4] sm:$0xf] }
 0x3d9   :  { %v4878_v60 = vsel %vm15171_vm13, %v4873_v59, %v4877_v56  ;;  %v11413_v25 = vcombine.low %v5781_v27, %v5784_v15  ;;  %v3360_v9 = vrot.slane %v3358_v57, 5  ;;  %v3362_v45 = vshrl.u32 %v2662_v51, 16 }
 0x3da   :  { %9072 = vmatprep.mubr.bf16.mxu0 %v11235_v1  ;;  %v11348_v31 = vcombine.low %v4868_v13, %v4878_v60  ;;  %v3355_v7 = vor.u32 %v3354_v44, %v3351_v55  ;;  %v3368_v26 = vshll.u32 %v2663_v36, 16  ;;  %v4880_v11 = vshrl.u32 %v4510_v50, 16  ;;  %v4514_v36 = vld [vmem:[#allocation2 + $0xb8] sm:$0xf]  ;;  %v12745_v55 = vld [vmem:[#allocation2 + $0x168] sm:$0xff]  }
 0x3db   :  { %v3364_v43 = vrot.slane %v3362_v45, 4  ;;  %v4883_v20 = vshll.u32 %v4510_v50, 16  ;;  %v4889_v54 = vshll.u32 %v4511_v5, 16  ;;  %v4893_v58 = vshrl.u32 %v4511_v5, 16  ;;  %v4515_v50 = vld [vmem:[#allocation2 + $0xbc] sm:$0x1] }
 0x3dc   :  { %9531 = vmatmul.mubr.bf16.gmra.mrb[104].mxu1 %v11348_v31  ;;  %v3356_v6 = vrot.slane %v3355_v7, 4  ;;  %v3370_v63 = vrot.slane %v3368_v26, 5  ;;  %v4882_v12 = vrot.slane %v4880_v11, 4  ;;  %v4899_v40 = vshll.u32 %v4512_v8, 16  ;;  %v5540_v5 = vld [vmem:[#allocation2 + $0xc0] sm:$0xe] }
 0x3dd   :  { %9538 = vmatprep.mubr.bf16.mxu1 %v11413_v25  ;;  %9073 = vmatmul.mubr.bf16.gmra.mrb[172].mxu0 %v12744_v10  ;;  %v3365_v4 = vor.u32 %v3364_v43, %v3360_v9  ;;  %v4885_v3 = vrot.slane %v4883_v20, 5  ;;  %v4891_v33 = vrot.slane %v4889_v54, 5  ;;  %v4895_v32 = vrot.slane %v4893_v58, 4  ;;  %v5541_v60 = vld [vmem:[#allocation2 + $0xc4] sm:$0xf] }
 0x3de   :  { %v3361_v30 = vsel %vm15171_vm13, %v3356_v6, %v3360_v9  ;;  %v4901_v19 = vrot.slane %v4899_v40, 5  ;;  %v11382_v42 = vrot.slane %v5537_v22, 9  ;;  %v5787_v49 = vrot.slane %v5538_v24, 5  ;;  %v5542_v8 = vld [vmem:[#allocation2 + $0xc8] sm:$0x1] }
 0x3df   :  { %v3366_v18 = vrot.slane %v3365_v4, 4  ;;  %v4886_v61 = vor.u32 %v4885_v3, %v4882_v12  ;;  %v4896_v28 = vor.u32 %v4895_v32, %v4891_v33  ;;  %v5790_v62 = vrot.slane %v5539_v38, 5  ;;  %v2667_v22 = vld [vmem:[#allocation2 + $0x180] sm:$0xf]  ;;  %v2668_v58 = vld [vmem:[#allocation2 + $0x184] sm:$0xf] }
 0x3e0   :  { %v5788_v37 = vsel %vm15165_vm12, %v11382_v42, %v5787_v49  ;;  %v5789_v48 = vrot.slane %v5787_v49, 4  ;;  %v3373_v56 = vshrl.u32 %v2664_v41, 16  ;;  %v3376_v21 = vshll.u32 %v2664_v41, 16  ;;  %v2669_v41 = vld [vmem:[#allocation2 + $0x188] sm:$0x1] }
 0x3e1   :  { %v3371_v52 = vsel %vm15171_vm13, %v3366_v18, %v3370_v63  ;;  %v4887_v51 = vrot.slane %v4886_v61, 4  ;;  %v4897_v46 = vrot.slane %v4896_v28, 4  ;;  %v3382_v53 = vshll.u32 %v2665_v35, 16  ;;  %v4516_v28 = vld [vmem:[#allocation2 + $0xc0] sm:$0xf] }
 0x3e2   :  { %v11236_v47 = vcombine.low %v3361_v30, %v3371_v52  ;;  %v5791_v23 = vsel %vm15165_vm12, %v5789_v48, %v5790_v62  ;;  %v3375_v0 = vrot.slane %v3373_v56, 4  ;;  %v3378_v27 = vrot.slane %v3376_v21, 5  ;;  %v12768_v62 = vld [vmem:[%s17897_s4 + $0x1f0] sm:$0xff]   ;;  %v4517_v52 = vld [vmem:[#allocation2 + $0xc4] sm:$0xf] }
 0x3e3   :  { %v4892_v34 = vsel %vm15171_vm13, %v4887_v51, %v4891_v33  ;;  %v4902_v2 = vsel %vm15171_vm13, %v4897_v46, %v4901_v19  ;;  %v11414_v59 = vcombine.low %v5788_v37, %v5791_v23  ;;  %v3384_v57 = vrot.slane %v3382_v53, 5  ;;  %v4518_v23 = vld [vmem:[#allocation2 + $0xc8] sm:$0x1]  ;;  %9720 = vmatpush1.bf16.msra.mxu1 %v12768_v62 }
 0x3e4   :  { %9080 = vmatprep.mubr.bf16.mxu0 %v11236_v47  ;;  %v11349_v1 = vcombine.low %v4892_v34, %v4902_v2  ;;  %v3379_v13 = vor.u32 %v3378_v27, %v3375_v0  ;;  %v3386_v15 = vshrl.u32 %v2665_v35, 16  ;;  %v3392_v44 = vshll.u32 %v2666_v39, 16  ;;  %v12747_v47 = vld [vmem:[#allocation2 + $0x174] sm:$0xff]   ;;  %v5543_v34 = vld [vmem:[#allocation2 + $0xe4] sm:$0xe]  ;;  %9721 = vmatprep.subr.bf16.mxu1 %v18377_v17 }
 0x3e5   :  { %9081 = vmatmul.mubr.bf16.gmra.mrb[176].mxu0 %v12745_v55  ;;  %v4904_v25 = vshrl.u32 %v4513_v16, 16  ;;  %v4907_v10 = vshll.u32 %v4513_v16, 16  ;;  %v4913_v9 = vshll.u32 %v4514_v36, 16  ;;  %v4917_v45 = vshrl.u32 %v4514_v36, 16  ;;  %v5544_v2 = vld [vmem:[#allocation2 + $0xe8] sm:$0xf] }
 0x3e6   :  { %9539 = vmatmul.mubr.bf16.gmra.mrb[108].mxu1 %v11349_v1  ;;  %v3380_v31 = vrot.slane %v3379_v13, 4  ;;  %v3388_v7 = vrot.slane %v3386_v15, 4  ;;  %v3394_v26 = vrot.slane %v3392_v44, 5  ;;  %v4923_v11 = vshll.u32 %v4515_v50, 16  ;;  %v5545_v13 = vld [vmem:[#allocation2 + $0xec] sm:$0x1] }
 0x3e7   :  { %9546 = vmatprep.mubr.bf16.mxu1 %v11414_v59  ;;  %v4906_v24 = vrot.slane %v4904_v25, 4  ;;  %v4909_v43 = vrot.slane %v4907_v10, 5  ;;  %v4915_v20 = vrot.slane %v4913_v9, 5  ;;  %v4919_v54 = vrot.slane %v4917_v45, 4  ;;  %v15877_v59 = vld [vmem:[%s17897_s4 + $0x200] sm:$0xff]  }
 0x3e8   :  { %v3385_v38 = vsel %vm15171_vm13, %v3380_v31, %v3384_v57  ;;  %v3389_v6 = vor.u32 %v3388_v7, %v3384_v57  ;;  %v4925_v63 = vrot.slane %v4923_v11, 5  ;;  %v11383_v12 = vrot.slane %v5540_v5, 9  ;;  %v2670_v25 = vld [vmem:[#allocation2 + $0x18c] sm:$0xf]  ;;  %12175 = vmatprep.subr.bf16.mxu0 %v15877_v59  ;;  %v2671_v11 = vld [vmem:[#allocation2 + $0x190] sm:$0xf] }
 0x3e9   :  { %v4910_v40 = vor.u32 %v4909_v43, %v4906_v24  ;;  %v4920_v4 = vor.u32 %v4919_v54, %v4915_v20  ;;  %v5794_v3 = vrot.slane %v5541_v60, 5  ;;  %v5797_v33 = vrot.slane %v5542_v8, 5 }
 0x3ea   :  { %v3390_v32 = vrot.slane %v3389_v6, 4  ;;  %v3397_v30 = vshrl.u32 %v2667_v22, 16  ;;  %v3400_v19 = vshll.u32 %v2667_v22, 16  ;;  %v3406_v42 = vshll.u32 %v2668_v58, 16 }
 0x3eb   :  { %v4911_v49 = vrot.slane %v4910_v40, 4  ;;  %v4921_v35 = vrot.slane %v4920_v4, 4  ;;  %v5795_v18 = vsel %vm15165_vm12, %v11383_v12, %v5794_v3  ;;  %v5796_v61 = vrot.slane %v5794_v3, 4  ;;  %v2672_v4 = vld [vmem:[#allocation2 + $0x194] sm:$0x1] }
 0x3ec   :  { %v3395_v37 = vsel %vm15171_vm13, %v3390_v32, %v3394_v26  ;;  %v3399_v48 = vrot.slane %v3397_v30, 4  ;;  %v3402_v56 = vrot.slane %v3400_v19, 5  ;;  %v3408_v21 = vrot.slane %v3406_v42, 5  ;;  %v4519_v42 = vld [vmem:[#allocation2 + $0xe4] sm:$0xf] }
 0x3ed   :  { %v11237_v51 = vcombine.low %v3385_v38, %v3395_v37  ;;  %v4916_v46 = vsel %vm15171_vm13, %v4911_v49, %v4915_v20  ;;  %v4926_v39 = vsel %vm15171_vm13, %v4921_v35, %v4925_v63  ;;  %v5798_v53 = vsel %vm15165_vm12, %v5796_v61, %v5797_v33  ;;  %v12772_v33 = vld [vmem:[%s17897_s4 + $0x1f8] sm:$0xff]  }
 0x3ee   :  { %v11350_v0 = vcombine.low %v4916_v46, %v4926_v39  ;;  %v11415_v27 = vcombine.low %v5795_v18, %v5798_v53  ;;  %v3403_v16 = vor.u32 %v3402_v56, %v3399_v48  ;;  %v3410_v36 = vshrl.u32 %v2668_v58, 16  ;;  %9722 = vmatpush1.bf16.msra.mxu1 %v12772_v33  ;;  %v12748_v48 = vld [vmem:[#allocation2 + $0x180] sm:$0xff]  }
 0x3ef   :  { %9088 = vmatprep.mubr.bf16.mxu0 %v11237_v51  ;;  %v3416_v55 = vshll.u32 %v2669_v41, 16  ;;  %v4928_v57 = vshrl.u32 %v4516_v28, 16  ;;  %v4931_v50 = vshll.u32 %v4516_v28, 16  ;;  %v4937_v1 = vshll.u32 %v4517_v52, 16  ;;  %v4520_v28 = vld [vmem:[#allocation2 + $0xe8] sm:$0xf] }
 0x3f0   :  { %9547 = vmatmul.mubr.bf16.gmra.mrb[112].mxu1 %v11350_v0  ;;  %9089 = vmatmul.mubr.bf16.gmra.mrb[180].mxu0 %v12747_v47  ;;  %v3404_v15 = vrot.slane %v3403_v16, 4  ;;  %v3412_v44 = vrot.slane %v3410_v36, 4  ;;  %v4941_v5 = vshrl.u32 %v4517_v52, 16  ;;  %v4947_v60 = vshll.u32 %v4518_v23, 16  ;;  %v4521_v52 = vld [vmem:[#allocation2 + $0xec] sm:$0x1] }
 0x3f1   :  { %9554 = vmatprep.mubr.bf16.mxu1 %v11415_v27  ;;  %v3418_v10 = vrot.slane %v3416_v55, 5  ;;  %v4930_v9 = vrot.slane %v4928_v57, 4  ;;  %v4933_v45 = vrot.slane %v4931_v50, 5  ;;  %v4939_v8 = vrot.slane %v4937_v1, 5  ;;  %v5546_v47 = vld [vmem:[#allocation2 + $0xf0] sm:$0xe] }
 0x3f2   :  { %v3409_v17 = vsel %vm15171_vm13, %v3404_v15, %v3408_v21  ;;  %v3413_v31 = vor.u32 %v3412_v44, %v3408_v21  ;;  %v4943_v7 = vrot.slane %v4941_v5, 4  ;;  %v4949_v26 = vrot.slane %v4947_v60, 5  ;;  %v5547_v36 = vld [vmem:[#allocation2 + $0xf4] sm:$0xf]  ;;  %v4522_v57 = vld [vmem:[#allocation2 + $0xf0] sm:$0xf] }
 0x3f3   :  { %v4934_v22 = vor.u32 %v4933_v45, %v4930_v9  ;;  %v11384_v24 = vrot.slane %v5543_v34, 9  ;;  %v5801_v43 = vrot.slane %v5544_v2, 5  ;;  %v5804_v20 = vrot.slane %v5545_v13, 5  ;;  %v5548_v44 = vld [vmem:[#allocation2 + $0xf8] sm:$0x1] }
 0x3f4   :  { %v3414_v54 = vrot.slane %v3413_v31, 4  ;;  %v4944_v58 = vor.u32 %v4943_v7, %v4939_v8  ;;  %v3421_v38 = vshrl.u32 %v2670_v25, 16  ;;  %v3424_v6 = vshll.u32 %v2670_v25, 16  ;;  %v4523_v9 = vld [vmem:[#allocation2 + $0xf4] sm:$0xf] }
 0x3f5   :  { %v4935_v63 = vrot.slane %v4934_v22, 4  ;;  %v5802_v12 = vsel %vm15165_vm12, %v11384_v24, %v5801_v43  ;;  %v5803_v40 = vrot.slane %v5801_v43, 4  ;;  %v3430_v3 = vshll.u32 %v2671_v11, 16  ;;  %v4524_v31 = vld [vmem:[#allocation2 + $0xf8] sm:$0x1] }
 0x3f6   :  { %v3419_v32 = vsel %vm15171_vm13, %v3414_v54, %v3418_v10  ;;  %v4945_v41 = vrot.slane %v4944_v58, 4  ;;  %v3423_v30 = vrot.slane %v3421_v38, 4  ;;  %v3426_v19 = vrot.slane %v3424_v6, 5 }
 0x3f7   :  { %v11238_v49 = vcombine.low %v3409_v17, %v3419_v32  ;;  %v4940_v35 = vsel %vm15171_vm13, %v4935_v63, %v4939_v8  ;;  %v5805_v18 = vsel %vm15165_vm12, %v5803_v40, %v5804_v20  ;;  %v3432_v61 = vrot.slane %v3430_v3, 5  ;;  %v5550_v20 = vld [vmem:[#allocation2 + $0x100] sm:$0xf]  ;;  %v5551_v63 = vld [vmem:[#allocation2 + $0x104] sm:$0x1]  ;;  %v12750_v3 = vld [vmem:[#allocation2 + $0x18c] sm:$0xff]  }
 0x3f8   :  { %v4950_v62 = vsel %vm15171_vm13, %v4945_v41, %v4949_v26  ;;  %v11416_v37 = vcombine.low %v5802_v12, %v5805_v18  ;;  %v3427_v56 = vor.u32 %v3426_v19, %v3423_v30  ;;  %v3434_v21 = vshrl.u32 %v2671_v11, 16  ;;  %v5549_v26 = vld [vmem:[#allocation2 + $0xfc] sm:$0xe]  ;;  %v3604_v32 = vld [vmem:[#allocation2] sm:$0xe] }
 0x3f9   :  { %9096 = vmatprep.mubr.bf16.mxu0 %v11238_v49  ;;  %v11351_v51 = vcombine.low %v4940_v35, %v4950_v62  ;;  %v3440_v46 = vshll.u32 %v2672_v4, 16  ;;  %v4952_v39 = vshrl.u32 %v4519_v42, 16  ;;  %v4955_v53 = vshll.u32 %v4519_v42, 16  ;;  %v3605_v49 = vld [vmem:[#allocation2 + $0x4] sm:$0xf] }
 0x3fa   :  { %9097 = vmatmul.mubr.bf16.gmra.mrb[184].mxu0 %v12748_v48  ;;  %v3428_v23 = vrot.slane %v3427_v56, 4  ;;  %v3436_v0 = vrot.slane %v3434_v21, 4  ;;  %v4961_v27 = vshll.u32 %v4520_v28, 16  ;;  %v4965_v16 = vshrl.u32 %v4520_v28, 16  ;;  %v3606_v35 = vld [vmem:[#allocation2 + $0x8] sm:$0x1] }
 0x3fb   :  { %9555 = vmatmul.mubr.bf16.gmra.mrb[116].mxu1 %v11351_v51  ;;  %v4954_v34 = vrot.slane %v4952_v39, 4  ;;  %v4957_v2 = vrot.slane %v4955_v53, 5  ;;  %v4971_v55 = vshll.u32 %v4521_v52, 16  ;;  %v3442_v1 = vrot.slane %v3440_v46, 5  ;;  %v4525_v48 = vld [vmem:[#allocation2 + $0xfc] sm:$0xf] }
 0x3fc   :  { %9562 = vmatprep.mubr.bf16.mxu1 %v11416_v37  ;;  %v3437_v50 = vor.u32 %v3436_v0, %v3432_v61  ;;  %v4963_v13 = vrot.slane %v4961_v27, 5  ;;  %v4967_v15 = vrot.slane %v4965_v16, 4  ;;  %v3433_v5 = vsel %vm15171_vm13, %v3428_v23, %v3432_v61  ;;  %v12751_v61 = vld [vmem:[#allocation2 + $0xc] sm:$0xff]   ;;  %v4526_v46 = vld [vmem:[#allocation2 + $0x100] sm:$0xf] }
 0x3fd   :  { %v4958_v60 = vor.u32 %v4957_v2, %v4954_v34  ;;  %v4973_v25 = vrot.slane %v4971_v55, 5  ;;  %v5808_v10 = vrot.slane %v5547_v36, 5  ;;  %v11385_v17 = vrot.slane %v5546_v47, 9  ;;  %v4527_v0 = vld [vmem:[#allocation2 + $0x104] sm:$0x1] }
 0x3fe   :  { %v3438_v45 = vrot.slane %v3437_v50, 4  ;;  %v4968_v8 = vor.u32 %v4967_v15, %v4963_v13  ;;  %v4976_v7 = vshrl.u32 %v4522_v57, 16  ;;  %v5811_v24 = vrot.slane %v5548_v44, 5  ;;  %v5552_v2 = vld [vmem:[#allocation2 + $0x108] sm:$0xe] }
 0x3ff   :  { %v4959_v11 = vrot.slane %v4958_v60, 4  ;;  %v5810_v22 = vrot.slane %v5808_v10, 4  ;;  %v4979_v43 = vshll.u32 %v4522_v57, 16  ;;  %v4985_v6 = vshll.u32 %v4523_v9, 16 }
 0x400   :  { %v3443_v54 = vsel %vm15171_vm13, %v3438_v45, %v3442_v1  ;;  %v4969_v58 = vrot.slane %v4968_v8, 4  ;;  %v4978_v38 = vrot.slane %v4976_v7, 4  ;;  %v5809_v30 = vsel %vm15165_vm12, %v11385_v17, %v5808_v10  ;;  %v3607_v17 = vld [vmem:[#allocation2 + $0xc] sm:$0xe] }
 0x401   :  { %v11239_v12 = vcombine.low %v3433_v5, %v3443_v54  ;;  %v4964_v40 = vsel %vm15171_vm13, %v4959_v11, %v4963_v13  ;;  %v5812_v4 = vsel %vm15165_vm12, %v5810_v22, %v5811_v24  ;;  %v4981_v33 = vrot.slane %v4979_v43, 5  ;;  %v5553_v13 = vld [vmem:[#allocation2 + $0x10c] sm:$0xf]  ;;  %v3609_v24 = vld [vmem:[#allocation2 + $0x14] sm:$0x1]  ;;  %v12752_v54 = vld [vmem:[#allocation2 + $0x18] sm:$0xff]  }
 0x402   :  { %v4974_v41 = vsel %vm15171_vm13, %v4969_v58, %v4973_v25  ;;  %v4987_v19 = vrot.slane %v4985_v6, 5  ;;  %v4989_v42 = vshrl.u32 %v4523_v9, 16  ;;  %v4995_v62 = vshll.u32 %v4524_v31, 16  ;;  %v5554_v25 = vld [vmem:[#allocation2 + $0x110] sm:$0x1] }
 0x403   :  { %9104 = vmatprep.mubr.bf16.mxu0 %v11239_v12  ;;  %v11352_v18 = vcombine.low %v4964_v40, %v4974_v41  ;;  %v4982_v28 = vor.u32 %v4981_v33, %v4978_v38  ;;  %v11386_v37 = vrot.slane %v5549_v26, 9  ;;  %v11417_v56 = vcombine.low %v5809_v30, %v5812_v4  ;;  %v3608_v31 = vld [vmem:[#allocation2 + $0x10] sm:$0xf]  ;;  %v4528_v43 = vld [vmem:[#allocation2 + $0x108] sm:$0xf] }
 0x404   :  { %9105 = vmatmul.mubr.bf16.gmra.mrb[188].mxu0 %v12750_v3  ;;  %v4991_v21 = vrot.slane %v4989_v42, 4  ;;  %v5815_v52 = vrot.slane %v5550_v20, 5  ;;  %v11240_v51 = vrot.slane %v3604_v32, 9  ;;  %v5818_v53 = vrot.slane %v5551_v63, 5  ;;  %v12775_v63 = vld [vmem:[%s17897_s4 + $0x208] sm:$0xff]  }
 0x405   :  { %9563 = vmatmul.mubr.bf16.gmra.mrb[120].mxu1 %v11352_v18  ;;  %9145 = vmatprep.mubr.bf16.mxu0 %v12751_v61  ;;  %v4983_v39 = vrot.slane %v4982_v28, 4  ;;  %v3801_v47 = vrot.slane %v3605_v49, 5  ;;  %v3804_v23 = vrot.slane %v3606_v35, 5  ;;  %v4997_v16 = vrot.slane %v4995_v62, 5  ;;  %v4530_v35 = vld [vmem:[#allocation2 + $0x110] sm:$0x1] }
 0x406   :  { %9570 = vmatprep.mubr.bf16.mxu1 %v11417_v56  ;;  %v4992_v27 = vor.u32 %v4991_v21, %v4987_v19  ;;  %v5817_v36 = vrot.slane %v5815_v52, 4  ;;  %v5000_v34 = vshrl.u32 %v4525_v48, 16  ;;  %v5816_v55 = vsel %vm15165_vm12, %v11386_v37, %v5815_v52  ;;  %v5555_v28 = vld [vmem:[#allocation2 + $0x114] sm:$0xe]  ;;  %v5556_v21 = vld [vmem:[#allocation2 + $0x118] sm:$0xf] }
 0x407   :  { %v3802_v57 = vsel %vm15165_vm12, %v11240_v51, %v3801_v47  ;;  %v3803_v50 = vrot.slane %v3801_v47, 4  ;;  %v5003_v1 = vshll.u32 %v4525_v48, 16  ;;  %v4988_v15 = vsel %vm15171_vm13, %v4983_v39, %v4987_v19  ;;  %v4529_v19 = vld [vmem:[#allocation2 + $0x10c] sm:$0xf]  ;;  %v12777_v52 = vld [vmem:[%s17897_s4 + $0x210] sm:$0xff]  }
 0x408   :  { %v4993_v44 = vrot.slane %v4992_v27, 4  ;;  %v5002_v5 = vrot.slane %v5000_v34, 4  ;;  %v5009_v60 = vshll.u32 %v4526_v46, 16  ;;  %v5819_v10 = vsel %vm15165_vm12, %v5817_v36, %v5818_v53  ;;  %v5557_v53 = vld [vmem:[#allocation2 + $0x11c] sm:$0x1] }
 0x409   :  { %v3805_v9 = vsel %vm15165_vm12, %v3803_v50, %v3804_v23  ;;  %v5005_v45 = vrot.slane %v5003_v1, 5  ;;  %v5013_v8 = vshrl.u32 %v4526_v46, 16  ;;  %v5019_v22 = vshll.u32 %v4527_v0, 16  ;;  %v3610_v47 = vld [vmem:[#allocation2 + $0x18] sm:$0xe]  ;;  %v12754_v1 = vld [vmem:[#allocation2 + $0x24] sm:$0xff]  }
 0x40a   :  { %v4998_v7 = vsel %vm15171_vm13, %v4993_v44, %v4997_v16  ;;  %v11272_v26 = vcombine.low %v3802_v57, %v3805_v9  ;;  %v5011_v11 = vrot.slane %v5009_v60, 5  ;;  %v11387_v6 = vrot.slane %v5552_v2, 9  ;;  %v3611_v36 = vld [vmem:[#allocation2 + $0x1c] sm:$0xf]  ;;  %v3612_v50 = vld [vmem:[#allocation2 + $0x20] sm:$0x1] }
 0x40b   :  { %v11353_v20 = vcombine.low %v4988_v15, %v4998_v7  ;;  %v5006_v58 = vor.u32 %v5005_v45, %v5002_v5  ;;  %v5015_v38 = vrot.slane %v5013_v8, 4  ;;  %v11418_v12 = vcombine.low %v5816_v55, %v5819_v10  ;;  %v12780_v60 = vld [vmem:[%s17897_s4 + $0x218] sm:$0xff]   ;;  %v4531_v8 = vld [vmem:[#allocation2 + $0x114] sm:$0xf] }
 0x40c   :  { %9146 = vmatmul.mubr.bf16.vlgmr.msra.gmra.mrb[64].mxu0 %v11272_v26  ;;  %v5021_v40 = vrot.slane %v5019_v22, 5  ;;  %v5822_v4 = vrot.slane %v5553_v13, 5  ;;  %v11241_v3 = vrot.slane %v3607_v17, 9  ;;  %v5825_v41 = vrot.slane %v5554_v25, 5  ;;  %v4532_v26 = vld [vmem:[#allocation2 + $0x118] sm:$0xf] }
 0x40d   :  { %9571 = vmatmul.mubr.bf16.gmra.mrb[124].mxu1 %v11353_v20  ;;  %9153 = vmatprep.mubr.bf16.mxu0 %v12752_v54  ;;  %v5007_v33 = vrot.slane %v5006_v58, 4  ;;  %v5016_v32 = vor.u32 %v5015_v38, %v5011_v11  ;;  %v3808_v30 = vrot.slane %v3608_v31, 5  ;;  %v3811_v49 = vrot.slane %v3609_v24, 5  ;;  %v5558_v54 = vld [vmem:[#allocation2 + $0x120] sm:$0xe] }
 0x40e   :  { %9578 = vmatprep.mubr.bf16.mxu1 %v11418_v12  ;;  %v5824_v42 = vrot.slane %v5822_v4, 4  ;;  %v5024_v18 = vshrl.u32 %v4528_v43, 16  ;;  %v5027_v61 = vshll.u32 %v4528_v43, 16  ;;  %12176 = vmatpush3.bf16.msra.mxu0 %v15877_v59  ;;  %v5823_v48 = vsel %vm15165_vm12, %v11387_v6, %v5822_v4  ;;  %v5559_v12 = vld [vmem:[#allocation2 + $0x124] sm:$0xf] }
 0x40f   :  { %v5012_v62 = vsel %vm15171_vm13, %v5007_v33, %v5011_v11  ;;  %v5017_v37 = vrot.slane %v5016_v32, 4  ;;  %v3810_v56 = vrot.slane %v3808_v30, 4  ;;  %12177 = vmatprep.subr.bf16.mxu0 %v12775_v63  ;;  %v3809_v51 = vsel %vm15165_vm12, %v11241_v3, %v3808_v30  ;;  %v4533_v11 = vld [vmem:[#allocation2 + $0x11c] sm:$0x1]  ;;  %v3613_v30 = vld [vmem:[#allocation2 + $0x24] sm:$0xe] }
 0x410   :  { %v5026_v46 = vrot.slane %v5024_v18, 4  ;;  %v5029_v39 = vrot.slane %v5027_v61, 5  ;;  %v5033_v59 = vshll.u32 %v4529_v19, 16  ;;  %v5826_v0 = vsel %vm15165_vm12, %v5824_v42, %v5825_v41  ;;  %v5560_v41 = vld [vmem:[#allocation2 + $0x128] sm:$0x1] }
 0x411   :  { %v5022_v23 = vsel %vm15171_vm13, %v5017_v37, %v5021_v40  ;;  %v3812_v27 = vsel %vm15165_vm12, %v3810_v56, %v3811_v49  ;;  %v5037_v16 = vshrl.u32 %v4529_v19, 16  ;;  %v5043_v15 = vshll.u32 %v4530_v35, 16  ;;  %v12781_v40 = vld [vmem:[%s17897_s4 + $0x220] sm:$0xff]   ;;  %v3614_v18 = vld [vmem:[#allocation2 + $0x28] sm:$0xf] }
 0x412   :  { %v11354_v34 = vcombine.low %v5012_v62, %v5022_v23  ;;  %v11273_v2 = vcombine.low %v3809_v51, %v3812_v27  ;;  %v5030_v55 = vor.u32 %v5029_v39, %v5026_v46  ;;  %v5035_v57 = vrot.slane %v5033_v59, 5  ;;  %12178 = vmatpush3.bf16.msra.mxu0 %v12775_v63  ;;  %v4534_v39 = vld [vmem:[#allocation2 + $0x120] sm:$0xf]  ;;  %v12784_v59 = vld [vmem:[%s17897_s4 + $0x228] sm:$0xff]   ;;  %v4535_v27 = vld [vmem:[#allocation2 + $0x124] sm:$0xf] }
 0x413   :  { %v5039_v13 = vrot.slane %v5037_v16, 4  ;;  %v11388_v44 = vrot.slane %v5555_v28, 9  ;;  %v5829_v5 = vrot.slane %v5556_v21, 5  ;;  %12179 = vmatprep.subr.bf16.mxu0 %v12777_v52  ;;  %v11419_v25 = vcombine.low %v5823_v48, %v5826_v0  ;;  %v3615_v48 = vld [vmem:[#allocation2 + $0x2c] sm:$0x1]  ;;  %v12755_v21 = vld [vmem:[#allocation2 + $0x30] sm:$0xff]  }
 0x414   :  { %9154 = vmatmul.mubr.bf16.gmra.mrb[68].mxu0 %v11273_v2  ;;  %v5031_v10 = vrot.slane %v5030_v55, 4  ;;  %v11242_v9 = vrot.slane %v3610_v47, 9  ;;  %v3815_v45 = vrot.slane %v3611_v36, 5  ;;  %v5832_v7 = vrot.slane %v5557_v53, 5  ;;  %v4536_v55 = vld [vmem:[#allocation2 + $0x128] sm:$0x1] }
 0x415   :  { %9579 = vmatmul.mubr.bf16.gmra.mrb[0].mxu1 %v11354_v34  ;;  %9161 = vmatprep.mubr.bf16.mxu0 %v12754_v1  ;;  %v5040_v17 = vor.u32 %v5039_v13, %v5035_v57  ;;  %v5831_v31 = vrot.slane %v5829_v5, 4  ;;  %v5045_v22 = vrot.slane %v5043_v15, 5  ;;  %v5830_v24 = vsel %vm15165_vm12, %v11388_v44, %v5829_v5  ;;  %v5562_v44 = vld [vmem:[#allocation2 + $0x130] sm:$0xf] }
 0x416   :  { %9586 = vmatprep.mubr.bf16.mxu1 %v11419_v25  ;;  %v3817_v43 = vrot.slane %v3815_v45, 4  ;;  %v3818_v20 = vrot.slane %v3612_v50, 5  ;;  %12180 = vmatpush3.bf16.msra.mxu0 %v12777_v52  ;;  %v5036_v58 = vsel %vm15171_vm13, %v5031_v10, %v5035_v57  ;;  %v5048_v6 = vshrl.u32 %v4531_v8, 16  ;;  %v5561_v57 = vld [vmem:[#allocation2 + $0x12c] sm:$0xe] }
 0x417   :  { %v5041_v38 = vrot.slane %v5040_v17, 4  ;;  %v5051_v63 = vshll.u32 %v4531_v8, 16  ;;  %12181 = vmatprep.subr.bf16.mxu0 %v12780_v60  ;;  %v3816_v4 = vsel %vm15165_vm12, %v11242_v9, %v3815_v45  ;;  %v5057_v33 = vshll.u32 %v4532_v26, 16  ;;  %v3616_v9 = vld [vmem:[#allocation2 + $0x30] sm:$0xe] }
 0x418   :  { %v3819_v3 = vsel %vm15165_vm12, %v3817_v43, %v3818_v20  ;;  %v5061_v32 = vshrl.u32 %v4532_v26, 16  ;;  %v5833_v42 = vsel %vm15165_vm12, %v5831_v31, %v5832_v7  ;;  %v5050_v49 = vrot.slane %v5048_v6, 4  ;;  %v12785_v45 = vld [vmem:[%s17897_s4 + $0x230] sm:$0xff]  }
 0x419   :  { %v5046_v19 = vsel %vm15171_vm13, %v5041_v38, %v5045_v22  ;;  %v5053_v35 = vrot.slane %v5051_v63, 5  ;;  %v11274_v61 = vcombine.low %v3816_v4, %v3819_v3  ;;  %v5059_v28 = vrot.slane %v5057_v33, 5  ;;  %v3617_v26 = vld [vmem:[#allocation2 + $0x34] sm:$0xf]  ;;  %v3618_v63 = vld [vmem:[#allocation2 + $0x38] sm:$0x1] }
 0x41a   :  { %v5063_v62 = vrot.slane %v5061_v32, 4  ;;  %v5067_v37 = vshll.u32 %v4533_v11, 16  ;;  %12182 = vmatpush3.bf16.msra.mxu0 %v12780_v60  ;;  %v11355_v56 = vcombine.low %v5036_v58, %v5046_v19  ;;  %v11389_v51 = vrot.slane %v5558_v54, 9  ;;  %v5563_v20 = vld [vmem:[#allocation2 + $0x134] sm:$0x1] }
 0x41b   :  { %v5054_v52 = vor.u32 %v5053_v35, %v5050_v49  ;;  %v5836_v46 = vrot.slane %v5559_v12, 5  ;;  %12183 = vmatprep.subr.bf16.mxu0 %v12781_v40  ;;  %v11420_v53 = vcombine.low %v5830_v24, %v5833_v42  ;;  %v11243_v23 = vrot.slane %v3613_v30, 9  ;;  %v4537_v32 = vld [vmem:[#allocation2 + $0x12c] sm:$0xf]  ;;  %v4538_v35 = vld [vmem:[#allocation2 + $0x130] sm:$0xf] }
 0x41c   :  { %9162 = vmatmul.mubr.bf16.gmra.mrb[72].mxu0 %v11274_v61  ;;  %v5064_v47 = vor.u32 %v5063_v62, %v5059_v28  ;;  %v3822_v0 = vrot.slane %v3614_v18, 5  ;;  %v5069_v36 = vrot.slane %v5067_v37, 5  ;;  %v5839_v2 = vrot.slane %v5560_v41, 5  ;;  %v12787_v41 = vld [vmem:[%s17897_s4 + $0x238] sm:$0xff]  }
 0x41d   :  { %9587 = vmatmul.mubr.bf16.gmra.mrb[4].mxu1 %v11355_v56  ;;  %9169 = vmatprep.mubr.bf16.mxu0 %v12755_v21  ;;  %v5055_v16 = vrot.slane %v5054_v52, 4  ;;  %v5838_v34 = vrot.slane %v5836_v46, 4  ;;  %v3825_v13 = vrot.slane %v3615_v48, 5  ;;  %v5072_v15 = vshrl.u32 %v4534_v39, 16  ;;  %v4539_v56 = vld [vmem:[#allocation2 + $0x134] sm:$0x1] }
 0x41e   :  { %9594 = vmatprep.mubr.bf16.mxu1 %v11420_v53  ;;  %v5065_v50 = vrot.slane %v5064_v47, 4  ;;  %v3824_v1 = vrot.slane %v3822_v0, 4  ;;  %12184 = vmatpush3.bf16.msra.mxu0 %v12781_v40  ;;  %v5837_v5 = vsel %vm15165_vm12, %v11389_v51, %v5836_v46  ;;  %v3823_v60 = vsel %vm15165_vm12, %v11243_v23, %v3822_v0  ;;  %v12757_v40 = vld [vmem:[#allocation2 + $0x3c] sm:$0xff]   ;;  %v5564_v51 = vld [vmem:[#allocation2 + $0x138] sm:$0xe] }
 0x41f   :  { %v5075_v25 = vshll.u32 %v4534_v39, 16  ;;  %v5081_v10 = vshll.u32 %v4535_v27, 16  ;;  %12185 = vmatprep.subr.bf16.mxu0 %v12784_v59  ;;  %v5060_v8 = vsel %vm15171_vm13, %v5055_v16, %v5059_v28  ;;  %v5074_v7 = vrot.slane %v5072_v15, 4  ;;  %v5565_v47 = vld [vmem:[#allocation2 + $0x13c] sm:$0xf] }
 0x420   :  { %v5070_v17 = vsel %vm15171_vm13, %v5065_v50, %v5069_v36  ;;  %v3826_v31 = vsel %vm15165_vm12, %v3824_v1, %v3825_v13  ;;  %v5840_v11 = vsel %vm15165_vm12, %v5838_v34, %v5839_v2  ;;  %v5085_v54 = vshrl.u32 %v4535_v27, 16  ;;  %v5566_v36 = vld [vmem:[#allocation2 + $0x140] sm:$0x1] }
 0x421   :  { %v11275_v22 = vcombine.low %v3823_v60, %v3826_v31  ;;  %v5077_v24 = vrot.slane %v5075_v25, 5  ;;  %v5083_v43 = vrot.slane %v5081_v10, 5  ;;  %v5091_v58 = vshll.u32 %v4536_v55, 16  ;;  %v3620_v50 = vld [vmem:[#allocation2 + $0x40] sm:$0xf] }
 0x422   :  { %v11390_v38 = vrot.slane %v5561_v57, 9  ;;  %v5843_v6 = vrot.slane %v5562_v44, 5  ;;  %12186 = vmatpush3.bf16.msra.mxu0 %v12784_v59  ;;  %v11356_v12 = vcombine.low %v5060_v8, %v5070_v17  ;;  %v11244_v3 = vrot.slane %v3616_v9, 9  ;;  %v4540_v60 = vld [vmem:[#allocation2 + $0x138] sm:$0xf]  ;;  %v12758_v9 = vld [vmem:[#allocation2 + $0x48] sm:$0xff]  }
 0x423   :  { %v5078_v4 = vor.u32 %v5077_v24, %v5074_v7  ;;  %v3829_v33 = vrot.slane %v3617_v26, 5  ;;  %12187 = vmatprep.subr.bf16.mxu0 %v12785_v45  ;;  %v11421_v30 = vcombine.low %v5837_v5, %v5840_v11  ;;  %v5087_v19 = vrot.slane %v5085_v54, 4  ;;  %v3619_v5 = vld [vmem:[#allocation2 + $0x3c] sm:$0xe]  ;;  %v3621_v17 = vld [vmem:[#allocation2 + $0x44] sm:$0x1] }
 0x424   :  { %9170 = vmatmul.mubr.bf16.gmra.mrb[76].mxu0 %v11275_v22  ;;  %v5845_v42 = vrot.slane %v5843_v6, 4  ;;  %v5846_v49 = vrot.slane %v5563_v20, 5  ;;  %v5093_v61 = vrot.slane %v5091_v58, 5  ;;  %v3832_v62 = vrot.slane %v3618_v63, 5  ;;  %v4541_v22 = vld [vmem:[#allocation2 + $0x13c] sm:$0xf] }
 0x425   :  { %9595 = vmatmul.mubr.bf16.gmra.mrb[8].mxu1 %v11356_v12  ;;  %9177 = vmatprep.mubr.bf16.mxu0 %v12757_v40  ;;  %v5079_v18 = vrot.slane %v5078_v4, 4  ;;  %v3831_v28 = vrot.slane %v3829_v33, 4  ;;  %v5088_v37 = vor.u32 %v5087_v19, %v5083_v43  ;;  %v5844_v48 = vsel %vm15165_vm12, %v11390_v38, %v5843_v6  ;;  %v4542_v20 = vld [vmem:[#allocation2 + $0x140] sm:$0x1]  ;;  %v5567_v40 = vld [vmem:[#allocation2 + $0x144] sm:$0xe] }
 0x426   :  { %9602 = vmatprep.mubr.bf16.mxu1 %v11421_v30  ;;  %v5096_v21 = vshrl.u32 %v4537_v32, 16  ;;  %v5099_v52 = vshll.u32 %v4537_v32, 16  ;;  %12188 = vmatpush3.bf16.msra.mxu0 %v12785_v45  ;;  %v5847_v46 = vsel %vm15165_vm12, %v5845_v42, %v5846_v49  ;;  %v3830_v39 = vsel %vm15165_vm12, %v11244_v3, %v3829_v33  ;;  %v5568_v4 = vld [vmem:[#allocation2 + $0x148] sm:$0xf] }
 0x427   :  { %v3833_v59 = vsel %vm15165_vm12, %v3831_v28, %v3832_v62  ;;  %v5105_v53 = vshll.u32 %v4538_v35, 16  ;;  %12189 = vmatprep.subr.bf16.mxu0 %v12787_v41  ;;  %v5084_v23 = vsel %vm15171_vm13, %v5079_v18, %v5083_v43  ;;  %v5089_v0 = vrot.slane %v5088_v37, 4  ;;  %v3622_v37 = vld [vmem:[#allocation2 + $0x48] sm:$0xe] }
 0x428   :  { %v5098_v27 = vrot.slane %v5096_v21, 4  ;;  %v5101_v16 = vrot.slane %v5099_v52, 5  ;;  %v11276_v34 = vcombine.low %v3830_v39, %v3833_v59  ;;  %v5109_v55 = vshrl.u32 %v4538_v35, 16  ;;  %v5569_v35 = vld [vmem:[#allocation2 + $0x14c] sm:$0x1] }
 0x429   :  { %v5107_v2 = vrot.slane %v5105_v53, 5  ;;  %v5115_v57 = vshll.u32 %v4539_v56, 16  ;;  %v5094_v1 = vsel %vm15171_vm13, %v5089_v0, %v5093_v61  ;;  %v11391_v15 = vrot.slane %v5564_v51, 9  ;;  %v4543_v56 = vld [vmem:[#allocation2 + $0x144] sm:$0xf]  ;;  %v12760_v53 = vld [vmem:[#allocation2 + $0x54] sm:$0xff]  }
 0x42a   :  { %v5102_v13 = vor.u32 %v5101_v16, %v5098_v27  ;;  %v5850_v44 = vrot.slane %v5565_v47, 5  ;;  %12190 = vmatpush3.bf16.msra.mxu0 %v12787_v41  ;;  %v11357_v25 = vcombine.low %v5084_v23, %v5094_v1  ;;  %v11422_v10 = vcombine.low %v5844_v48, %v5847_v46  ;;  %v3623_v48 = vld [vmem:[#allocation2 + $0x4c] sm:$0xf]  ;;  %v3624_v39 = vld [vmem:[#allocation2 + $0x50] sm:$0x1] }
 0x42b   :  { %v5111_v45 = vrot.slane %v5109_v55, 4  ;;  %v5853_v8 = vrot.slane %v5566_v36, 5  ;;  %v5117_v7 = vrot.slane %v5115_v57, 5  ;;  %v3836_v11 = vrot.slane %v3620_v50, 5  ;;  %v4544_v27 = vld [vmem:[#allocation2 + $0x148] sm:$0xf] }
 0x42c   :  { %9178 = vmatmul.mubr.bf16.gmra.mrb[80].mxu0 %v11276_v34  ;;  %v5103_v31 = vrot.slane %v5102_v13, 4  ;;  %v5852_v26 = vrot.slane %v5850_v44, 4  ;;  %v11245_v43 = vrot.slane %v3619_v5, 9  ;;  %v5120_v54 = vshrl.u32 %v4540_v60, 16 }
 0x42d   :  { %9603 = vmatmul.mubr.bf16.gmra.mrb[12].mxu1 %v11357_v25  ;;  %9185 = vmatprep.mubr.bf16.mxu0 %v12758_v9  ;;  %v5112_v24 = vor.u32 %v5111_v45, %v5107_v2  ;;  %v5123_v58 = vshll.u32 %v4540_v60, 16  ;;  %v5851_v38 = vsel %vm15165_vm12, %v11391_v15, %v5850_v44  ;;  %v3838_v63 = vrot.slane %v3836_v11, 4  ;;  %v5570_v15 = vld [vmem:[#allocation2 + $0x150] sm:$0xe] }
 0x42e   :  { %9610 = vmatprep.mubr.bf16.mxu1 %v11422_v10  ;;  %v5854_v6 = vsel %vm15165_vm12, %v5852_v26, %v5853_v8  ;;  %v3839_v12 = vrot.slane %v3621_v17, 5  ;;  %v5108_v3 = vsel %vm15171_vm13, %v5103_v31, %v5107_v2  ;;  %v5122_v32 = vrot.slane %v5120_v54, 4  ;;  %v4545_v2 = vld [vmem:[#allocation2 + $0x14c] sm:$0x1]  ;;  %v5571_v10 = vld [vmem:[#allocation2 + $0x154] sm:$0xf] }
 0x42f   :  { %v5113_v33 = vrot.slane %v5112_v24, 4  ;;  %v5125_v41 = vrot.slane %v5123_v58, 5  ;;  %v5129_v19 = vshll.u32 %v4541_v22, 16  ;;  %v5133_v42 = vshrl.u32 %v4541_v22, 16  ;;  %v5572_v22 = vld [vmem:[#allocation2 + $0x158] sm:$0x1] }
 0x430   :  { %v3840_v30 = vsel %vm15165_vm12, %v3838_v63, %v3839_v12  ;;  %v5139_v49 = vshll.u32 %v4542_v20, 16  ;;  %v11423_v61 = vcombine.low %v5851_v38, %v5854_v6  ;;  %v3837_v28 = vsel %vm15165_vm12, %v11245_v43, %v3836_v11  ;;  %v3626_v24 = vld [vmem:[#allocation2 + $0x58] sm:$0xf]  ;;  %v3625_v38 = vld [vmem:[#allocation2 + $0x54] sm:$0xe] }
 0x431   :  { %v5118_v18 = vsel %vm15171_vm13, %v5113_v33, %v5117_v7  ;;  %v5126_v62 = vor.u32 %v5125_v41, %v5122_v32  ;;  %v11277_v21 = vcombine.low %v3837_v28, %v3840_v30  ;;  %v5131_v52 = vrot.slane %v5129_v19, 5  ;;  %v3627_v6 = vld [vmem:[#allocation2 + $0x5c] sm:$0x1]  ;;  %v12761_v32 = vld [vmem:[#allocation2 + $0x60] sm:$0xff]   ;;  %v4548_v28 = vld [vmem:[#allocation2 + $0x158] sm:$0x1] }
 0x432   :  { %v5135_v51 = vrot.slane %v5133_v42, 4  ;;  %v11392_v46 = vrot.slane %v5567_v40, 9  ;;  %v11358_v59 = vcombine.low %v5108_v3, %v5118_v18  ;;  %v5141_v23 = vrot.slane %v5139_v49, 5  ;;  %v4546_v3 = vld [vmem:[#allocation2 + $0x150] sm:$0xf] }
 0x433   :  { %v5127_v47 = vrot.slane %v5126_v62, 4  ;;  %v5857_v0 = vrot.slane %v5568_v4, 5  ;;  %v5860_v36 = vrot.slane %v5569_v35, 5  ;;  %v3843_v34 = vrot.slane %v3623_v48, 5  ;;  %v4547_v42 = vld [vmem:[#allocation2 + $0x154] sm:$0xf] }
 0x434   :  { %9186 = vmatmul.mubr.bf16.gmra.mrb[84].mxu0 %v11277_v21  ;;  %v5136_v16 = vor.u32 %v5135_v51, %v5131_v52  ;;  %v5144_v55 = vshrl.u32 %v4543_v56, 16  ;;  %v11246_v50 = vrot.slane %v3622_v37, 9  ;;  %v3846_v1 = vrot.slane %v3624_v39, 5  ;;  %v5573_v39 = vld [vmem:[#allocation2 + $0x15c] sm:$0xe] }
 0x435   :  { %9611 = vmatmul.mubr.bf16.gmra.mrb[16].mxu1 %v11358_v59  ;;  %9193 = vmatprep.mubr.bf16.mxu0 %v12760_v53  ;;  %v5859_v57 = vrot.slane %v5857_v0, 4  ;;  %v5147_v13 = vshll.u32 %v4543_v56, 16  ;;  %v5132_v44 = vsel %vm15171_vm13, %v5127_v47, %v5131_v52  ;;  %v3845_v60 = vrot.slane %v3843_v34, 4 }
 0x436   :  { %9618 = vmatprep.mubr.bf16.mxu1 %v11423_v61  ;;  %v5137_v5 = vrot.slane %v5136_v16, 4  ;;  %v5146_v25 = vrot.slane %v5144_v55, 4  ;;  %v5153_v8 = vshll.u32 %v4544_v27, 16  ;;  %v5157_v17 = vshrl.u32 %v4544_v27, 16  ;;  %v5575_v27 = vld [vmem:[#allocation2 + $0x164] sm:$0x1] }
 0x437   :  { %v5861_v9 = vsel %vm15165_vm12, %v5859_v57, %v5860_v36  ;;  %v5149_v45 = vrot.slane %v5147_v13, 5  ;;  %v5858_v7 = vsel %vm15165_vm12, %v11392_v46, %v5857_v0  ;;  %v3847_v26 = vsel %vm15165_vm12, %v3845_v60, %v3846_v1  ;;  %v5574_v0 = vld [vmem:[#allocation2 + $0x160] sm:$0xf]  ;;  %v3629_v57 = vld [vmem:[#allocation2 + $0x64] sm:$0xf] }
 0x438   :  { %v5142_v31 = vsel %vm15171_vm13, %v5137_v5, %v5141_v23  ;;  %v5163_v11 = vshll.u32 %v4545_v2, 16  ;;  %v11424_v43 = vcombine.low %v5858_v7, %v5861_v9  ;;  %v3844_v20 = vsel %vm15165_vm12, %v11246_v50, %v3843_v34  ;;  %v3628_v55 = vld [vmem:[#allocation2 + $0x60] sm:$0xe]  ;;  %v3630_v9 = vld [vmem:[#allocation2 + $0x68] sm:$0x1] }
 0x439   :  { %v5150_v54 = vor.u32 %v5149_v45, %v5146_v25  ;;  %v5155_v58 = vrot.slane %v5153_v8, 5  ;;  %v11278_v63 = vcombine.low %v3844_v20, %v3847_v26  ;;  %v5159_v12 = vrot.slane %v5157_v17, 4  ;;  %v12763_v45 = vld [vmem:[#allocation2 + $0x6c] sm:$0xff]   ;;  %v4550_v26 = vld [vmem:[#allocation2 + $0x160] sm:$0xf] }
 0x43a   :  { %v11393_v40 = vrot.slane %v5570_v15, 9  ;;  %v5864_v4 = vrot.slane %v5571_v10, 5  ;;  %v11359_v33 = vcombine.low %v5132_v44, %v5142_v31  ;;  %v5165_v30 = vrot.slane %v5163_v11, 5  ;;  %v4549_v44 = vld [vmem:[#allocation2 + $0x15c] sm:$0xf] }
 0x43b   :  { %v5151_v41 = vrot.slane %v5150_v54, 4  ;;  %v3850_v19 = vrot.slane %v3626_v24, 5  ;;  %v5160_v49 = vor.u32 %v5159_v12, %v5155_v58  ;;  %v5867_v18 = vrot.slane %v5572_v22, 5 }
 0x43c   :  { %9194 = vmatmul.mubr.bf16.gmra.mrb[88].mxu0 %v11278_v63  ;;  %v5866_v35 = vrot.slane %v5864_v4, 4  ;;  %v11247_v61 = vrot.slane %v3625_v38, 9  ;;  %v5865_v62 = vsel %vm15165_vm12, %v11393_v40, %v5864_v4  ;;  %v3853_v48 = vrot.slane %v3627_v6, 5 }
 0x43d   :  { %9619 = vmatmul.mubr.bf16.gmra.mrb[20].mxu1 %v11359_v33  ;;  %9201 = vmatprep.mubr.bf16.mxu0 %v12761_v32  ;;  %v3852_v37 = vrot.slane %v3850_v19, 4  ;;  %v5168_v56 = vshrl.u32 %v4546_v3, 16  ;;  %v5161_v21 = vrot.slane %v5160_v49, 4  ;;  %v5171_v51 = vshll.u32 %v4546_v3, 16  ;;  %v5576_v3 = vld [vmem:[#allocation2 + $0x168] sm:$0xe] }
 0x43e   :  { %9626 = vmatprep.mubr.bf16.mxu1 %v11424_v43  ;;  %v5868_v52 = vsel %vm15165_vm12, %v5866_v35, %v5867_v18  ;;  %v5177_v46 = vshll.u32 %v4547_v42, 16  ;;  %v5156_v59 = vsel %vm15171_vm13, %v5151_v41, %v5155_v58  ;;  %v5181_v23 = vshrl.u32 %v4547_v42, 16  ;;  %v4551_v43 = vld [vmem:[#allocation2 + $0x164] sm:$0x1]  ;;  %v5577_v33 = vld [vmem:[#allocation2 + $0x16c] sm:$0xf] }
 0x43f   :  { %v3854_v53 = vsel %vm15165_vm12, %v3852_v37, %v3853_v48  ;;  %v5170_v47 = vrot.slane %v5168_v56, 4  ;;  %v5166_v16 = vsel %vm15171_vm13, %v5161_v21, %v5165_v30  ;;  %v3851_v36 = vsel %vm15165_vm12, %v11247_v61, %v3850_v19  ;;  %v3631_v42 = vld [vmem:[#allocation2 + $0x6c] sm:$0xe]  ;;  %v3632_v49 = vld [vmem:[#allocation2 + $0x70] sm:$0xf] }
 0x440   :  { %v5173_v34 = vrot.slane %v5171_v51, 5  ;;  %v5179_v2 = vrot.slane %v5177_v46, 5  ;;  %v11425_v50 = vcombine.low %v5865_v62, %v5868_v52  ;;  %v11279_v1 = vcombine.low %v3851_v36, %v3854_v53  ;;  %v5578_v62 = vld [vmem:[#allocation2 + $0x170] sm:$0x1]  ;;  %v3633_v37 = vld [vmem:[#allocation2 + $0x74] sm:$0x1] }
 0x441   :  { %v5183_v13 = vrot.slane %v5181_v23, 4  ;;  %v5187_v15 = vshll.u32 %v4548_v28, 16  ;;  %v11360_v5 = vcombine.low %v5156_v59, %v5166_v16  ;;  %v11394_v25 = vrot.slane %v5573_v39, 9  ;;  %v4552_v51 = vld [vmem:[#allocation2 + $0x168] sm:$0xf] }
 0x442   :  { %v5174_v60 = vor.u32 %v5173_v34, %v5170_v47  ;;  %v5871_v10 = vrot.slane %v5574_v0, 5  ;;  %v5874_v17 = vrot.slane %v5575_v27, 5  ;;  %v11248_v31 = vrot.slane %v3628_v55, 9  ;;  %v4553_v47 = vld [vmem:[#allocation2 + $0x16c] sm:$0xf]  ;;  %v12764_v0 = vld [vmem:[#allocation2 + $0x78] sm:$0xff]  }
 0x443   :  { %v5184_v8 = vor.u32 %v5183_v13, %v5179_v2  ;;  %v3857_v7 = vrot.slane %v3629_v57, 5  ;;  %v5189_v22 = vrot.slane %v5187_v15, 5  ;;  %v5192_v20 = vshrl.u32 %v4549_v44, 16  ;;  %v4554_v34 = vld [vmem:[#allocation2 + $0x170] sm:$0x1] }
 0x444   :  { %9202 = vmatmul.mubr.bf16.gmra.mrb[92].mxu0 %v11279_v1  ;;  %v5175_v11 = vrot.slane %v5174_v60, 4  ;;  %v5873_v24 = vrot.slane %v5871_v10, 4  ;;  %v3860_v38 = vrot.slane %v3630_v9, 5  ;;  %v5195_v6 = vshll.u32 %v4549_v44, 16  ;;  %v5579_v1 = vld [vmem:[#allocation2 + $0x174] sm:$0xe] }
 0x445   :  { %9627 = vmatmul.mubr.bf16.gmra.mrb[24].mxu1 %v11360_v5  ;;  %9209 = vmatprep.mubr.bf16.mxu0 %v12763_v45  ;;  %v5185_v54 = vrot.slane %v5184_v8, 4  ;;  %v3859_v58 = vrot.slane %v3857_v7, 4  ;;  %v5872_v63 = vsel %vm15165_vm12, %v11394_v25, %v5871_v10  ;;  %v5194_v40 = vrot.slane %v5192_v20, 4  ;;  %v5580_v60 = vld [vmem:[#allocation2 + $0x178] sm:$0xf] }
 0x446   :  { %9634 = vmatprep.mubr.bf16.mxu1 %v11425_v50  ;;  %v5875_v12 = vsel %vm15165_vm12, %v5873_v24, %v5874_v17  ;;  %v5201_v4 = vshll.u32 %v4550_v26, 16  ;;  %v5180_v32 = vsel %vm15171_vm13, %v5175_v11, %v5179_v2  ;;  %v3858_v41 = vsel %vm15165_vm12, %v11248_v31, %v3857_v7  ;;  %v5581_v8 = vld [vmem:[#allocation2 + $0x17c] sm:$0x1]  ;;  %v3634_v17 = vld [vmem:[#allocation2 + $0x78] sm:$0xe] }
 0x447   :  { %v3861_v30 = vsel %vm15165_vm12, %v3859_v58, %v3860_v38  ;;  %v5197_v19 = vrot.slane %v5195_v6, 5  ;;  %v5190_v35 = vsel %vm15171_vm13, %v5185_v54, %v5189_v22  ;;  %v11426_v18 = vcombine.low %v5872_v63, %v5875_v12  ;;  %v3635_v22 = vld [vmem:[#allocation2 + $0x7c] sm:$0xf]  ;;  %v3636_v58 = vld [vmem:[#allocation2 + $0x80] sm:$0x1] }
 0x448   :  { %v5203_v61 = vrot.slane %v5201_v4, 5  ;;  %v5205_v28 = vshrl.u32 %v4550_v26, 16  ;;  %v5211_v56 = vshll.u32 %v4551_v43, 16  ;;  %v11395_v21 = vrot.slane %v5576_v3, 9 }
 0x449   :  { %v5198_v48 = vor.u32 %v5197_v19, %v5194_v40  ;;  %v5878_v52 = vrot.slane %v5577_v33, 5  ;;  %v11280_v46 = vcombine.low %v3858_v41, %v3861_v30  ;;  %v11249_v59 = vrot.slane %v3631_v42, 9  ;;  %v4555_v40 = vld [vmem:[#allocation2 + $0x174] sm:$0xf]  ;;  %v12766_v41 = vld [vmem:[#allocation2 + $0x84] sm:$0xff]  }
 0x44a   :  { %v5207_v39 = vrot.slane %v5205_v28, 4  ;;  %v3864_v53 = vrot.slane %v3632_v49, 5  ;;  %v11361_v23 = vcombine.low %v5180_v32, %v5190_v35  ;;  %v5881_v36 = vrot.slane %v5578_v62, 5  ;;  %v4556_v35 = vld [vmem:[#allocation2 + $0x178] sm:$0xf] }
 0x44b   :  { %v5199_v27 = vrot.slane %v5198_v48, 4  ;;  %v5880_v16 = vrot.slane %v5878_v52, 4  ;;  %v5213_v55 = vrot.slane %v5211_v56, 5  ;;  %v5879_v57 = vsel %vm15165_vm12, %v11395_v21, %v5878_v52  ;;  %v4557_v21 = vld [vmem:[#allocation2 + $0x17c] sm:$0x1] }
 0x44c   :  { %9210 = vmatmul.mubr.bf16.gmra.mrb[96].mxu0 %v11280_v46  ;;  %v5208_v2 = vor.u32 %v5207_v39, %v5203_v61  ;;  %v3866_v50 = vrot.slane %v3864_v53, 4  ;;  %v3867_v15 = vrot.slane %v3633_v37, 5  ;;  %v5216_v44 = vshrl.u32 %v4552_v51, 16 }
 0x44d   :  { %9635 = vmatmul.mubr.bf16.gmra.mrb[28].mxu1 %v11361_v23  ;;  %9217 = vmatprep.mubr.bf16.mxu0 %v12764_v0  ;;  %v5882_v13 = vsel %vm15165_vm12, %v5880_v16, %v5881_v36  ;;  %v5219_v5 = vshll.u32 %v4552_v51, 16  ;;  %v5204_v25 = vsel %vm15171_vm13, %v5199_v27, %v5203_v61  ;;  %v3865_v9 = vsel %vm15165_vm12, %v11249_v59, %v3864_v53  ;;  %v5582_v51 = vld [vmem:[#allocation2 + $0x180] sm:$0xe]  ;;  %v5584_v23 = vld [vmem:[#allocation2 + $0x188] sm:$0x1] }
 0x44e   :  { %9642 = vmatprep.mubr.bf16.mxu1 %v11426_v18  ;;  %v5209_v10 = vrot.slane %v5208_v2, 4  ;;  %v5225_v45 = vshll.u32 %v4553_v47, 16  ;;  %v3868_v31 = vsel %vm15165_vm12, %v3866_v50, %v3867_v15  ;;  %v5218_v7 = vrot.slane %v5216_v44, 4  ;;  %v3638_v2 = vld [vmem:[#allocation2 + $0x88] sm:$0xf] }
 0x44f   :  { %v5221_v26 = vrot.slane %v5219_v5, 5  ;;  %v5229_v11 = vshrl.u32 %v4553_v47, 16  ;;  %v11427_v43 = vcombine.low %v5879_v57, %v5882_v13  ;;  %v5235_v54 = vshll.u32 %v4554_v34, 16  ;;  %v5583_v47 = vld [vmem:[#allocation2 + $0x184] sm:$0xf] }
 0x450   :  { %v5214_v24 = vsel %vm15171_vm13, %v5209_v10, %v5213_v55  ;;  %v5227_v20 = vrot.slane %v5225_v45, 5  ;;  %v11396_v63 = vrot.slane %v5579_v1, 9  ;;  %v5885_v12 = vrot.slane %v5580_v60, 5  ;;  %v3637_v34 = vld [vmem:[#allocation2 + $0x84] sm:$0xe] }
 0x451   :  { %v5222_v38 = vor.u32 %v5221_v26, %v5218_v7  ;;  %v5231_v6 = vrot.slane %v5229_v11, 4  ;;  %v11362_v4 = vcombine.low %v5204_v25, %v5214_v24  ;;  %v11281_v3 = vcombine.low %v3865_v9, %v3868_v31  ;;  %v3639_v13 = vld [vmem:[#allocation2 + $0x8c] sm:$0x1]  ;;  %v4558_v25 = vld [vmem:[#allocation2 + $0x180] sm:$0xf]  ;;  %v12767_v31 = vld [vmem:[#allocation2 + $0x90] sm:$0xff]  }
 0x452   :  { %v11250_v33 = vrot.slane %v3634_v17, 9  ;;  %v3871_v32 = vrot.slane %v3635_v22, 5  ;;  %v5887_v42 = vrot.slane %v5885_v12, 4  ;;  %v5888_v49 = vrot.slane %v5581_v8, 5  ;;  %v4559_v17 = vld [vmem:[#allocation2 + $0x184] sm:$0xf] }
 0x453   :  { %v5223_v30 = vrot.slane %v5222_v38, 4  ;;  %v5232_v19 = vor.u32 %v5231_v6, %v5227_v20  ;;  %v5237_v18 = vrot.slane %v5235_v54, 5  ;;  %v3874_v28 = vrot.slane %v3636_v58, 5 }
 0x454   :  { %9218 = vmatmul.mubr.bf16.gmra.mrb[100].mxu0 %v11281_v3  ;;  %v3873_v61 = vrot.slane %v3871_v32, 4  ;;  %v5240_v62 = vshrl.u32 %v4555_v40, 16  ;;  %v5886_v48 = vsel %vm15165_vm12, %v11396_v63, %v5885_v12  ;;  %v5889_v56 = vsel %vm15165_vm12, %v5887_v42, %v5888_v49 }
 0x455   :  { %9643 = vmatmul.mubr.bf16.gmra.mrb[32].mxu1 %v11362_v4  ;;  %9225 = vmatprep.mubr.bf16.mxu0 %v12766_v41  ;;  %v5233_v37 = vrot.slane %v5232_v19, 4  ;;  %v5243_v52 = vshll.u32 %v4555_v40, 16  ;;  %v3872_v46 = vsel %vm15165_vm12, %v11250_v33, %v3871_v32  ;;  %v5249_v53 = vshll.u32 %v4556_v35, 16  ;;  %v5585_v40 = vld [vmem:[#allocation2 + $0x18c] sm:$0xe] }
 0x456   :  { %9650 = vmatprep.mubr.bf16.mxu1 %v11427_v43  ;;  %v3875_v39 = vsel %vm15165_vm12, %v3873_v61, %v3874_v28  ;;  %v5242_v59 = vrot.slane %v5240_v62, 4  ;;  %v5228_v0 = vsel %vm15171_vm13, %v5223_v30, %v5227_v20  ;;  %v5253_v36 = vshrl.u32 %v4556_v35, 16  ;;  %v4560_v20 = vld [vmem:[#allocation2 + $0x188] sm:$0x1]  ;;  %v5586_v4 = vld [vmem:[#allocation2 + $0x190] sm:$0xf] }
 0x457   :  { %v5238_v27 = vsel %vm15171_vm13, %v5233_v37, %v5237_v18  ;;  %v5245_v16 = vrot.slane %v5243_v52, 5  ;;  %v11428_v55 = vcombine.low %v5886_v48, %v5889_v56  ;;  %v11282_v57 = vcombine.low %v3872_v46, %v3875_v39  ;;  %v5587_v30 = vld [vmem:[#allocation2 + $0x194] sm:$0x1]  ;;  %v3640_v19 = vld [vmem:[#allocation2 + $0x90] sm:$0xe] }
 0x458   :  { %v5251_v50 = vrot.slane %v5249_v53, 5  ;;  %v5259_v1 = vshll.u32 %v4557_v21, 16  ;;  %v5255_v44 = vrot.slane %v5253_v36, 4  ;;  %v11397_v5 = vrot.slane %v5582_v51, 9  ;;  %v3641_v61 = vld [vmem:[#allocation2 + $0x94] sm:$0xf] }
 0x459   :  { %v5246_v15 = vor.u32 %v5245_v16, %v5242_v59  ;;  %v5892_v60 = vrot.slane %v5583_v47, 5  ;;  %v11363_v10 = vcombine.low %v5228_v0, %v5238_v27  ;;  %v5895_v45 = vrot.slane %v5584_v23, 5  ;;  %v4561_v56 = vld [vmem:[#allocation2 + $0x18c] sm:$0xf]  ;;  %v3642_v39 = vld [vmem:[#allocation2 + $0x98] sm:$0x1] }
 0x45a   :  { %v5261_v9 = vrot.slane %v5259_v1, 5  ;;  %v3878_v8 = vrot.slane %v3638_v2, 5  ;;  %v5256_v26 = vor.u32 %v5255_v44, %v5251_v50  ;;  %v11251_v22 = vrot.slane %v3637_v34, 9  ;;  %v4562_v59 = vld [vmem:[#allocation2 + $0x190] sm:$0xf]  ;;  %v12769_v16 = vld [vmem:[#allocation2 + $0x9c] sm:$0xff]  }
 0x45b   :  { %v5247_v7 = vrot.slane %v5246_v15, 4  ;;  %v5894_v11 = vrot.slane %v5892_v60, 4  ;;  %v3881_v43 = vrot.slane %v3639_v13, 5  ;;  %v5264_v54 = vshrl.u32 %v4558_v25, 16  ;;  %v4563_v27 = vld [vmem:[#allocation2 + $0x194] sm:$0x1] }
 0x45c   :  { %9226 = vmatmul.mubr.bf16.gmra.mrb[104].mxu0 %v11282_v57  ;;  %v3880_v24 = vrot.slane %v3878_v8, 4  ;;  %v5267_v58 = vshll.u32 %v4558_v25, 16  ;;  %v5257_v38 = vrot.slane %v5256_v26, 4  ;;  %v5893_v6 = vsel %vm15165_vm12, %v11397_v5, %v5892_v60  ;;  %v5588_v57 = vld [vmem:[#allocation2 + $0x198] sm:$0xe] }
 0x45d   :  { %9651 = vmatmul.mubr.bf16.gmra.mrb[36].mxu1 %v11363_v10  ;;  %9233 = vmatprep.mubr.bf16.mxu0 %v12767_v31  ;;  %v5896_v63 = vsel %vm15165_vm12, %v5894_v11, %v5895_v45  ;;  %v5273_v12 = vshll.u32 %v4559_v17, 16  ;;  %v5252_v3 = vsel %vm15171_vm13, %v5247_v7, %v5251_v50  ;;  %v5266_v32 = vrot.slane %v5264_v54, 4  ;;  %v5589_v44 = vld [vmem:[#allocation2 + $0x19c] sm:$0xf]  ;;  %v5590_v31 = vld [vmem:[#allocation2 + $0x1a0] sm:$0x1] }
 0x45e   :  { %9658 = vmatprep.mubr.bf16.mxu1 %v11428_v55  ;;  %v3882_v33 = vsel %vm15165_vm12, %v3880_v24, %v3881_v43  ;;  %v5269_v41 = vrot.slane %v5267_v58, 5  ;;  %v5262_v42 = vsel %vm15171_vm13, %v5257_v38, %v5261_v9  ;;  %v3879_v49 = vsel %vm15165_vm12, %v11251_v22, %v3878_v8  ;;  %v3643_v24 = vld [vmem:[#allocation2 + $0x9c] sm:$0xe]  ;;  %v3644_v43 = vld [vmem:[#allocation2 + $0xa0] sm:$0xf] }
 0x45f   :  { %v5275_v35 = vrot.slane %v5273_v12, 5  ;;  %v5277_v18 = vshrl.u32 %v4559_v17, 16  ;;  %v11429_v28 = vcombine.low %v5893_v6, %v5896_v63  ;;  %v5283_v37 = vshll.u32 %v4560_v20, 16  ;;  %v4564_v63 = vld [vmem:[#allocation2 + $0x198] sm:$0xf] }
 0x460   :  { %v5270_v62 = vor.u32 %v5269_v41, %v5266_v32  ;;  %v11398_v48 = vrot.slane %v5585_v40, 9  ;;  %v11364_v21 = vcombine.low %v5252_v3, %v5262_v42  ;;  %v11283_v52 = vcombine.low %v3879_v49, %v3882_v33  ;;  %v3645_v32 = vld [vmem:[#allocation2 + $0xa4] sm:$0x1] }
 0x461   :  { %v5279_v51 = vrot.slane %v5277_v18, 4  ;;  %v5899_v46 = vrot.slane %v5586_v4, 5  ;;  %v5902_v47 = vrot.slane %v5587_v30, 5  ;;  %v11252_v23 = vrot.slane %v3640_v19, 9  ;;  %v12771_v18 = vld [vmem:[#allocation2 + $0xa8] sm:$0xff]  }
 0x462   :  { %v5271_v53 = vrot.slane %v5270_v62, 4  ;;  %v3885_v0 = vrot.slane %v3641_v61, 5  ;;  %v5285_v34 = vrot.slane %v5283_v37, 5  ;;  %v5288_v55 = vshrl.u32 %v4561_v56, 16 }
 0x463   :  { %v5280_v36 = vor.u32 %v5279_v51, %v5275_v35  ;;  %v5901_v2 = vrot.slane %v5899_v46, 4  ;;  %v5900_v50 = vsel %vm15165_vm12, %v11398_v48, %v5899_v46  ;;  %v3888_v13 = vrot.slane %v3642_v39, 5  ;;  %v4566_v46 = vld [vmem:[#allocation2 + $0x1a0] sm:$0x1] }
 0x464   :  { %9234 = vmatmul.mubr.bf16.gmra.mrb[108].mxu0 %v11283_v52  ;;  %v3887_v1 = vrot.slane %v3885_v0, 4  ;;  %v5291_v15 = vshll.u32 %v4561_v56, 16  ;;  %v5290_v25 = vrot.slane %v5288_v55, 4  ;;  %v5297_v10 = vshll.u32 %v4562_v59, 16 }
 0x465   :  { %9659 = vmatmul.mubr.bf16.gmra.mrb[40].mxu1 %v11364_v21  ;;  %9241 = vmatprep.mubr.bf16.mxu0 %v12769_v16  ;;  %v5281_v5 = vrot.slane %v5280_v36, 4  ;;  %v5903_v60 = vsel %vm15165_vm12, %v5901_v2, %v5902_v47  ;;  %v5276_v9 = vsel %vm15171_vm13, %v5271_v53, %v5275_v35  ;;  %v5301_v17 = vshrl.u32 %v4562_v59, 16  ;;  %v4565_v35 = vld [vmem:[#allocation2 + $0x19c] sm:$0xf] }
 0x466   :  { %9666 = vmatprep.mubr.bf16.mxu1 %v11429_v28  ;;  %v3889_v45 = vsel %vm15165_vm12, %v3887_v1, %v3888_v13  ;;  %v5293_v8 = vrot.slane %v5291_v15, 5  ;;  %v3886_v26 = vsel %vm15165_vm12, %v11252_v23, %v3885_v0  ;;  %v16086_v11 = vrot.slane %v5297_v10, 5  ;;  %v6360_v23 = vld [vmem:[#allocation2 + $0x18] sm:$0xf]  ;;  %v6362_v1 = vld [vmem:[#allocation2 + $0x20] sm:$0x1] }
 0x467   :  { %v5286_v7 = vsel %vm15171_vm13, %v5281_v5, %v5285_v34  ;;  %v5307_v22 = vshll.u32 %v4563_v27, 16  ;;  %v11430_v20 = vcombine.low %v5900_v50, %v5903_v60  ;;  %v5303_v38 = vrot.slane %v5301_v17, 4  ;;  %v6361_v34 = vld [vmem:[#allocation2 + $0x1c] sm:$0xf] }
 0x468   :  { %v16088_v54 = vpop.f32.mrb[136].mxu0  ;;  %v5294_v58 = vor.u32 %v5293_v8, %v5290_v25  ;;  %v11399_v6 = vrot.slane %v5588_v57, 9  ;;  %v11365_v12 = vcombine.low %v5276_v9, %v5286_v7  ;;  %v11284_v40 = vcombine.low %v3886_v26, %v3889_v45  ;;  %v3646_v25 = vld [vmem:[#allocation2 + $0xa8] sm:$0xe]  ;;  %v12773_v9 = vld [vmem:[#allocation2 + $0xb4] sm:$0xff]  }
 0x469   :  { %v5309_v4 = vrot.slane %v5307_v22, 5  ;;  %v9004_v3 = vpop.f32.mrb[137].mxu0  ;;  %v5906_v33 = vrot.slane %v5589_v44, 5  ;;  %v5304_v30 = vor.u32 %v5303_v38, %v16086_v11  ;;  %v11253_v42 = vrot.slane %v3643_v24, 9  ;;  %v3647_v7 = vld [vmem:[#allocation2 + $0xac] sm:$0xf] }
 0x46a   :  { %v5295_v41 = vrot.slane %v5294_v58, 4  ;;  %v16091_v19 = vpop.f32.mrb[138].mxu0  ;;  %v3892_v49 = vrot.slane %v3644_v43, 5  ;;  %v5909_v28 = vrot.slane %v5590_v31, 5  ;;  %v5312_v37 = vshrl.u32 %v4564_v63, 16 }
 0x46b   :  { %18378 = vst [vmem:[#allocation20_spill] sm:$0xff] %v16091_v19  ;;  %v5908_v61 = vrot.slane %v5906_v33, 4  ;;  %v9007_v62 = vpop.f32.mrb[139].mxu0  ;;  %v5315_v48 = vshll.u32 %v4564_v63, 16  ;;  %v5305_v56 = vrot.slane %v5304_v30, 4  ;;  %v5907_v21 = vsel %vm15165_vm12, %v11399_v6, %v5906_v33 }
 0x46c   :  { %9242 = vmatmul.mubr.bf16.gmra.mrb[112].mxu0 %v11284_v40  ;;  %v3894_v52 = vrot.slane %v3892_v49, 4  ;;  %v3895_v51 = vrot.slane %v3645_v32, 5  ;;  %v5314_v59 = vrot.slane %v5312_v37, 4  ;;  %v5321_v47 = vshll.u32 %v4565_v35, 16  ;;  %v3648_v40 = vld [vmem:[#allocation2 + $0xb0] sm:$0x1] }
 0x46d   :  { %9667 = vmatmul.mubr.bf16.gmra.mrb[44].mxu1 %v11365_v12  ;;  %9249 = vmatprep.mubr.bf16.mxu0 %v12771_v18  ;;  %v5910_v39 = vsel %vm15165_vm12, %v5908_v61, %v5909_v28  ;;  %v5317_v53 = vrot.slane %v5315_v48, 5  ;;  %v5300_v0 = vsel %vm15171_vm13, %v5295_v41, %v16086_v11  ;;  %v3893_v27 = vsel %vm15165_vm12, %v11253_v42, %v3892_v49  ;;  %v6364_v42 = vld [vmem:[#allocation2 + $0x28] sm:$0xf]  ;;  %v6365_v37 = vld [vmem:[#allocation2 + $0x2c] sm:$0x1] }
 0x46e   :  { %9674 = vmatprep.mubr.bf16.mxu1 %v11430_v20  ;;  %v3896_v16 = vsel %vm15165_vm12, %v3894_v52, %v3895_v51  ;;  %v5325_v36 = vshrl.u32 %v4565_v35, 16  ;;  %v5310_v2 = vsel %vm15171_vm13, %v5305_v56, %v5309_v4  ;;  %v11431_v55 = vcombine.low %v5907_v21, %v5910_v39  ;;  %v6363_v20 = vld [vmem:[#allocation2 + $0x24] sm:$0xf] }
 0x46f   :  { %v5318_v57 = vor.u32 %v5317_v53, %v5314_v59  ;;  %v16106_v50 = vrot.slane %v5321_v47, 5  ;;  %v5331_v44 = vshll.u32 %v4566_v46, 16  ;;  %v6457_v5 = vshrl.u32 %v6360_v23, 16  ;;  %v3649_v47 = vld [vmem:[#allocation2 + $0xb4] sm:$0xe] }
 0x470   :  { %v16108_v13 = vpop.f32.mrb[140].mxu0  ;;  %v5327_v15 = vrot.slane %v5325_v36, 4  ;;  %v6460_v60 = vshll.u32 %v6360_v23, 16  ;;  %v11285_v10 = vcombine.low %v3893_v27, %v3896_v16  ;;  %v6466_v17 = vshll.u32 %v6361_v34, 16  ;;  %v3650_v23 = vld [vmem:[#allocation2 + $0xb8] sm:$0xf] }
 0x471   :  { %18379 = vst [vmem:[#allocation22_spill] sm:$0xff] %v16108_v13  ;;  %v5319_v45 = vrot.slane %v5318_v57, 4  ;;  %v9012_v8 = vpop.f32.mrb[141].mxu0  ;;  %v6470_v31 = vshrl.u32 %v6361_v34, 16  ;;  %v6459_v11 = vrot.slane %v6457_v5, 4  ;;  %v6476_v24 = vshll.u32 %v6362_v1, 16 }
 0x472   :  { %v5328_v26 = vor.u32 %v5327_v15, %v16106_v50  ;;  %v6462_v22 = vrot.slane %v6460_v60, 5  ;;  %v16111_v43 = vpop.f32.mrb[142].mxu0  ;;  %v11366_v58 = vcombine.low %v5300_v0, %v5310_v2  ;;  %v5333_v38 = vrot.slane %v5331_v44, 5  ;;  %v6366_v34 = vld [vmem:[#allocation2 + $0x30] sm:$0xf] }
 0x473   :  { %18380 = vst [vmem:[#allocation5_spill] sm:$0xff] %v16111_v43  ;;  %v6468_v6 = vrot.slane %v6466_v17, 5  ;;  %v6472_v63 = vrot.slane %v6470_v31, 4  ;;  %v9015_v12 = vpop.f32.mrb[143].mxu0  ;;  %v5324_v4 = vsel %vm15171_vm13, %v5319_v45, %v16106_v50  ;;  %v3899_v32 = vrot.slane %v3647_v7, 5  ;;  %v12774_v50 = vld [vmem:[#allocation2 + $0xc0] sm:$0xff]  }
 0x474   :  { %9250 = vmatmul.mubr.bf16.gmra.mrb[116].mxu0 %v11285_v10  ;;  %v5329_v3 = vrot.slane %v5328_v26, 4  ;;  %v6463_v33 = vor.u32 %v6462_v22, %v6459_v11  ;;  %v11254_v30 = vrot.slane %v3646_v25, 9  ;;  %v6481_v49 = vshrl.u32 %v6363_v20, 16  ;;  %v6367_v2 = vld [vmem:[#allocation2 + $0x34] sm:$0xf] }
 0x475   :  { %9675 = vmatmul.mubr.bf16.gmra.mrb[48].mxu1 %v11366_v58  ;;  %9257 = vmatprep.mubr.bf16.mxu0 %v12773_v9  ;;  %v6473_v41 = vor.u32 %v6472_v63, %v6468_v6  ;;  %v6484_v35 = vshll.u32 %v6363_v20, 16  ;;  %v6478_v61 = vrot.slane %v6476_v24, 5  ;;  %v3901_v28 = vrot.slane %v3899_v32, 4  ;;  %v3651_v5 = vld [vmem:[#allocation2 + $0xbc] sm:$0x1] }
 0x476   :  { %9682 = vmatprep.mubr.bf16.mxu1 %v11431_v55  ;;  %v6464_v18 = vrot.slane %v6463_v33, 4  ;;  %v3902_v62 = vrot.slane %v3648_v40, 5  ;;  %v5334_v48 = vsel %vm15171_vm13, %v5329_v3, %v5333_v38  ;;  %v6483_v21 = vrot.slane %v6481_v49, 4  ;;  %v3652_v8 = vld [vmem:[#allocation2 + $0xd8] sm:$0xe] }
 0x477   :  { %v6474_v56 = vrot.slane %v6473_v41, 4  ;;  %v6486_v52 = vrot.slane %v6484_v35, 5  ;;  %v6490_v59 = vshll.u32 %v6364_v42, 16  ;;  %v6494_v53 = vshrl.u32 %v6364_v42, 16  ;;  %v3653_v11 = vld [vmem:[#allocation2 + $0xdc] sm:$0xf] }
 0x478   :  { %v6469_v51 = vsel %vm15171_vm13, %v6464_v18, %v6468_v6  ;;  %v3903_v46 = vsel %vm15165_vm12, %v3901_v28, %v3902_v62  ;;  %v16122_v39 = vpop.f32.mrb[144].mxu0  ;;  %v3900_v27 = vsel %vm15165_vm12, %v11254_v30, %v3899_v32  ;;  %v11367_v55 = vcombine.low %v5324_v4, %v5334_v48  ;;  %v6368_v58 = vld [vmem:[#allocation2 + $0x38] sm:$0x1]  ;;  %v3654_v6 = vld [vmem:[#allocation2 + $0xe0] sm:$0x1] }
 0x479   :  { %18381 = vst [vmem:[#allocation19_spill] sm:$0xff] %v16122_v39  ;;  %v6479_v0 = vsel %vm15171_vm13, %v6474_v56, %v6478_v61  ;;  %v9020_v16 = vpop.f32.mrb[145].mxu0  ;;  %v6487_v36 = vor.u32 %v6486_v52, %v6483_v21  ;;  %v11286_v57 = vcombine.low %v3900_v27, %v3903_v46  ;;  %v6492_v1 = vrot.slane %v6490_v59, 5  ;;  %v6369_v3 = vld [vmem:[#allocation2 + $0x3c] sm:$0xf] }
 0x47a   :  { %v6496_v15 = vrot.slane %v6494_v53, 4  ;;  %v16128_v44 = vpop.f32.mrb[146].mxu0  ;;  %v11464_v60 = vcombine.low %v6469_v51, %v6479_v0  ;;  %v6500_v10 = vshll.u32 %v6365_v37, 16  ;;  %v3906_v45 = vrot.slane %v3650_v23, 5  ;;  %v6370_v42 = vld [vmem:[#allocation2 + $0x40] sm:$0xf] }
 0x47b   :  { %18382 = vst [vmem:[#allocation21_spill] sm:$0xff] %v16128_v44  ;;  %v6488_v25 = vrot.slane %v6487_v36, 4  ;;  %v9023_v9 = vpop.f32.mrb[147].mxu0  ;;  %v6505_v31 = vshrl.u32 %v6366_v34, 16  ;;  %v6508_v7 = vshll.u32 %v6366_v34, 16  ;;  %v6514_v26 = vshll.u32 %v6367_v2, 16 }
 0x47c   :  { %9258 = vmatmul.mubr.bf16.gmra.mrb[120].mxu0 %v11286_v57  ;;  %v6497_v17 = vor.u32 %v6496_v15, %v6492_v1  ;;  %v11255_v22 = vrot.slane %v3649_v47, 9  ;;  %v3908_v24 = vrot.slane %v3906_v45, 4  ;;  %v3909_v20 = vrot.slane %v3651_v5, 5  ;;  %v12776_v28 = vld [vmem:[#allocation2 + $0x18] sm:$0xff]   ;;  %v6371_v53 = vld [vmem:[#allocation2 + $0x44] sm:$0x1] }
 0x47d   :  { %9683 = vmatmul.mubr.bf16.gmra.mrb[52].mxu1 %v11367_v55  ;;  %9265 = vmatprep.mubr.bf16.mxu0 %v12774_v50  ;;  %v6518_v38 = vshrl.u32 %v6367_v2, 16  ;;  %v6507_v12 = vrot.slane %v6505_v31, 4  ;;  %v6510_v40 = vrot.slane %v6508_v7, 5  ;;  %v16130_v4 = vrot.slane %v6514_v26, 5  ;;  %v12778_v23 = vld [vmem:[#allocation2 + $0xe4] sm:$0xff]  }
 0x47e   :  { %9723 = vmatprep.mubr.bf16.mxu1 %v11464_v60  ;;  %v6498_v63 = vrot.slane %v6497_v17, 4  ;;  %v6502_v33 = vrot.slane %v6500_v10, 5  ;;  %v3910_v32 = vsel %vm15165_vm12, %v3908_v24, %v3909_v20  ;;  %v11256_v30 = vrot.slane %v3652_v8, 9  ;;  %v16147_v50 = vld [vmem:[#allocation2 + $0xe8] sm:$0xf] }
 0x47f   :  { %v6520_v41 = vrot.slane %v6518_v38, 4  ;;  %v6493_v49 = vsel %vm15171_vm13, %v6488_v25, %v6492_v1  ;;  %v6511_v18 = vor.u32 %v6510_v40, %v6507_v12  ;;  %v3913_v61 = vrot.slane %v3653_v11, 5  ;;  %v16149_v1 = vld [vmem:[#allocation2 + $0x1c] sm:$0xf]  ;;  %v6372_v10 = vld [vmem:[#allocation2 + $0x48] sm:$0xf] }
 0x480   :  { %v16136_v35 = vpop.f32.mrb[148].mxu0  ;;  %v6503_v62 = vsel %vm15171_vm13, %v6498_v63, %v6502_v33  ;;  %v3907_v37 = vsel %vm15165_vm12, %v11255_v22, %v3906_v45  ;;  %v3916_v21 = vrot.slane %v3654_v6, 5  ;;  %v6524_v51 = vshll.u32 %v6368_v58, 16  ;;  %v3655_v8 = vld [vmem:[#allocation2 + $0xe4] sm:$0xe] }
 0x481   :  { %18383 = vst [vmem:[#allocation25_spill] sm:$0xff] %v16136_v35  ;;  %v9028_v48 = vpop.f32.mrb[149].mxu0  ;;  %v6521_v56 = vor.u32 %v6520_v41, %v16130_v4  ;;  %v11287_v52 = vcombine.low %v3907_v37, %v3910_v32  ;;  %v3915_v59 = vrot.slane %v3913_v61, 4  ;;  %v6529_v47 = vshrl.u32 %v6369_v3, 16  ;;  %v3657_v26 = vld [vmem:[#allocation2 + $0xec] sm:$0x1] }
 0x482   :  { %v16143_v46 = vpop.f32.mrb[150].mxu0  ;;  %v6512_v0 = vrot.slane %v6511_v18, 4  ;;  %v6532_v16 = vshll.u32 %v6369_v3, 16  ;;  %v6538_v36 = vshll.u32 %v6370_v42, 16  ;;  %v6542_v34 = vshrl.u32 %v6370_v42, 16  ;;  %v12779_v40 = vld [vmem:[#allocation2 + $0x24] sm:$0xff]  }
 0x483   :  { %18384 = vst [vmem:[#allocation10_spill] sm:$0xff] %v16143_v46  ;;  %v9031_v27 = vpop.f32.mrb[151].mxu0  ;;  %v11465_v2 = vcombine.low %v6493_v49, %v6503_v62  ;;  %v3914_v55 = vsel %vm15165_vm12, %v11256_v30, %v3913_v61  ;;  %v6531_v57 = vrot.slane %v6529_v47, 4  ;;  %v6522_v15 = vrot.slane %v6521_v56, 4  ;;  %v7384_v22 = vld [vmem:[#allocation2 + $0x18] sm:$0xe] }
 0x484   :  { %9266 = vmatmul.mubr.bf16.gmra.mrb[124].mxu0 %v11287_v52  ;;  %v3917_v5 = vsel %vm15165_vm12, %v3915_v59, %v3916_v21  ;;  %v6534_v60 = vrot.slane %v6532_v16, 5  ;;  %v16153_v25 = vrot.slane %v6538_v36, 5  ;;  %v6526_v9 = vrot.slane %v6524_v51, 5  ;;  %v7386_v38 = vld [vmem:[#allocation2 + $0x20] sm:$0x1] }
 0x485   :  { %9724 = vmatmul.mubr.bf16.vlgmr.msra.gmra.mrb[56].mxu1 %v12776_v28  ;;  %9273 = vmatprep.mubr.bf16.mxu0 %v12778_v23  ;;  %v6544_v45 = vrot.slane %v6542_v34, 4  ;;  %v6517_v17 = vsel %vm15171_vm13, %v6512_v0, %v16130_v4  ;;  %v6548_v7 = vshll.u32 %v6371_v53, 16  ;;  %v3920_v11 = vrot.slane %v16147_v50, 5  ;;  %v6373_v63 = vld [vmem:[#allocation2 + $0x4c] sm:$0xf]  ;;  %v12782_v28 = vld [vmem:[#allocation2 + $0xf0] sm:$0xff]  }
 0x486   :  { %9731 = vmatprep.mubr.bf16.mxu1 %v11465_v2  ;;  %v6535_v31 = vor.u32 %v6534_v60, %v6531_v57  ;;  %v11288_v24 = vcombine.low %v3914_v55, %v3917_v5  ;;  %v7578_v6 = vrot.slane %v16149_v1, 5  ;;  %v6553_v12 = vshrl.u32 %v6372_v10, 16  ;;  %v16167_v61 = vld [vmem:[#allocation2 + $0x28] sm:$0xf]  ;;  %v16169_v47 = vld [vmem:[#allocation2 + $0x34] sm:$0xf] }
 0x487   :  { %v6545_v58 = vor.u32 %v6544_v45, %v16153_v25  ;;  %v6527_v4 = vsel %vm15171_vm13, %v6522_v15, %v6526_v9  ;;  %v11257_v33 = vrot.slane %v3655_v8, 9  ;;  %v3922_v32 = vrot.slane %v3920_v11, 4  ;;  %v6374_v2 = vld [vmem:[#allocation2 + $0x50] sm:$0x1]  ;;  %v7387_v57 = vld [vmem:[#allocation2 + $0x24] sm:$0xe] }
 0x488   :  { %v16159_v20 = vpop.f32.mrb[152].mxu0  ;;  %v6556_v41 = vshll.u32 %v6372_v10, 16  ;;  %v6536_v30 = vrot.slane %v6535_v31, 4  ;;  %v6555_v18 = vrot.slane %v6553_v12, 4  ;;  %v3923_v37 = vrot.slane %v3657_v26, 5 }
 0x489   :  { %18385 = vst [vmem:[#allocation14_spill] sm:$0xff] %v16159_v20  ;;  %v9036_v3 = vpop.f32.mrb[153].mxu0  ;;  %v6546_v42 = vrot.slane %v6545_v58, 4  ;;  %v7580_v48 = vrot.slane %v7578_v6, 4  ;;  %v6562_v21 = vshll.u32 %v6373_v63, 16  ;;  %v11466_v52 = vcombine.low %v6517_v17, %v6527_v4 }
 0x48a   :  { %v16165_v49 = vpop.f32.mrb[154].mxu0  ;;  %v6558_v56 = vrot.slane %v6556_v41, 5  ;;  %v6550_v51 = vrot.slane %v6548_v7, 5  ;;  %v11496_v59 = vrot.slane %v7384_v22, 9  ;;  %v6566_v53 = vshrl.u32 %v6373_v63, 16  ;;  %v12783_v3 = vld [vmem:[#allocation2 + $0x30] sm:$0xff]  }
 0x48b   :  { %18386 = vst [vmem:[#allocation4_spill] sm:$0xff] %v16165_v49  ;;  %v9039_v62 = vpop.f32.mrb[155].mxu0  ;;  %v3924_v23 = vsel %vm15165_vm12, %v3922_v32, %v3923_v37  ;;  %v7581_v0 = vrot.slane %v7386_v38, 5  ;;  %v16173_v16 = vrot.slane %v6562_v21, 5  ;;  %v6541_v36 = vsel %vm15171_vm13, %v6536_v30, %v16153_v25  ;;  %v7389_v15 = vld [vmem:[#allocation2 + $0x2c] sm:$0x1] }
 0x48c   :  { %9274 = vmatmul.mubr.bf16.gmra.mrb[128].mxu0 %v11288_v24  ;;  %v6559_v27 = vor.u32 %v6558_v56, %v6555_v18  ;;  %v6551_v34 = vsel %vm15171_vm13, %v6546_v42, %v6550_v51  ;;  %v6568_v55 = vrot.slane %v6566_v53, 4  ;;  %v3921_v50 = vsel %vm15165_vm12, %v11257_v33, %v3920_v11  ;;  %v6375_v60 = vld [vmem:[#allocation2 + $0x54] sm:$0xf]  ;;  %v7390_v8 = vld [vmem:[#allocation2 + $0x30] sm:$0xe] }
 0x48d   :  { %9732 = vmatmul.mubr.bf16.gmra.mrb[60].mxu1 %v12779_v40  ;;  %9281 = vmatprep.mubr.bf16.mxu0 %v12782_v28  ;;  %v7582_v1 = vsel %vm15165_vm12, %v7580_v48, %v7581_v0  ;;  %v7585_v5 = vrot.slane %v16167_v61, 5  ;;  %v11289_v10 = vcombine.low %v3921_v50, %v3924_v23  ;;  %v7579_v25 = vsel %vm15165_vm12, %v11496_v59, %v7578_v6  ;;  %v6376_v31 = vld [vmem:[#allocation2 + $0x58] sm:$0xf]  ;;  %v16191_v38 = vld [vmem:[#allocation2 + $0x40] sm:$0xf] }
 0x48e   :  { %9739 = vmatprep.mubr.bf16.mxu1 %v11466_v52  ;;  %v6569_v45 = vor.u32 %v6568_v55, %v16173_v16  ;;  %v7592_v17 = vrot.slane %v16169_v47, 5  ;;  %v11467_v7 = vcombine.low %v6541_v36, %v6551_v34  ;;  %v6560_v11 = vrot.slane %v6559_v27, 4  ;;  %v7392_v58 = vld [vmem:[#allocation2 + $0x38] sm:$0x1]  ;;  %v6377_v30 = vld [vmem:[#allocation2 + $0x5c] sm:$0x1] }
 0x48f   :  { %v6572_v22 = vshll.u32 %v6374_v2, 16  ;;  %v11497_v24 = vrot.slane %v7387_v57, 9  ;;  %v11528_v63 = vcombine.low %v7579_v25, %v7582_v1  ;;  %v7588_v6 = vrot.slane %v7389_v15, 5  ;;  %v7393_v61 = vld [vmem:[#allocation2 + $0x3c] sm:$0xe] }
 0x490   :  { %v16187_v9 = vpop.f32.mrb[156].mxu0  ;;  %v6577_v40 = vshrl.u32 %v6375_v60, 16  ;;  %v6580_v4 = vshll.u32 %v6375_v60, 16  ;;  %v7587_v32 = vrot.slane %v7585_v5, 4  ;;  %v11498_v41 = vrot.slane %v7390_v8, 9 }
 0x491   :  { %18387 = vst [vmem:[#allocation11_spill] sm:$0xff] %v16187_v9  ;;  %v9044_v26 = vpop.f32.mrb[157].mxu0  ;;  %v6586_v42 = vshll.u32 %v6376_v31, 16  ;;  %v6590_v18 = vshrl.u32 %v6376_v31, 16  ;;  %v6570_v28 = vrot.slane %v6569_v45, 4  ;;  %v7594_v62 = vrot.slane %v7592_v17, 4 }
 0x492   :  { %v16193_v12 = vpop.f32.mrb[158].mxu0  ;;  %v6579_v37 = vrot.slane %v6577_v40, 4  ;;  %v6582_v48 = vrot.slane %v6580_v4, 5  ;;  %v16195_v56 = vld [vmem:[#allocation2 + $0x48] sm:$0xe]  ;;  %v6574_v52 = vrot.slane %v6572_v22, 5  ;;  %v7586_v51 = vsel %vm15165_vm12, %v11497_v24, %v7585_v5 }
 0x493   :  { %18388 = vst [vmem:[#allocation13_spill] sm:$0xff] %v16193_v12  ;;  %v9047_v33 = vpop.f32.mrb[159].mxu0  ;;  %v16197_v21 = vld [vmem:[#allocation2 + $0x4c] sm:$0xf]  ;;  %v16201_v59 = vrot.slane %v6586_v42, 5  ;;  %v6592_v53 = vrot.slane %v6590_v18, 4  ;;  %v6565_v47 = vsel %vm15171_vm13, %v6560_v11, %v16173_v16  ;;  %v7589_v34 = vsel %vm15165_vm12, %v7587_v32, %v7588_v6 }
 0x494   :  { %9282 = vmatmul.mubr.bf16.gmra.mrb[132].mxu0 %v11289_v10  ;;  %v7595_v23 = vrot.slane %v7392_v58, 5  ;;  %v6583_v0 = vor.u32 %v6582_v48, %v6579_v37  ;;  %v7599_v27 = vrot.slane %v16191_v38, 5  ;;  %v6378_v36 = vld [vmem:[#allocation2 + $0x60] sm:$0xf]  ;;  %v7593_v2 = vsel %vm15165_vm12, %v11498_v41, %v7592_v17  ;;  %v7395_v57 = vld [vmem:[#allocation2 + $0x44] sm:$0x1] }
 0x495   :  { %9740 = vmatmul.mubr.bf16.gmra.mrb[64].mxu1 %v12783_v3  ;;  %12191 = vmatprep.mubr.bf16.mxu0 %v11528_v63  ;;  %v6593_v55 = vor.u32 %v6592_v53, %v16201_v59  ;;  %v7606_v50 = vrot.slane %v16197_v21, 5  ;;  %v6379_v1 = vld [vmem:[#allocation2 + $0x64] sm:$0xf]  ;;  %v6575_v16 = vsel %vm15171_vm13, %v6570_v28, %v6574_v52  ;;  %v6596_v60 = vshll.u32 %v6377_v30, 16  ;;  %v7398_v25 = vld [vmem:[#allocation2 + $0x50] sm:$0x1] }
 0x496   :  { %9747 = vmatprep.mubr.bf16.mxu1 %v11467_v7  ;;  %v7596_v15 = vsel %vm15165_vm12, %v7594_v62, %v7595_v23  ;;  %v11499_v10 = vrot.slane %v7393_v61, 9  ;;  %v16219_v45 = vld [vmem:[#allocation2 + $0x58] sm:$0xf]  ;;  %v16221_v17 = vrot.slane %v6583_v0, 4  ;;  %v7601_v31 = vrot.slane %v7599_v27, 4  ;;  %v12786_v63 = vld [vmem:[#allocation2 + $0x3c] sm:$0xff]  }
 0x497   :  { %v11500_v7 = vrot.slane %v16195_v56, 9  ;;  %v6601_v26 = vshrl.u32 %v6378_v36, 16  ;;  %v11529_v11 = vcombine.low %v7586_v51, %v7589_v34  ;;  %v6594_v22 = vrot.slane %v6593_v55, 4  ;;  %v6380_v33 = vld [vmem:[#allocation2 + $0x68] sm:$0x1] }
 0x498   :  { %v16217_v5 = vpop.f32.mrb[160].mxu0  ;;  %v6604_v58 = vshll.u32 %v6378_v36, 16  ;;  %v6610_v38 = vshll.u32 %v6379_v1, 16  ;;  %v11468_v6 = vcombine.low %v6565_v47, %v6575_v16  ;;  %v11530_v40 = vcombine.low %v7593_v2, %v7596_v15  ;;  %v16226_v41 = vld [vmem:[#allocation2 + $0x54] sm:$0xe] }
 0x499   :  { %18389 = vst [vmem:[#allocation16_spill] sm:$0xff] %v16217_v5  ;;  %v9052_v8 = vpop.f32.mrb[161].mxu0  ;;  %v7608_v3 = vrot.slane %v7606_v50, 4  ;;  %v6603_v32 = vrot.slane %v6601_v26, 4  ;;  %v7401_v30 = vld [vmem:[#allocation2 + $0x5c] sm:$0x1]  ;;  %v7600_v18 = vsel %vm15165_vm12, %v11499_v10, %v7599_v27  ;;  %v6589_v52 = vsel %vm15171_vm13, %v16221_v17, %v16201_v59 }
 0x49a   :  { %v16224_v24 = vpop.f32.mrb[162].mxu0  ;;  %v6598_v42 = vrot.slane %v6596_v60, 5  ;;  %v7602_v61 = vrot.slane %v7395_v57, 5  ;;  %v6606_v28 = vrot.slane %v6604_v58, 5  ;;  %v7403_v62 = vld [vmem:[#allocation2 + $0x64] sm:$0xf]  ;;  %v7607_v47 = vsel %vm15165_vm12, %v11500_v7, %v7606_v50 }
 0x49b   :  { %18390 = vst [vmem:[#allocation29_spill] sm:$0xff] %v16224_v24  ;;  %v9055_v4 = vpop.f32.mrb[163].mxu0  ;;  %v7609_v37 = vrot.slane %v7398_v25, 5  ;;  %v16230_v48 = vrot.slane %v6610_v38, 5  ;;  %v6614_v56 = vshrl.u32 %v6379_v1, 16  ;;  %v7613_v21 = vrot.slane %v16219_v45, 5 }
 0x49c   :  { %12192 = vmatmul.mubr.bf16.vlgmr.msra.gmra.mrb[192].mxu0 %v11529_v11  ;;  %v6599_v51 = vsel %vm15171_vm13, %v6594_v22, %v6598_v42  ;;  %v7603_v53 = vsel %vm15165_vm12, %v7601_v31, %v7602_v61  ;;  %v7402_v23 = vld [vmem:[#allocation2 + $0x60] sm:$0xe]  ;;  %v6381_v0 = vld [vmem:[#allocation2 + $0x6c] sm:$0xf]  ;;  %v6607_v36 = vor.u32 %v6606_v28, %v6603_v32  ;;  %v7620_v2 = vrot.slane %v7403_v62, 5 }
 0x49d   :  { %9748 = vmatmul.mubr.bf16.gmra.mrb[68].mxu1 %v12786_v63  ;;  %12195 = vmatprep.mubr.bf16.mxu0 %v11530_v40  ;;  %v7610_v27 = vsel %vm15165_vm12, %v7608_v3, %v7609_v37  ;;  %v6616_v34 = vrot.slane %v6614_v56, 4  ;;  %v6382_v55 = vld [vmem:[#allocation2 + $0x70] sm:$0xf]  ;;  %v6620_v59 = vshll.u32 %v6380_v33, 16  ;;  %v11501_v1 = vrot.slane %v16226_v41, 9  ;;  %v12788_v22 = vld [vmem:[#allocation2 + $0x48] sm:$0xff]  }
 0x49e   :  { %9755 = vmatprep.mubr.bf16.mxu1 %v11468_v6  ;;  %v7615_v16 = vrot.slane %v7613_v21, 4  ;;  %v7616_v15 = vrot.slane %v7401_v30, 5  ;;  %v7404_v60 = vld [vmem:[#allocation2 + $0x68] sm:$0x1]  ;;  %v11502_v25 = vrot.slane %v7402_v23, 9  ;;  %v6625_v45 = vshrl.u32 %v6381_v0, 16 }
 0x49f   :  { %v6617_v50 = vor.u32 %v6616_v34, %v16230_v48  ;;  %v6628_v8 = vshll.u32 %v6381_v0, 16  ;;  %v16249_v17 = vld [vmem:[#allocation2 + $0x70] sm:$0xf]  ;;  %v11531_v31 = vcombine.low %v7600_v18, %v7603_v53  ;;  %v11532_v7 = vcombine.low %v7607_v47, %v7610_v27  ;;  %v16253_v6 = vld [vmem:[#allocation2 + $0x74] sm:$0x1] }
 0x4a0   :  { %v16245_v57 = vpop.f32.mrb[164].mxu0  ;;  %v6634_v11 = vshll.u32 %v6382_v55, 16  ;;  %v6608_v58 = vrot.slane %v6607_v36, 4  ;;  %v7622_v63 = vrot.slane %v7620_v2, 4  ;;  %v6627_v40 = vrot.slane %v6625_v45, 4 }
 0x4a1   :  { %18391 = vst [vmem:[#allocation30_spill] sm:$0xff] %v16245_v57  ;;  %v9060_v10 = vpop.f32.mrb[165].mxu0  ;;  %v6630_v4 = vrot.slane %v6628_v8, 5  ;;  %v11469_v3 = vcombine.low %v6589_v52, %v6599_v51  ;;  %v7617_v33 = vsel %vm15165_vm12, %v7615_v16, %v7616_v15  ;;  %v6638_v41 = vshrl.u32 %v6382_v55, 16  ;;  %v7405_v30 = vld [vmem:[#allocation2 + $0x6c] sm:$0xe] }
 0x4a2   :  { %v16251_v26 = vpop.f32.mrb[166].mxu0  ;;  %v16257_v32 = vrot.slane %v6634_v11, 5  ;;  %v16259_v42 = vld [vmem:[#allocation2 + $0x7c] sm:$0xf]  ;;  %v6384_v18 = vld [vmem:[#allocation2 + $0x78] sm:$0xf]  ;;  %v7614_v56 = vsel %vm15165_vm12, %v11501_v1, %v7613_v21  ;;  %v7621_v52 = vsel %vm15165_vm12, %v11502_v25, %v7620_v2  ;;  %v6613_v23 = vsel %vm15171_vm13, %v6608_v58, %v16230_v48 }
 0x4a3   :  { %18392 = vst [vmem:[#allocation24_spill] sm:$0xff] %v16251_v26  ;;  %v9063_v38 = vpop.f32.mrb[167].mxu0  ;;  %v6618_v61 = vrot.slane %v6617_v50, 4  ;;  %v6622_v28 = vrot.slane %v6620_v59, 5  ;;  %v7623_v62 = vrot.slane %v7404_v60, 5  ;;  %v7627_v37 = vrot.slane %v16249_v17, 5 }
 0x4a4   :  { %12196 = vmatmul.mubr.bf16.gmra.mrb[196].mxu0 %v11531_v31  ;;  %v6631_v51 = vor.u32 %v6630_v4, %v6627_v40  ;;  %v6640_v53 = vrot.slane %v6638_v41, 4  ;;  %v7407_v47 = vld [vmem:[#allocation2 + $0x74] sm:$0x1]  ;;  %v11533_v0 = vcombine.low %v7614_v56, %v7617_v33  ;;  %v7408_v36 = vld [vmem:[#allocation2 + $0x78] sm:$0xe]  ;;  %v7634_v55 = vrot.slane %v16259_v42, 5 }
 0x4a5   :  { %9756 = vmatmul.mubr.bf16.gmra.mrb[72].mxu1 %v12788_v22  ;;  %12199 = vmatprep.mubr.bf16.mxu0 %v11532_v7  ;;  %v7624_v27 = vsel %vm15165_vm12, %v7622_v63, %v7623_v62  ;;  %v7410_v34 = vld [vmem:[#allocation2 + $0x80] sm:$0x1]  ;;  %v6644_v2 = vshll.u32 %v16253_v6, 16  ;;  %v6385_v1 = vld [vmem:[#allocation2 + $0x7c] sm:$0xf]  ;;  %v6649_v16 = vshrl.u32 %v6384_v18, 16  ;;  %v6623_v48 = vsel %vm15171_vm13, %v6618_v61, %v6622_v28 }
 0x4a6   :  { %9763 = vmatprep.mubr.bf16.mxu1 %v11469_v3  ;;  %v6641_v21 = vor.u32 %v6640_v53, %v16257_v32  ;;  %v6652_v15 = vshll.u32 %v6384_v18, 16  ;;  %v11503_v10 = vrot.slane %v7405_v30, 9  ;;  %v7629_v50 = vrot.slane %v7627_v37, 4  ;;  %v16278_v45 = vld [vmem:[#allocation2 + $0x88] sm:$0xf]  ;;  %v12789_v22 = vld [vmem:[#allocation2 + $0x54] sm:$0xff]  }
 0x4a7   :  { %v7630_v25 = vrot.slane %v7407_v47, 5  ;;  %v11534_v8 = vcombine.low %v7621_v52, %v7624_v27  ;;  %v6632_v17 = vrot.slane %v6631_v51, 4  ;;  %v6651_v7 = vrot.slane %v6649_v16, 4  ;;  %v6386_v41 = vld [vmem:[#allocation2 + $0x80] sm:$0x1] }
 0x4a8   :  { %v16272_v59 = vpop.f32.mrb[168].mxu0  ;;  %v6654_v11 = vrot.slane %v6652_v15, 5  ;;  %v11504_v38 = vrot.slane %v7408_v36, 9  ;;  %v7636_v63 = vrot.slane %v7634_v55, 4  ;;  %v6658_v6 = vshll.u32 %v6385_v1, 16 }
 0x4a9   :  { %18393 = vst [vmem:[#allocation26_spill] sm:$0xff] %v16272_v59  ;;  %v9068_v60 = vpop.f32.mrb[169].mxu0  ;;  %v6662_v40 = vshrl.u32 %v6385_v1, 16  ;;  %v11470_v4 = vcombine.low %v6613_v23, %v6623_v48  ;;  %v6642_v3 = vrot.slane %v6641_v21, 4  ;;  %v7637_v33 = vrot.slane %v7410_v34, 5 }
 0x4aa   :  { %v16280_v31 = vpop.f32.mrb[170].mxu0  ;;  %v6387_v30 = vld [vmem:[#allocation2 + $0x84] sm:$0xf]  ;;  %v7631_v42 = vsel %vm15165_vm12, %v7629_v50, %v7630_v25  ;;  %v6655_v18 = vor.u32 %v6654_v11, %v6651_v7  ;;  %v16284_v61 = vrot.slane %v6658_v6, 5  ;;  %v7415_v62 = vld [vmem:[#allocation2 + $0x94] sm:$0xf]  ;;  %v6637_v56 = vsel %vm15171_vm13, %v6632_v17, %v16257_v32 }
 0x4ab   :  { %18394 = vst [vmem:[#allocation31_spill] sm:$0xff] %v16280_v31  ;;  %v9071_v58 = vpop.f32.mrb[171].mxu0  ;;  %v6664_v28 = vrot.slane %v6662_v40, 4  ;;  %v6646_v52 = vrot.slane %v6644_v2, 5  ;;  %v7628_v51 = vsel %vm15165_vm12, %v11503_v10, %v7627_v37  ;;  %v7411_v53 = vld [vmem:[#allocation2 + $0x84] sm:$0xe]  ;;  %v7635_v23 = vsel %vm15165_vm12, %v11504_v38, %v7634_v55 }
 0x4ac   :  { %12200 = vmatmul.mubr.bf16.gmra.mrb[200].mxu0 %v11533_v0  ;;  %v7641_v47 = vrot.slane %v16278_v45, 5  ;;  %v7638_v0 = vsel %vm15165_vm12, %v7636_v63, %v7637_v33  ;;  %v7413_v36 = vld [vmem:[#allocation2 + $0x8c] sm:$0x1]  ;;  %v7414_v34 = vld [vmem:[#allocation2 + $0x90] sm:$0xe]  ;;  %v6673_v1 = vshrl.u32 %v6387_v30, 16  ;;  %v11535_v2 = vcombine.low %v7628_v51, %v7631_v42 }
 0x4ad   :  { %9764 = vmatmul.mubr.bf16.gmra.mrb[76].mxu1 %v12789_v22  ;;  %12203 = vmatprep.mubr.bf16.mxu0 %v11534_v8  ;;  %v6665_v27 = vor.u32 %v6664_v28, %v16284_v61  ;;  %v6388_v21 = vld [vmem:[#allocation2 + $0x88] sm:$0xf]  ;;  %v6647_v32 = vsel %vm15171_vm13, %v6642_v3, %v6646_v52  ;;  %v7648_v16 = vrot.slane %v7415_v62, 5  ;;  %v6676_v15 = vshll.u32 %v6387_v30, 16  ;;  %v16301_v48 = vld [vmem:[#allocation2 + $0xa0] sm:$0xf] }
 0x4ae   :  { %9771 = vmatprep.mubr.bf16.mxu1 %v11470_v4  ;;  %v12790_v55 = vld [vmem:[#allocation2 + $0x60] sm:$0xff]   ;;  %v16303_v10 = vrot.slane %v6655_v18, 4  ;;  %v6668_v50 = vshll.u32 %v6386_v41, 16  ;;  %v7643_v25 = vrot.slane %v7641_v47, 4  ;;  %v7416_v45 = vld [vmem:[#allocation2 + $0x98] sm:$0x1]  ;;  %v11536_v7 = vcombine.low %v7635_v23, %v7638_v0 }
 0x4af   :  { %v6675_v8 = vrot.slane %v6673_v1, 4  ;;  %v16305_v17 = vld [vmem:[#allocation2 + $0xac] sm:$0xf]  ;;  %v6678_v22 = vrot.slane %v6676_v15, 5  ;;  %v6682_v58 = vshll.u32 %v6388_v21, 16  ;;  %v6686_v38 = vshrl.u32 %v6388_v21, 16 }
 0x4b0   :  { %v16299_v37 = vpop.f32.mrb[172].mxu0  ;;  %v11471_v63 = vcombine.low %v6637_v56, %v6647_v32  ;;  %v6666_v6 = vrot.slane %v6665_v27, 4  ;;  %v11505_v4 = vrot.slane %v7411_v53, 9  ;;  %v11506_v3 = vrot.slane %v7414_v34, 9  ;;  %v6389_v33 = vld [vmem:[#allocation2 + $0x8c] sm:$0x1] }
 0x4b1   :  { %18395 = vst [vmem:[#allocation33_spill] sm:$0xff] %v16299_v37  ;;  %v9076_v60 = vpop.f32.mrb[173].mxu0  ;;  %v7644_v30 = vrot.slane %v7413_v36, 5  ;;  %v7650_v41 = vrot.slane %v7648_v16, 4  ;;  %v6679_v42 = vor.u32 %v6678_v22, %v6675_v8  ;;  %v16309_v18 = vrot.slane %v6682_v58, 5 }
 0x4b2   :  { %v16307_v11 = vpop.f32.mrb[174].mxu0  ;;  %v6390_v28 = vld [vmem:[#allocation2 + $0x90] sm:$0xf]  ;;  %v6670_v62 = vrot.slane %v6668_v50, 5  ;;  %v6688_v52 = vrot.slane %v6686_v38, 4  ;;  %v7655_v51 = vrot.slane %v16301_v48, 5  ;;  %v6661_v56 = vsel %vm15171_vm13, %v16303_v10, %v16284_v61 }
 0x4b3   :  { %18396 = vst [vmem:[#allocation32_spill] sm:$0xff] %v16307_v11  ;;  %v9079_v40 = vpop.f32.mrb[175].mxu0  ;;  %v7645_v53 = vsel %vm15165_vm12, %v7643_v25, %v7644_v30  ;;  %v7651_v23 = vrot.slane %v7416_v45, 5  ;;  %v7417_v0 = vld [vmem:[#allocation2 + $0x9c] sm:$0xe]  ;;  %v7662_v27 = vrot.slane %v16305_v17, 5  ;;  %v7642_v21 = vsel %vm15165_vm12, %v11505_v4, %v7641_v47 }
 0x4b4   :  { %12204 = vmatmul.mubr.bf16.gmra.mrb[204].mxu0 %v11535_v2  ;;  %v6391_v36 = vld [vmem:[#allocation2 + $0x94] sm:$0xf]  ;;  %v6671_v34 = vsel %vm15171_vm13, %v6666_v6, %v6670_v62  ;;  %v7649_v1 = vsel %vm15165_vm12, %v11506_v3, %v7648_v16  ;;  %v6689_v32 = vor.u32 %v6688_v52, %v16309_v18  ;;  %v7419_v61 = vld [vmem:[#allocation2 + $0xa4] sm:$0x1]  ;;  %v7420_v2 = vld [vmem:[#allocation2 + $0xa8] sm:$0xe]  ;;  %v11537_v25 = vcombine.low %v7642_v21, %v7645_v53 }
 0x4b5   :  { %9772 = vmatmul.mubr.bf16.gmra.mrb[80].mxu1 %v12790_v55  ;;  %12207 = vmatprep.mubr.bf16.mxu0 %v11536_v7  ;;  %v7422_v15 = vld [vmem:[#allocation2 + $0xb0] sm:$0x1]  ;;  %v7652_v48 = vsel %vm15165_vm12, %v7650_v41, %v7651_v23  ;;  %v6680_v60 = vrot.slane %v6679_v42, 4  ;;  %v6692_v10 = vshll.u32 %v6389_v33, 16  ;;  %v6697_v50 = vshrl.u32 %v6390_v28, 16 }
 0x4b6   :  { %9779 = vmatprep.mubr.bf16.mxu1 %v11471_v63  ;;  %v7657_v8 = vrot.slane %v7655_v51, 4  ;;  %v6700_v47 = vshll.u32 %v6390_v28, 16  ;;  %v6706_v17 = vshll.u32 %v6391_v36, 16  ;;  %v16330_v7 = vld [vmem:[#allocation2 + $0xb8] sm:$0xf]  ;;  %v12791_v16 = vld [vmem:[#allocation2 + $0x6c] sm:$0xff]   ;;  %v11538_v40 = vcombine.low %v7649_v1, %v7652_v48 }
 0x4b7   :  { %v6690_v22 = vrot.slane %v6689_v32, 4  ;;  %v7664_v38 = vrot.slane %v7662_v27, 4  ;;  %v6699_v63 = vrot.slane %v6697_v50, 4  ;;  %v6710_v6 = vshrl.u32 %v6391_v36, 16  ;;  %v16334_v41 = vld [vmem:[#allocation2 + $0xc4] sm:$0xf] }
 0x4b8   :  { %v16328_v55 = vpop.f32.mrb[176].mxu0  ;;  %v11507_v3 = vrot.slane %v7417_v0, 9  ;;  %v7658_v30 = vrot.slane %v7419_v61, 5  ;;  %v6702_v33 = vrot.slane %v6700_v47, 5  ;;  %v11472_v42 = vcombine.low %v6661_v56, %v6671_v34  ;;  %v6393_v53 = vld [vmem:[#allocation2 + $0x9c] sm:$0xf] }
 0x4b9   :  { %18397 = vst [vmem:[#allocation35_spill] sm:$0xff] %v16328_v55  ;;  %v9084_v45 = vpop.f32.mrb[177].mxu0  ;;  %v6694_v28 = vrot.slane %v6692_v10, 5  ;;  %v11508_v62 = vrot.slane %v7420_v2, 9  ;;  %v7665_v52 = vrot.slane %v7422_v15, 5  ;;  %v6685_v23 = vsel %vm15171_vm13, %v6680_v60, %v16309_v18 }
 0x4ba   :  { %v16332_v58 = vpop.f32.mrb[178].mxu0  ;;  %v7659_v36 = vsel %vm15165_vm12, %v7657_v8, %v7658_v30  ;;  %v6392_v0 = vld [vmem:[#allocation2 + $0x98] sm:$0x1]  ;;  %v16341_v21 = vrot.slane %v6706_v17, 5  ;;  %v6712_v1 = vrot.slane %v6710_v6, 4  ;;  %v6703_v32 = vor.u32 %v6702_v33, %v6699_v63 }
 0x4bb   :  { %18398 = vst [vmem:[#allocation34_spill] sm:$0xff] %v16332_v58  ;;  %v9087_v4 = vpop.f32.mrb[179].mxu0  ;;  %v6695_v56 = vsel %vm15171_vm13, %v6690_v22, %v6694_v28  ;;  %v7666_v34 = vsel %vm15165_vm12, %v7664_v38, %v7665_v52  ;;  %v7669_v61 = vrot.slane %v16330_v7, 5  ;;  %v6394_v2 = vld [vmem:[#allocation2 + $0xa0] sm:$0xf]  ;;  %v7656_v18 = vsel %vm15165_vm12, %v11507_v3, %v7655_v51 }
 0x4bc   :  { %12208 = vmatmul.mubr.bf16.gmra.mrb[208].mxu0 %v11537_v25  ;;  %v7423_v15 = vld [vmem:[#allocation2 + $0xb4] sm:$0xe]  ;;  %v7426_v48 = vld [vmem:[#allocation2 + $0xc0] sm:$0xe]  ;;  %v7676_v60 = vrot.slane %v16334_v41, 5  ;;  %v6721_v10 = vshrl.u32 %v6393_v53, 16  ;;  %v11539_v50 = vcombine.low %v7656_v18, %v7659_v36  ;;  %v7663_v25 = vsel %vm15165_vm12, %v11508_v62, %v7662_v27 }
 0x4bd   :  { %9780 = vmatmul.mubr.bf16.gmra.mrb[84].mxu1 %v12791_v16  ;;  %12211 = vmatprep.mubr.bf16.mxu0 %v11538_v40  ;;  %v6716_v45 = vshll.u32 %v6392_v0, 16  ;;  %v7425_v8 = vld [vmem:[#allocation2 + $0xbc] sm:$0x1]  ;;  %v7428_v47 = vld [vmem:[#allocation2 + $0xc8] sm:$0x1]  ;;  %v6724_v17 = vshll.u32 %v6393_v53, 16  ;;  %v11473_v16 = vcombine.low %v6685_v23, %v6695_v56  ;;  %v11540_v22 = vcombine.low %v7663_v25, %v7666_v34 }
 0x4be   :  { %9787 = vmatprep.mubr.bf16.mxu1 %v11472_v42  ;;  %v6713_v7 = vor.u32 %v6712_v1, %v16341_v21  ;;  %v6730_v38 = vshll.u32 %v6394_v2, 16  ;;  %v16354_v63 = vld [vmem:[#allocation2 + $0xd0] sm:$0xf]  ;;  %v16356_v51 = vld [vmem:[#allocation2 + $0xf4] sm:$0xf]  ;;  %v6704_v6 = vrot.slane %v6703_v32, 4 }
 0x4bf   :  { %v11509_v40 = vrot.slane %v7423_v15, 9  ;;  %v7671_v4 = vrot.slane %v7669_v61, 4  ;;  %v11510_v3 = vrot.slane %v7426_v48, 9  ;;  %v7429_v30 = vld [vmem:[#allocation2 + $0xcc] sm:$0xe]  ;;  %v12792_v27 = vld [vmem:[#allocation2 + $0x78] sm:$0xff]  }
 0x4c0   :  { %v7431_v33 = vld [vmem:[#allocation2 + $0xd4] sm:$0x1]  ;;  %v7678_v42 = vrot.slane %v7676_v60, 4  ;;  %v6723_v28 = vrot.slane %v6721_v10, 4  ;;  %v6726_v62 = vrot.slane %v6724_v17, 5  ;;  %v6734_v52 = vshrl.u32 %v6394_v2, 16 }
 0x4c1   :  { %v6396_v53 = vld [vmem:[#allocation2 + $0xa8] sm:$0xf]  ;;  %v6718_v36 = vrot.slane %v6716_v45, 5  ;;  %v7672_v0 = vrot.slane %v7425_v8, 5  ;;  %v16360_v1 = vrot.slane %v6730_v38, 5  ;;  %v7683_v56 = vrot.slane %v16354_v63, 5 }
 0x4c2   :  { %v6714_v34 = vrot.slane %v6713_v7, 4  ;;  %v7679_v18 = vrot.slane %v7428_v47, 5  ;;  %v6736_v15 = vrot.slane %v6734_v52, 4  ;;  %v7690_v48 = vrot.slane %v16356_v51, 5  ;;  %v6397_v8 = vld [vmem:[#allocation2 + $0xac] sm:$0xf] }
 0x4c3   :  { %v16358_v41 = vpop.f32.mrb[180].mxu0  ;;  %v6709_v2 = vsel %vm15171_vm13, %v6704_v6, %v16341_v21  ;;  %v7673_v25 = vsel %vm15165_vm12, %v7671_v4, %v7672_v0  ;;  %v7677_v45 = vsel %vm15165_vm12, %v11510_v3, %v7676_v60  ;;  %v6395_v17 = vld [vmem:[#allocation2 + $0xa4] sm:$0x1]  ;;  %v7686_v7 = vrot.slane %v7431_v33, 5  ;;  %v7432_v38 = vld [vmem:[#allocation2 + $0xf0] sm:$0xe] }
 0x4c4   :  { %18399 = vst [vmem:[#allocation37_spill] sm:$0xff] %v16358_v41  ;;  %12212 = vmatmul.mubr.bf16.gmra.mrb[212].mxu0 %v11539_v50  ;;  %v9092_v23 = vpop.f32.mrb[181].mxu0  ;;  %v7670_v50 = vsel %vm15165_vm12, %v11509_v40, %v7669_v61  ;;  %v7680_v47 = vsel %vm15165_vm12, %v7678_v42, %v7679_v18  ;;  %v6737_v21 = vor.u32 %v6736_v15, %v16360_v1  ;;  %v7685_v63 = vrot.slane %v7683_v56, 4  ;;  %v7434_v51 = vld [vmem:[#allocation2 + $0xf8] sm:$0x1] }
 0x4c5   :  { %9788 = vmatmul.mubr.bf16.gmra.mrb[88].mxu1 %v12792_v27  ;;  %12215 = vmatprep.mubr.bf16.mxu0 %v11540_v22  ;;  %v16363_v32 = vpop.f32.mrb[182].mxu0  ;;  %v11511_v22 = vrot.slane %v7429_v30, 9  ;;  %v6745_v61 = vshrl.u32 %v6396_v53, 16  ;;  %v6748_v6 = vshll.u32 %v6396_v53, 16  ;;  %v6719_v40 = vsel %vm15171_vm13, %v6714_v34, %v6718_v36  ;;  %v12793_v30 = vld [vmem:[#allocation2 + $0x84] sm:$0xff]  }
 0x4c6   :  { %18400 = vst [vmem:[#allocation36_spill] sm:$0xff] %v16363_v32  ;;  %9795 = vmatprep.mubr.bf16.mxu1 %v11473_v16  ;;  %v9095_v10 = vpop.f32.mrb[183].mxu0  ;;  %v6727_v16 = vor.u32 %v6726_v62, %v6723_v28  ;;  %v11541_v4 = vcombine.low %v7670_v50, %v7673_v25  ;;  %v7692_v60 = vrot.slane %v7690_v48, 4  ;;  %v6754_v3 = vshll.u32 %v6397_v8, 16  ;;  %v16380_v28 = vld [vmem:[#allocation2 + $0x100] sm:$0xf] }
 0x4c7   :  { %v11542_v27 = vcombine.low %v7677_v45, %v7680_v47  ;;  %v6740_v52 = vshll.u32 %v6395_v17, 16  ;;  %v11512_v42 = vrot.slane %v7432_v38, 9  ;;  %v6758_v23 = vshrl.u32 %v6397_v8, 16  ;;  %v6399_v10 = vld [vmem:[#allocation2 + $0xb4] sm:$0xf] }
 0x4c8   :  { %v6728_v33 = vrot.slane %v6727_v16, 4  ;;  %v7693_v62 = vrot.slane %v7434_v51, 5  ;;  %v6747_v0 = vrot.slane %v6745_v61, 4  ;;  %v6750_v18 = vrot.slane %v6748_v6, 5  ;;  %v7439_v47 = vld [vmem:[#allocation2 + $0x10c] sm:$0xf] }
 0x4c9   :  { %v11474_v15 = vcombine.low %v6709_v2, %v6719_v40  ;;  %v6738_v53 = vrot.slane %v6737_v21, 4  ;;  %v7684_v36 = vsel %vm15165_vm12, %v11511_v22, %v7683_v56  ;;  %v7687_v34 = vsel %vm15165_vm12, %v7685_v63, %v7686_v7  ;;  %v6398_v22 = vld [vmem:[#allocation2 + $0xb0] sm:$0x1]  ;;  %v6400_v7 = vld [vmem:[#allocation2 + $0xb8] sm:$0xf] }
 0x4ca   :  { %v7694_v25 = vsel %vm15165_vm12, %v7692_v60, %v7693_v62  ;;  %v16390_v45 = vrot.slane %v6754_v3, 5  ;;  %v6760_v8 = vrot.slane %v6758_v23, 4  ;;  %v7697_v2 = vrot.slane %v16380_v28, 5  ;;  %v7435_v61 = vld [vmem:[#allocation2 + $0xfc] sm:$0xe] }
 0x4cb   :  { %v6742_v56 = vrot.slane %v6740_v52, 5  ;;  %v7691_v16 = vsel %vm15165_vm12, %v11512_v42, %v7690_v48  ;;  %v6733_v38 = vsel %vm15171_vm13, %v6728_v33, %v16360_v1  ;;  %v11543_v63 = vcombine.low %v7684_v36, %v7687_v34  ;;  %v7437_v6 = vld [vmem:[#allocation2 + $0x104] sm:$0x1]  ;;  %v12794_v42 = vld [vmem:[#allocation2 + $0x90] sm:$0xff]   ;;  %v16403_v33 = vld [vmem:[#allocation2 + $0x118] sm:$0xf] }
 0x4cc   :  { %12216 = vmatmul.mubr.bf16.gmra.mrb[216].mxu0 %v11541_v4  ;;  %v6751_v51 = vor.u32 %v6750_v18, %v6747_v0  ;;  %v6769_v40 = vshrl.u32 %v6399_v10, 16  ;;  %v11544_v3 = vcombine.low %v7691_v16, %v7694_v25  ;;  %v7704_v48 = vrot.slane %v7439_v47, 5  ;;  %v16405_v36 = vld [vmem:[#allocation2 + $0x124] sm:$0xf]  ;;  %v7440_v25 = vld [vmem:[#allocation2 + $0x110] sm:$0x1] }
 0x4cd   :  { %9796 = vmatmul.mubr.bf16.gmra.mrb[92].mxu1 %v12793_v30  ;;  %12219 = vmatprep.mubr.bf16.mxu0 %v11542_v27  ;;  %v16386_v50 = vpop.f32.mrb[184].mxu0  ;;  %v6743_v4 = vsel %vm15171_vm13, %v6738_v53, %v6742_v56  ;;  %v7438_v27 = vld [vmem:[#allocation2 + $0x108] sm:$0xe]  ;;  %v6772_v52 = vshll.u32 %v6399_v10, 16  ;;  %v6761_v23 = vor.u32 %v6760_v8, %v16390_v45  ;;  %v7699_v28 = vrot.slane %v7697_v2, 4 }
 0x4ce   :  { %18401 = vst [vmem:[#allocation23_spill] sm:$0xff] %v16386_v50  ;;  %9803 = vmatprep.mubr.bf16.mxu1 %v11474_v15  ;;  %v9100_v17 = vpop.f32.mrb[185].mxu0  ;;  %v6771_v1 = vrot.slane %v6769_v40, 4  ;;  %v6778_v30 = vshll.u32 %v6400_v7, 16  ;;  %v6764_v62 = vshll.u32 %v6398_v22, 16  ;;  %v11513_v0 = vrot.slane %v7435_v61, 9 }
 0x4cf   :  { %v16398_v21 = vpop.f32.mrb[186].mxu0  ;;  %v6774_v18 = vrot.slane %v6772_v52, 5  ;;  %v6782_v15 = vshrl.u32 %v6400_v7, 16  ;;  %v6752_v53 = vrot.slane %v6751_v51, 4  ;;  %v7700_v34 = vrot.slane %v7437_v6, 5 }
 0x4d0   :  { %18402 = vst [vmem:[#allocation38_spill] sm:$0xff] %v16398_v21  ;;  %v9103_v60 = vpop.f32.mrb[187].mxu0  ;;  %v11514_v17 = vrot.slane %v7438_v27, 9  ;;  %v16407_v47 = vrot.slane %v6778_v30, 5  ;;  %v11475_v10 = vcombine.low %v6733_v38, %v6743_v4  ;;  %v7706_v8 = vrot.slane %v7704_v48, 4 }
 0x4d1   :  { %v6775_v56 = vor.u32 %v6774_v18, %v6771_v1  ;;  %v6784_v16 = vrot.slane %v6782_v15, 4  ;;  %v6402_v40 = vld [vmem:[#allocation2 + $0xc0] sm:$0xf]  ;;  %v6762_v22 = vrot.slane %v6761_v23, 4  ;;  %v7701_v7 = vsel %vm15165_vm12, %v7699_v28, %v7700_v34  ;;  %v6401_v61 = vld [vmem:[#allocation2 + $0xbc] sm:$0x1] }
 0x4d2   :  { %v7711_v51 = vrot.slane %v16403_v33, 5  ;;  %v18001_v6 = vrot.slane %v16405_v36, 5  ;;  %v6766_v60 = vrot.slane %v6764_v62, 5  ;;  %v7698_v38 = vsel %vm15165_vm12, %v11513_v0, %v7697_v2  ;;  %v7441_v27 = vld [vmem:[#allocation2 + $0x114] sm:$0xe] }
 0x4d3   :  { %v6785_v4 = vor.u32 %v6784_v16, %v16407_v47  ;;  %v7443_v52 = vld [vmem:[#allocation2 + $0x11c] sm:$0x1]  ;;  %v6757_v23 = vsel %vm15171_vm13, %v6752_v53, %v16390_v45  ;;  %v7705_v28 = vsel %vm15165_vm12, %v11514_v17, %v7704_v48  ;;  %v7444_v1 = vld [vmem:[#allocation2 + $0x120] sm:$0xe]  ;;  %v6793_v30 = vshrl.u32 %v6402_v40, 16 }
 0x4d4   :  { %12220 = vmatmul.mubr.bf16.gmra.mrb[220].mxu0 %v11543_v63  ;;  %v7707_v63 = vrot.slane %v7440_v25, 5  ;;  %v6796_v33 = vshll.u32 %v6402_v40, 16  ;;  %v11545_v2 = vcombine.low %v7698_v38, %v7701_v7  ;;  %v6776_v18 = vrot.slane %v6775_v56, 4  ;;  %v7446_v34 = vld [vmem:[#allocation2 + $0x128] sm:$0x1]  ;;  %v12795_v56 = vld [vmem:[#allocation2 + $0x9c] sm:$0xff]  }
 0x4d5   :  { %9804 = vmatmul.mubr.bf16.gmra.mrb[96].mxu1 %v12794_v42  ;;  %12223 = vmatprep.mubr.bf16.mxu0 %v11544_v3  ;;  %v6403_v3 = vld [vmem:[#allocation2 + $0xc4] sm:$0xf]  ;;  %v6788_v15 = vshll.u32 %v6401_v61, 16  ;;  %v6767_v25 = vsel %vm15171_vm13, %v6762_v22, %v6766_v60  ;;  %v7713_v45 = vrot.slane %v7711_v51, 4  ;;  %v7720_v48 = vrot.slane %v18001_v6, 4 }
 0x4d6   :  { %9811 = vmatprep.mubr.bf16.mxu1 %v11475_v10  ;;  %v7708_v0 = vsel %vm15165_vm12, %v7706_v8, %v7707_v63  ;;  %v6802_v53 = vshll.u32 %v6403_v3, 16  ;;  %v16431_v17 = vld [vmem:[#allocation2 + $0x130] sm:$0xf]  ;;  %v6786_v40 = vrot.slane %v6785_v4, 4  ;;  %v6795_v7 = vrot.slane %v6793_v30, 4 }
 0x4d7   :  { %v16416_v42 = vpop.f32.mrb[188].mxu0  ;;  %v6798_v38 = vrot.slane %v6796_v33, 5  ;;  %v6806_v8 = vshrl.u32 %v6403_v3, 16  ;;  %v11546_v61 = vcombine.low %v7705_v28, %v7708_v0  ;;  %v11515_v63 = vrot.slane %v7441_v27, 9  ;;  %v16433_v22 = vld [vmem:[#allocation2 + $0x13c] sm:$0xf] }
 0x4d8   :  { %18403 = vst [vmem:[#allocation8_spill] sm:$0xff] %v16416_v42  ;;  %v9108_v62 = vpop.f32.mrb[189].mxu0  ;;  %v7721_v42 = vrot.slane %v7446_v34, 5  ;;  %v11476_v60 = vcombine.low %v6757_v23, %v6767_v25  ;;  %v6781_v6 = vsel %vm15171_vm13, %v6776_v18, %v16407_v47  ;;  %v11516_v21 = vrot.slane %v7444_v1, 9  ;;  %v7447_v23 = vld [vmem:[#allocation2 + $0x12c] sm:$0xe] }
 0x4d9   :  { %v16427_v10 = vpop.f32.mrb[190].mxu0  ;;  %v7714_v62 = vrot.slane %v7443_v52, 5  ;;  %v16442_v52 = vrot.slane %v6802_v53, 5  ;;  %v6808_v3 = vrot.slane %v6806_v8, 4  ;;  %v6799_v47 = vor.u32 %v6798_v38, %v6795_v7  ;;  %v7449_v30 = vld [vmem:[#allocation2 + $0x134] sm:$0x1] }
 0x4da   :  { %18404 = vst [vmem:[#allocation27_spill] sm:$0xff] %v16427_v10  ;;  %v9111_v16 = vpop.f32.mrb[191].mxu0  ;;  %v6790_v10 = vrot.slane %v6788_v15, 5  ;;  %v7722_v27 = vsel %vm15165_vm12, %v7720_v48, %v7721_v42  ;;  %v7725_v1 = vrot.slane %v16431_v17, 5  ;;  %v7732_v33 = vrot.slane %v16433_v22, 5 }
 0x4db   :  { %v6404_v16 = vld [vmem:[#allocation2 + $0xc8] sm:$0x1]  ;;  %v7715_v4 = vsel %vm15165_vm12, %v7713_v45, %v7714_v62  ;;  %v7712_v0 = vsel %vm15165_vm12, %v11515_v63, %v7711_v51  ;;  %v7450_v18 = vld [vmem:[#allocation2 + $0x138] sm:$0xe]  ;;  %v7452_v15 = vld [vmem:[#allocation2 + $0x140] sm:$0x1]  ;;  %v6809_v51 = vor.u32 %v6808_v3, %v16442_v52 }
 0x4dc   :  { %12224 = vmatmul.mubr.bf16.gmra.mrb[224].mxu0 %v11545_v2  ;;  %v6791_v28 = vsel %vm15171_vm13, %v6786_v40, %v6790_v10  ;;  %v6812_v42 = vshll.u32 %v6404_v16, 16  ;;  %v11547_v25 = vcombine.low %v7712_v0, %v7715_v4  ;;  %v18405_v45 = vrot.slane %v16405_v36, 5  ;;  %v16456_v53 = vld [vmem:[#allocation2 + $0x144] sm:$0xe]  ;;  %v6405_v17 = vld [vmem:[#allocation2 + $0xcc] sm:$0xf] }
 0x4dd   :  { %9812 = vmatmul.mubr.bf16.gmra.mrb[100].mxu1 %v12795_v56  ;;  %12227 = vmatprep.mubr.bf16.mxu0 %v11546_v61  ;;  %v11517_v48 = vrot.slane %v7447_v23, 9  ;;  %v11477_v40 = vcombine.low %v6781_v6, %v6791_v28  ;;  %v7728_v8 = vrot.slane %v7449_v30, 5  ;;  %v16461_v56 = vld [vmem:[#allocation2 + $0x148] sm:$0xf]  ;;  %v6406_v61 = vld [vmem:[#allocation2 + $0xd0] sm:$0xf] }
 0x4de   :  { %9819 = vmatprep.mubr.bf16.mxu1 %v11476_v60  ;;  %v7719_v10 = vsel %vm15165_vm12, %v11516_v21, %v18405_v45  ;;  %v12796_v63 = vld [vmem:[#allocation2 + $0xa8] sm:$0xff]   ;;  %v6800_v36 = vrot.slane %v6799_v47, 4  ;;  %v7727_v22 = vrot.slane %v7725_v1, 4  ;;  %v11518_v60 = vrot.slane %v7450_v18, 9  ;;  %v6407_v23 = vld [vmem:[#allocation2 + $0xd4] sm:$0x1] }
 0x4df   :  { %v16448_v2 = vpop.f32.mrb[64].mxu0  ;;  %v11548_v38 = vcombine.low %v7719_v10, %v7722_v27  ;;  %v7734_v21 = vrot.slane %v7732_v33, 4  ;;  %v6814_v16 = vrot.slane %v6812_v42, 5  ;;  %v7735_v4 = vrot.slane %v7452_v15, 5  ;;  %v16467_v18 = vld [vmem:[#allocation2 + $0x154] sm:$0xf] }
 0x4e0   :  { %v9149_v34 = vpop.f32.mrb[65].mxu0  ;;  %v6817_v0 = vshrl.u32 %v6405_v17, 16  ;;  %v6820_v6 = vshll.u32 %v6405_v17, 16  ;;  %v7726_v27 = vsel %vm15165_vm12, %v11517_v48, %v7725_v1  ;;  %v11519_v3 = vrot.slane %v16456_v53, 9  ;;  %v6409_v53 = vld [vmem:[#allocation2 + $0xf4] sm:$0xf] }
 0x4e1   :  { %v16458_v7 = vpop.f32.mrb[66].mxu0  ;;  %v7739_v28 = vrot.slane %v16461_v56, 5  ;;  %v6826_v30 = vshll.u32 %v6406_v61, 16  ;;  %v6408_v34 = vld [vmem:[#allocation2 + $0xf0] sm:$0xf]  ;;  %v6810_v47 = vrot.slane %v6809_v51, 4  ;;  %v7736_v1 = vsel %vm15165_vm12, %v7734_v21, %v7735_v4 }
 0x4e2   :  { %v9152_v62 = vpop.f32.mrb[67].mxu0  ;;  %v6819_v42 = vrot.slane %v6817_v0, 4  ;;  %v6822_v15 = vrot.slane %v6820_v6, 5  ;;  %v6830_v45 = vshrl.u32 %v6406_v61, 16  ;;  %v6836_v48 = vshll.u32 %v6407_v23, 16 }
 0x4e3   :  { %v16473_v10 = vrot.slane %v6826_v30, 5  ;;  %v6844_v62 = vshll.u32 %v6408_v34, 16  ;;  %v7741_v61 = vrot.slane %v7739_v28, 4  ;;  %v7746_v21 = vrot.slane %v16467_v18, 5  ;;  %v7458_v6 = vld [vmem:[#allocation2 + $0x158] sm:$0x1] }
 0x4e4   :  { %12228 = vmatmul.mubr.bf16.gmra.mrb[228].mxu0 %v11547_v25  ;;  %v7729_v25 = vsel %vm15165_vm12, %v7727_v22, %v7728_v8  ;;  %v6823_v51 = vor.u32 %v6822_v15, %v6819_v42  ;;  %v6832_v56 = vrot.slane %v6830_v45, 4  ;;  %v7733_v8 = vsel %vm15165_vm12, %v11518_v60, %v7732_v33  ;;  %v7456_v22 = vld [vmem:[#allocation2 + $0x150] sm:$0xe]  ;;  %v12797_v15 = vld [vmem:[#allocation2 + $0xb4] sm:$0xff]   ;;  %v16488_v60 = vld [vmem:[#allocation2 + $0x160] sm:$0xf] }
 0x4e5   :  { %9820 = vmatmul.mubr.bf16.gmra.mrb[104].mxu1 %v12796_v63  ;;  %12231 = vmatprep.mubr.bf16.mxu0 %v11548_v38  ;;  %v7455_v38 = vld [vmem:[#allocation2 + $0x14c] sm:$0x1]  ;;  %v6841_v63 = vshrl.u32 %v6408_v34, 16  ;;  %v6815_v4 = vsel %vm15171_vm13, %v6810_v47, %v6814_v16  ;;  %v6850_v34 = vshll.u32 %v6409_v53, 16  ;;  %v6854_v42 = vshrl.u32 %v6409_v53, 16 }
 0x4e6   :  { %9827 = vmatprep.mubr.bf16.mxu1 %v11477_v40  ;;  %v6805_v40 = vsel %vm15171_vm13, %v6800_v36, %v16442_v52  ;;  %v6833_v30 = vor.u32 %v6832_v56, %v16473_v10  ;;  %v11549_v52 = vcombine.low %v7726_v27, %v7729_v25  ;;  %v11550_v36 = vcombine.low %v7733_v8, %v7736_v1  ;;  %v16490_v16 = vld [vmem:[#allocation2 + $0x16c] sm:$0xf]  ;;  %v7477_v59 = vld [vmem:[#allocation2 + $0x1a4] sm:$0xe] }
 0x4e7   :  { %v16475_v17 = vpop.f32.mrb[68].mxu0  ;;  %v6838_v33 = vrot.slane %v6836_v48, 5  ;;  %v6824_v50 = vrot.slane %v6823_v51, 4  ;;  %v6843_v32 = vrot.slane %v6841_v63, 4  ;;  %v6846_v41 = vrot.slane %v6844_v62, 5 }
 0x4e8   :  { %v9157_v0 = vpop.f32.mrb[69].mxu0  ;;  %v6834_v18 = vrot.slane %v6833_v30, 4  ;;  %v11478_v47 = vcombine.low %v6805_v40, %v6815_v4  ;;  %v11520_v53 = vrot.slane %v7456_v22, 9  ;;  %v7748_v58 = vrot.slane %v7746_v21, 4  ;;  %v6411_v48 = vld [vmem:[#allocation2 + $0xfc] sm:$0xf] }
 0x4e9   :  { %v16485_v23 = vpop.f32.mrb[70].mxu0  ;;  %v7742_v0 = vrot.slane %v7455_v38, 5  ;;  %v16494_v27 = vrot.slane %v6850_v34, 5  ;;  %v6856_v25 = vrot.slane %v6854_v42, 4  ;;  %v7753_v1 = vrot.slane %v16488_v60, 5 }
 0x4ea   :  { %v9160_v45 = vpop.f32.mrb[71].mxu0  ;;  %v7740_v38 = vsel %vm15165_vm12, %v11519_v3, %v7739_v28  ;;  %v7749_v51 = vrot.slane %v7458_v6, 5  ;;  %v6410_v63 = vld [vmem:[#allocation2 + $0xf8] sm:$0x1]  ;;  %v7760_v62 = vrot.slane %v16490_v16, 5  ;;  %v6829_v22 = vsel %vm15171_vm13, %v6824_v50, %v16473_v10 }
 0x4eb   :  { %v7743_v56 = vsel %vm15165_vm12, %v7741_v61, %v7742_v0  ;;  %v6412_v40 = vld [vmem:[#allocation2 + $0x100] sm:$0xf]  ;;  %v6839_v4 = vsel %vm15171_vm13, %v6834_v18, %v6838_v33  ;;  %v6847_v30 = vor.u32 %v6846_v41, %v6843_v32  ;;  %v7459_v34 = vld [vmem:[#allocation2 + $0x15c] sm:$0xe]  ;;  %v7461_v42 = vld [vmem:[#allocation2 + $0x164] sm:$0x1]  ;;  %v7747_v3 = vsel %vm15165_vm12, %v11520_v53, %v7746_v21 }
 0x4ec   :  { %12232 = vmatmul.mubr.bf16.gmra.mrb[232].mxu0 %v11549_v52  ;;  %v11551_v61 = vcombine.low %v7740_v38, %v7743_v56  ;;  %v7750_v28 = vsel %vm15165_vm12, %v7748_v58, %v7749_v51  ;;  %v7462_v6 = vld [vmem:[#allocation2 + $0x168] sm:$0xe]  ;;  %v6865_v45 = vshrl.u32 %v6411_v48, 16  ;;  %v6868_v52 = vshll.u32 %v6411_v48, 16  ;;  %v7464_v0 = vld [vmem:[#allocation2 + $0x170] sm:$0x1] }
 0x4ed   :  { %9828 = vmatmul.mubr.bf16.gmra.mrb[108].mxu1 %v12797_v15  ;;  %12235 = vmatprep.mubr.bf16.mxu0 %v11550_v36  ;;  %v6857_v50 = vor.u32 %v6856_v25, %v16494_v27  ;;  %v7755_v10 = vrot.slane %v7753_v1, 4  ;;  %v6874_v33 = vshll.u32 %v6412_v40, 16  ;;  %v6878_v41 = vshrl.u32 %v6412_v40, 16  ;;  %v12798_v32 = vld [vmem:[#allocation2 + $0xc0] sm:$0xff]   ;;  %v16514_v38 = vld [vmem:[#allocation2 + $0x178] sm:$0xf] }
 0x4ee   :  { %9835 = vmatprep.mubr.bf16.mxu1 %v11478_v47  ;;  %v11479_v18 = vcombine.low %v6829_v22, %v6839_v4  ;;  %v6860_v16 = vshll.u32 %v6410_v63, 16  ;;  %v11521_v47 = vrot.slane %v7459_v34, 9  ;;  %v7762_v21 = vrot.slane %v7760_v62, 4  ;;  %v16516_v48 = vld [vmem:[#allocation2 + $0x184] sm:$0xf] }
 0x4ef   :  { %v16500_v8 = vpop.f32.mrb[72].mxu0  ;;  %v11552_v56 = vcombine.low %v7747_v3, %v7750_v28  ;;  %v6848_v53 = vrot.slane %v6847_v30, 4  ;;  %v7756_v58 = vrot.slane %v7461_v42, 5  ;;  %v11522_v51 = vrot.slane %v7462_v6, 9  ;;  %v6414_v40 = vld [vmem:[#allocation2 + $0x108] sm:$0xf] }
 0x4f0   :  { %v9165_v15 = vpop.f32.mrb[73].mxu0  ;;  %v7763_v25 = vrot.slane %v7464_v0, 5  ;;  %v6867_v55 = vrot.slane %v6865_v45, 4  ;;  %v6870_v11 = vrot.slane %v6868_v52, 5  ;;  %v6858_v22 = vrot.slane %v6857_v50, 4 }
 0x4f1   :  { %v16511_v36 = vpop.f32.mrb[74].mxu0  ;;  %v6413_v15 = vld [vmem:[#allocation2 + $0x104] sm:$0x1]  ;;  %v7757_v63 = vsel %vm15165_vm12, %v7755_v10, %v7756_v58  ;;  %v16520_v4 = vrot.slane %v6874_v33, 5  ;;  %v6880_v30 = vrot.slane %v6878_v41, 4  ;;  %v6862_v42 = vrot.slane %v6860_v16, 5 }
 0x4f2   :  { %v9168_v60 = vpop.f32.mrb[75].mxu0  ;;  %v7465_v34 = vld [vmem:[#allocation2 + $0x174] sm:$0xe]  ;;  %v7764_v3 = vsel %vm15165_vm12, %v7762_v21, %v7763_v25  ;;  %v7468_v28 = vld [vmem:[#allocation2 + $0x180] sm:$0xe]  ;;  %v7767_v52 = vrot.slane %v16514_v38, 5  ;;  %v6853_v41 = vsel %vm15171_vm13, %v6848_v53, %v16494_v27 }
 0x4f3   :  { %v6415_v6 = vld [vmem:[#allocation2 + $0x10c] sm:$0xf]  ;;  %v7774_v50 = vrot.slane %v16516_v48, 5  ;;  %v6889_v10 = vshrl.u32 %v6414_v40, 16  ;;  %v6892_v0 = vshll.u32 %v6414_v40, 16  ;;  %v6871_v60 = vor.u32 %v6870_v11, %v6867_v55 }
 0x4f4   :  { %12236 = vmatmul.mubr.bf16.gmra.mrb[236].mxu0 %v11551_v61  ;;  %v7754_v61 = vsel %vm15165_vm12, %v11521_v47, %v7753_v1  ;;  %v7761_v1 = vsel %vm15165_vm12, %v11522_v51, %v7760_v62  ;;  %v6863_v16 = vsel %vm15171_vm13, %v6858_v22, %v6862_v42  ;;  %v6881_v21 = vor.u32 %v6880_v30, %v16520_v4  ;;  %v7467_v58 = vld [vmem:[#allocation2 + $0x17c] sm:$0x1]  ;;  %v7470_v27 = vld [vmem:[#allocation2 + $0x188] sm:$0x1]  ;;  %v6447_v20 = vld [vmem:[#allocation2 + $0x18c] sm:$0xf] }
 0x4f5   :  { %9836 = vmatmul.mubr.bf16.gmra.mrb[112].mxu1 %v12798_v32  ;;  %12239 = vmatprep.mubr.bf16.mxu0 %v11552_v56  ;;  %v11553_v32 = vcombine.low %v7754_v61, %v7757_v63  ;;  %v6884_v56 = vshll.u32 %v6413_v15, 16  ;;  %v6898_v38 = vshll.u32 %v6415_v6, 16  ;;  %v11554_v25 = vcombine.low %v7761_v1, %v7764_v3  ;;  %v16542_v30 = vld [vmem:[#allocation2 + $0x19c] sm:$0xf] }
 0x4f6   :  { %9843 = vmatprep.mubr.bf16.mxu1 %v11479_v18  ;;  %v12799_v18 = vld [vmem:[#allocation2 + $0xcc] sm:$0xff]   ;;  %v11523_v40 = vrot.slane %v7465_v34, 9  ;;  %v11524_v53 = vrot.slane %v7468_v28, 9  ;;  %v6902_v63 = vshrl.u32 %v6415_v6, 16  ;;  %v7769_v61 = vrot.slane %v7767_v52, 4 }
 0x4f7   :  { %v16526_v45 = vpop.f32.mrb[76].mxu0  ;;  %v7776_v62 = vrot.slane %v7774_v50, 4  ;;  %v6891_v11 = vrot.slane %v6889_v10, 4  ;;  %v6894_v55 = vrot.slane %v6892_v0, 5  ;;  %v11480_v51 = vcombine.low %v6853_v41, %v6863_v16  ;;  %v6417_v6 = vld [vmem:[#allocation2 + $0x114] sm:$0xf] }
 0x4f8   :  { %v9173_v33 = vpop.f32.mrb[77].mxu0  ;;  %v6872_v22 = vrot.slane %v6871_v60, 4  ;;  %v7770_v42 = vrot.slane %v7467_v58, 5  ;;  %v6882_v15 = vrot.slane %v6881_v21, 4  ;;  %v7777_v3 = vrot.slane %v7470_v27, 5 }
 0x4f9   :  { %v16537_v47 = vpop.f32.mrb[78].mxu0  ;;  %v16540_v33 = vld [vmem:[#allocation2 + $0x190] sm:$0xf]  ;;  %v16544_v34 = vrot.slane %v6898_v38, 5  ;;  %v6904_v28 = vrot.slane %v6902_v63, 4  ;;  %v6886_v1 = vrot.slane %v6884_v56, 5  ;;  %v7768_v10 = vsel %vm15165_vm12, %v11523_v40, %v7767_v52 }
 0x4fa   :  { %v9176_v48 = vpop.f32.mrb[79].mxu0  ;;  %v7775_v0 = vsel %vm15165_vm12, %v11524_v53, %v7774_v50  ;;  %v6418_v41 = vld [vmem:[#allocation2 + $0x118] sm:$0xf]  ;;  %v7771_v60 = vsel %vm15165_vm12, %v7769_v61, %v7770_v42  ;;  %v6416_v16 = vld [vmem:[#allocation2 + $0x110] sm:$0x1]  ;;  %v6895_v21 = vor.u32 %v6894_v55, %v6891_v11  ;;  %v7781_v58 = vrot.slane %v16540_v33, 5 }
 0x4fb   :  { %v6877_v52 = vsel %vm15171_vm13, %v6872_v22, %v16520_v4  ;;  %v7471_v38 = vld [vmem:[#allocation2 + $0x18c] sm:$0xe]  ;;  %v7788_v50 = vrot.slane %v16542_v30, 5  ;;  %v6913_v48 = vshrl.u32 %v6417_v6, 16  ;;  %v6887_v40 = vsel %vm15171_vm13, %v6882_v15, %v6886_v1  ;;  %v7473_v42 = vld [vmem:[#allocation2 + $0x194] sm:$0x1] }
 0x4fc   :  { %12240 = vmatmul.mubr.bf16.gmra.mrb[240].mxu0 %v11553_v32  ;;  %v6905_v53 = vor.u32 %v6904_v28, %v16544_v34  ;;  %v6922_v63 = vshll.u32 %v6418_v41, 16  ;;  %v6926_v61 = vshrl.u32 %v6418_v41, 16  ;;  %v11555_v55 = vcombine.low %v7768_v10, %v7771_v60  ;;  %v7474_v4 = vld [vmem:[#allocation2 + $0x198] sm:$0xe]  ;;  %v6420_v10 = vld [vmem:[#allocation2 + $0x120] sm:$0xf] }
 0x4fd   :  { %9844 = vmatmul.mubr.bf16.gmra.mrb[116].mxu1 %v12799_v18  ;;  %12243 = vmatprep.mubr.bf16.mxu0 %v11554_v25  ;;  %v7778_v18 = vsel %vm15165_vm12, %v7776_v62, %v7777_v3  ;;  %v6916_v25 = vshll.u32 %v6417_v6, 16  ;;  %v12800_v62 = vld [vmem:[#allocation2 + $0xf0] sm:$0xff]   ;;  %v6896_v22 = vrot.slane %v6895_v21, 4  ;;  %v6908_v33 = vshll.u32 %v6416_v16, 16  ;;  %v7476_v6 = vld [vmem:[#allocation2 + $0x1a0] sm:$0x1] }
 0x4fe   :  { %9851 = vmatprep.mubr.bf16.mxu1 %v11480_v51  ;;  %v11556_v51 = vcombine.low %v7775_v0, %v7778_v18  ;;  %v11525_v30 = vrot.slane %v7471_v38, 9  ;;  %v7783_v3 = vrot.slane %v7781_v58, 4  ;;  %v7790_v15 = vrot.slane %v7788_v50, 4  ;;  %v6421_v18 = vld [vmem:[#allocation2 + $0x124] sm:$0xf] }
 0x4ff   :  { %v16550_v32 = vpop.f32.mrb[80].mxu0  ;;  %v6915_v1 = vrot.slane %v6913_v48, 4  ;;  %v6918_v37 = vrot.slane %v6916_v25, 5  ;;  %v6906_v28 = vrot.slane %v6905_v53, 4  ;;  %v7784_v41 = vrot.slane %v7473_v42, 5 }
 0x500   :  { %v9181_v56 = vpop.f32.mrb[81].mxu0  ;;  %v6924_v31 = vrot.slane %v6922_v63, 5  ;;  %v11526_v0 = vrot.slane %v7474_v4, 9  ;;  %v7791_v60 = vrot.slane %v7476_v6, 5  ;;  %v6901_v21 = vsel %vm15171_vm13, %v6896_v22, %v16544_v34  ;;  %v6419_v53 = vld [vmem:[#allocation2 + $0x11c] sm:$0x1] }
 0x501   :  { %v16563_v27 = vpop.f32.mrb[82].mxu0  ;;  %v11481_v56 = vcombine.low %v6877_v52, %v6887_v40  ;;  %v6910_v52 = vrot.slane %v6908_v33, 5  ;;  %v7782_v38 = vsel %vm15165_vm12, %v11525_v30, %v7781_v58  ;;  %v7785_v48 = vsel %vm15165_vm12, %v7783_v3, %v7784_v41  ;;  %v12801_v30 = vld [vmem:[#allocation2 + $0xfc] sm:$0xff]  }
 0x502   :  { %v9184_v11 = vpop.f32.mrb[83].mxu0  ;;  %v7792_v40 = vsel %vm15165_vm12, %v7790_v15, %v7791_v60  ;;  %v6919_v63 = vor.u32 %v6918_v37, %v6915_v1  ;;  %v6946_v42 = vshll.u32 %v6421_v18, 16  ;;  %v6950_v4 = vshrl.u32 %v6421_v18, 16  ;;  %v6424_v60 = vld [vmem:[#allocation2 + $0x130] sm:$0xf] }
 0x503   :  { %v6928_v11 = vrot.slane %v6926_v61, 4  ;;  %v6937_v61 = vshrl.u32 %v6420_v10, 16  ;;  %v11557_v22 = vcombine.low %v7782_v38, %v7785_v48  ;;  %v7789_v33 = vsel %vm15165_vm12, %v11526_v0, %v7788_v50 }
 0x504   :  { %12244 = vmatmul.mubr.bf16.gmra.mrb[244].mxu0 %v11555_v55  ;;  %v6911_v55 = vsel %vm15171_vm13, %v6906_v28, %v6910_v52  ;;  %v11558_v3 = vcombine.low %v7789_v33, %v7792_v40  ;;  %v6932_v6 = vshll.u32 %v6419_v53, 16  ;;  %v6920_v37 = vrot.slane %v6919_v63, 4 }
 0x505   :  { %9852 = vmatmul.mubr.bf16.gmra.mrb[120].mxu1 %v12800_v62  ;;  %12247 = vmatprep.mubr.bf16.mxu0 %v11556_v51  ;;  %v6940_v62 = vshll.u32 %v6420_v10, 16  ;;  %v6929_v34 = vor.u32 %v6928_v11, %v6924_v31  ;;  %v6939_v15 = vrot.slane %v6937_v61, 4  ;;  %v6948_v41 = vrot.slane %v6946_v42, 5  ;;  %v6423_v10 = vld [vmem:[#allocation2 + $0x12c] sm:$0xf] }
 0x506   :  { %9859 = vmatprep.mubr.bf16.mxu1 %v11481_v56  ;;  %v11482_v56 = vcombine.low %v6901_v21, %v6911_v55  ;;  %v6952_v11 = vrot.slane %v6950_v4, 4  ;;  %v6934_v52 = vrot.slane %v6932_v6, 5  ;;  %v6925_v0 = vsel %vm15171_vm13, %v6920_v37, %v6924_v31  ;;  %v6422_v21 = vld [vmem:[#allocation2 + $0x128] sm:$0x1]  ;;  %v6426_v6 = vld [vmem:[#allocation2 + $0x138] sm:$0xf] }
 0x507   :  { %v16566_v16 = vpop.f32.mrb[84].mxu0  ;;  %v6942_v1 = vrot.slane %v6940_v62, 5  ;;  %v6930_v28 = vrot.slane %v6929_v34, 4  ;;  %v6961_v48 = vshrl.u32 %v6423_v10, 16  ;;  %v6970_v61 = vshll.u32 %v6424_v60, 16  ;;  %v12802_v34 = vld [vmem:[#allocation2 + $0x108] sm:$0xff]  }
 0x508   :  { %v9189_v25 = vpop.f32.mrb[85].mxu0  ;;  %v6953_v63 = vor.u32 %v6952_v11, %v6948_v41  ;;  %v6974_v62 = vshrl.u32 %v6424_v60, 16  ;;  %v6956_v42 = vshll.u32 %v6422_v21, 16  ;;  %v6425_v11 = vld [vmem:[#allocation2 + $0x134] sm:$0x1]  ;;  %v6985_v60 = vshrl.u32 %v6426_v6, 16 }
 0x509   :  { %v16579_v51 = vpop.f32.mrb[86].mxu0  ;;  %v6943_v38 = vor.u32 %v6942_v1, %v6939_v15  ;;  %v6964_v25 = vshll.u32 %v6423_v10, 16  ;;  %v6935_v40 = vsel %vm15171_vm13, %v6930_v28, %v6934_v52  ;;  %v6988_v52 = vshll.u32 %v6426_v6, 16 }
 0x50a   :  { %v9192_v58 = vpop.f32.mrb[87].mxu0  ;;  %v11483_v4 = vcombine.low %v6925_v0, %v6935_v40  ;;  %v6954_v31 = vrot.slane %v6953_v63, 4  ;;  %v6958_v15 = vrot.slane %v6956_v42, 5  ;;  %v12803_v40 = vld [vmem:[#allocation2 + $0x114] sm:$0xff]   ;;  %v6980_v63 = vshll.u32 %v6425_v11, 16 }
 0x50b   :  { %v6944_v58 = vrot.slane %v6943_v38, 4  ;;  %v6966_v33 = vrot.slane %v6964_v25, 5  ;;  %v11527_v57 = vrot.slane %v7477_v59, 9 }
 0x50c   :  { %12248 = vmatmul.mubr.bf16.gmra.mrb[248].mxu0 %v11557_v22  ;;  %v6963_v22 = vrot.slane %v6961_v48, 4 }
 0x50d   :  { %9860 = vmatmul.mubr.bf16.gmra.mrb[124].mxu1 %v12801_v30  ;;  %12251 = vmatprep.mubr.bf16.mxu0 %v11558_v3  ;;  %v6972_v30 = vrot.slane %v6970_v61, 5  ;;  %v6976_v3 = vrot.slane %v6974_v62, 4  ;;  %v6949_v28 = vsel %vm15171_vm13, %v6944_v58, %v6948_v41  ;;  %v6429_v41 = vld [vmem:[#allocation2 + $0x144] sm:$0xf] }
 0x50e   :  { %9867 = vmatprep.mubr.bf16.mxu1 %v11482_v56  ;;  %v6427_v56 = vld [vmem:[#allocation2 + $0x13c] sm:$0xf]  ;;  %v6967_v10 = vor.u32 %v6966_v33, %v6963_v22  ;;  %v6430_v22 = vld [vmem:[#allocation2 + $0x148] sm:$0xf]  ;;  %v7012_v6 = vshll.u32 %v6429_v41, 16 }
 0x50f   :  { %v16583_v18 = vpop.f32.mrb[88].mxu0  ;;  %v6977_v21 = vor.u32 %v6976_v3, %v6972_v30  ;;  %v6994_v38 = vshll.u32 %v6427_v56, 16  ;;  %v6998_v48 = vshrl.u32 %v6427_v56, 16  ;;  %v7009_v3 = vshrl.u32 %v6429_v41, 16  ;;  %v6432_v41 = vld [vmem:[#allocation2 + $0x150] sm:$0xf] }
 0x510   :  { %v9197_v50 = vpop.f32.mrb[89].mxu0  ;;  %v6968_v62 = vrot.slane %v6967_v10, 4 }
 0x511   :  { %v16589_v53 = vpop.f32.mrb[90].mxu0  ;;  %v6959_v50 = vsel %vm15171_vm13, %v6954_v31, %v6958_v15  ;;  %v6978_v42 = vrot.slane %v6977_v21, 4  ;;  %v7000_v58 = vrot.slane %v6998_v48, 4  ;;  %v6982_v31 = vrot.slane %v6980_v63, 5 }
 0x512   :  { %v9200_v55 = vpop.f32.mrb[91].mxu0  ;;  %v11484_v61 = vcombine.low %v6949_v28, %v6959_v50  ;;  %v6973_v15 = vsel %vm15171_vm13, %v6968_v62, %v6972_v30  ;;  %v7022_v50 = vshrl.u32 %v6430_v22, 16 }
 0x513   :  { %v6987_v55 = vrot.slane %v6985_v60, 4  ;;  %v6983_v11 = vsel %vm15171_vm13, %v6978_v42, %v6982_v31 }
 0x514   :  { %v11485_v63 = vcombine.low %v6973_v15, %v6983_v11 }
 0x515   :  { %9868 = vmatmul.mubr.bf16.gmra.mrb[0].mxu1 %v12802_v34  ;;  %v6990_v34 = vrot.slane %v6988_v52, 5  ;;  %v7018_v52 = vshll.u32 %v6430_v22, 16  ;;  %v7036_v22 = vshll.u32 %v6432_v41, 16 }
 0x516   :  { %9875 = vmatprep.mubr.bf16.mxu1 %v11483_v4  ;;  %v6996_v4 = vrot.slane %v6994_v38, 5  ;;  %v12804_v38 = vld [vmem:[#allocation2 + $0x120] sm:$0xff]  }
 0x517   :  { %v16591_v37 = vpop.f32.mrb[92].mxu0  ;;  %v6991_v28 = vor.u32 %v6990_v34, %v6987_v55  ;;  %v7020_v62 = vrot.slane %v7018_v52, 5  ;;  %v7024_v55 = vrot.slane %v7022_v50, 4  ;;  %v6433_v34 = vld [vmem:[#allocation2 + $0x154] sm:$0xf]  ;;  %v12805_v50 = vld [vmem:[#allocation2 + $0x12c] sm:$0xff]  }
 0x518   :  { %v9205_v1 = vpop.f32.mrb[93].mxu0  ;;  %v7001_v60 = vor.u32 %v7000_v58, %v6996_v4  ;;  %v7042_v11 = vshll.u32 %v6433_v34, 16 }
 0x519   :  { %v16597_v0 = vpop.f32.mrb[94].mxu0  ;;  %v6428_v1 = vld [vmem:[#allocation2 + $0x140] sm:$0x1] }
 0x51a   :  { %v9208_v25 = vpop.f32.mrb[95].mxu0  ;;  %v7004_v48 = vshll.u32 %v6428_v1, 16  ;;  %v7002_v30 = vrot.slane %v7001_v60, 4  ;;  %v7046_v60 = vshrl.u32 %v6433_v34, 16 }
 0x51b   :  { %v7011_v25 = vrot.slane %v7009_v3, 4 }
 0x51c   :  { %v7006_v31 = vrot.slane %v7004_v48, 5  ;;  %v7048_v26 = vrot.slane %v7046_v60, 4 }
 0x51d   :  { %9876 = vmatmul.mubr.bf16.gmra.mrb[4].mxu1 %v12803_v40  ;;  %v7014_v40 = vrot.slane %v7012_v6, 5  ;;  %v6431_v6 = vld [vmem:[#allocation2 + $0x14c] sm:$0x1] }
 0x51e   :  { %9883 = vmatprep.mubr.bf16.mxu1 %v11484_v61  ;;  %v6992_v61 = vrot.slane %v6991_v28, 4  ;;  %v7007_v15 = vsel %vm15171_vm13, %v7002_v30, %v7006_v31  ;;  %v7025_v28 = vor.u32 %v7024_v55, %v7020_v62  ;;  %v7028_v48 = vshll.u32 %v6431_v6, 16  ;;  %v7478_v30 = vld [vmem:[#allocation2 + $0x1a8] sm:$0xf]  ;;  %v7479_v31 = vld [vmem:[#allocation2 + $0x1ac] sm:$0x1] }
 0x51f   :  { %v16599_v33 = vpop.f32.mrb[96].mxu0  ;;  %v7015_v58 = vor.u32 %v7014_v40, %v7011_v25  ;;  %v7038_v40 = vrot.slane %v7036_v22, 5  ;;  %v6434_v6 = vld [vmem:[#allocation2 + $0x158] sm:$0x1]  ;;  %v7798_v24 = vrot.slane %v7479_v31, 5 }
 0x520   :  { %v9213_v56 = vpop.f32.mrb[97].mxu0  ;;  %v6997_v3 = vsel %vm15171_vm13, %v6992_v61, %v6996_v4  ;;  %v7026_v4 = vrot.slane %v7025_v28, 4  ;;  %v7044_v61 = vrot.slane %v7042_v11, 5 }
 0x521   :  { %v16605_v10 = vpop.f32.mrb[98].mxu0  ;;  %v7033_v56 = vshrl.u32 %v6432_v41, 16  ;;  %v6435_v41 = vld [vmem:[#allocation2 + $0x15c] sm:$0xf] }
 0x522   :  { %v9216_v21 = vpop.f32.mrb[99].mxu0  ;;  %v7057_v22 = vshrl.u32 %v6435_v41, 16  ;;  %v7049_v60 = vor.u32 %v7048_v26, %v7044_v61 }
 0x523   :  { %v7035_v25 = vrot.slane %v7033_v56, 4 }
 0x525   :  { %9884 = vmatmul.mubr.bf16.gmra.mrb[8].mxu1 %v12804_v38  ;;  %v7016_v38 = vrot.slane %v7015_v58, 4  ;;  %v7030_v58 = vrot.slane %v7028_v48, 5  ;;  %v7039_v56 = vor.u32 %v7038_v40, %v7035_v25  ;;  %v12806_v48 = vld [vmem:[#allocation2 + $0x138] sm:$0xff]   ;;  %v7052_v25 = vshll.u32 %v6434_v6, 16 }
 0x526   :  { %9891 = vmatprep.mubr.bf16.mxu1 %v11485_v63  ;;  %v11486_v63 = vcombine.low %v6997_v3, %v7007_v15  ;;  %v7060_v15 = vshll.u32 %v6435_v41, 16  ;;  %v7059_v40 = vrot.slane %v7057_v22, 4 }
 0x527   :  { %v16607_v42 = vpop.f32.mrb[100].mxu0  ;;  %v7021_v34 = vsel %vm15171_vm13, %v7016_v38, %v7020_v62  ;;  %v7031_v28 = vsel %vm15171_vm13, %v7026_v4, %v7030_v58  ;;  %v7050_v4 = vrot.slane %v7049_v60, 4 }
 0x528   :  { %v9221_v21 = vpop.f32.mrb[101].mxu0  ;;  %v11487_v41 = vcombine.low %v7021_v34, %v7031_v28  ;;  %v7062_v59 = vrot.slane %v7060_v15, 5 }
 0x529   :  { %v16613_v1 = vpop.f32.mrb[102].mxu0  ;;  %v6436_v21 = vld [vmem:[#allocation2 + $0x160] sm:$0xf] }
 0x52a   :  { %v9224_v52 = vpop.f32.mrb[103].mxu0  ;;  %v7063_v22 = vor.u32 %v7062_v59, %v7059_v40  ;;  %v6441_v59 = vld [vmem:[#allocation2 + $0x174] sm:$0xf] }
 0x52b   :  { %v7066_v52 = vshll.u32 %v6436_v21, 16 }
 0x52d   :  { %9892 = vmatmul.mubr.bf16.gmra.mrb[12].mxu1 %v12805_v50  ;;  %v7795_v50 = vrot.slane %v7478_v30, 5  ;;  %v7068_v58 = vrot.slane %v7066_v52, 5 }
 0x52e   :  { %9899 = vmatprep.mubr.bf16.mxu1 %v11486_v63  ;;  %v7070_v63 = vshrl.u32 %v6436_v21, 16  ;;  %v6438_v21 = vld [vmem:[#allocation2 + $0x168] sm:$0xf] }
 0x52f   :  { %v16615_v55 = vpop.f32.mrb[104].mxu0  ;;  %v7796_v62 = vsel %vm15165_vm12, %v11527_v57, %v7795_v50  ;;  %v7797_v38 = vrot.slane %v7795_v50, 4  ;;  %v7054_v57 = vrot.slane %v7052_v25, 5  ;;  %v7081_v14 = vshrl.u32 %v6438_v21, 16 }
 0x530   :  { %v9229_v3 = vpop.f32.mrb[105].mxu0  ;;  %v7072_v26 = vrot.slane %v7070_v63, 4  ;;  %v7064_v25 = vrot.slane %v7063_v22, 4 }
 0x531   :  { %v16621_v11 = vpop.f32.mrb[106].mxu0  ;;  %v7040_v3 = vrot.slane %v7039_v56, 4  ;;  %v7799_v30 = vsel %vm15165_vm12, %v7797_v38, %v7798_v24  ;;  %v6437_v56 = vld [vmem:[#allocation2 + $0x164] sm:$0x1]  ;;  %v7084_v24 = vshll.u32 %v6438_v21, 16  ;;  %v7055_v15 = vsel %vm15171_vm13, %v7050_v4, %v7054_v57 }
 0x532   :  { %v9232_v5 = vpop.f32.mrb[107].mxu0  ;;  %v11559_v31 = vcombine.low %v7796_v62, %v7799_v30  ;;  %v7073_v50 = vor.u32 %v7072_v26, %v7068_v58  ;;  %v12807_v62 = vld [vmem:[#allocation2 + $0x144] sm:$0xff]   ;;  %v7076_v38 = vshll.u32 %v6437_v56, 16  ;;  %v6442_v21 = vld [vmem:[#allocation2 + $0x178] sm:$0xf]  ;;  %v7108_v56 = vshll.u32 %v6441_v59, 16 }
 0x533   :  { %v6439_v5 = vld [vmem:[#allocation2 + $0x16c] sm:$0xf]  ;;  %v7045_v34 = vsel %vm15171_vm13, %v7040_v3, %v7044_v61  ;;  %v7086_v30 = vrot.slane %v7084_v24, 5  ;;  %v6440_v57 = vld [vmem:[#allocation2 + $0x170] sm:$0x1] }
 0x534   :  { %12252 = vmatmul.mubr.bf16.gmra.mrb[252].mxu0 %v11559_v31  ;;  %v7090_v28 = vshll.u32 %v6439_v5, 16  ;;  %v7094_v60 = vshrl.u32 %v6439_v5, 16  ;;  %v7074_v61 = vrot.slane %v7073_v50, 4  ;;  %v7078_v31 = vrot.slane %v7076_v38, 5 }
 0x535   :  { %9900 = vmatmul.mubr.bf16.gmra.mrb[16].mxu1 %v12806_v48  ;;  %v11488_v48 = vcombine.low %v7045_v34, %v7055_v15  ;;  %v7069_v5 = vsel %vm15171_vm13, %v7064_v25, %v7068_v58  ;;  %v7105_v34 = vshrl.u32 %v6441_v59, 16  ;;  %v7114_v15 = vshll.u32 %v6442_v21, 16  ;;  %v6445_v59 = vld [vmem:[#allocation2 + $0x184] sm:$0xf] }
 0x536   :  { %9907 = vmatprep.mubr.bf16.mxu1 %v11487_v41  ;;  %v7083_v41 = vrot.slane %v7081_v14, 4  ;;  %v7092_v40 = vrot.slane %v7090_v28, 5  ;;  %v7096_v3 = vrot.slane %v7094_v60, 4  ;;  %v7079_v22 = vsel %vm15171_vm13, %v7074_v61, %v7078_v31  ;;  %v12808_v60 = vld [vmem:[#allocation2 + $0x150] sm:$0xff]  }
 0x537   :  { %v16627_v12 = vpop.f32.mrb[108].mxu0  ;;  %v7118_v50 = vshrl.u32 %v6442_v21, 16  ;;  %v7110_v25 = vrot.slane %v7108_v56, 5  ;;  %v6443_v21 = vld [vmem:[#allocation2 + $0x17c] sm:$0x1]  ;;  %v7138_v49 = vshll.u32 %v6445_v59, 16 }
 0x538   :  { %v9237_v6 = vpop.f32.mrb[109].mxu0  ;;  %v7097_v24 = vor.u32 %v7096_v3, %v7092_v40 }
 0x539   :  { %v16633_v52 = vpop.f32.mrb[110].mxu0  ;;  %v7087_v6 = vor.u32 %v7086_v30, %v7083_v41  ;;  %v7116_v41 = vrot.slane %v7114_v15, 5  ;;  %v7120_v30 = vrot.slane %v7118_v50, 4  ;;  %v12809_v15 = vld [vmem:[#allocation2 + $0x15c] sm:$0xff]   ;;  %v7124_v50 = vshll.u32 %v6443_v21, 16 }
 0x53a   :  { %v9240_v63 = vpop.f32.mrb[111].mxu0  ;;  %v7098_v58 = vrot.slane %v7097_v24, 4 }
 0x53b   :  { %v7100_v63 = vshll.u32 %v6440_v57, 16  ;;  %v7088_v38 = vrot.slane %v7087_v6, 4  ;;  %v7142_v57 = vshrl.u32 %v6445_v59, 16 }
 0x53d   :  { %9908 = vmatmul.mubr.bf16.gmra.mrb[20].mxu1 %v12807_v62  ;;  %v11489_v62 = vcombine.low %v7069_v5, %v7079_v22  ;;  %v7102_v31 = vrot.slane %v7100_v63, 5  ;;  %v7093_v5 = vsel %vm15171_vm13, %v7088_v38, %v7092_v40  ;;  %v7121_v22 = vor.u32 %v7120_v30, %v7116_v41  ;;  %v6448_v40 = vld [vmem:[#allocation2 + $0x190] sm:$0xf] }
 0x53e   :  { %9915 = vmatprep.mubr.bf16.mxu1 %v11488_v48  ;;  %v7107_v48 = vrot.slane %v7105_v34, 4 }
 0x53f   :  { %v16635_v4 = vpop.f32.mrb[112].mxu0  ;;  %v7103_v6 = vsel %vm15171_vm13, %v7098_v58, %v7102_v31  ;;  %v7122_v46 = vrot.slane %v7121_v22, 4  ;;  %v7126_v58 = vrot.slane %v7124_v50, 5  ;;  %v6446_v31 = vld [vmem:[#allocation2 + $0x188] sm:$0x1] }
 0x540   :  { %v9245_v26 = vpop.f32.mrb[113].mxu0  ;;  %v7111_v56 = vor.u32 %v7110_v25, %v7107_v48  ;;  %v11490_v63 = vcombine.low %v7093_v5, %v7103_v6  ;;  %v7153_v48 = vshrl.u32 %v6447_v20, 16  ;;  %v7156_v25 = vshll.u32 %v6447_v20, 16  ;;  %v12810_v22 = vld [vmem:[#allocation2 + $0x168] sm:$0xff]  }
 0x541   :  { %v16641_v14 = vpop.f32.mrb[114].mxu0  ;;  %v6444_v26 = vld [vmem:[#allocation2 + $0x180] sm:$0xf]  ;;  %v7166_v5 = vshrl.u32 %v6448_v40, 16 }
 0x542   :  { %v9248_v28 = vpop.f32.mrb[115].mxu0  ;;  %v7129_v3 = vshrl.u32 %v6444_v26, 16  ;;  %v7112_v59 = vrot.slane %v7111_v56, 4  ;;  %v7148_v56 = vshll.u32 %v6446_v31, 16  ;;  %v7158_v50 = vrot.slane %v7156_v25, 5 }
 0x543   :  { %v7132_v28 = vshll.u32 %v6444_v26, 16  ;;  %v7144_v26 = vrot.slane %v7142_v57, 4  ;;  %v7162_v57 = vshll.u32 %v6448_v40, 16  ;;  %v6449_v25 = vld [vmem:[#allocation2 + $0x194] sm:$0x1] }
 0x545   :  { %9916 = vmatmul.mubr.bf16.gmra.mrb[24].mxu1 %v12808_v60  ;;  %v7131_v60 = vrot.slane %v7129_v3, 4  ;;  %v7117_v3 = vsel %vm15171_vm13, %v7112_v59, %v7116_v41  ;;  %v6450_v41 = vld [vmem:[#allocation2 + $0x198] sm:$0xf] }
 0x546   :  { %9923 = vmatprep.mubr.bf16.mxu1 %v11489_v62  ;;  %v7140_v62 = vrot.slane %v7138_v49, 5  ;;  %v7127_v49 = vsel %vm15171_vm13, %v7122_v46, %v7126_v58  ;;  %v6451_v46 = vld [vmem:[#allocation2 + $0x19c] sm:$0xf] }
 0x547   :  { %v16643_v61 = vpop.f32.mrb[116].mxu0 }
 0x548   :  { %v9253_v9 = vpop.f32.mrb[117].mxu0  ;;  %v7145_v21 = vor.u32 %v7144_v26, %v7140_v62  ;;  %v7150_v26 = vrot.slane %v7148_v56, 5  ;;  %v7186_v56 = vshll.u32 %v6451_v46, 16 }
 0x549   :  { %v16649_v34 = vpop.f32.mrb[118].mxu0  ;;  %v7134_v9 = vrot.slane %v7132_v28, 5 }
 0x54a   :  { %v9256_v24 = vpop.f32.mrb[119].mxu0  ;;  %v7188_v44 = vrot.slane %v7186_v56, 5 }
 0x54b   :  { %v7135_v24 = vor.u32 %v7134_v9, %v7131_v60  ;;  %v16659_v60 = vrot.slane %v7162_v57, 5  ;;  %v7168_v9 = vrot.slane %v7166_v5, 4 }
 0x54d   :  { %9924 = vmatmul.mubr.bf16.gmra.mrb[28].mxu1 %v12809_v15  ;;  %v7155_v15 = vrot.slane %v7153_v48, 4  ;;  %v7136_v20 = vrot.slane %v7135_v24, 4  ;;  %v7177_v24 = vshrl.u32 %v6450_v41, 16  ;;  %v7169_v5 = vor.u32 %v7168_v9, %v16659_v60 }
 0x54e   :  { %9931 = vmatprep.mubr.bf16.mxu1 %v11490_v63  ;;  %v11491_v63 = vcombine.low %v7117_v3, %v7127_v49 }
 0x54f   :  { %v16651_v38 = vpop.f32.mrb[120].mxu0  ;;  %v7159_v58 = vor.u32 %v7158_v50, %v7155_v15  ;;  %v7141_v31 = vsel %vm15171_vm13, %v7136_v20, %v7140_v62  ;;  %v12811_v20 = vld [vmem:[#allocation2 + $0x174] sm:$0xff]  }
 0x550   :  { %v9261_v30 = vpop.f32.mrb[121].mxu0 }
 0x551   :  { %v16657_v28 = vpop.f32.mrb[122].mxu0  ;;  %v7146_v30 = vrot.slane %v7145_v21, 4  ;;  %v7180_v21 = vshll.u32 %v6450_v41, 16 }
 0x552   :  { %v9264_v6 = vpop.f32.mrb[123].mxu0 }
 0x553   :  { %v7151_v48 = vsel %vm15171_vm13, %v7146_v30, %v7150_v26  ;;  %v7172_v30 = vshll.u32 %v6449_v25, 16  ;;  %v6453_v26 = vld [vmem:[#allocation2 + $0x1a4] sm:$0xf]  ;;  %v7182_v35 = vrot.slane %v7180_v21, 5 }
 0x554   :  { %v11492_v41 = vcombine.low %v7141_v31, %v7151_v48  ;;  %v7201_v39 = vshrl.u32 %v6453_v26, 16 }
 0x555   :  { %9932 = vmatmul.mubr.bf16.gmra.mrb[32].mxu1 %v12810_v22  ;;  %v7190_v22 = vshrl.u32 %v6451_v46, 16  ;;  %v6452_v46 = vld [vmem:[#allocation2 + $0x1a0] sm:$0x1] }
 0x556   :  { %9939 = vmatprep.mubr.bf16.mxu1 %v11491_v63 }
 0x557   :  { %v16661_v59 = vpop.f32.mrb[124].mxu0  ;;  %v7192_v9 = vrot.slane %v7190_v22, 4 }
 0x558   :  { %v9725_v40 = vpop.f32.mrb[56].mxu1  ;;  %v9269_v6 = vpop.f32.mrb[125].mxu0 }
 0x559   :  { %v16668_v3 = vadd.f32 %v9725_v40, %v16448_v2  ;;  %v9727_v49 = vpop.f32.mrb[57].mxu1  ;;  %v16670_v57 = vpop.f32.mrb[126].mxu0  ;;  %v7160_v6 = vrot.slane %v7159_v58, 4  ;;  %v7179_v2 = vrot.slane %v7177_v24, 4  ;;  %v6454_v40 = vld [vmem:[#allocation2 + $0x1a8] sm:$0xf]  ;;  %v7193_v56 = vor.u32 %v7192_v9, %v7188_v44 }
 0x55a   :  { %v9728_v15 = vpop.f32.mrb[58].mxu1  ;;  %v9272_v50 = vpop.f32.mrb[127].mxu0  ;;  %v7170_v49 = vrot.slane %v7169_v5, 4  ;;  %v7214_v43 = vshrl.u32 %v6454_v40, 16 }
 0x55b   :  { %v16674_v62 = vadd.f32 %v9728_v15, %v16458_v7  ;;  %v9730_v63 = vpop.f32.mrb[59].mxu1  ;;  %v7174_v7 = vrot.slane %v7172_v30, 5  ;;  %v7204_v15 = vshll.u32 %v6453_v26, 16  ;;  %v7165_v58 = vsel %vm15171_vm13, %v7160_v6, %v16659_v60 }
 0x55c   :  { %v7210_v63 = vshll.u32 %v6454_v40, 16  ;;  %v7183_v5 = vor.u32 %v7182_v35, %v7179_v2  ;;  %v7196_v30 = vshll.u32 %v6452_v46, 16  ;;  %v7203_v26 = vrot.slane %v7201_v39, 4  ;;  %v12812_v40 = vld [vmem:[#allocation2 + $0x180] sm:$0xff]  }
 0x55d   :  { %9940 = vmatmul.mubr.bf16.gmra.mrb[36].mxu1 %v12811_v20  ;;  %v7175_v24 = vsel %vm15171_vm13, %v7170_v49, %v7174_v7  ;;  %v7206_v19 = vrot.slane %v7204_v15, 5  ;;  %v7216_v6 = vrot.slane %v7214_v43, 4  ;;  %v7194_v49 = vrot.slane %v7193_v56, 4  ;;  %v12813_v56 = vld [vmem:[#allocation2 + $0x18c] sm:$0xff]  }
 0x55e   :  { %9947 = vmatprep.mubr.bf16.mxu1 %v11492_v41  ;;  %v7212_v60 = vrot.slane %v7210_v63, 5  ;;  %v7198_v35 = vrot.slane %v7196_v30, 5 }
 0x55f   :  { %v16676_v50 = vpop.f32.mrb[128].mxu0  ;;  %v7207_v2 = vor.u32 %v7206_v19, %v7203_v26 }
 0x560   :  { %v9733_v25 = vpop.f32.mrb[60].mxu1  ;;  %v9277_v13 = vpop.f32.mrb[129].mxu0  ;;  %v7217_v9 = vor.u32 %v7216_v6, %v7212_v60  ;;  %v7199_v15 = vsel %vm15171_vm13, %v7194_v49, %v7198_v35 }
 0x561   :  { %v12289_v31 = vadd.f32 %v9733_v25, %v16475_v17  ;;  %v9735_v48 = vpop.f32.mrb[61].mxu1  ;;  %v16684_v21 = vpop.f32.mrb[130].mxu0  ;;  %v11493_v17 = vcombine.low %v7165_v58, %v7175_v24  ;;  %v6455_v25 = vld [vmem:[#allocation2 + $0x1ac] sm:$0x1]  ;;  %v7208_v30 = vrot.slane %v7207_v2, 4 }
 0x562   :  { %v9736_v22 = vpop.f32.mrb[62].mxu1  ;;  %v9280_v20 = vpop.f32.mrb[131].mxu0  ;;  %v7184_v48 = vrot.slane %v7183_v5, 4  ;;  %v7220_v46 = vshll.u32 %v6455_v25, 16  ;;  %v7218_v26 = vrot.slane %v7217_v9, 4 }
 0x563   :  { %v12290_v13 = vadd.f32 %v9736_v22, %v16485_v23  ;;  %v9738_v41 = vpop.f32.mrb[63].mxu1 }
 0x564   :  { %v7189_v43 = vsel %vm15171_vm13, %v7184_v48, %v7188_v44  ;;  %v7222_v41 = vrot.slane %v7220_v46, 5  ;;  %v7213_v44 = vsel %vm15171_vm13, %v7208_v30, %v7212_v60 }
 0x565   :  { %9948 = vmatmul.mubr.bf16.gmra.mrb[40].mxu1 %v12812_v40  ;;  %v11494_v40 = vcombine.low %v7189_v43, %v7199_v15 }
 0x566   :  { %9955 = vmatprep.mubr.bf16.mxu1 %v11493_v17  ;;  %v7223_v6 = vsel %vm15171_vm13, %v7218_v26, %v7222_v41 }
 0x567   :  { %v16687_v7 = vpop.f32.mrb[132].mxu0 }
 0x568   :  { %v9741_v39 = vpop.f32.mrb[64].mxu1  ;;  %v9285_v20 = vpop.f32.mrb[133].mxu0 }
 0x569   :  { %v12291_v23 = vadd.f32 %v9741_v39, %v16500_v8  ;;  %v9743_v22 = vpop.f32.mrb[65].mxu1  ;;  %v16694_v63 = vpop.f32.mrb[134].mxu0  ;;  %v11495_v20 = vcombine.low %v7213_v44, %v7223_v6 }
 0x56a   :  { %v9744_v58 = vpop.f32.mrb[66].mxu1  ;;  %v9288_v24 = vpop.f32.mrb[135].mxu0  ;;  %v12814_v22 = vld [vmem:[#allocation2 + $0x198] sm:$0xff]  }
 0x56b   :  { %v12292_v5 = vadd.f32 %v9744_v58, %v16511_v36  ;;  %v9746_v19 = vpop.f32.mrb[67].mxu1  ;;  %v12815_v24 = vld [vmem:[#allocation2 + $0x1a4] sm:$0xff]  }
 0x56d   :  { %9956 = vmatmul.mubr.bf16.gmra.mrb[44].mxu1 %v12813_v56 }
 0x56e   :  { %9963 = vmatprep.mubr.bf16.mxu1 %v11494_v40 }
 0x56f   :  { %v12193_v8 = vpop.f32.mrb[192].mxu0 }
 0x570   :  { %v9749_v17 = vpop.f32.mrb[68].mxu1  ;;  %v16701_v25 = vadd.f32 %v12289_v31, %v12193_v8  ;;  %v10014_v48 = vpop.f32.mrb[193].mxu0 }
 0x571   :  { %v12293_v36 = vadd.f32 %v9749_v17, %v16526_v45  ;;  %v9751_v49 = vpop.f32.mrb[69].mxu1  ;;  %v16705_v35 = vadd.f32 %v16668_v3, %v10014_v48  ;;  %v12194_v2 = vpop.f32.mrb[194].mxu0 }
 0x572   :  { %18406 = vst [vmem:[#allocation12_spill] sm:$0xff] %v16701_v25  ;;  %v9752_v9 = vpop.f32.mrb[70].mxu1  ;;  %v16707_v46 = vadd.f32 %v12290_v13, %v12194_v2  ;;  %v10017_v39 = vpop.f32.mrb[195].mxu0 }
 0x573   :  { %v12294_v60 = vadd.f32 %v9752_v9, %v16537_v47  ;;  %v9754_v29 = vpop.f32.mrb[71].mxu1  ;;  %v16711_v31 = vadd.f32 %v16674_v62, %v10017_v39 }
 0x574   :  { %18407 = vst [vmem:[#allocation9_spill] sm:$0xff] %v16707_v46 }
 0x575   :  { %9964 = vmatmul.mubr.bf16.gmra.mrb[48].mxu1 %v12814_v22 }
 0x576   :  { %9971 = vmatprep.mubr.bf16.mxu1 %v11495_v20 }
 0x577   :  { %v12197_v45 = vpop.f32.mrb[196].mxu0 }
 0x578   :  { %v9757_v43 = vpop.f32.mrb[72].mxu1  ;;  %v16713_v15 = vadd.f32 %v12293_v36, %v12197_v45  ;;  %v10030_v3 = vpop.f32.mrb[197].mxu0 }
 0x579   :  { %v12295_v58 = vadd.f32 %v9757_v43, %v16550_v32  ;;  %v9759_v13 = vpop.f32.mrb[73].mxu1  ;;  %v16716_v19 = vadd.f32 %v12291_v23, %v10030_v3  ;;  %v12198_v56 = vpop.f32.mrb[198].mxu0 }
 0x57a   :  { %v9760_v47 = vpop.f32.mrb[74].mxu1  ;;  %v16718_v30 = vadd.f32 %v12294_v60, %v12198_v56  ;;  %v10033_v26 = vpop.f32.mrb[199].mxu0 }
 0x57b   :  { %18408 = vst [vmem:[#allocation17_spill] sm:$0xff] %v16716_v19  ;;  %v12296_v62 = vadd.f32 %v9760_v47, %v16563_v27  ;;  %v9762_v41 = vpop.f32.mrb[75].mxu1  ;;  %v16721_v40 = vadd.f32 %v12292_v5, %v10033_v26 }
 0x57c   :  { %18409 = vst [vmem:[#allocation18_spill] sm:$0xff] %v16718_v30 }
 0x57d   :  { %18410 = vst [vmem:[#allocation6_spill] sm:$0xff] %v16721_v40  ;;  %9972 = vmatmul.mubr.bf16.gmra.mrb[52].mxu1 %v12815_v24 }
 0x57f   :  { %v12201_v8 = vpop.f32.mrb[200].mxu0 }
 0x580   :  { %v9765_v44 = vpop.f32.mrb[76].mxu1  ;;  %v10046_v6 = vpop.f32.mrb[201].mxu0 }
 0x581   :  { %v12297_v32 = vadd.f32 %v9765_v44, %v16566_v16  ;;  %v9767_v17 = vpop.f32.mrb[77].mxu1  ;;  %v16724_v48 = vadd.f32 %v12295_v58, %v10046_v6  ;;  %v12202_v23 = vpop.f32.mrb[202].mxu0 }
 0x582   :  { %v9768_v36 = vpop.f32.mrb[78].mxu1  ;;  %v10049_v49 = vpop.f32.mrb[203].mxu0 }
 0x583   :  { %18411 = vst [vmem:[#allocation7_spill] sm:$0xff] %v16724_v48  ;;  %v12298_v2 = vadd.f32 %v9768_v36, %v16579_v51  ;;  %v9770_v9 = vpop.f32.mrb[79].mxu1  ;;  %v16727_v39 = vadd.f32 %v12297_v32, %v12201_v8  ;;  %v16729_v27 = vadd.f32 %v12296_v62, %v10049_v49 }
 0x585   :  { %18412 = vst [vmem:[#allocation15_spill] sm:$0xff] %v16727_v39  ;;  %18413 = vst [vmem:[#allocation39_spill] sm:$0xff] %v16729_v27  ;;  %v16731_v5 = vadd.f32 %v12298_v2, %v12202_v23  ;;  %v10271_v23 = vadd.f32 %v16711_v31, %v16705_v35 }
 0x587   :  { %18414 = vst [vmem:[#allocation40_spill] sm:$0xff] %v16731_v5  ;;  %v12205_v20 = vpop.f32.mrb[204].mxu0 }
 0x588   :  { %v9773_v60 = vpop.f32.mrb[80].mxu1  ;;  %v10062_v29 = vpop.f32.mrb[205].mxu0 }
 0x589   :  { %v12299_v16 = vadd.f32 %v9773_v60, %v16583_v18  ;;  %v9775_v22 = vpop.f32.mrb[81].mxu1  ;;  %v12206_v45 = vpop.f32.mrb[206].mxu0 }
 0x58a   :  { %v9776_v43 = vpop.f32.mrb[82].mxu1  ;;  %v10065_v3 = vpop.f32.mrb[207].mxu0 }
 0x58b   :  { %v12300_v58 = vadd.f32 %v9776_v43, %v16589_v53  ;;  %v9778_v13 = vpop.f32.mrb[83].mxu1  ;;  %v16735_v51 = vadd.f32 %v12299_v16, %v10062_v29 }
 0x58d   :  { %18415 = vst [vmem:[#allocation41_spill] sm:$0xff] %v16735_v51  ;;  %v16737_v24 = vadd.f32 %v12300_v58, %v10065_v3 }
 0x58f   :  { %18416 = vst [vmem:[#allocation42_spill] sm:$0xff] %v16737_v24  ;;  %v12209_v56 = vpop.f32.mrb[208].mxu0 }
 0x590   :  { %v9781_v47 = vpop.f32.mrb[84].mxu1  ;;  %v10078_v26 = vpop.f32.mrb[209].mxu0 }
 0x591   :  { %v12301_v62 = vadd.f32 %v9781_v47, %v16591_v37  ;;  %v9783_v41 = vpop.f32.mrb[85].mxu1  ;;  %v12210_v8 = vpop.f32.mrb[210].mxu0 }
 0x592   :  { %v9784_v44 = vpop.f32.mrb[86].mxu1  ;;  %v10081_v18 = vpop.f32.mrb[211].mxu0 }
 0x593   :  { %v16740_v6 = vadd.f32 %v12301_v62, %v12205_v20  ;;  %v12302_v32 = vadd.f32 %v9784_v44, %v16597_v0  ;;  %v9786_v17 = vpop.f32.mrb[87].mxu1  ;;  %v10272_v20 = vadd.f32 %v10271_v23, %v16701_v25 }
 0x595   :  { %18417 = vst [vmem:[#allocation43_spill] sm:$0xff] %v16740_v6  ;;  %v16743_v53 = vadd.f32 %v12302_v32, %v12206_v45  ;;  %v10273_v3 = vadd.f32 %v10272_v20, %v16707_v46 }
 0x597   :  { %18418 = vst [vmem:[#allocation44_spill] sm:$0xff] %v16743_v53  ;;  %v12213_v36 = vpop.f32.mrb[212].mxu0 }
 0x598   :  { %v9789_v49 = vpop.f32.mrb[88].mxu1  ;;  %v10094_v2 = vpop.f32.mrb[213].mxu0 }
 0x599   :  { %v12303_v9 = vadd.f32 %v9789_v49, %v16599_v33  ;;  %v9791_v37 = vpop.f32.mrb[89].mxu1  ;;  %v12214_v60 = vpop.f32.mrb[214].mxu0 }
 0x59a   :  { %v9792_v29 = vpop.f32.mrb[90].mxu1  ;;  %v10097_v16 = vpop.f32.mrb[215].mxu0 }
 0x59b   :  { %v16749_v22 = vadd.f32 %v12303_v9, %v10078_v26  ;;  %v12304_v0 = vadd.f32 %v9792_v29, %v16605_v10  ;;  %v9794_v45 = vpop.f32.mrb[91].mxu1  ;;  %v10274_v26 = vadd.f32 %v10273_v3, %v16716_v19 }
 0x59d   :  { %18419 = vst [vmem:[#allocation45_spill] sm:$0xff] %v16749_v22  ;;  %v16752_v43 = vadd.f32 %v12304_v0, %v10081_v18  ;;  %v10275_v49 = vadd.f32 %v10274_v26, %v16721_v40 }
 0x59f   :  { %18420 = vst [vmem:[#allocation46_spill] sm:$0xff] %v16752_v43  ;;  %v16755_v58 = vpop.f32.mrb[216].mxu0  ;;  %v10276_v3 = vadd.f32 %v10275_v49, %v16713_v15 }
 0x5a0   :  { %v9797_v13 = vpop.f32.mrb[92].mxu1  ;;  %v10110_v47 = vpop.f32.mrb[217].mxu0 }
 0x5a1   :  { %v12305_v33 = vadd.f32 %v9797_v13, %v16607_v42  ;;  %v9799_v62 = vpop.f32.mrb[93].mxu1  ;;  %v16758_v41 = vpop.f32.mrb[218].mxu0 }
 0x5a2   :  { %v9800_v44 = vpop.f32.mrb[94].mxu1  ;;  %v10113_v32 = vpop.f32.mrb[219].mxu0  ;;  %v10277_v62 = vadd.f32 %v10276_v3, %v16718_v30 }
 0x5a3   :  { %v16761_v17 = vadd.f32 %v12305_v33, %v12209_v56  ;;  %v12306_v10 = vadd.f32 %v9800_v44, %v16613_v1  ;;  %v9802_v18 = vpop.f32.mrb[95].mxu1 }
 0x5a5   :  { %18421 = vst [vmem:[#allocation47_spill] sm:$0xff] %v16761_v17  ;;  %v16764_v23 = vadd.f32 %v12306_v10, %v12210_v8 }
 0x5a7   :  { %18422 = vst [vmem:[#allocation48_spill] sm:$0xff] %v16764_v23  ;;  %v16767_v9 = vpop.f32.mrb[220].mxu0 }
 0x5a8   :  { %v9805_v37 = vpop.f32.mrb[96].mxu1  ;;  %v16769_v42 = vpop.f32.mrb[221].mxu0 }
 0x5a9   :  { %v12307_v29 = vadd.f32 %v9805_v37, %v16615_v55  ;;  %v9807_v20 = vpop.f32.mrb[97].mxu1  ;;  %v16772_v0 = vpop.f32.mrb[222].mxu0 }
 0x5aa   :  { %v9808_v45 = vpop.f32.mrb[98].mxu1  ;;  %v10129_v56 = vpop.f32.mrb[223].mxu0 }
 0x5ab   :  { %v16775_v1 = vadd.f32 %v12307_v29, %v10094_v2  ;;  %v12308_v8 = vadd.f32 %v9808_v45, %v16621_v11  ;;  %v9810_v13 = vpop.f32.mrb[99].mxu1  ;;  %v10278_v11 = vadd.f32 %v10277_v62, %v16724_v48 }
 0x5ad   :  { %18423 = vst [vmem:[#allocation49_spill] sm:$0xff] %v16775_v1  ;;  %v16778_v33 = vadd.f32 %v12308_v8, %v10097_v16  ;;  %v10279_v3 = vadd.f32 %v10278_v11, %v16729_v27 }
 0x5af   :  { %18424 = vst [vmem:[#allocation50_spill] sm:$0xff] %v16778_v33  ;;  %v16781_v44 = vpop.f32.mrb[224].mxu0 }
 0x5b0   :  { %v9813_v26 = vpop.f32.mrb[100].mxu1  ;;  %v16783_v55 = vpop.f32.mrb[225].mxu0 }
 0x5b1   :  { %v12309_v10 = vadd.f32 %v9813_v26, %v16627_v12  ;;  %v9815_v18 = vpop.f32.mrb[101].mxu1  ;;  %v16786_v37 = vpop.f32.mrb[226].mxu0 }
 0x5b2   :  { %v9816_v49 = vpop.f32.mrb[102].mxu1  ;;  %v16788_v2 = vpop.f32.mrb[227].mxu0 }
 0x5b3   :  { %v16791_v29 = vadd.f32 %v12309_v10, %v12213_v36  ;;  %v12310_v16 = vadd.f32 %v9816_v49, %v16633_v52  ;;  %v9818_v20 = vpop.f32.mrb[103].mxu1  ;;  %v10280_v52 = vadd.f32 %v10279_v3, %v16727_v39 }
 0x5b5   :  { %18425 = vst [vmem:[#allocation51_spill] sm:$0xff] %v16791_v29  ;;  %v16794_v45 = vadd.f32 %v12310_v16, %v12214_v60  ;;  %v10281_v16 = vadd.f32 %v10280_v52, %v16731_v5 }
 0x5b7   :  { %v16797_v8 = vpop.f32.mrb[228].mxu0 }
 0x5b8   :  { %v9821_v12 = vpop.f32.mrb[104].mxu1  ;;  %v16799_v13 = vpop.f32.mrb[229].mxu0 }
 0x5b9   :  { %v12311_v26 = vadd.f32 %v9821_v12, %v16635_v4  ;;  %v9823_v18 = vpop.f32.mrb[105].mxu1  ;;  %v16802_v30 = vpop.f32.mrb[230].mxu0 }
 0x5ba   :  { %v9824_v62 = vpop.f32.mrb[106].mxu1  ;;  %v16804_v36 = vpop.f32.mrb[231].mxu0 }
 0x5bb   :  { %v16807_v10 = vadd.f32 %v12311_v26, %v10110_v47  ;;  %v12312_v60 = vadd.f32 %v9824_v62, %v16641_v14  ;;  %v9826_v49 = vpop.f32.mrb[107].mxu1  ;;  %v10282_v14 = vadd.f32 %v10281_v16, %v16735_v51 }
 0x5bd   :  { %v16810_v11 = vadd.f32 %v12312_v60, %v10113_v32  ;;  %v10283_v60 = vadd.f32 %v10282_v14, %v16737_v24 }
 0x5bf   :  { %v16813_v20 = vpop.f32.mrb[232].mxu0 }
 0x5c0   :  { %v9829_v4 = vpop.f32.mrb[108].mxu1  ;;  %v16815_v12 = vpop.f32.mrb[233].mxu0 }
 0x5c1   :  { %v12313_v18 = vadd.f32 %v9829_v4, %v16643_v61  ;;  %v9831_v27 = vpop.f32.mrb[109].mxu1  ;;  %v16818_v48 = vpop.f32.mrb[234].mxu0 }
 0x5c2   :  { %v9832_v3 = vpop.f32.mrb[110].mxu1  ;;  %v16820_v47 = vpop.f32.mrb[235].mxu0 }
 0x5c3   :  { %v16824_v32 = vadd.f32 %v12313_v18, %v16755_v58  ;;  %v12314_v26 = vadd.f32 %v9832_v3, %v16649_v34  ;;  %v9834_v62 = vpop.f32.mrb[111].mxu1  ;;  %v10284_v34 = vadd.f32 %v10283_v60, %v16740_v6 }
 0x5c5   :  { %v16828_v52 = vadd.f32 %v12314_v26, %v16758_v41  ;;  %v10285_v62 = vadd.f32 %v10284_v34, %v16743_v53 }
 0x5c7   :  { %v16831_v61 = vpop.f32.mrb[236].mxu0 }
 0x5c8   :  { %v9837_v27 = vpop.f32.mrb[112].mxu1  ;;  %v16833_v49 = vpop.f32.mrb[237].mxu0 }
 0x5c9   :  { %v12315_v4 = vadd.f32 %v9837_v27, %v16651_v38  ;;  %v9839_v5 = vpop.f32.mrb[113].mxu1  ;;  %v16836_v16 = vpop.f32.mrb[238].mxu0  ;;  %v10286_v27 = vadd.f32 %v10285_v62, %v16749_v22 }
 0x5ca   :  { %v9840_v58 = vpop.f32.mrb[114].mxu1  ;;  %v16838_v18 = vpop.f32.mrb[239].mxu0 }
 0x5cb   :  { %v16842_v41 = vadd.f32 %v12315_v4, %v16769_v42  ;;  %v12316_v3 = vadd.f32 %v9840_v58, %v16657_v28  ;;  %v9842_v14 = vpop.f32.mrb[115].mxu1  ;;  %v10287_v34 = vadd.f32 %v10286_v27, %v16752_v43 }
 0x5cd   :  { %v16845_v26 = vadd.f32 %v12316_v3, %v10129_v56  ;;  %v10288_v14 = vadd.f32 %v10287_v34, %v16761_v17 }
 0x5cf   :  { %v16848_v24 = vpop.f32.mrb[240].mxu0  ;;  %v10289_v27 = vadd.f32 %v10288_v14, %v16764_v23 }
 0x5d0   :  { %v9845_v38 = vpop.f32.mrb[116].mxu1  ;;  %v16850_v5 = vpop.f32.mrb[241].mxu0 }
 0x5d1   :  { %v12317_v51 = vadd.f32 %v9845_v38, %v16661_v59  ;;  %v9847_v60 = vpop.f32.mrb[117].mxu1  ;;  %v16854_v6 = vpop.f32.mrb[242].mxu0 }
 0x5d2   :  { %v9848_v42 = vpop.f32.mrb[118].mxu1  ;;  %v16856_v4 = vpop.f32.mrb[243].mxu0 }
 0x5d3   :  { %v16859_v28 = vadd.f32 %v12317_v51, %v16767_v9  ;;  %v12318_v56 = vadd.f32 %v9848_v42, %v16670_v57  ;;  %v9850_v58 = vpop.f32.mrb[119].mxu1 }
 0x5d4   :  { %v10290_v58 = vadd.f32 %v10289_v27, %v16775_v1 }
 0x5d5   :  { %v16864_v3 = vadd.f32 %v12318_v56, %v16772_v0 }
 0x5d6   :  { %v10291_v17 = vadd.f32 %v10290_v58, %v16778_v33 }
 0x5d7   :  { %18426 = vst [vmem:[#allocation52_spill] sm:$0xff] %v16864_v3  ;;  %v16867_v59 = vpop.f32.mrb[244].mxu0 }
 0x5d8   :  { %v9853_v62 = vpop.f32.mrb[120].mxu1  ;;  %v16869_v38 = vpop.f32.mrb[245].mxu0 }
 0x5d9   :  { %v12319_v60 = vadd.f32 %v9853_v62, %v16676_v50  ;;  %v9855_v22 = vpop.f32.mrb[121].mxu1  ;;  %v16872_v51 = vpop.f32.mrb[246].mxu0 }
 0x5da   :  { %v9856_v9 = vpop.f32.mrb[122].mxu1  ;;  %v16874_v57 = vpop.f32.mrb[247].mxu0 }
 0x5db   :  { %v16878_v0 = vadd.f32 %v12319_v60, %v16783_v55  ;;  %v12320_v42 = vadd.f32 %v9856_v9, %v16684_v21  ;;  %v9858_v56 = vpop.f32.mrb[123].mxu1  ;;  %v10292_v9 = vadd.f32 %v10291_v17, %v16791_v29 }
 0x5dd   :  { %18427 = vst [vmem:[#allocation53_spill] sm:$0xff] %v16878_v0  ;;  %v16883_v34 = vadd.f32 %v12320_v42, %v16788_v2  ;;  %v10293_v58 = vadd.f32 %v10292_v9, %v16794_v45 }
 0x5df   :  { %18428 = vst [vmem:[#allocation54_spill] sm:$0xff] %v16883_v34  ;;  %v16885_v50 = vpop.f32.mrb[248].mxu0 }
 0x5e0   :  { %v9861_v22 = vpop.f32.mrb[124].mxu1  ;;  %v16887_v62 = vpop.f32.mrb[249].mxu0 }
 0x5e1   :  { %v12321_v14 = vadd.f32 %v9861_v22, %v16687_v7  ;;  %v9863_v23 = vpop.f32.mrb[125].mxu1  ;;  %v16891_v55 = vpop.f32.mrb[250].mxu0 }
 0x5e2   :  { %v9864_v60 = vpop.f32.mrb[126].mxu1  ;;  %v16893_v21 = vpop.f32.mrb[251].mxu0  ;;  %v10294_v23 = vadd.f32 %v10293_v58, %v16807_v10 }
 0x5e3   :  { %v16897_v2 = vadd.f32 %v12321_v14, %v16781_v44  ;;  %v12322_v27 = vadd.f32 %v9864_v60, %v16694_v63  ;;  %v9866_v42 = vpop.f32.mrb[127].mxu1  ;;  %v18432_v44 = vld [vmem:[#allocation20_spill] sm:$0xff] }
 0x5e4   :  { %v10295_v63 = vadd.f32 %v10294_v23, %v16810_v11 }
 0x5e5   :  { %18429 = vst [vmem:[#allocation55_spill] sm:$0xff] %v16897_v2  ;;  %v16901_v56 = vadd.f32 %v12322_v27, %v16786_v37  ;;  %v18434_v27 = vld [vmem:[#allocation22_spill] sm:$0xff] }
 0x5e6   :  { %v10296_v60 = vadd.f32 %v10295_v63, %v16824_v32 }
 0x5e7   :  { %18430 = vst [vmem:[#allocation56_spill] sm:$0xff] %v16901_v56 }
 0x5e8   :  { %v9869_v7 = vpop.f32.mrb[0].mxu1 }
 0x5e9   :  { %v12323_v22 = vadd.f32 %v9869_v7, %v16088_v54  ;;  %v9871_v33 = vpop.f32.mrb[1].mxu1  ;;  %v18436_v7 = vld [vmem:[#allocation5_spill] sm:$0xff] }
 0x5ea   :  { %v9872_v1 = vpop.f32.mrb[2].mxu1  ;;  %v10297_v33 = vadd.f32 %v10296_v60, %v16828_v52 }
 0x5eb   :  { %v16907_v17 = vadd.f32 %v12323_v22, %v16799_v13  ;;  %v12324_v14 = vadd.f32 %v9872_v1, %v18432_v44  ;;  %v9874_v29 = vpop.f32.mrb[3].mxu1 }
 0x5ec   :  { %v10298_v23 = vadd.f32 %v10297_v33, %v16842_v41 }
 0x5ed   :  { %18431 = vst [vmem:[#allocation57_spill] sm:$0xff] %v16907_v17  ;;  %v16912_v37 = vadd.f32 %v12324_v14, %v16804_v36  ;;  %v18437_v14 = vld [vmem:[#allocation19_spill] sm:$0xff] }
 0x5ee   :  { %v10299_v44 = vadd.f32 %v10298_v23, %v16845_v26 }
 0x5ef   :  { %18433 = vst [vmem:[#allocation20_spill] sm:$0xff] %v16912_v37 }
 0x5f0   :  { %v9877_v9 = vpop.f32.mrb[4].mxu1  ;;  %v10300_v60 = vadd.f32 %v10299_v44, %v16859_v28 }
 0x5f1   :  { %v12325_v42 = vadd.f32 %v9877_v9, %v18434_v27  ;;  %v9879_v58 = vpop.f32.mrb[5].mxu1 }
 0x5f2   :  { %v9880_v54 = vpop.f32.mrb[6].mxu1 }
 0x5f3   :  { %v16918_v13 = vadd.f32 %v12325_v42, %v16797_v8  ;;  %v12326_v1 = vadd.f32 %v9880_v54, %v18436_v7  ;;  %v9882_v29 = vpop.f32.mrb[7].mxu1  ;;  %v18438_v42 = vld [vmem:[#allocation21_spill] sm:$0xff] }
 0x5f4   :  { %v18439_v29 = vld [vmem:[#allocation25_spill] sm:$0xff] }
 0x5f5   :  { %18435 = vst [vmem:[#allocation22_spill] sm:$0xff] %v16918_v13  ;;  %v16923_v36 = vadd.f32 %v12326_v1, %v16802_v30  ;;  %v10301_v30 = vadd.f32 %v10300_v60, %v16864_v3 }
 0x5f7   :  { %v10302_v1 = vadd.f32 %v10301_v30, %v16878_v0 }
 0x5f8   :  { %v9885_v22 = vpop.f32.mrb[8].mxu1 }
 0x5f9   :  { %v12327_v63 = vadd.f32 %v9885_v22, %v18437_v14  ;;  %v9887_v9 = vpop.f32.mrb[9].mxu1 }
 0x5fa   :  { %v9888_v27 = vpop.f32.mrb[10].mxu1 }
 0x5fb   :  { %v16929_v8 = vadd.f32 %v12327_v63, %v16815_v12  ;;  %v12328_v58 = vadd.f32 %v9888_v27, %v18438_v42  ;;  %v9890_v54 = vpop.f32.mrb[11].mxu1  ;;  %v18440_v12 = vld [vmem:[#allocation10_spill] sm:$0xff]  ;;  %v10303_v27 = vadd.f32 %v10302_v1, %v16883_v34 }
 0x5fd   :  { %v16933_v33 = vadd.f32 %v12328_v58, %v16820_v47  ;;  %v10304_v60 = vadd.f32 %v10303_v27, %v16897_v2  ;;  %v18441_v58 = vld [vmem:[#allocation14_spill] sm:$0xff] }
 0x600   :  { %v9893_v7 = vpop.f32.mrb[12].mxu1 }
 0x601   :  { %v12329_v23 = vadd.f32 %v9893_v7, %v18439_v29  ;;  %v9895_v22 = vpop.f32.mrb[13].mxu1 }
 0x602   :  { %v9896_v14 = vpop.f32.mrb[14].mxu1  ;;  %v18442_v22 = vld [vmem:[#allocation4_spill] sm:$0xff] }
 0x603   :  { %v16939_v44 = vadd.f32 %v12329_v23, %v16813_v20  ;;  %v12330_v63 = vadd.f32 %v9896_v14, %v18440_v12  ;;  %v9898_v9 = vpop.f32.mrb[15].mxu1  ;;  %v10305_v20 = vadd.f32 %v10304_v60, %v16901_v56 }
 0x605   :  { %v16944_v47 = vadd.f32 %v12330_v63, %v16818_v48  ;;  %v10306_v63 = vadd.f32 %v10305_v20, %v16907_v17 }
 0x607   :  { %v16948_v29 = vpop.f32.mrb[252].mxu0  ;;  %v10307_v60 = vadd.f32 %v10306_v63, %v16912_v37  ;;  %v18445_v37 = vld [vmem:[#allocation16_spill] sm:$0xff] }
 0x608   :  { %v9901_v42 = vpop.f32.mrb[16].mxu1  ;;  %v16955_v12 = vpop.f32.mrb[253].mxu0 }
 0x609   :  { %v12331_v54 = vadd.f32 %v9901_v42, %v18441_v58  ;;  %v9903_v30 = vpop.f32.mrb[17].mxu1  ;;  %v16957_v48 = vpop.f32.mrb[254].mxu0  ;;  %v18443_v58 = vld [vmem:[#allocation11_spill] sm:$0xff] }
 0x60a   :  { %v9904_v7 = vpop.f32.mrb[18].mxu1  ;;  %v16963_v27 = vpop.f32.mrb[255].mxu0 }
 0x60b   :  { %v16952_v23 = vadd.f32 %v12331_v54, %v16833_v49  ;;  %v12332_v14 = vadd.f32 %v9904_v7, %v18442_v22  ;;  %v9906_v1 = vpop.f32.mrb[19].mxu1  ;;  %v10308_v7 = vadd.f32 %v10307_v60, %v16918_v13 }
 0x60c   :  { %v18444_v1 = vld [vmem:[#allocation13_spill] sm:$0xff] }
 0x60d   :  { %v16961_v9 = vadd.f32 %v12332_v14, %v16838_v18  ;;  %v10309_v14 = vadd.f32 %v10308_v7, %v16923_v36 }
 0x60f   :  { %v10310_v63 = vadd.f32 %v10309_v14, %v16929_v8 }
 0x610   :  { %v9909_v42 = vpop.f32.mrb[20].mxu1 }
 0x611   :  { %v12333_v49 = vadd.f32 %v9909_v42, %v18443_v58  ;;  %v9911_v54 = vpop.f32.mrb[21].mxu1 }
 0x612   :  { %v9912_v30 = vpop.f32.mrb[22].mxu1 }
 0x613   :  { %v16969_v22 = vadd.f32 %v12333_v49, %v16831_v61  ;;  %v12334_v56 = vadd.f32 %v9912_v30, %v18444_v1  ;;  %v9914_v20 = vpop.f32.mrb[23].mxu1  ;;  %v18446_v61 = vld [vmem:[#allocation29_spill] sm:$0xff]  ;;  %v10311_v30 = vadd.f32 %v10310_v63, %v16933_v33  ;;  %v18447_v1 = vld [vmem:[#allocation30_spill] sm:$0xff] }
 0x615   :  { %v16973_v18 = vadd.f32 %v12334_v56, %v16836_v16  ;;  %v10312_v56 = vadd.f32 %v10311_v30, %v16939_v44 }
 0x618   :  { %v9917_v17 = vpop.f32.mrb[24].mxu1 }
 0x619   :  { %v12335_v42 = vadd.f32 %v9917_v17, %v18445_v37  ;;  %v9919_v58 = vpop.f32.mrb[25].mxu1  ;;  %v10313_v37 = vadd.f32 %v10312_v56, %v16944_v47 }
 0x61a   :  { %v9920_v54 = vpop.f32.mrb[26].mxu1 }
 0x61b   :  { %v16979_v60 = vadd.f32 %v12335_v42, %v16850_v5  ;;  %v12336_v49 = vadd.f32 %v9920_v54, %v18446_v61  ;;  %v9922_v13 = vpop.f32.mrb[27].mxu1  ;;  %v18448_v42 = vld [vmem:[#allocation24_spill] sm:$0xff]  ;;  %v10314_v63 = vadd.f32 %v10313_v37, %v16952_v23 }
 0x61d   :  { %v16984_v16 = vadd.f32 %v12336_v49, %v16856_v4  ;;  %v10315_v61 = vadd.f32 %v10314_v63, %v16961_v9  ;;  %v18449_v49 = vld [vmem:[#allocation26_spill] sm:$0xff] }
 0x61f   :  { %v10316_v56 = vadd.f32 %v10315_v61, %v16969_v22 }
 0x620   :  { %v9925_v7 = vpop.f32.mrb[28].mxu1 }
 0x621   :  { %v12337_v20 = vadd.f32 %v9925_v7, %v18447_v1  ;;  %v9927_v14 = vpop.f32.mrb[29].mxu1 }
 0x622   :  { %v9928_v17 = vpop.f32.mrb[30].mxu1 }
 0x623   :  { %v16990_v5 = vadd.f32 %v12337_v20, %v16848_v24  ;;  %v12338_v58 = vadd.f32 %v9928_v17, %v18448_v42  ;;  %v9930_v13 = vpop.f32.mrb[31].mxu1  ;;  %v18450_v20 = vld [vmem:[#allocation31_spill] sm:$0xff] }
 0x624   :  { %v18451_v13 = vld [vmem:[#allocation33_spill] sm:$0xff] }
 0x625   :  { %v16995_v4 = vadd.f32 %v12338_v58, %v16854_v6  ;;  %v10317_v6 = vadd.f32 %v10316_v56, %v16973_v18 }
 0x627   :  { %v10318_v58 = vadd.f32 %v10317_v6, %v16979_v60 }
 0x628   :  { %v9933_v54 = vpop.f32.mrb[32].mxu1 }
 0x629   :  { %v12339_v30 = vadd.f32 %v9933_v54, %v18449_v49  ;;  %v9935_v7 = vpop.f32.mrb[33].mxu1 }
 0x62a   :  { %v9936_v1 = vpop.f32.mrb[34].mxu1 }
 0x62b   :  { %v17001_v24 = vadd.f32 %v12339_v30, %v16869_v38  ;;  %v12340_v14 = vadd.f32 %v9936_v1, %v18450_v20  ;;  %v9938_v17 = vpop.f32.mrb[35].mxu1  ;;  %v18452_v38 = vld [vmem:[#allocation32_spill] sm:$0xff]  ;;  %v10319_v1 = vadd.f32 %v10318_v58, %v16984_v16 }
 0x62d   :  { %v17005_v37 = vadd.f32 %v12340_v14, %v16874_v57  ;;  %v10320_v56 = vadd.f32 %v10319_v1, %v16990_v5  ;;  %v18453_v14 = vld [vmem:[#allocation35_spill] sm:$0xff] }
 0x630   :  { %v9941_v42 = vpop.f32.mrb[36].mxu1 }
 0x631   :  { %v12341_v63 = vadd.f32 %v9941_v42, %v18451_v13  ;;  %v9943_v54 = vpop.f32.mrb[37].mxu1  ;;  %v10321_v13 = vadd.f32 %v10320_v56, %v16995_v4 }
 0x632   :  { %v9944_v49 = vpop.f32.mrb[38].mxu1 }
 0x633   :  { %v17011_v61 = vadd.f32 %v12341_v63, %v16867_v59  ;;  %v12342_v30 = vadd.f32 %v9944_v49, %v18452_v38  ;;  %v9946_v7 = vpop.f32.mrb[39].mxu1  ;;  %v18454_v63 = vld [vmem:[#allocation34_spill] sm:$0xff]  ;;  %v10322_v58 = vadd.f32 %v10321_v13, %v17001_v24 }
 0x634   :  { %v18456_v7 = vld [vmem:[#allocation37_spill] sm:$0xff] }
 0x635   :  { %v17016_v57 = vadd.f32 %v12342_v30, %v16872_v51  ;;  %v10323_v30 = vadd.f32 %v10322_v58, %v17005_v37 }
 0x637   :  { %v10324_v56 = vadd.f32 %v10323_v30, %v17011_v61 }
 0x638   :  { %v9949_v20 = vpop.f32.mrb[40].mxu1 }
 0x639   :  { %v12343_v17 = vadd.f32 %v9949_v20, %v18453_v14  ;;  %v9951_v6 = vpop.f32.mrb[41].mxu1 }
 0x63a   :  { %v9952_v42 = vpop.f32.mrb[42].mxu1 }
 0x63b   :  { %v17022_v59 = vadd.f32 %v12343_v17, %v16887_v62  ;;  %v12344_v54 = vadd.f32 %v9952_v42, %v18454_v63  ;;  %v9954_v49 = vpop.f32.mrb[43].mxu1  ;;  %v18458_v17 = vld [vmem:[#allocation36_spill] sm:$0xff] }
 0x63c   :  { %v18460_v49 = vld [vmem:[#allocation23_spill] sm:$0xff] }
 0x63d   :  { %v17027_v51 = vadd.f32 %v12344_v54, %v16893_v21  ;;  %v10325_v21 = vadd.f32 %v10324_v56, %v17016_v57 }
 0x63f   :  { %18455 = vst [vmem:[#allocation5_spill] sm:$0xff] %v17027_v51  ;;  %v10326_v54 = vadd.f32 %v10325_v21, %v17022_v59 }
 0x640   :  { %v9957_v38 = vpop.f32.mrb[44].mxu1 }
 0x641   :  { %v12345_v1 = vadd.f32 %v9957_v38, %v18456_v7  ;;  %v9959_v20 = vpop.f32.mrb[45].mxu1 }
 0x642   :  { %v9960_v14 = vpop.f32.mrb[46].mxu1  ;;  %v18461_v20 = vld [vmem:[#allocation38_spill] sm:$0xff] }
 0x643   :  { %v17033_v62 = vadd.f32 %v12345_v1, %v16885_v50  ;;  %v12346_v6 = vadd.f32 %v9960_v14, %v18458_v17  ;;  %v9962_v42 = vpop.f32.mrb[47].mxu1  ;;  %v10327_v14 = vadd.f32 %v10326_v54, %v17027_v51 }
 0x645   :  { %18457 = vst [vmem:[#allocation19_spill] sm:$0xff] %v17033_v62  ;;  %v17037_v13 = vadd.f32 %v12346_v6, %v16891_v55  ;;  %v10328_v56 = vadd.f32 %v10327_v14, %v17033_v62  ;;  %v18464_v6 = vld [vmem:[#allocation8_spill] sm:$0xff] }
 0x647   :  { %18459 = vst [vmem:[#allocation21_spill] sm:$0xff] %v17037_v13 }
 0x648   :  { %v9965_v63 = vpop.f32.mrb[48].mxu1 }
 0x649   :  { %v12347_v58 = vadd.f32 %v9965_v63, %v18460_v49  ;;  %v9967_v38 = vpop.f32.mrb[49].mxu1  ;;  %v10329_v49 = vadd.f32 %v10328_v56, %v17037_v13 }
 0x64a   :  { %v9968_v7 = vpop.f32.mrb[50].mxu1 }
 0x64b   :  { %v12348_v30 = vadd.f32 %v9968_v7, %v18461_v20  ;;  %v17044_v50 = vadd.f32 %v12347_v58, %v16955_v12  ;;  %v9970_v1 = vpop.f32.mrb[51].mxu1  ;;  %v18466_v12 = vld [vmem:[#allocation27_spill] sm:$0xff] }
 0x64d   :  { %18462 = vst [vmem:[#allocation25_spill] sm:$0xff] %v17044_v50  ;;  %v17048_v55 = vadd.f32 %v12348_v30, %v16963_v27  ;;  %v10330_v54 = vadd.f32 %v10329_v49, %v17044_v50 }
 0x64f   :  { %18463 = vst [vmem:[#allocation10_spill] sm:$0xff] %v17048_v55  ;;  %v10331_v20 = vadd.f32 %v10330_v54, %v17048_v55 }
 0x650   :  { %v9973_v17 = vpop.f32.mrb[52].mxu1 }
 0x651   :  { %v12349_v42 = vadd.f32 %v9973_v17, %v18464_v6  ;;  %v9975_v21 = vpop.f32.mrb[53].mxu1 }
 0x652   :  { %v9976_v63 = vpop.f32.mrb[54].mxu1 }
 0x653   :  { %v17054_v38 = vadd.f32 %v12349_v42, %v16948_v29  ;;  %v12350_v58 = vadd.f32 %v9976_v63, %v18466_v12  ;;  %v9978_v7 = vpop.f32.mrb[55].mxu1 }
 0x655   :  { %18465 = vst [vmem:[#allocation14_spill] sm:$0xff] %v17054_v38  ;;  %v17059_v27 = vadd.f32 %v12350_v58, %v16957_v48  ;;  %v10332_v30 = vadd.f32 %v10331_v20, %v17054_v38 }
 0x657   :  { %v10333_v1 = vadd.f32 %v10332_v30, %v17059_v27 }
 0x659   :  { %v10334_v14 = vrot.slane %v10333_v1, 4 }
 0x65b   :  { %v10335_v17 = vadd.f32 %v10334_v14, %v10333_v1 }
 0x65d   :  { %v10336_v56 = vrot.slane %v10335_v17, 2 }
 0x65f   :  { %v10337_v6 = vadd.f32 %v10336_v56, %v10335_v17 }
 0x661   :  { %v10338_v29 = vrot.slane %v10337_v6, 1 }
 0x663   :  { %v10339_v42 = vadd.f32 %v10338_v29, %v10337_v6 }
 0x665   :  { %v17064_v21 = vmul.f32 0.001953125, %v10339_v42  ;;  %v18467_v42 = vld [vmem:[#allocation18_spill] sm:$0xff] }
 0x667   :  { %v10341_v63 = vsub.f32 %v16705_v35, %v17064_v21  ;;  %v10342_v48 = vsub.f32 %v16711_v31, %v17064_v21  ;;  %v10343_v49 = vsub.f32 %v16701_v25, %v17064_v21  ;;  %v10344_v7 = vsub.f32 %v16707_v46, %v17064_v21  ;;  %v18468_v25 = vld [vmem:[#allocation7_spill] sm:$0xff] }
 0x668   :  { %v10345_v54 = vsub.f32 %v16716_v19, %v17064_v21  ;;  %v10346_v1 = vsub.f32 %v16721_v40, %v17064_v21  ;;  %v10347_v56 = vsub.f32 %v16713_v15, %v17064_v21  ;;  %v10349_v19 = vsub.f32 %v18468_v25, %v17064_v21 }
 0x669   :  { %v10405_v12 = vmul.f32 %v10341_v63, %v10341_v63  ;;  %v10406_v58 = vmul.f32 %v10342_v48, %v10342_v48  ;;  %v10407_v20 = vmul.f32 %v10343_v49, %v10343_v49  ;;  %v10408_v14 = vmul.f32 %v10344_v7, %v10344_v7 }
 0x66a   :  { %v10409_v6 = vmul.f32 %v10345_v54, %v10345_v54  ;;  %v10348_v63 = vsub.f32 %v18467_v42, %v17064_v21  ;;  %v10410_v48 = vmul.f32 %v10346_v1, %v10346_v1  ;;  %v10411_v49 = vmul.f32 %v10347_v56, %v10347_v56 }
 0x66b   :  { %v10469_v30 = vadd.f32 %v10406_v58, %v10405_v12  ;;  %v18469_v58 = vld [vmem:[#allocation39_spill] sm:$0xff]  ;;  %v10413_v54 = vmul.f32 %v10349_v19, %v10349_v19 }
 0x66c   :  { %v10350_v40 = vsub.f32 %v18469_v58, %v17064_v21  ;;  %v10412_v7 = vmul.f32 %v10348_v63, %v10348_v63 }
 0x66d   :  { %v10470_v17 = vadd.f32 %v10469_v30, %v10407_v20  ;;  %v10351_v30 = vsub.f32 %v16727_v39, %v17064_v21 }
 0x66e   :  { %v10414_v1 = vmul.f32 %v10350_v40, %v10350_v40 }
 0x66f   :  { %v10471_v29 = vadd.f32 %v10470_v17, %v10408_v14  ;;  %v18470_v17 = vld [vmem:[#allocation40_spill] sm:$0xff]  ;;  %v10415_v56 = vmul.f32 %v10351_v30, %v10351_v30 }
 0x670   :  { %v10352_v42 = vsub.f32 %v18470_v17, %v17064_v21 }
 0x671   :  { %v10472_v46 = vadd.f32 %v10471_v29, %v10409_v6  ;;  %v18471_v29 = vld [vmem:[#allocation41_spill] sm:$0xff] }
 0x672   :  { %v10353_v25 = vsub.f32 %v18471_v29, %v17064_v21  ;;  %v10416_v63 = vmul.f32 %v10352_v42, %v10352_v42 }
 0x673   :  { %v10473_v12 = vadd.f32 %v10472_v46, %v10410_v48  ;;  %v18472_v48 = vld [vmem:[#allocation42_spill] sm:$0xff] }
 0x674   :  { %v10354_v58 = vsub.f32 %v18472_v48, %v17064_v21  ;;  %v10417_v19 = vmul.f32 %v10353_v25, %v10353_v25 }
 0x675   :  { %v10474_v20 = vadd.f32 %v10473_v12, %v10411_v49  ;;  %v18473_v12 = vld [vmem:[#allocation43_spill] sm:$0xff] }
 0x676   :  { %v10355_v39 = vsub.f32 %v18473_v12, %v17064_v21  ;;  %v10418_v40 = vmul.f32 %v10354_v58, %v10354_v58 }
 0x677   :  { %v10475_v14 = vadd.f32 %v10474_v20, %v10412_v7  ;;  %v10356_v20 = vsub.f32 %v16743_v53, %v17064_v21 }
 0x678   :  { %v10419_v30 = vmul.f32 %v10355_v39, %v10355_v39 }
 0x679   :  { %v10476_v6 = vadd.f32 %v10475_v14, %v10413_v54  ;;  %v18474_v14 = vld [vmem:[#allocation45_spill] sm:$0xff]  ;;  %v10420_v42 = vmul.f32 %v10356_v20, %v10356_v20 }
 0x67a   :  { %v10357_v29 = vsub.f32 %v18474_v14, %v17064_v21 }
 0x67b   :  { %v10477_v46 = vadd.f32 %v10476_v6, %v10414_v1  ;;  %v10358_v6 = vsub.f32 %v16752_v43, %v17064_v21 }
 0x67c   :  { %v10421_v25 = vmul.f32 %v10357_v29, %v10357_v29 }
 0x67d   :  { %v10478_v49 = vadd.f32 %v10477_v46, %v10415_v56  ;;  %v18475_v46 = vld [vmem:[#allocation47_spill] sm:$0xff]  ;;  %v10422_v58 = vmul.f32 %v10358_v6, %v10358_v6 }
 0x67e   :  { %v10359_v12 = vsub.f32 %v18475_v46, %v17064_v21 }
 0x67f   :  { %v10479_v7 = vadd.f32 %v10478_v49, %v10416_v63  ;;  %v18476_v49 = vld [vmem:[#allocation48_spill] sm:$0xff] }
 0x680   :  { %v10360_v53 = vsub.f32 %v18476_v49, %v17064_v21  ;;  %v10423_v39 = vmul.f32 %v10359_v12, %v10359_v12 }
 0x681   :  { %v10480_v54 = vadd.f32 %v10479_v7, %v10417_v19  ;;  %v18477_v7 = vld [vmem:[#allocation49_spill] sm:$0xff] }
 0x682   :  { %v10361_v14 = vsub.f32 %v18477_v7, %v17064_v21  ;;  %v10424_v20 = vmul.f32 %v10360_v53, %v10360_v53 }
 0x683   :  { %v10481_v1 = vadd.f32 %v10480_v54, %v10418_v40  ;;  %v18478_v54 = vld [vmem:[#allocation50_spill] sm:$0xff] }
 0x684   :  { %v10362_v43 = vsub.f32 %v18478_v54, %v17064_v21  ;;  %v10425_v29 = vmul.f32 %v10361_v14, %v10361_v14 }
 0x685   :  { %v10482_v56 = vadd.f32 %v10481_v1, %v10419_v30  ;;  %v18479_v1 = vld [vmem:[#allocation51_spill] sm:$0xff] }
 0x686   :  { %v10363_v46 = vsub.f32 %v18479_v1, %v17064_v21  ;;  %v10426_v6 = vmul.f32 %v10362_v43, %v10362_v43 }
 0x687   :  { %v10483_v63 = vadd.f32 %v10482_v56, %v10420_v42  ;;  %v10364_v56 = vsub.f32 %v16794_v45, %v17064_v21 }
 0x688   :  { %v10427_v12 = vmul.f32 %v10363_v46, %v10363_v46 }
 0x689   :  { %v10484_v19 = vadd.f32 %v10483_v63, %v10421_v25  ;;  %v10365_v63 = vsub.f32 %v16807_v10, %v17064_v21  ;;  %v10428_v53 = vmul.f32 %v10364_v56, %v10364_v56 }
 0x68b   :  { %v10485_v40 = vadd.f32 %v10484_v19, %v10422_v58  ;;  %v10366_v19 = vsub.f32 %v16810_v11, %v17064_v21  ;;  %v10429_v14 = vmul.f32 %v10365_v63, %v10365_v63 }
 0x68d   :  { %v10486_v30 = vadd.f32 %v10485_v40, %v10423_v39  ;;  %v10367_v40 = vsub.f32 %v16824_v32, %v17064_v21  ;;  %v10430_v43 = vmul.f32 %v10366_v19, %v10366_v19 }
 0x68f   :  { %v10487_v42 = vadd.f32 %v10486_v30, %v10424_v20  ;;  %v10368_v30 = vsub.f32 %v16828_v52, %v17064_v21  ;;  %v10431_v46 = vmul.f32 %v10367_v40, %v10367_v40 }
 0x691   :  { %v10488_v25 = vadd.f32 %v10487_v42, %v10425_v29  ;;  %v10369_v42 = vsub.f32 %v16842_v41, %v17064_v21  ;;  %v10432_v56 = vmul.f32 %v10368_v30, %v10368_v30 }
 0x693   :  { %v10489_v58 = vadd.f32 %v10488_v25, %v10426_v6  ;;  %v10370_v25 = vsub.f32 %v16845_v26, %v17064_v21  ;;  %v10433_v63 = vmul.f32 %v10369_v42, %v10369_v42 }
 0x695   :  { %v10490_v39 = vadd.f32 %v10489_v58, %v10427_v12  ;;  %v10371_v58 = vsub.f32 %v16859_v28, %v17064_v21  ;;  %v10434_v19 = vmul.f32 %v10370_v25, %v10370_v25 }
 0x697   :  { %v10491_v20 = vadd.f32 %v10490_v39, %v10428_v53  ;;  %v10372_v39 = vsub.f32 %v16864_v3, %v17064_v21  ;;  %v10435_v40 = vmul.f32 %v10371_v58, %v10371_v58 }
 0x699   :  { %v10492_v29 = vadd.f32 %v10491_v20, %v10429_v14  ;;  %v10373_v20 = vsub.f32 %v16878_v0, %v17064_v21  ;;  %v10436_v30 = vmul.f32 %v10372_v39, %v10372_v39 }
 0x69b   :  { %v10493_v6 = vadd.f32 %v10492_v29, %v10430_v43  ;;  %v10374_v29 = vsub.f32 %v16883_v34, %v17064_v21  ;;  %v10437_v42 = vmul.f32 %v10373_v20, %v10373_v20 }
 0x69d   :  { %v10494_v12 = vadd.f32 %v10493_v6, %v10431_v46  ;;  %v10375_v6 = vsub.f32 %v16897_v2, %v17064_v21  ;;  %v10438_v25 = vmul.f32 %v10374_v29, %v10374_v29 }
 0x69f   :  { %v10495_v53 = vadd.f32 %v10494_v12, %v10432_v56  ;;  %v18480_v12 = vld [vmem:[#allocation56_spill] sm:$0xff]  ;;  %v10439_v58 = vmul.f32 %v10375_v6, %v10375_v6 }
 0x6a0   :  { %v10376_v3 = vsub.f32 %v18480_v12, %v17064_v21 }
 0x6a1   :  { %v10496_v14 = vadd.f32 %v10495_v53, %v10433_v63  ;;  %v18481_v53 = vld [vmem:[#allocation57_spill] sm:$0xff] }
 0x6a2   :  { %v10377_v0 = vsub.f32 %v18481_v53, %v17064_v21  ;;  %v10440_v39 = vmul.f32 %v10376_v3, %v10376_v3 }
 0x6a3   :  { %v10497_v43 = vadd.f32 %v10496_v14, %v10434_v19  ;;  %v18482_v14 = vld [vmem:[#allocation20_spill] sm:$0xff] }
 0x6a4   :  { %v10378_v34 = vsub.f32 %v18482_v14, %v17064_v21  ;;  %v10441_v20 = vmul.f32 %v10377_v0, %v10377_v0 }
 0x6a5   :  { %v10498_v46 = vadd.f32 %v10497_v43, %v10435_v40  ;;  %v18483_v43 = vld [vmem:[#allocation22_spill] sm:$0xff] }
 0x6a6   :  { %v10379_v2 = vsub.f32 %v18483_v43, %v17064_v21  ;;  %v10442_v29 = vmul.f32 %v10378_v34, %v10378_v34 }
 0x6a7   :  { %v10499_v56 = vadd.f32 %v10498_v46, %v10436_v30  ;;  %v10380_v46 = vsub.f32 %v16923_v36, %v17064_v21 }
 0x6a8   :  { %v10443_v6 = vmul.f32 %v10379_v2, %v10379_v2 }
 0x6a9   :  { %v10500_v63 = vadd.f32 %v10499_v56, %v10437_v42  ;;  %v10381_v56 = vsub.f32 %v16929_v8, %v17064_v21  ;;  %v10444_v3 = vmul.f32 %v10380_v46, %v10380_v46 }
 0x6ab   :  { %v10501_v19 = vadd.f32 %v10500_v63, %v10438_v25  ;;  %v10382_v63 = vsub.f32 %v16933_v33, %v17064_v21  ;;  %v10445_v0 = vmul.f32 %v10381_v56, %v10381_v56 }
 0x6ad   :  { %v10502_v40 = vadd.f32 %v10501_v19, %v10439_v58  ;;  %v10383_v19 = vsub.f32 %v16939_v44, %v17064_v21  ;;  %v10446_v34 = vmul.f32 %v10382_v63, %v10382_v63 }
 0x6af   :  { %v10503_v30 = vadd.f32 %v10502_v40, %v10440_v39  ;;  %v10384_v40 = vsub.f32 %v16944_v47, %v17064_v21  ;;  %v10447_v2 = vmul.f32 %v10383_v19, %v10383_v19 }
 0x6b1   :  { %v10504_v42 = vadd.f32 %v10503_v30, %v10441_v20  ;;  %v10385_v30 = vsub.f32 %v16952_v23, %v17064_v21  ;;  %v10448_v46 = vmul.f32 %v10384_v40, %v10384_v40 }
 0x6b3   :  { %v10505_v25 = vadd.f32 %v10504_v42, %v10442_v29  ;;  %v10386_v42 = vsub.f32 %v16961_v9, %v17064_v21  ;;  %v10449_v56 = vmul.f32 %v10385_v30, %v10385_v30 }
 0x6b5   :  { %v10506_v58 = vadd.f32 %v10505_v25, %v10443_v6  ;;  %v10387_v25 = vsub.f32 %v16969_v22, %v17064_v21  ;;  %v10450_v63 = vmul.f32 %v10386_v42, %v10386_v42 }
 0x6b7   :  { %v10507_v39 = vadd.f32 %v10506_v58, %v10444_v3  ;;  %v10388_v58 = vsub.f32 %v16973_v18, %v17064_v21  ;;  %v10451_v19 = vmul.f32 %v10387_v25, %v10387_v25 }
 0x6b9   :  { %v10508_v20 = vadd.f32 %v10507_v39, %v10445_v0  ;;  %v10389_v39 = vsub.f32 %v16979_v60, %v17064_v21  ;;  %v10452_v40 = vmul.f32 %v10388_v58, %v10388_v58 }
 0x6bb   :  { %v10509_v29 = vadd.f32 %v10508_v20, %v10446_v34  ;;  %v10390_v20 = vsub.f32 %v16984_v16, %v17064_v21  ;;  %v10453_v30 = vmul.f32 %v10389_v39, %v10389_v39 }
 0x6bd   :  { %v10510_v6 = vadd.f32 %v10509_v29, %v10447_v2  ;;  %v10391_v29 = vsub.f32 %v16990_v5, %v17064_v21  ;;  %v10454_v42 = vmul.f32 %v10390_v20, %v10390_v20 }
 0x6bf   :  { %v10511_v3 = vadd.f32 %v10510_v6, %v10448_v46  ;;  %v10392_v6 = vsub.f32 %v16995_v4, %v17064_v21  ;;  %v10455_v25 = vmul.f32 %v10391_v29, %v10391_v29 }
 0x6c1   :  { %v10512_v0 = vadd.f32 %v10511_v3, %v10449_v56  ;;  %v10393_v3 = vsub.f32 %v17001_v24, %v17064_v21  ;;  %v10456_v58 = vmul.f32 %v10392_v6, %v10392_v6 }
 0x6c3   :  { %v10513_v34 = vadd.f32 %v10512_v0, %v10450_v63  ;;  %v10394_v0 = vsub.f32 %v17005_v37, %v17064_v21  ;;  %v10457_v39 = vmul.f32 %v10393_v3, %v10393_v3 }
 0x6c5   :  { %v10514_v2 = vadd.f32 %v10513_v34, %v10451_v19  ;;  %v10395_v34 = vsub.f32 %v17011_v61, %v17064_v21  ;;  %v10458_v20 = vmul.f32 %v10394_v0, %v10394_v0 }
 0x6c7   :  { %v10515_v46 = vadd.f32 %v10514_v2, %v10452_v40  ;;  %v10396_v2 = vsub.f32 %v17016_v57, %v17064_v21  ;;  %v10459_v29 = vmul.f32 %v10395_v34, %v10395_v34 }
 0x6c9   :  { %v10516_v56 = vadd.f32 %v10515_v46, %v10453_v30  ;;  %v10397_v46 = vsub.f32 %v17022_v59, %v17064_v21  ;;  %v10460_v6 = vmul.f32 %v10396_v2, %v10396_v2 }
 0x6cb   :  { %v10517_v63 = vadd.f32 %v10516_v56, %v10454_v42  ;;  %v10398_v56 = vsub.f32 %v17027_v51, %v17064_v21  ;;  %v10461_v3 = vmul.f32 %v10397_v46, %v10397_v46 }
 0x6cd   :  { %v10518_v19 = vadd.f32 %v10517_v63, %v10455_v25  ;;  %v10399_v63 = vsub.f32 %v17033_v62, %v17064_v21  ;;  %v10462_v0 = vmul.f32 %v10398_v56, %v10398_v56 }
 0x6cf   :  { %v10519_v40 = vadd.f32 %v10518_v19, %v10456_v58  ;;  %v10400_v19 = vsub.f32 %v17037_v13, %v17064_v21  ;;  %v10463_v34 = vmul.f32 %v10399_v63, %v10399_v63 }
 0x6d1   :  { %v10520_v30 = vadd.f32 %v10519_v40, %v10457_v39  ;;  %v10401_v40 = vsub.f32 %v17044_v50, %v17064_v21  ;;  %v10464_v2 = vmul.f32 %v10400_v19, %v10400_v19 }
 0x6d3   :  { %v10521_v42 = vadd.f32 %v10520_v30, %v10458_v20  ;;  %v10402_v30 = vsub.f32 %v17048_v55, %v17064_v21  ;;  %v10465_v46 = vmul.f32 %v10401_v40, %v10401_v40  ;;  %v10269_v40 = vld [vmem:[%s17900_s5] sm:$0x1] }
 0x6d5   :  { %v10522_v25 = vadd.f32 %v10521_v42, %v10459_v29  ;;  %v10403_v42 = vsub.f32 %v17054_v38, %v17064_v21  ;;  %v10466_v56 = vmul.f32 %v10402_v30, %v10402_v30 }
 0x6d7   :  { %v10523_v58 = vadd.f32 %v10522_v25, %v10460_v6  ;;  %v10404_v25 = vsub.f32 %v17059_v27, %v17064_v21 }
 0x6d9   :  { %v10524_v39 = vadd.f32 %v10523_v58, %v10461_v3  ;;  %v10467_v58 = vmul.f32 %v10403_v42, %v10403_v42  ;;  %v10468_v50 = vmul.f32 %v10404_v25, %v10404_v25  ;;  %v18485_v42 = vld [vmem:[#allocation12_spill] sm:$0xff]  ;;  %v18487_v25 = vld [vmem:[#allocation17_spill] sm:$0xff] }
 0x6db   :  { %v10525_v20 = vadd.f32 %v10524_v39, %v10462_v0 }
 0x6dd   :  { %v10526_v29 = vadd.f32 %v10525_v20, %v10463_v34 }
 0x6df   :  { %v10527_v6 = vadd.f32 %v10526_v29, %v10464_v2 }
 0x6e1   :  { %v10528_v3 = vadd.f32 %v10527_v6, %v10465_v46 }
 0x6e3   :  { %v10529_v13 = vadd.f32 %v10528_v3, %v10466_v56  ;;  %v18488_v3 = vld [vmem:[#allocation6_spill] sm:$0xff] }
 0x6e5   :  { %v10530_v63 = vadd.f32 %v10529_v13, %v10467_v58  ;;  %v17200_v13 = vld [vmem:[%s17901_s6] sm:$0x1] }
 0x6e6   :  { %v18489_v58 = vld [vmem:[#allocation18_spill] sm:$0xff] }
 0x6e7   :  { %v10531_v0 = vadd.f32 %v10530_v63, %v10468_v50 }
 0x6e9   :  { %v10532_v39 = vrot.slane %v10531_v0, 4 }
 0x6eb   :  { %v10533_v62 = vadd.f32 %v10532_v39, %v10531_v0  ;;  %v18490_v0 = vld [vmem:[#allocation7_spill] sm:$0xff] }
 0x6ed   :  { %v10534_v55 = vrot.slane %v10533_v62, 2 }
 0x6ef   :  { %v10535_v19 = vadd.f32 %v10534_v55, %v10533_v62  ;;  %v18484_v62 = vld [vmem:[#allocation28_spill] sm:$0xff] }
 0x6f1   :  { %v10536_v34 = vrot.slane %v10535_v19, 1 }
 0x6f3   :  { %v10537_v20 = vadd.f32 %v10536_v34, %v10535_v19  ;;  %v18491_v19 = vld [vmem:[#allocation39_spill] sm:$0xff] }
 0x6f5   :  { %v10538_v51 = vmul.f32 0.001953125, %v10537_v20  ;;  %v18492_v20 = vld [vmem:[#allocation15_spill] sm:$0xff] }
 0x6f7   :  { %v10539_v38 = vadd.f32 1e-05, %v10538_v51 }
 0x6f9   :  { %12818 = vrsqrt.f32 %v10539_v38 }
 0x703   :  { %v12819_v30 = vpop.eup %12818 }
 0x704   :  { %v10541_v2 = vmul.f32 %v12819_v30, %v10269_v40  ;;  %v18493_v30 = vld [vmem:[#allocation41_spill] sm:$0xff] }
 0x706   :  { %v17203_v50 = vmul.f32 %v10541_v2, %v17064_v21  ;;  %v17206_v55 = vrot.slane %v10541_v2, %v18484_v62  ;;  %v18486_v21 = vld [vmem:[#allocation9_spill] sm:$0xff] }
 0x708   :  { %v10543_v51 = vsub.f32 %v17200_v13, %v17203_v50  ;;  %v17212_v38 = vmul.f32 %v17206_v55, %v16705_v35  ;;  %v17216_v29 = vmul.f32 %v17206_v55, %v16711_v31  ;;  %v17220_v46 = vmul.f32 %v17206_v55, %v18485_v42  ;;  %v18494_v50 = vld [vmem:[#allocation43_spill] sm:$0xff] }
 0x709   :  { %v17224_v6 = vmul.f32 %v17206_v55, %v18486_v21  ;;  %v17228_v56 = vmul.f32 %v17206_v55, %v18487_v25  ;;  %v17232_v35 = vmul.f32 %v17206_v55, %v18488_v3  ;;  %v17236_v31 = vmul.f32 %v17206_v55, %v16713_v15  ;;  %v18495_v21 = vld [vmem:[#allocation44_spill] sm:$0xff]  ;;  %v18496_v3 = vld [vmem:[#allocation45_spill] sm:$0xff] }
 0x70a   :  { %v17240_v63 = vmul.f32 %v17206_v55, %v18489_v58  ;;  %v17244_v39 = vmul.f32 %v17206_v55, %v18490_v0  ;;  %v17248_v34 = vmul.f32 %v17206_v55, %v18491_v19  ;;  %v17252_v40 = vmul.f32 %v17206_v55, %v18492_v20  ;;  %v18497_v58 = vld [vmem:[#allocation46_spill] sm:$0xff]  ;;  %v18498_v19 = vld [vmem:[#allocation47_spill] sm:$0xff] }
 0x70b   :  { %v17256_v15 = vmul.f32 %v17206_v55, %v18470_v17  ;;  %v17260_v2 = vmul.f32 %v17206_v55, %v18493_v30  ;;  %v17264_v13 = vmul.f32 %v17206_v55, %v18472_v48  ;;  %v17268_v42 = vmul.f32 %v17206_v55, %v18494_v50 }
 0x70c   :  { %v17272_v25 = vmul.f32 %v17206_v55, %v18495_v21  ;;  %v17276_v17 = vmul.f32 %v17206_v55, %v18496_v3  ;;  %v17280_v0 = vmul.f32 %v17206_v55, %v18497_v58  ;;  %v17284_v48 = vmul.f32 %v17206_v55, %v18498_v19  ;;  %v18501_v58 = vld [vmem:[#allocation52_spill] sm:$0xff]  ;;  %v18502_v19 = vld [vmem:[#allocation53_spill] sm:$0xff] }
 0x70d   :  { %v17288_v20 = vmul.f32 %v17206_v55, %v18476_v49  ;;  %v17292_v30 = vmul.f32 %v17206_v55, %v18477_v7  ;;  %v17296_v50 = vmul.f32 %v17206_v55, %v18478_v54  ;;  %v17300_v21 = vmul.f32 %v17206_v55, %v18479_v1 }
 0x70e   :  { %v17304_v3 = vmul.f32 %v17206_v55, %v16794_v45  ;;  %v17308_v49 = vmul.f32 %v17206_v55, %v16807_v10  ;;  %v17312_v7 = vmul.f32 %v17206_v55, %v16810_v11  ;;  %v17316_v54 = vmul.f32 %v17206_v55, %v16824_v32 }
 0x70f   :  { %v17320_v1 = vmul.f32 %v17206_v55, %v16828_v52  ;;  %v17324_v45 = vmul.f32 %v17206_v55, %v16842_v41  ;;  %v17328_v10 = vmul.f32 %v17206_v55, %v16845_v26  ;;  %v17332_v11 = vmul.f32 %v17206_v55, %v16859_v28 }
 0x710   :  { %v17336_v32 = vmul.f32 %v17206_v55, %v18501_v58  ;;  %v17340_v52 = vmul.f32 %v17206_v55, %v18502_v19  ;;  %v17352_v28 = vmul.f32 %v17206_v55, %v18480_v12  ;;  %v17356_v58 = vmul.f32 %v17206_v55, %v18481_v53 }
 0x711   :  { %18499 = vst [vmem:[#allocation4_spill] sm:$0xff] %v17320_v1  ;;  %18500 = vst [vmem:[#allocation11_spill] sm:$0xff] %v17324_v45  ;;  %v18503_v1 = vld [vmem:[#allocation54_spill] sm:$0xff]  ;;  %v18504_v45 = vld [vmem:[#allocation55_spill] sm:$0xff]  ;;  %v17360_v19 = vmul.f32 %v17206_v55, %v18482_v14  ;;  %v17372_v12 = vmul.f32 %v17206_v55, %v16929_v8  ;;  %v17376_v53 = vmul.f32 %v17206_v55, %v16933_v33 }
 0x712   :  { %v17344_v41 = vmul.f32 %v17206_v55, %v18503_v1  ;;  %v17348_v26 = vmul.f32 %v17206_v55, %v18504_v45  ;;  %v17364_v1 = vmul.f32 %v17206_v55, %v18483_v43  ;;  %v17368_v45 = vmul.f32 %v17206_v55, %v16923_v36 }
 0x713   :  { %v17380_v14 = vmul.f32 %v17206_v55, %v16939_v44  ;;  %v17384_v43 = vmul.f32 %v17206_v55, %v16944_v47  ;;  %v17388_v36 = vmul.f32 %v17206_v55, %v16952_v23  ;;  %v17392_v8 = vmul.f32 %v17206_v55, %v16961_v9 }
 0x714   :  { %v17396_v33 = vmul.f32 %v17206_v55, %v16969_v22  ;;  %v17400_v44 = vmul.f32 %v17206_v55, %v16973_v18  ;;  %v17404_v47 = vmul.f32 %v17206_v55, %v16979_v60  ;;  %v17408_v23 = vmul.f32 %v17206_v55, %v16984_v16 }
 0x715   :  { %v17412_v9 = vmul.f32 %v17206_v55, %v16990_v5  ;;  %v17416_v22 = vmul.f32 %v17206_v55, %v16995_v4  ;;  %v17420_v18 = vmul.f32 %v17206_v55, %v17001_v24  ;;  %v17424_v60 = vmul.f32 %v17206_v55, %v17005_v37 }
 0x716   :  { %v17428_v16 = vmul.f32 %v17206_v55, %v17011_v61  ;;  %v17432_v5 = vmul.f32 %v17206_v55, %v17016_v57  ;;  %v17436_v4 = vmul.f32 %v17206_v55, %v17022_v59  ;;  %v18515_v57 = vld [vmem:[#allocation25_spill] sm:$0xff]  ;;  %v18516_v59 = vld [vmem:[#allocation10_spill] sm:$0xff] }
 0x717   :  { %18505 = vst [vmem:[#allocation13_spill] sm:$0xff] %v17416_v22  ;;  %18506 = vst [vmem:[#allocation16_spill] sm:$0xff] %v17420_v18  ;;  %v18511_v22 = vld [vmem:[#allocation5_spill] sm:$0xff]  ;;  %v18513_v18 = vld [vmem:[#allocation19_spill] sm:$0xff] }
 0x718   :  { %18507 = vst [vmem:[#allocation29_spill] sm:$0xff] %v17424_v60  ;;  %18508 = vst [vmem:[#allocation30_spill] sm:$0xff] %v17428_v16  ;;  %v17440_v24 = vmul.f32 %v17206_v55, %v18511_v22  ;;  %v17444_v37 = vmul.f32 %v17206_v55, %v18513_v18  ;;  %v18514_v60 = vld [vmem:[#allocation21_spill] sm:$0xff]  ;;  %v17451_v16 = vrot.slane %v10543_v51, %v18484_v62  ;;  %v18517_v22 = vld [vmem:[#allocation14_spill] sm:$0xff] }
 0x719   :  { %18509 = vst [vmem:[#allocation24_spill] sm:$0xff] %v17432_v5  ;;  %18510 = vst [vmem:[#allocation26_spill] sm:$0xff] %v17436_v4  ;;  %v17448_v61 = vmul.f32 %v17206_v55, %v18514_v60  ;;  %v17455_v5 = vmul.f32 %v17206_v55, %v18515_v57  ;;  %v17459_v4 = vmul.f32 %v17206_v55, %v18516_v59  ;;  %v18524_v59 = vld [vmem:[#allocation11_spill] sm:$0xff] }
 0x71a   :  { %18512 = vst [vmem:[#allocation31_spill] sm:$0xff] %v17440_v24  ;;  %v17463_v24 = vmul.f32 %v17206_v55, %v18517_v22  ;;  %v17467_v18 = vmul.f32 %v17206_v55, %v17059_v27  ;;  %v17471_v62 = vadd.f32 %v17451_v16, %v17212_v38  ;;  %v17475_v51 = vadd.f32 %v17451_v16, %v17216_v29 }
 0x71b   :  { %v17479_v60 = vadd.f32 %v17451_v16, %v17220_v46  ;;  %v17483_v57 = vadd.f32 %v17451_v16, %v17224_v6  ;;  %v17487_v27 = vadd.f32 %v17451_v16, %v17228_v56  ;;  %v17491_v55 = vadd.f32 %v17451_v16, %v17232_v35 }
 0x71c   :  { %18518 = vst [vmem:[#allocation33_spill] sm:$0xff] %v17471_v62  ;;  %18519 = vst [vmem:[#allocation32_spill] sm:$0xff] %v17475_v51  ;;  %v17495_v38 = vadd.f32 %v17451_v16, %v17236_v31  ;;  %v17499_v29 = vadd.f32 %v17451_v16, %v17240_v63  ;;  %v17503_v46 = vadd.f32 %v17451_v16, %v17244_v39 }
 0x71d   :  { %18520 = vst [vmem:[#allocation35_spill] sm:$0xff] %v17479_v60  ;;  %18521 = vst [vmem:[#allocation34_spill] sm:$0xff] %v17483_v57  ;;  %v17507_v6 = vadd.f32 %v17451_v16, %v17248_v34  ;;  %v17511_v56 = vadd.f32 %v17451_v16, %v17252_v40  ;;  %v17515_v35 = vadd.f32 %v17451_v16, %v17256_v15 }
 0x71e   :  { %18522 = vst [vmem:[#allocation37_spill] sm:$0xff] %v17487_v27  ;;  %v17519_v31 = vadd.f32 %v17451_v16, %v17260_v2  ;;  %v17523_v63 = vadd.f32 %v17451_v16, %v17264_v13  ;;  %v17527_v39 = vadd.f32 %v17451_v16, %v17268_v42  ;;  %v17531_v34 = vadd.f32 %v17451_v16, %v17272_v25 }
 0x71f   :  { %v17535_v40 = vadd.f32 %v17451_v16, %v17276_v17  ;;  %v17539_v15 = vadd.f32 %v17451_v16, %v17280_v0  ;;  %v17543_v2 = vadd.f32 %v17451_v16, %v17284_v48  ;;  %v17547_v13 = vadd.f32 %v17451_v16, %v17288_v20 }
 0x720   :  { %v17551_v42 = vadd.f32 %v17451_v16, %v17292_v30  ;;  %v17555_v25 = vadd.f32 %v17451_v16, %v17296_v50  ;;  %v17559_v17 = vadd.f32 %v17451_v16, %v17300_v21  ;;  %v17563_v0 = vadd.f32 %v17451_v16, %v17304_v3  ;;  %v18523_v50 = vld [vmem:[#allocation4_spill] sm:$0xff] }
 0x721   :  { %v17567_v48 = vadd.f32 %v17451_v16, %v17308_v49  ;;  %v17571_v20 = vadd.f32 %v17451_v16, %v17312_v7  ;;  %v17575_v30 = vadd.f32 %v17451_v16, %v17316_v54  ;;  %v17579_v21 = vadd.f32 %v17451_v16, %v18523_v50 }
 0x722   :  { %v17583_v3 = vadd.f32 %v17451_v16, %v18524_v59  ;;  %v17587_v49 = vadd.f32 %v17451_v16, %v17328_v10  ;;  %v17591_v7 = vadd.f32 %v17451_v16, %v17332_v11  ;;  %v17595_v54 = vadd.f32 %v17451_v16, %v17336_v32  ;;  %v18530_v59 = vld [vmem:[#allocation13_spill] sm:$0xff] }
 0x723   :  { %v17599_v22 = vadd.f32 %v17451_v16, %v17340_v52  ;;  %v17603_v50 = vadd.f32 %v17451_v16, %v17344_v41  ;;  %v17607_v10 = vadd.f32 %v17451_v16, %v17348_v26  ;;  %v17611_v11 = vadd.f32 %v17451_v16, %v17352_v28 }
 0x724   :  { %v17615_v32 = vadd.f32 %v17451_v16, %v17356_v58  ;;  %v17619_v52 = vadd.f32 %v17451_v16, %v17360_v19  ;;  %v17623_v41 = vadd.f32 %v17451_v16, %v17364_v1  ;;  %v17627_v26 = vadd.f32 %v17451_v16, %v17368_v45 }
 0x725   :  { %v17631_v28 = vadd.f32 %v17451_v16, %v17372_v12  ;;  %v17635_v58 = vadd.f32 %v17451_v16, %v17376_v53  ;;  %v17639_v19 = vadd.f32 %v17451_v16, %v17380_v14  ;;  %v17643_v1 = vadd.f32 %v17451_v16, %v17384_v43 }
 0x726   :  { %v17647_v45 = vadd.f32 %v17451_v16, %v17388_v36  ;;  %v17651_v12 = vadd.f32 %v17451_v16, %v17392_v8  ;;  %v17655_v53 = vadd.f32 %v17451_v16, %v17396_v33  ;;  %v17659_v14 = vadd.f32 %v17451_v16, %v17400_v44 }
 0x727   :  { %v17663_v43 = vadd.f32 %v17451_v16, %v17404_v47  ;;  %v17667_v36 = vadd.f32 %v17451_v16, %v17408_v23  ;;  %v17671_v8 = vadd.f32 %v17451_v16, %v17412_v9  ;;  %v17675_v33 = vadd.f32 %v17451_v16, %v18530_v59 }
 0x728   :  { %18525 = vst [vmem:[#allocation36_spill] sm:$0xff] %v17655_v53  ;;  %18526 = vst [vmem:[#allocation23_spill] sm:$0xff] %v17659_v14  ;;  %v18532_v53 = vld [vmem:[#allocation16_spill] sm:$0xff]  ;;  %v18533_v14 = vld [vmem:[#allocation29_spill] sm:$0xff] }
 0x729   :  { %18527 = vst [vmem:[#allocation38_spill] sm:$0xff] %v17663_v43  ;;  %18528 = vst [vmem:[#allocation8_spill] sm:$0xff] %v17667_v36  ;;  %v17679_v44 = vadd.f32 %v17451_v16, %v18532_v53  ;;  %v17683_v47 = vadd.f32 %v17451_v16, %v18533_v14  ;;  %v18534_v43 = vld [vmem:[#allocation30_spill] sm:$0xff]  ;;  %v18535_v36 = vld [vmem:[#allocation24_spill] sm:$0xff]  ;;  %v17703_v14 = vadd.f32 %v17451_v16, %v17444_v37 }
 0x72a   :  { %18529 = vst [vmem:[#allocation27_spill] sm:$0xff] %v17671_v8  ;;  %18531 = vst [vmem:[#allocation40_spill] sm:$0xff] %v17675_v33  ;;  %v17687_v23 = vadd.f32 %v17451_v16, %v18534_v43  ;;  %v17691_v9 = vadd.f32 %v17451_v16, %v18535_v36  ;;  %v18536_v8 = vld [vmem:[#allocation26_spill] sm:$0xff]  ;;  %v18537_v33 = vld [vmem:[#allocation31_spill] sm:$0xff]  ;;  %v17707_v43 = vadd.f32 %v17451_v16, %v17448_v61  ;;  %v10695_v61 = vmax.f32 %v17515_v35, 0.0 }
 0x72b   :  { %v17695_v59 = vadd.f32 %v17451_v16, %v18536_v8  ;;  %v17699_v53 = vadd.f32 %v17451_v16, %v18537_v33  ;;  %18538 = vst [vmem:[#allocation42_spill] sm:$0xff] %v17703_v14  ;;  %v17711_v36 = vadd.f32 %v17451_v16, %v17455_v5  ;;  %v17715_v8 = vadd.f32 %v17451_v16, %v17459_v4 }
 0x72c   :  { %18539 = vst [vmem:[#allocation48_spill] sm:$0xff] %v17707_v43  ;;  %v17719_v33 = vadd.f32 %v17451_v16, %v17463_v24  ;;  %v17723_v37 = vadd.f32 %v17451_v16, %v17467_v18  ;;  %v10689_v4 = vmax.f32 %v17491_v55, 0.0  ;;  %v10691_v24 = vmax.f32 %v17499_v29, 0.0 }
 0x72d   :  { %18540 = vst [vmem:[#allocation49_spill] sm:$0xff] %v17711_v36  ;;  %18541 = vst [vmem:[#allocation50_spill] sm:$0xff] %v17715_v8  ;;  %v10690_v8 = vmax.f32 %v17495_v38, 0.0  ;;  %v10693_v16 = vmax.f32 %v17507_v6, 0.0  ;;  %v10694_v18 = vmax.f32 %v17511_v56, 0.0  ;;  %v10696_v43 = vmax.f32 %v17519_v31, 0.0 }
 0x72e   :  { %18542 = vst [vmem:[#allocation51_spill] sm:$0xff] %v17719_v33  ;;  %18543 = vst [vmem:[#allocation56_spill] sm:$0xff] %v17723_v37  ;;  %v10692_v33 = vmax.f32 %v17503_v46, 0.0  ;;  %v10697_v5 = vmax.f32 %v17523_v63, 0.0  ;;  %v10698_v36 = vmax.f32 %v17527_v39, 0.0  ;;  %v10699_v55 = vmax.f32 %v17531_v34, 0.0 }
 0x72f   :  { %v10700_v38 = vmax.f32 %v17535_v40, 0.0  ;;  %v10701_v29 = vmax.f32 %v17539_v15, 0.0  ;;  %v10702_v46 = vmax.f32 %v17543_v2, 0.0  ;;  %v10703_v6 = vmax.f32 %v17547_v13, 0.0  ;;  %v18544_v14 = vld [vmem:[#allocation36_spill] sm:$0xff]  ;;  %v18545_v27 = vld [vmem:[#allocation23_spill] sm:$0xff] }
 0x730   :  { %v10704_v56 = vmax.f32 %v17551_v42, 0.0  ;;  %v10705_v35 = vmax.f32 %v17555_v25, 0.0  ;;  %v10706_v31 = vmax.f32 %v17559_v17, 0.0  ;;  %v10707_v63 = vmax.f32 %v17563_v0, 0.0  ;;  %v18546_v57 = vld [vmem:[#allocation38_spill] sm:$0xff]  ;;  %v18547_v60 = vld [vmem:[#allocation8_spill] sm:$0xff] }
 0x731   :  { %v10708_v39 = vmax.f32 %v17567_v48, 0.0  ;;  %v10709_v34 = vmax.f32 %v17571_v20, 0.0  ;;  %v10710_v40 = vmax.f32 %v17575_v30, 0.0  ;;  %v10711_v15 = vmax.f32 %v17579_v21, 0.0  ;;  %v18548_v51 = vld [vmem:[#allocation27_spill] sm:$0xff]  ;;  %v18549_v62 = vld [vmem:[#allocation40_spill] sm:$0xff] }
 0x732   :  { %v10712_v2 = vmax.f32 %v17583_v3, 0.0  ;;  %v10713_v13 = vmax.f32 %v17587_v49, 0.0  ;;  %v10714_v42 = vmax.f32 %v17591_v7, 0.0  ;;  %v10715_v25 = vmax.f32 %v17595_v54, 0.0  ;;  %v18550_v37 = vld [vmem:[#allocation42_spill] sm:$0xff] }
 0x733   :  { %v10716_v17 = vmax.f32 %v17599_v22, 0.0  ;;  %v10717_v0 = vmax.f32 %v17603_v50, 0.0  ;;  %v10718_v48 = vmax.f32 %v17607_v10, 0.0  ;;  %v10719_v20 = vmax.f32 %v17611_v11, 0.0 }
 0x734   :  { %v10720_v30 = vmax.f32 %v17615_v32, 0.0  ;;  %v10721_v21 = vmax.f32 %v17619_v52, 0.0  ;;  %v10722_v3 = vmax.f32 %v17623_v41, 0.0  ;;  %v10723_v49 = vmax.f32 %v17627_v26, 0.0 }
 0x735   :  { %v10724_v7 = vmax.f32 %v17631_v28, 0.0  ;;  %v10725_v54 = vmax.f32 %v17635_v58, 0.0  ;;  %v10726_v22 = vmax.f32 %v17639_v19, 0.0  ;;  %v10727_v50 = vmax.f32 %v17643_v1, 0.0 }
 0x736   :  { %v10728_v10 = vmax.f32 %v17647_v45, 0.0  ;;  %v10729_v11 = vmax.f32 %v17651_v12, 0.0  ;;  %v10730_v32 = vmax.f32 %v18544_v14, 0.0  ;;  %v10731_v52 = vmax.f32 %v18545_v27, 0.0 }
 0x737   :  { %v10732_v41 = vmax.f32 %v18546_v57, 0.0  ;;  %v10733_v26 = vmax.f32 %v18547_v60, 0.0  ;;  %v10734_v28 = vmax.f32 %v18548_v51, 0.0  ;;  %v10735_v58 = vmax.f32 %v18549_v62, 0.0  ;;  %v18551_v60 = vld [vmem:[#allocation48_spill] sm:$0xff]  ;;  %v18552_v62 = vld [vmem:[#allocation49_spill] sm:$0xff] }
 0x738   :  { %v10736_v19 = vmax.f32 %v17679_v44, 0.0  ;;  %v10737_v1 = vmax.f32 %v17683_v47, 0.0  ;;  %v10738_v45 = vmax.f32 %v17687_v23, 0.0  ;;  %v10739_v12 = vmax.f32 %v17691_v9, 0.0  ;;  %v18553_v47 = vld [vmem:[#allocation50_spill] sm:$0xff]  ;;  %v18554_v9 = vld [vmem:[#allocation51_spill] sm:$0xff] }
 0x739   :  { %v10740_v14 = vmax.f32 %v17695_v59, 0.0  ;;  %v10741_v27 = vmax.f32 %v17699_v53, 0.0  ;;  %v10742_v57 = vmax.f32 %v18550_v37, 0.0  ;;  %v10743_v51 = vmax.f32 %v18551_v60, 0.0  ;;  %v18555_v53 = vld [vmem:[#allocation56_spill] sm:$0xff]  ;;  %v18556_v60 = vld [vmem:[#allocation33_spill] sm:$0xff] }
 0x73a   :  { %v10744_v44 = vmax.f32 %v18552_v62, 0.0  ;;  %v10745_v23 = vmax.f32 %v18553_v47, 0.0  ;;  %v10746_v59 = vmax.f32 %v18554_v9, 0.0  ;;  %v10747_v37 = vmax.f32 %v18555_v53, 0.0  ;;  %v18558_v47 = vld [vmem:[#allocation32_spill] sm:$0xff] }
 0x73b   :  { %v18557_v62 = vmax.f32 %v18556_v60, 0.0  ;;  %v18559_v9 = vmax.f32 %v18558_v47, 0.0  ;;  %v18560_v60 = vld [vmem:[#allocation35_spill] sm:$0xff] }
 0x73c   :  { %v18561_v47 = vmax.f32 %v18560_v60, 0.0 }
 0x73d   :  { %v11827_v53 = vpack.c.bf16 %v18559_v9, %v18557_v62  ;;  %v18562_v9 = vld [vmem:[#allocation34_spill] sm:$0xff] }
 0x73e   :  { %v18563_v62 = vmax.f32 %v18562_v9, 0.0  ;;  %v18564_v9 = vld [vmem:[#allocation37_spill] sm:$0xff] }
 0x73f   :  { %11828 = vst [vmem:[%s17902_s7] sm:$0xff] %v11827_v53  }
 0x740   :  { %v11832_v60 = vpack.c.bf16 %v18563_v62, %v18561_v47  ;;  %v18565_v47 = vmax.f32 %v18564_v9, 0.0  ;;  %v11842_v9 = vpack.c.bf16 %v10691_v24, %v10690_v8  ;;  %v11857_v8 = vpack.c.bf16 %v10697_v5, %v10696_v43 }
 0x741   :  { %v11862_v24 = vpack.c.bf16 %v10699_v55, %v10698_v36  ;;  %v11877_v43 = vpack.c.bf16 %v10705_v35, %v10704_v56  ;;  %v11882_v36 = vpack.c.bf16 %v10707_v63, %v10706_v31  ;;  %v11887_v5 = vpack.c.bf16 %v10709_v34, %v10708_v39 }
 0x742   :  { %v11837_v62 = vpack.c.bf16 %v10689_v4, %v18565_v47  ;;  %v11847_v4 = vpack.c.bf16 %v10693_v16, %v10692_v33  ;;  %v11852_v47 = vpack.c.bf16 %v10695_v61, %v10694_v18  ;;  %11984 = vst [vmem:[%s17902_s7 + $0x8] sm:$0xff] %v11832_v60   ;;  %11986 = vst [vmem:[%s17902_s7 + $0x18] sm:$0xff] %v11842_v9  }
 0x743   :  { %v11867_v33 = vpack.c.bf16 %v10701_v29, %v10700_v38  ;;  %v11872_v61 = vpack.c.bf16 %v10703_v6, %v10702_v46  ;;  %11989 = vst [vmem:[%s17902_s7 + $0x30] sm:$0xff] %v11857_v8   ;;  %11990 = vst [vmem:[%s17902_s7 + $0x38] sm:$0xff] %v11862_v24   ;;  %v11892_v16 = vpack.c.bf16 %v10711_v15, %v10710_v40 }
 0x744   :  { %11985 = vst [vmem:[%s17902_s7 + $0x10] sm:$0xff] %v11837_v62   ;;  %11987 = vst [vmem:[%s17902_s7 + $0x20] sm:$0xff] %v11847_v4   ;;  %v11897_v18 = vpack.c.bf16 %v10713_v13, %v10712_v2  ;;  %v11902_v55 = vpack.c.bf16 %v10715_v25, %v10714_v42  ;;  %v11907_v38 = vpack.c.bf16 %v10717_v0, %v10716_v17 }
 0x745   :  { %11988 = vst [vmem:[%s17902_s7 + $0x28] sm:$0xff] %v11852_v47   ;;  %11991 = vst [vmem:[%s17902_s7 + $0x40] sm:$0xff] %v11867_v33   ;;  %v11912_v29 = vpack.c.bf16 %v10719_v20, %v10718_v48  ;;  %v11917_v46 = vpack.c.bf16 %v10721_v21, %v10720_v30  ;;  %v11922_v6 = vpack.c.bf16 %v10723_v49, %v10722_v3 }
 0x746   :  { %11992 = vst [vmem:[%s17902_s7 + $0x48] sm:$0xff] %v11872_v61   ;;  %11993 = vst [vmem:[%s17902_s7 + $0x50] sm:$0xff] %v11877_v43   ;;  %v11927_v56 = vpack.c.bf16 %v10725_v54, %v10724_v7  ;;  %v11932_v35 = vpack.c.bf16 %v10727_v50, %v10726_v22  ;;  %v11937_v31 = vpack.c.bf16 %v10729_v11, %v10728_v10 }
 0x747   :  { %11994 = vst [vmem:[%s17902_s7 + $0x58] sm:$0xff] %v11882_v36   ;;  %11995 = vst [vmem:[%s17902_s7 + $0x60] sm:$0xff] %v11887_v5   ;;  %v11942_v63 = vpack.c.bf16 %v10731_v52, %v10730_v32  ;;  %v11947_v39 = vpack.c.bf16 %v10733_v26, %v10732_v41  ;;  %v11952_v34 = vpack.c.bf16 %v10735_v58, %v10734_v28 }
 0x748   :  { %11996 = vst [vmem:[%s17902_s7 + $0x68] sm:$0xff] %v11892_v16   ;;  %11997 = vst [vmem:[%s17902_s7 + $0x70] sm:$0xff] %v11897_v18   ;;  %v11957_v40 = vpack.c.bf16 %v10737_v1, %v10736_v19  ;;  %v11962_v15 = vpack.c.bf16 %v10739_v12, %v10738_v45  ;;  %v11967_v2 = vpack.c.bf16 %v10741_v27, %v10740_v14 }
 0x749   :  { %11998 = vst [vmem:[%s17902_s7 + $0x78] sm:$0xff] %v11902_v55   ;;  %11999 = vst [vmem:[%s17902_s7 + $0x80] sm:$0xff] %v11907_v38   ;;  %v11972_v13 = vpack.c.bf16 %v10743_v51, %v10742_v57  ;;  %v11977_v42 = vpack.c.bf16 %v10745_v23, %v10744_v44  ;;  %v11982_v25 = vpack.c.bf16 %v10747_v37, %v10746_v59 }
 0x74a   :  { %12000 = vst [vmem:[%s17902_s7 + $0x88] sm:$0xff] %v11912_v29   ;;  %12001 = vst [vmem:[%s17902_s7 + $0x90] sm:$0xff] %v11917_v46  }
 0x74b   :  { %12002 = vst [vmem:[%s17902_s7 + $0x98] sm:$0xff] %v11922_v6   ;;  %12003 = vst [vmem:[%s17902_s7 + $0xa0] sm:$0xff] %v11927_v56  }
 0x74c   :  { %12004 = vst [vmem:[%s17902_s7 + $0xa8] sm:$0xff] %v11932_v35   ;;  %12005 = vst [vmem:[%s17902_s7 + $0xb0] sm:$0xff] %v11937_v31  }
 0x74d   :  { %12006 = vst [vmem:[%s17902_s7 + $0xb8] sm:$0xff] %v11942_v63   ;;  %12007 = vst [vmem:[%s17902_s7 + $0xc0] sm:$0xff] %v11947_v39  }
 0x74e   :  { %12008 = vst [vmem:[%s17902_s7 + $0xc8] sm:$0xff] %v11952_v34   ;;  %12009 = vst [vmem:[%s17902_s7 + $0xd0] sm:$0xff] %v11957_v40  }
 0x74f   :  { %12010 = vst [vmem:[%s17902_s7 + $0xd8] sm:$0xff] %v11962_v15   ;;  %12011 = vst [vmem:[%s17902_s7 + $0xe0] sm:$0xff] %v11967_v2  }
 0x750   :  { %12012 = vst [vmem:[%s17902_s7 + $0xe8] sm:$0xff] %v11972_v13   ;;  %12013 = vst [vmem:[%s17902_s7 + $0xf0] sm:$0xff] %v11977_v42  }
 0x751   :  { %12014 = vst [vmem:[%s17902_s7 + $0xf8] sm:$0xff] %v11982_v25  }

</bundles_post_ra>
